<compile_context>
chip_gen: v7x
topology: tpu7x:2x2x1
jax: 0.10.0
libtpu: 0.0.40
codegen_flags: <defaults>
</compile_context>

<pallas_src>
import functools

import jax
import jax.numpy as jnp
from jax.experimental import pallas as pl
from jax.experimental.pallas import tpu as pltpu

# ----------------------------- configuration ------------------------------
N = 2          # batch
FEATURES = 32  # channels (C)
H = 16
W = 16
M = 2          # number of branches
G = 4          # conv groups
RATIO = 2
L = 32
D = max(FEATURES // RATIO, L)   # bottleneck dim d
BN_EPS = 1e-5


# ----------------------------- fused Pallas kernel --------------------------
def skconv_fused_kernel(*refs, M, H, W, C, ks, offs, inv_hw):
    """One batch element of the full SKConv forward.

    refs layout:
      refs[0]        : xp_ref   (Hp, Wp, C)      zero-padded NHWC input (pad = p_max)
      refs[1:1+M]    : w_refs   (K_i, K_i, C, C) block-diagonal grouped weights,
                                                  BN scale already folded in
      refs[1+M]      : bias_ref (M, C)           folded BN bias (beta - mean*scale)
      refs[2+M]      : fcw_ref  (C, D)           fc weight (transposed)
      refs[3+M]      : fcb_ref  (1, D)
      refs[4+M]      : fcsw_ref (D, M*C)         all per-branch fc weights (transposed, concat)
      refs[5+M]      : fcsb_ref (1, M*C)
      refs[6+M]      : out_ref  (H, W, C)
      refs[7+M]      : feas_ref (M, H, W, C)     VMEM scratch (branch features)
    """
    xp_ref = refs[0]
    w_refs = refs[1:1 + M]
    bias_ref, fcw_ref, fcb_ref, fcsw_ref, fcsb_ref = refs[1 + M:6 + M]
    out_ref = refs[6 + M]
    feas_ref = refs[7 + M]

    xp = xp_ref[...]                                      # (Hp, Wp, C)
    bias = bias_ref[...]                                  # (M, C)

    # ---- M branches: grouped conv (block-diagonal per-tap matmuls) + BN + ReLU ----
    for i in range(M):
        K = ks[i]
        off = offs[i]                                     # p_max - p_i (static)
        w_ref = w_refs[i]
        acc = jnp.zeros((H, W, C), jnp.float32)
        for kh in range(K):
            for kw in range(K):
                patch = xp[off + kh: off + kh + H, off + kw: off + kw + W, :]   # (H, W, C)
                acc = acc + jax.lax.dot_general(
                    patch, w_ref[kh, kw],                 # (C, C) block-diagonal
                    dimension_numbers=(((2,), (0,)), ((), ())),
                    preferred_element_type=jnp.float32)
        fea = jnp.maximum(acc + bias[i:i + 1, :].reshape(1, 1, C), 0.0)
        feas_ref[i] = fea                                 # stays in VMEM

    # ---- selection / attention path ----
    fea_U = feas_ref[0]
    for i in range(1, M):
        fea_U = fea_U + feas_ref[i]                       # (H, W, C)

    # global average pool without reshape(H*W, C)
    fea_s = jnp.sum(fea_U, axis=(0, 1), keepdims=True).reshape(1, C) * inv_hw   # (1, C)

    fea_z = jnp.dot(fea_s, fcw_ref[...],
                    preferred_element_type=jnp.float32) + fcb_ref[...]          # (1, D)

    # single batched matmul for all M branch logits
    logits_flat = jnp.dot(fea_z, fcsw_ref[...],
                          preferred_element_type=jnp.float32) + fcsb_ref[...]   # (1, M*C)
    logits = jnp.concatenate(
        [logits_flat[:, i * C:(i + 1) * C] for i in range(M)], axis=0)          # (M, C)

    mx = jnp.max(logits, axis=0, keepdims=True)
    ex = jnp.exp(logits - mx)
    attn = ex / jnp.sum(ex, axis=0, keepdims=True)        # softmax over branch axis

    out = feas_ref[0] * attn[0:1, :].reshape(1, 1, C)
    for i in range(1, M):
        out = out + feas_ref[i] * attn[i:i + 1, :].reshape(1, 1, C)
    out_ref[...] = out


# ------------------------------ wrapper ------------------------------------
def _fold_branch_weight(w_t, scale, k, g, cg, c):
    """PyTorch grouped weight (C, C/G, K, K) -> block-diagonal (K, K, C, C) with
    BN scale folded into the output channels."""
    # (g, cout_local, cin_local, kh, kw) -> (kh, kw, g, cin_local, cout_local)
    w5 = w_t.reshape(g, cg, cg, k, k).transpose(3, 4, 0, 2, 1)
    w_bd = jnp.zeros((k, k, c, c), jnp.float32)
    for gi in range(g):
        sl = slice(gi * cg, (gi + 1) * cg)
        w_bd = w_bd.at[:, :, sl, sl].set(w5[:, :, gi])
    return w_bd * scale.reshape(1, 1, 1, c)


def skconv_pallas(x_nchw, params):
    x = jnp.transpose(x_nchw, (0, 2, 3, 1)).astype(jnp.float32)   # NCHW -> NHWC
    n, h, w, c = x.shape
    cg = c // G

    # pad ONCE to the maximum padding needed by any branch
    p_max = 1 + (M - 1)
    hp, wp = h + 2 * p_max, w + 2 * p_max
    xp = jnp.pad(x, ((0, 0), (p_max, p_max), (p_max, p_max), (0, 0)))

    ks = tuple(3 + 2 * i for i in range(M))
    offs = tuple(p_max - (1 + i) for i in range(M))

    # fold BN (eval mode, real running stats) into conv weights / bias
    w_bds, biases = [], []
    for i in range(M):
        scale = params["bn_gamma"][i] / jnp.sqrt(params["bn_var"][i] + BN_EPS)
        bias = params["bn_beta"][i] - params["bn_mean"][i] * scale
        w_bds.append(_fold_branch_weight(params["conv_w"][i], scale, ks[i], G, cg, c))
        biases.append(bias)
    bias_all = jnp.stack(biases, axis=0)                           # (M, C)

    fc_w_t = params["fc_w"].T                                      # (C, D)
    fc_b = params["fc_b"].reshape(1, D)                            # (1, D)
    fcs_w_cat = jnp.concatenate(
        [params["fcs_w"][i].T for i in range(M)], axis=1)          # (D, M*C)
    fcs_b_cat = jnp.concatenate(
        [params["fcs_b"][i].reshape(1, c) for i in range(M)], axis=1)  # (1, M*C)

    in_specs = [pl.BlockSpec((None, hp, wp, c), lambda b: (b, 0, 0, 0))]
    for i in range(M):
        k = ks[i]
        in_specs.append(pl.BlockSpec((k, k, c, c), lambda b: (0, 0, 0, 0)))
    in_specs += [
        pl.BlockSpec((M, c), lambda b: (0, 0)),
        pl.BlockSpec((c, D), lambda b: (0, 0)),
        pl.BlockSpec((1, D), lambda b: (0, 0)),
        pl.BlockSpec((D, M * c), lambda b: (0, 0)),
        pl.BlockSpec((1, M * c), lambda b: (0, 0)),
    ]

    out = pl.pallas_call(
        functools.partial(skconv_fused_kernel, M=M, H=h, W=w, C=c,
                          ks=ks, offs=offs, inv_hw=1.0 / float(h * w)),
        out_shape=jax.ShapeDtypeStruct((n, h, w, c), jnp.float32),
        grid=(n,),
        in_specs=in_specs,
        out_specs=pl.BlockSpec((None, h, w, c), lambda b: (b, 0, 0, 0)),
        scratch_shapes=[pltpu.VMEM((M, h, w, c), jnp.float32)],
        compiler_params=pltpu.CompilerParams(dimension_semantics=("parallel",)),
    )(xp, *w_bds, bias_all, fc_w_t, fc_b, fcs_w_cat, fcs_b_cat)

    return jnp.transpose(out, (0, 3, 1, 2))                        # NHWC -> NCHW


skconv_forward = jax.jit(skconv_pallas)


# --------------------------- pure-JAX reference -----------------------------
def skconv_reference(x_nchw, params):
    feas = []
    for i in range(M):
        p = 1 + i
        y = jax.lax.conv_general_dilated(
            x_nchw, params["conv_w"][i], (1, 1), [(p, p), (p, p)],
            feature_group_count=G,
            dimension_numbers=("NCHW", "OIHW", "NCHW"))
        scale = params["bn_gamma"][i] / jnp.sqrt(params["bn_var"][i] + BN_EPS)
        bias = params["bn_beta"][i] - params["bn_mean"][i] * scale
        y = y * scale[None, :, None, None] + bias[None, :, None, None]
        feas.append(jnp.maximum(y, 0.0))
    feas = jnp.stack(feas, axis=1)                     # (N, M, C, H, W)
    fea_U = feas.sum(axis=1)
    fea_s = fea_U.mean(axis=(-1, -2))                  # (N, C)
    fea_z = fea_s @ params["fc_w"].T + params["fc_b"]  # (N, d)
    vecs = jnp.stack([fea_z @ params["fcs_w"][i].T + params["fcs_b"][i]
                      for i in range(M)], axis=1)      # (N, M, C)
    attn = jax.nn.softmax(vecs, axis=1)
    return (feas * attn[:, :, :, None, None]).sum(axis=1)


# ------------------------------- main ---------------------------------------
if __name__ == "__main__":
    key = jax.random.PRNGKey(0)
    keys = jax.random.split(key, 14)

    cg = FEATURES // G
    params = {
        "conv_w": [
            0.1 * jax.random.normal(keys[i], (FEATURES, cg, 3 + 2 * i, 3 + 2 * i),
                                    jnp.float32)
            for i in range(M)
        ],
        "bn_gamma": [1.0 + 0.05 * jax.random.normal(keys[2 + i], (FEATURES,), jnp.float32)
                     for i in range(M)],
        "bn_beta": [0.05 * jax.random.normal(keys[4 + i], (FEATURES,), jnp.float32)
                    for i in range(M)],
        # eval-mode running statistics (non-trivial, to exercise the BN fold)
        "bn_mean": [0.05 * jax.random.normal(keys[10 + i], (FEATURES,), jnp.float32)
                    for i in range(M)],
        "bn_var": [1.0 + 0.1 * jax.nn.softplus(
                       jax.random.normal(keys[12 + i], (FEATURES,), jnp.float32))
                   for i in range(M)],
        "fc_w": 0.1 * jax.random.normal(keys[6], (D, FEATURES), jnp.float32),
        "fc_b": 0.05 * jax.random.normal(keys[7], (D,), jnp.float32),
        "fcs_w": 0.1 * jax.random.normal(keys[8], (M, FEATURES, D), jnp.float32),
        "fcs_b": 0.05 * jax.random.normal(keys[9], (M, FEATURES), jnp.float32),
    }

    x = jax.random.normal(jax.random.PRNGKey(42), (N, FEATURES, H, W), jnp.float32)

    out = skconv_forward(x, params)
    out = jax.block_until_ready(out)

    ref = jax.block_until_ready(skconv_reference(x, params))
    assert out.shape == (N, FEATURES, H, W)
    assert jnp.allclose(out, ref, rtol=1e-4, atol=1e-4), \
        f"max abs diff {jnp.max(jnp.abs(out - ref))}"

    print("KERNEL_OK")
</pallas_src>

<mosaic_0001>
module attributes {stable_mosaic.version = 11 : i64} {
  func.func @skconv_fused_kernel(%arg0: i32, %arg1: memref<1x20x20x32xf32, #tpu.memory_space<vmem>>, %arg2: memref<3x3x32x32xf32, #tpu.memory_space<vmem>>, %arg3: memref<5x5x32x32xf32, #tpu.memory_space<vmem>>, %arg4: memref<2x32xf32, #tpu.memory_space<vmem>>, %arg5: memref<32x32xf32, #tpu.memory_space<vmem>>, %arg6: memref<1x32xf32, #tpu.memory_space<vmem>>, %arg7: memref<32x64xf32, #tpu.memory_space<vmem>>, %arg8: memref<1x64xf32, #tpu.memory_space<vmem>>, %arg9: memref<1x16x16x32xf32, #tpu.memory_space<vmem>>, %arg10: memref<2x16x16x32xf32, #tpu.memory_space<vmem>>) attributes {dimension_semantics = [#tpu.dimension_semantics<parallel>], iteration_bounds = array<i64: 2>, scalar_prefetch = 0 : i64, scratch_operands = 1 : i64, tpu.core_type = #tpu.core_type<tc>, window_params = [{transform_indices = @transform_0, window_bounds = array<i64: 1, 20, 20, 32>}, {pipeline_mode = #tpu.pipeline_mode<synchronous>, transform_indices = @transform_1, window_bounds = array<i64: 3, 3, 32, 32>}, {pipeline_mode = #tpu.pipeline_mode<synchronous>, transform_indices = @transform_2, window_bounds = array<i64: 5, 5, 32, 32>}, {pipeline_mode = #tpu.pipeline_mode<synchronous>, transform_indices = @transform_3, window_bounds = array<i64: 2, 32>}, {pipeline_mode = #tpu.pipeline_mode<synchronous>, transform_indices = @transform_4, window_bounds = array<i64: 32, 32>}, {pipeline_mode = #tpu.pipeline_mode<synchronous>, transform_indices = @transform_5, window_bounds = array<i64: 1, 32>}, {pipeline_mode = #tpu.pipeline_mode<synchronous>, transform_indices = @transform_6, window_bounds = array<i64: 32, 64>}, {pipeline_mode = #tpu.pipeline_mode<synchronous>, transform_indices = @transform_7, window_bounds = array<i64: 1, 64>}, {transform_indices = @transform_8, window_bounds = array<i64: 1, 16, 16, 32>}]} {
    %c0 = arith.constant 0 : index
    %c0_0 = arith.constant 0 : index
    %c0_1 = arith.constant 0 : index
    %c0_2 = arith.constant 0 : index
    %0 = vector.load %arg1[%c0, %c0_0, %c0_1, %c0_2] : memref<1x20x20x32xf32, #tpu.memory_space<vmem>>, vector<1x20x20x32xf32>
    %1 = vector.shape_cast %0 : vector<1x20x20x32xf32> to vector<20x20x32xf32>
    %c0_3 = arith.constant 0 : index
    %c0_4 = arith.constant 0 : index
    %2 = vector.load %arg4[%c0_3, %c0_4] : memref<2x32xf32, #tpu.memory_space<vmem>>, vector<2x32xf32>
    %cst = arith.constant 0.000000e+00 : f32
    %3 = vector.broadcast %cst : f32 to vector<16x16x32xf32>
    %4 = vector.extract_strided_slice %1 {offsets = [1, 1, 0], sizes = [16, 16, 32], strides = [1, 1, 1]} : vector<20x20x32xf32> to vector<16x16x32xf32>
    %c0_5 = arith.constant 0 : index
    %c0_6 = arith.constant 0 : index
    %c0_7 = arith.constant 0 : index
    %c0_8 = arith.constant 0 : index
    %5 = vector.load %arg2[%c0_5, %c0_6, %c0_7, %c0_8] : memref<3x3x32x32xf32, #tpu.memory_space<vmem>>, vector<1x1x32x32xf32>
    %6 = vector.shape_cast %5 : vector<1x1x32x32xf32> to vector<32x32xf32>
    %cst_9 = arith.constant dense<0.000000e+00> : vector<16x16x32xf32>
    %7 = tpu.matmul %4, %6, %cst_9 {dimension_numbers = #tpu.dot_dimension_numbers<[2], [0], [0, 1], [1], [0, 0, 0, 1, 1, 1], [], []>} : vector<16x16x32xf32>, vector<32x32xf32>, vector<16x16x32xf32> -> vector<16x16x32xf32>
    %8 = arith.addf %3, %7 : vector<16x16x32xf32>
    %9 = vector.extract_strided_slice %1 {offsets = [1, 2, 0], sizes = [16, 16, 32], strides = [1, 1, 1]} : vector<20x20x32xf32> to vector<16x16x32xf32>
    %c0_10 = arith.constant 0 : index
    %c1 = arith.constant 1 : index
    %c0_11 = arith.constant 0 : index
    %c0_12 = arith.constant 0 : index
    %10 = vector.load %arg2[%c0_10, %c1, %c0_11, %c0_12] : memref<3x3x32x32xf32, #tpu.memory_space<vmem>>, vector<1x1x32x32xf32>
    %11 = vector.shape_cast %10 : vector<1x1x32x32xf32> to vector<32x32xf32>
    %cst_13 = arith.constant dense<0.000000e+00> : vector<16x16x32xf32>
    %12 = tpu.matmul %9, %11, %cst_13 {dimension_numbers = #tpu.dot_dimension_numbers<[2], [0], [0, 1], [1], [0, 0, 0, 1, 1, 1], [], []>} : vector<16x16x32xf32>, vector<32x32xf32>, vector<16x16x32xf32> -> vector<16x16x32xf32>
    %13 = arith.addf %8, %12 : vector<16x16x32xf32>
    %14 = vector.extract_strided_slice %1 {offsets = [1, 3, 0], sizes = [16, 16, 32], strides = [1, 1, 1]} : vector<20x20x32xf32> to vector<16x16x32xf32>
    %c0_14 = arith.constant 0 : index
    %c2 = arith.constant 2 : index
    %c0_15 = arith.constant 0 : index
    %c0_16 = arith.constant 0 : index
    %15 = vector.load %arg2[%c0_14, %c2, %c0_15, %c0_16] : memref<3x3x32x32xf32, #tpu.memory_space<vmem>>, vector<1x1x32x32xf32>
    %16 = vector.shape_cast %15 : vector<1x1x32x32xf32> to vector<32x32xf32>
    %cst_17 = arith.constant dense<0.000000e+00> : vector<16x16x32xf32>
    %17 = tpu.matmul %14, %16, %cst_17 {dimension_numbers = #tpu.dot_dimension_numbers<[2], [0], [0, 1], [1], [0, 0, 0, 1, 1, 1], [], []>} : vector<16x16x32xf32>, vector<32x32xf32>, vector<16x16x32xf32> -> vector<16x16x32xf32>
    %18 = arith.addf %13, %17 : vector<16x16x32xf32>
    %19 = vector.extract_strided_slice %1 {offsets = [2, 1, 0], sizes = [16, 16, 32], strides = [1, 1, 1]} : vector<20x20x32xf32> to vector<16x16x32xf32>
    %c1_18 = arith.constant 1 : index
    %c0_19 = arith.constant 0 : index
    %c0_20 = arith.constant 0 : index
    %c0_21 = arith.constant 0 : index
    %20 = vector.load %arg2[%c1_18, %c0_19, %c0_20, %c0_21] : memref<3x3x32x32xf32, #tpu.memory_space<vmem>>, vector<1x1x32x32xf32>
    %21 = vector.shape_cast %20 : vector<1x1x32x32xf32> to vector<32x32xf32>
    %cst_22 = arith.constant dense<0.000000e+00> : vector<16x16x32xf32>
    %22 = tpu.matmul %19, %21, %cst_22 {dimension_numbers = #tpu.dot_dimension_numbers<[2], [0], [0, 1], [1], [0, 0, 0, 1, 1, 1], [], []>} : vector<16x16x32xf32>, vector<32x32xf32>, vector<16x16x32xf32> -> vector<16x16x32xf32>
    %23 = arith.addf %18, %22 : vector<16x16x32xf32>
    %24 = vector.extract_strided_slice %1 {offsets = [2, 2, 0], sizes = [16, 16, 32], strides = [1, 1, 1]} : vector<20x20x32xf32> to vector<16x16x32xf32>
    %c1_23 = arith.constant 1 : index
    %c1_24 = arith.constant 1 : index
    %c0_25 = arith.constant 0 : index
    %c0_26 = arith.constant 0 : index
    %25 = vector.load %arg2[%c1_23, %c1_24, %c0_25, %c0_26] : memref<3x3x32x32xf32, #tpu.memory_space<vmem>>, vector<1x1x32x32xf32>
    %26 = vector.shape_cast %25 : vector<1x1x32x32xf32> to vector<32x32xf32>
    %cst_27 = arith.constant dense<0.000000e+00> : vector<16x16x32xf32>
    %27 = tpu.matmul %24, %26, %cst_27 {dimension_numbers = #tpu.dot_dimension_numbers<[2], [0], [0, 1], [1], [0, 0, 0, 1, 1, 1], [], []>} : vector<16x16x32xf32>, vector<32x32xf32>, vector<16x16x32xf32> -> vector<16x16x32xf32>
    %28 = arith.addf %23, %27 : vector<16x16x32xf32>
    %29 = vector.extract_strided_slice %1 {offsets = [2, 3, 0], sizes = [16, 16, 32], strides = [1, 1, 1]} : vector<20x20x32xf32> to vector<16x16x32xf32>
    %c1_28 = arith.constant 1 : index
    %c2_29 = arith.constant 2 : index
    %c0_30 = arith.constant 0 : index
    %c0_31 = arith.constant 0 : index
    %30 = vector.load %arg2[%c1_28, %c2_29, %c0_30, %c0_31] : memref<3x3x32x32xf32, #tpu.memory_space<vmem>>, vector<1x1x32x32xf32>
    %31 = vector.shape_cast %30 : vector<1x1x32x32xf32> to vector<32x32xf32>
    %cst_32 = arith.constant dense<0.000000e+00> : vector<16x16x32xf32>
    %32 = tpu.matmul %29, %31, %cst_32 {dimension_numbers = #tpu.dot_dimension_numbers<[2], [0], [0, 1], [1], [0, 0, 0, 1, 1, 1], [], []>} : vector<16x16x32xf32>, vector<32x32xf32>, vector<16x16x32xf32> -> vector<16x16x32xf32>
    %33 = arith.addf %28, %32 : vector<16x16x32xf32>
    %34 = vector.extract_strided_slice %1 {offsets = [3, 1, 0], sizes = [16, 16, 32], strides = [1, 1, 1]} : vector<20x20x32xf32> to vector<16x16x32xf32>
    %c2_33 = arith.constant 2 : index
    %c0_34 = arith.constant 0 : index
    %c0_35 = arith.constant 0 : index
    %c0_36 = arith.constant 0 : index
    %35 = vector.load %arg2[%c2_33, %c0_34, %c0_35, %c0_36] : memref<3x3x32x32xf32, #tpu.memory_space<vmem>>, vector<1x1x32x32xf32>
    %36 = vector.shape_cast %35 : vector<1x1x32x32xf32> to vector<32x32xf32>
    %cst_37 = arith.constant dense<0.000000e+00> : vector<16x16x32xf32>
    %37 = tpu.matmul %34, %36, %cst_37 {dimension_numbers = #tpu.dot_dimension_numbers<[2], [0], [0, 1], [1], [0, 0, 0, 1, 1, 1], [], []>} : vector<16x16x32xf32>, vector<32x32xf32>, vector<16x16x32xf32> -> vector<16x16x32xf32>
    %38 = arith.addf %33, %37 : vector<16x16x32xf32>
    %39 = vector.extract_strided_slice %1 {offsets = [3, 2, 0], sizes = [16, 16, 32], strides = [1, 1, 1]} : vector<20x20x32xf32> to vector<16x16x32xf32>
    %c2_38 = arith.constant 2 : index
    %c1_39 = arith.constant 1 : index
    %c0_40 = arith.constant 0 : index
    %c0_41 = arith.constant 0 : index
    %40 = vector.load %arg2[%c2_38, %c1_39, %c0_40, %c0_41] : memref<3x3x32x32xf32, #tpu.memory_space<vmem>>, vector<1x1x32x32xf32>
    %41 = vector.shape_cast %40 : vector<1x1x32x32xf32> to vector<32x32xf32>
    %cst_42 = arith.constant dense<0.000000e+00> : vector<16x16x32xf32>
    %42 = tpu.matmul %39, %41, %cst_42 {dimension_numbers = #tpu.dot_dimension_numbers<[2], [0], [0, 1], [1], [0, 0, 0, 1, 1, 1], [], []>} : vector<16x16x32xf32>, vector<32x32xf32>, vector<16x16x32xf32> -> vector<16x16x32xf32>
    %43 = arith.addf %38, %42 : vector<16x16x32xf32>
    %44 = vector.extract_strided_slice %1 {offsets = [3, 3, 0], sizes = [16, 16, 32], strides = [1, 1, 1]} : vector<20x20x32xf32> to vector<16x16x32xf32>
    %c2_43 = arith.constant 2 : index
    %c2_44 = arith.constant 2 : index
    %c0_45 = arith.constant 0 : index
    %c0_46 = arith.constant 0 : index
    %45 = vector.load %arg2[%c2_43, %c2_44, %c0_45, %c0_46] : memref<3x3x32x32xf32, #tpu.memory_space<vmem>>, vector<1x1x32x32xf32>
    %46 = vector.shape_cast %45 : vector<1x1x32x32xf32> to vector<32x32xf32>
    %cst_47 = arith.constant dense<0.000000e+00> : vector<16x16x32xf32>
    %47 = tpu.matmul %44, %46, %cst_47 {dimension_numbers = #tpu.dot_dimension_numbers<[2], [0], [0, 1], [1], [0, 0, 0, 1, 1, 1], [], []>} : vector<16x16x32xf32>, vector<32x32xf32>, vector<16x16x32xf32> -> vector<16x16x32xf32>
    %48 = arith.addf %43, %47 : vector<16x16x32xf32>
    %49 = vector.extract_strided_slice %2 {offsets = [0, 0], sizes = [1, 32], strides = [1, 1]} : vector<2x32xf32> to vector<1x32xf32>
    %50 = vector.shape_cast %49 : vector<1x32xf32> to vector<1x1x32xf32>
    %51 = vector.broadcast %50 : vector<1x1x32xf32> to vector<16x16x32xf32>
    %52 = arith.addf %48, %51 : vector<16x16x32xf32>
    %cst_48 = arith.constant 0.000000e+00 : f32
    %53 = vector.broadcast %cst_48 : f32 to vector<16x16x32xf32>
    %54 = arith.maximumf %52, %53 : vector<16x16x32xf32>
    %c0_49 = arith.constant 0 : index
    %c0_50 = arith.constant 0 : index
    %c0_51 = arith.constant 0 : index
    %c0_52 = arith.constant 0 : index
    %55 = vector.load %arg10[%c0_49, %c0_50, %c0_51, %c0_52] : memref<2x16x16x32xf32, #tpu.memory_space<vmem>>, vector<1x16x16x32xf32>
    %56 = vector.shape_cast %55 : vector<1x16x16x32xf32> to vector<16x16x32xf32>
    %57 = vector.shape_cast %54 : vector<16x16x32xf32> to vector<1x16x16x32xf32>
    tpu.vector_store %arg10[%c0_49, %c0_50, %c0_51, %c0_52], %57 {strides = array<i32>} : memref<2x16x16x32xf32, #tpu.memory_space<vmem>>, vector<1x16x16x32xf32>,
    %cst_53 = arith.constant 0.000000e+00 : f32
    %58 = vector.broadcast %cst_53 : f32 to vector<16x16x32xf32>
    %59 = vector.extract_strided_slice %1 {offsets = [0, 0, 0], sizes = [16, 16, 32], strides = [1, 1, 1]} : vector<20x20x32xf32> to vector<16x16x32xf32>
    %c0_54 = arith.constant 0 : index
    %c0_55 = arith.constant 0 : index
    %c0_56 = arith.constant 0 : index
    %c0_57 = arith.constant 0 : index
    %60 = vector.load %arg3[%c0_54, %c0_55, %c0_56, %c0_57] : memref<5x5x32x32xf32, #tpu.memory_space<vmem>>, vector<1x1x32x32xf32>
    %61 = vector.shape_cast %60 : vector<1x1x32x32xf32> to vector<32x32xf32>
    %cst_58 = arith.constant dense<0.000000e+00> : vector<16x16x32xf32>
    %62 = tpu.matmul %59, %61, %cst_58 {dimension_numbers = #tpu.dot_dimension_numbers<[2], [0], [0, 1], [1], [0, 0, 0, 1, 1, 1], [], []>} : vector<16x16x32xf32>, vector<32x32xf32>, vector<16x16x32xf32> -> vector<16x16x32xf32>
    %63 = arith.addf %58, %62 : vector<16x16x32xf32>
    %64 = vector.extract_strided_slice %1 {offsets = [0, 1, 0], sizes = [16, 16, 32], strides = [1, 1, 1]} : vector<20x20x32xf32> to vector<16x16x32xf32>
    %c0_59 = arith.constant 0 : index
    %c1_60 = arith.constant 1 : index
    %c0_61 = arith.constant 0 : index
    %c0_62 = arith.constant 0 : index
    %65 = vector.load %arg3[%c0_59, %c1_60, %c0_61, %c0_62] : memref<5x5x32x32xf32, #tpu.memory_space<vmem>>, vector<1x1x32x32xf32>
    %66 = vector.shape_cast %65 : vector<1x1x32x32xf32> to vector<32x32xf32>
    %cst_63 = arith.constant dense<0.000000e+00> : vector<16x16x32xf32>
    %67 = tpu.matmul %64, %66, %cst_63 {dimension_numbers = #tpu.dot_dimension_numbers<[2], [0], [0, 1], [1], [0, 0, 0, 1, 1, 1], [], []>} : vector<16x16x32xf32>, vector<32x32xf32>, vector<16x16x32xf32> -> vector<16x16x32xf32>
    %68 = arith.addf %63, %67 : vector<16x16x32xf32>
    %69 = vector.extract_strided_slice %1 {offsets = [0, 2, 0], sizes = [16, 16, 32], strides = [1, 1, 1]} : vector<20x20x32xf32> to vector<16x16x32xf32>
    %c0_64 = arith.constant 0 : index
    %c2_65 = arith.constant 2 : index
    %c0_66 = arith.constant 0 : index
    %c0_67 = arith.constant 0 : index
    %70 = vector.load %arg3[%c0_64, %c2_65, %c0_66, %c0_67] : memref<5x5x32x32xf32, #tpu.memory_space<vmem>>, vector<1x1x32x32xf32>
    %71 = vector.shape_cast %70 : vector<1x1x32x32xf32> to vector<32x32xf32>
    %cst_68 = arith.constant dense<0.000000e+00> : vector<16x16x32xf32>
    %72 = tpu.matmul %69, %71, %cst_68 {dimension_numbers = #tpu.dot_dimension_numbers<[2], [0], [0, 1], [1], [0, 0, 0, 1, 1, 1], [], []>} : vector<16x16x32xf32>, vector<32x32xf32>, vector<16x16x32xf32> -> vector<16x16x32xf32>
    %73 = arith.addf %68, %72 : vector<16x16x32xf32>
    %74 = vector.extract_strided_slice %1 {offsets = [0, 3, 0], sizes = [16, 16, 32], strides = [1, 1, 1]} : vector<20x20x32xf32> to vector<16x16x32xf32>
    %c0_69 = arith.constant 0 : index
    %c3 = arith.constant 3 : index
    %c0_70 = arith.constant 0 : index
    %c0_71 = arith.constant 0 : index
    %75 = vector.load %arg3[%c0_69, %c3, %c0_70, %c0_71] : memref<5x5x32x32xf32, #tpu.memory_space<vmem>>, vector<1x1x32x32xf32>
    %76 = vector.shape_cast %75 : vector<1x1x32x32xf32> to vector<32x32xf32>
    %cst_72 = arith.constant dense<0.000000e+00> : vector<16x16x32xf32>
    %77 = tpu.matmul %74, %76, %cst_72 {dimension_numbers = #tpu.dot_dimension_numbers<[2], [0], [0, 1], [1], [0, 0, 0, 1, 1, 1], [], []>} : vector<16x16x32xf32>, vector<32x32xf32>, vector<16x16x32xf32> -> vector<16x16x32xf32>
    %78 = arith.addf %73, %77 : vector<16x16x32xf32>
    %79 = vector.extract_strided_slice %1 {offsets = [0, 4, 0], sizes = [16, 16, 32], strides = [1, 1, 1]} : vector<20x20x32xf32> to vector<16x16x32xf32>
    %c0_73 = arith.constant 0 : index
    %c4 = arith.constant 4 : index
    %c0_74 = arith.constant 0 : index
    %c0_75 = arith.constant 0 : index
    %80 = vector.load %arg3[%c0_73, %c4, %c0_74, %c0_75] : memref<5x5x32x32xf32, #tpu.memory_space<vmem>>, vector<1x1x32x32xf32>
    %81 = vector.shape_cast %80 : vector<1x1x32x32xf32> to vector<32x32xf32>
    %cst_76 = arith.constant dense<0.000000e+00> : vector<16x16x32xf32>
    %82 = tpu.matmul %79, %81, %cst_76 {dimension_numbers = #tpu.dot_dimension_numbers<[2], [0], [0, 1], [1], [0, 0, 0, 1, 1, 1], [], []>} : vector<16x16x32xf32>, vector<32x32xf32>, vector<16x16x32xf32> -> vector<16x16x32xf32>
    %83 = arith.addf %78, %82 : vector<16x16x32xf32>
    %84 = vector.extract_strided_slice %1 {offsets = [1, 0, 0], sizes = [16, 16, 32], strides = [1, 1, 1]} : vector<20x20x32xf32> to vector<16x16x32xf32>
    %c1_77 = arith.constant 1 : index
    %c0_78 = arith.constant 0 : index
    %c0_79 = arith.constant 0 : index
    %c0_80 = arith.constant 0 : index
    %85 = vector.load %arg3[%c1_77, %c0_78, %c0_79, %c0_80] : memref<5x5x32x32xf32, #tpu.memory_space<vmem>>, vector<1x1x32x32xf32>
    %86 = vector.shape_cast %85 : vector<1x1x32x32xf32> to vector<32x32xf32>
    %cst_81 = arith.constant dense<0.000000e+00> : vector<16x16x32xf32>
    %87 = tpu.matmul %84, %86, %cst_81 {dimension_numbers = #tpu.dot_dimension_numbers<[2], [0], [0, 1], [1], [0, 0, 0, 1, 1, 1], [], []>} : vector<16x16x32xf32>, vector<32x32xf32>, vector<16x16x32xf32> -> vector<16x16x32xf32>
    %88 = arith.addf %83, %87 : vector<16x16x32xf32>
    %89 = vector.extract_strided_slice %1 {offsets = [1, 1, 0], sizes = [16, 16, 32], strides = [1, 1, 1]} : vector<20x20x32xf32> to vector<16x16x32xf32>
    %c1_82 = arith.constant 1 : index
    %c1_83 = arith.constant 1 : index
    %c0_84 = arith.constant 0 : index
    %c0_85 = arith.constant 0 : index
    %90 = vector.load %arg3[%c1_82, %c1_83, %c0_84, %c0_85] : memref<5x5x32x32xf32, #tpu.memory_space<vmem>>, vector<1x1x32x32xf32>
    %91 = vector.shape_cast %90 : vector<1x1x32x32xf32> to vector<32x32xf32>
    %cst_86 = arith.constant dense<0.000000e+00> : vector<16x16x32xf32>
    %92 = tpu.matmul %89, %91, %cst_86 {dimension_numbers = #tpu.dot_dimension_numbers<[2], [0], [0, 1], [1], [0, 0, 0, 1, 1, 1], [], []>} : vector<16x16x32xf32>, vector<32x32xf32>, vector<16x16x32xf32> -> vector<16x16x32xf32>
    %93 = arith.addf %88, %92 : vector<16x16x32xf32>
    %94 = vector.extract_strided_slice %1 {offsets = [1, 2, 0], sizes = [16, 16, 32], strides = [1, 1, 1]} : vector<20x20x32xf32> to vector<16x16x32xf32>
    %c1_87 = arith.constant 1 : index
    %c2_88 = arith.constant 2 : index
    %c0_89 = arith.constant 0 : index
    %c0_90 = arith.constant 0 : index
    %95 = vector.load %arg3[%c1_87, %c2_88, %c0_89, %c0_90] : memref<5x5x32x32xf32, #tpu.memory_space<vmem>>, vector<1x1x32x32xf32>
    %96 = vector.shape_cast %95 : vector<1x1x32x32xf32> to vector<32x32xf32>
    %cst_91 = arith.constant dense<0.000000e+00> : vector<16x16x32xf32>
    %97 = tpu.matmul %94, %96, %cst_91 {dimension_numbers = #tpu.dot_dimension_numbers<[2], [0], [0, 1], [1], [0, 0, 0, 1, 1, 1], [], []>} : vector<16x16x32xf32>, vector<32x32xf32>, vector<16x16x32xf32> -> vector<16x16x32xf32>
    %98 = arith.addf %93, %97 : vector<16x16x32xf32>
    %99 = vector.extract_strided_slice %1 {offsets = [1, 3, 0], sizes = [16, 16, 32], strides = [1, 1, 1]} : vector<20x20x32xf32> to vector<16x16x32xf32>
    %c1_92 = arith.constant 1 : index
    %c3_93 = arith.constant 3 : index
    %c0_94 = arith.constant 0 : index
    %c0_95 = arith.constant 0 : index
    %100 = vector.load %arg3[%c1_92, %c3_93, %c0_94, %c0_95] : memref<5x5x32x32xf32, #tpu.memory_space<vmem>>, vector<1x1x32x32xf32>
    %101 = vector.shape_cast %100 : vector<1x1x32x32xf32> to vector<32x32xf32>
    %cst_96 = arith.constant dense<0.000000e+00> : vector<16x16x32xf32>
    %102 = tpu.matmul %99, %101, %cst_96 {dimension_numbers = #tpu.dot_dimension_numbers<[2], [0], [0, 1], [1], [0, 0, 0, 1, 1, 1], [], []>} : vector<16x16x32xf32>, vector<32x32xf32>, vector<16x16x32xf32> -> vector<16x16x32xf32>
    %103 = arith.addf %98, %102 : vector<16x16x32xf32>
    %104 = vector.extract_strided_slice %1 {offsets = [1, 4, 0], sizes = [16, 16, 32], strides = [1, 1, 1]} : vector<20x20x32xf32> to vector<16x16x32xf32>
    %c1_97 = arith.constant 1 : index
    %c4_98 = arith.constant 4 : index
    %c0_99 = arith.constant 0 : index
    %c0_100 = arith.constant 0 : index
    %105 = vector.load %arg3[%c1_97, %c4_98, %c0_99, %c0_100] : memref<5x5x32x32xf32, #tpu.memory_space<vmem>>, vector<1x1x32x32xf32>
    %106 = vector.shape_cast %105 : vector<1x1x32x32xf32> to vector<32x32xf32>
    %cst_101 = arith.constant dense<0.000000e+00> : vector<16x16x32xf32>
    %107 = tpu.matmul %104, %106, %cst_101 {dimension_numbers = #tpu.dot_dimension_numbers<[2], [0], [0, 1], [1], [0, 0, 0, 1, 1, 1], [], []>} : vector<16x16x32xf32>, vector<32x32xf32>, vector<16x16x32xf32> -> vector<16x16x32xf32>
    %108 = arith.addf %103, %107 : vector<16x16x32xf32>
    %109 = vector.extract_strided_slice %1 {offsets = [2, 0, 0], sizes = [16, 16, 32], strides = [1, 1, 1]} : vector<20x20x32xf32> to vector<16x16x32xf32>
    %c2_102 = arith.constant 2 : index
    %c0_103 = arith.constant 0 : index
    %c0_104 = arith.constant 0 : index
    %c0_105 = arith.constant 0 : index
    %110 = vector.load %arg3[%c2_102, %c0_103, %c0_104, %c0_105] : memref<5x5x32x32xf32, #tpu.memory_space<vmem>>, vector<1x1x32x32xf32>
    %111 = vector.shape_cast %110 : vector<1x1x32x32xf32> to vector<32x32xf32>
    %cst_106 = arith.constant dense<0.000000e+00> : vector<16x16x32xf32>
    %112 = tpu.matmul %109, %111, %cst_106 {dimension_numbers = #tpu.dot_dimension_numbers<[2], [0], [0, 1], [1], [0, 0, 0, 1, 1, 1], [], []>} : vector<16x16x32xf32>, vector<32x32xf32>, vector<16x16x32xf32> -> vector<16x16x32xf32>
    %113 = arith.addf %108, %112 : vector<16x16x32xf32>
    %114 = vector.extract_strided_slice %1 {offsets = [2, 1, 0], sizes = [16, 16, 32], strides = [1, 1, 1]} : vector<20x20x32xf32> to vector<16x16x32xf32>
    %c2_107 = arith.constant 2 : index
    %c1_108 = arith.constant 1 : index
    %c0_109 = arith.constant 0 : index
    %c0_110 = arith.constant 0 : index
    %115 = vector.load %arg3[%c2_107, %c1_108, %c0_109, %c0_110] : memref<5x5x32x32xf32, #tpu.memory_space<vmem>>, vector<1x1x32x32xf32>
    %116 = vector.shape_cast %115 : vector<1x1x32x32xf32> to vector<32x32xf32>
    %cst_111 = arith.constant dense<0.000000e+00> : vector<16x16x32xf32>
    %117 = tpu.matmul %114, %116, %cst_111 {dimension_numbers = #tpu.dot_dimension_numbers<[2], [0], [0, 1], [1], [0, 0, 0, 1, 1, 1], [], []>} : vector<16x16x32xf32>, vector<32x32xf32>, vector<16x16x32xf32> -> vector<16x16x32xf32>
    %118 = arith.addf %113, %117 : vector<16x16x32xf32>
    %119 = vector.extract_strided_slice %1 {offsets = [2, 2, 0], sizes = [16, 16, 32], strides = [1, 1, 1]} : vector<20x20x32xf32> to vector<16x16x32xf32>
    %c2_112 = arith.constant 2 : index
    %c2_113 = arith.constant 2 : index
    %c0_114 = arith.constant 0 : index
    %c0_115 = arith.constant 0 : index
    %120 = vector.load %arg3[%c2_112, %c2_113, %c0_114, %c0_115] : memref<5x5x32x32xf32, #tpu.memory_space<vmem>>, vector<1x1x32x32xf32>
    %121 = vector.shape_cast %120 : vector<1x1x32x32xf32> to vector<32x32xf32>
    %cst_116 = arith.constant dense<0.000000e+00> : vector<16x16x32xf32>
    %122 = tpu.matmul %119, %121, %cst_116 {dimension_numbers = #tpu.dot_dimension_numbers<[2], [0], [0, 1], [1], [0, 0, 0, 1, 1, 1], [], []>} : vector<16x16x32xf32>, vector<32x32xf32>, vector<16x16x32xf32> -> vector<16x16x32xf32>
    %123 = arith.addf %118, %122 : vector<16x16x32xf32>
    %124 = vector.extract_strided_slice %1 {offsets = [2, 3, 0], sizes = [16, 16, 32], strides = [1, 1, 1]} : vector<20x20x32xf32> to vector<16x16x32xf32>
    %c2_117 = arith.constant 2 : index
    %c3_118 = arith.constant 3 : index
    %c0_119 = arith.constant 0 : index
    %c0_120 = arith.constant 0 : index
    %125 = vector.load %arg3[%c2_117, %c3_118, %c0_119, %c0_120] : memref<5x5x32x32xf32, #tpu.memory_space<vmem>>, vector<1x1x32x32xf32>
    %126 = vector.shape_cast %125 : vector<1x1x32x32xf32> to vector<32x32xf32>
    %cst_121 = arith.constant dense<0.000000e+00> : vector<16x16x32xf32>
    %127 = tpu.matmul %124, %126, %cst_121 {dimension_numbers = #tpu.dot_dimension_numbers<[2], [0], [0, 1], [1], [0, 0, 0, 1, 1, 1], [], []>} : vector<16x16x32xf32>, vector<32x32xf32>, vector<16x16x32xf32> -> vector<16x16x32xf32>
    %128 = arith.addf %123, %127 : vector<16x16x32xf32>
    %129 = vector.extract_strided_slice %1 {offsets = [2, 4, 0], sizes = [16, 16, 32], strides = [1, 1, 1]} : vector<20x20x32xf32> to vector<16x16x32xf32>
    %c2_122 = arith.constant 2 : index
    %c4_123 = arith.constant 4 : index
    %c0_124 = arith.constant 0 : index
    %c0_125 = arith.constant 0 : index
    %130 = vector.load %arg3[%c2_122, %c4_123, %c0_124, %c0_125] : memref<5x5x32x32xf32, #tpu.memory_space<vmem>>, vector<1x1x32x32xf32>
    %131 = vector.shape_cast %130 : vector<1x1x32x32xf32> to vector<32x32xf32>
    %cst_126 = arith.constant dense<0.000000e+00> : vector<16x16x32xf32>
    %132 = tpu.matmul %129, %131, %cst_126 {dimension_numbers = #tpu.dot_dimension_numbers<[2], [0], [0, 1], [1], [0, 0, 0, 1, 1, 1], [], []>} : vector<16x16x32xf32>, vector<32x32xf32>, vector<16x16x32xf32> -> vector<16x16x32xf32>
    %133 = arith.addf %128, %132 : vector<16x16x32xf32>
    %134 = vector.extract_strided_slice %1 {offsets = [3, 0, 0], sizes = [16, 16, 32], strides = [1, 1, 1]} : vector<20x20x32xf32> to vector<16x16x32xf32>
    %c3_127 = arith.constant 3 : index
    %c0_128 = arith.constant 0 : index
    %c0_129 = arith.constant 0 : index
    %c0_130 = arith.constant 0 : index
    %135 = vector.load %arg3[%c3_127, %c0_128, %c0_129, %c0_130] : memref<5x5x32x32xf32, #tpu.memory_space<vmem>>, vector<1x1x32x32xf32>
    %136 = vector.shape_cast %135 : vector<1x1x32x32xf32> to vector<32x32xf32>
    %cst_131 = arith.constant dense<0.000000e+00> : vector<16x16x32xf32>
    %137 = tpu.matmul %134, %136, %cst_131 {dimension_numbers = #tpu.dot_dimension_numbers<[2], [0], [0, 1], [1], [0, 0, 0, 1, 1, 1], [], []>} : vector<16x16x32xf32>, vector<32x32xf32>, vector<16x16x32xf32> -> vector<16x16x32xf32>
    %138 = arith.addf %133, %137 : vector<16x16x32xf32>
    %139 = vector.extract_strided_slice %1 {offsets = [3, 1, 0], sizes = [16, 16, 32], strides = [1, 1, 1]} : vector<20x20x32xf32> to vector<16x16x32xf32>
    %c3_132 = arith.constant 3 : index
    %c1_133 = arith.constant 1 : index
    %c0_134 = arith.constant 0 : index
    %c0_135 = arith.constant 0 : index
    %140 = vector.load %arg3[%c3_132, %c1_133, %c0_134, %c0_135] : memref<5x5x32x32xf32, #tpu.memory_space<vmem>>, vector<1x1x32x32xf32>
    %141 = vector.shape_cast %140 : vector<1x1x32x32xf32> to vector<32x32xf32>
    %cst_136 = arith.constant dense<0.000000e+00> : vector<16x16x32xf32>
    %142 = tpu.matmul %139, %141, %cst_136 {dimension_numbers = #tpu.dot_dimension_numbers<[2], [0], [0, 1], [1], [0, 0, 0, 1, 1, 1], [], []>} : vector<16x16x32xf32>, vector<32x32xf32>, vector<16x16x32xf32> -> vector<16x16x32xf32>
    %143 = arith.addf %138, %142 : vector<16x16x32xf32>
    %144 = vector.extract_strided_slice %1 {offsets = [3, 2, 0], sizes = [16, 16, 32], strides = [1, 1, 1]} : vector<20x20x32xf32> to vector<16x16x32xf32>
    %c3_137 = arith.constant 3 : index
    %c2_138 = arith.constant 2 : index
    %c0_139 = arith.constant 0 : index
    %c0_140 = arith.constant 0 : index
    %145 = vector.load %arg3[%c3_137, %c2_138, %c0_139, %c0_140] : memref<5x5x32x32xf32, #tpu.memory_space<vmem>>, vector<1x1x32x32xf32>
    %146 = vector.shape_cast %145 : vector<1x1x32x32xf32> to vector<32x32xf32>
    %cst_141 = arith.constant dense<0.000000e+00> : vector<16x16x32xf32>
    %147 = tpu.matmul %144, %146, %cst_141 {dimension_numbers = #tpu.dot_dimension_numbers<[2], [0], [0, 1], [1], [0, 0, 0, 1, 1, 1], [], []>} : vector<16x16x32xf32>, vector<32x32xf32>, vector<16x16x32xf32> -> vector<16x16x32xf32>
    %148 = arith.addf %143, %147 : vector<16x16x32xf32>
    %149 = vector.extract_strided_slice %1 {offsets = [3, 3, 0], sizes = [16, 16, 32], strides = [1, 1, 1]} : vector<20x20x32xf32> to vector<16x16x32xf32>
    %c3_142 = arith.constant 3 : index
    %c3_143 = arith.constant 3 : index
    %c0_144 = arith.constant 0 : index
    %c0_145 = arith.constant 0 : index
    %150 = vector.load %arg3[%c3_142, %c3_143, %c0_144, %c0_145] : memref<5x5x32x32xf32, #tpu.memory_space<vmem>>, vector<1x1x32x32xf32>
    %151 = vector.shape_cast %150 : vector<1x1x32x32xf32> to vector<32x32xf32>
    %cst_146 = arith.constant dense<0.000000e+00> : vector<16x16x32xf32>
    %152 = tpu.matmul %149, %151, %cst_146 {dimension_numbers = #tpu.dot_dimension_numbers<[2], [0], [0, 1], [1], [0, 0, 0, 1, 1, 1], [], []>} : vector<16x16x32xf32>, vector<32x32xf32>, vector<16x16x32xf32> -> vector<16x16x32xf32>
    %153 = arith.addf %148, %152 : vector<16x16x32xf32>
    %154 = vector.extract_strided_slice %1 {offsets = [3, 4, 0], sizes = [16, 16, 32], strides = [1, 1, 1]} : vector<20x20x32xf32> to vector<16x16x32xf32>
    %c3_147 = arith.constant 3 : index
    %c4_148 = arith.constant 4 : index
    %c0_149 = arith.constant 0 : index
    %c0_150 = arith.constant 0 : index
    %155 = vector.load %arg3[%c3_147, %c4_148, %c0_149, %c0_150] : memref<5x5x32x32xf32, #tpu.memory_space<vmem>>, vector<1x1x32x32xf32>
    %156 = vector.shape_cast %155 : vector<1x1x32x32xf32> to vector<32x32xf32>
    %cst_151 = arith.constant dense<0.000000e+00> : vector<16x16x32xf32>
    %157 = tpu.matmul %154, %156, %cst_151 {dimension_numbers = #tpu.dot_dimension_numbers<[2], [0], [0, 1], [1], [0, 0, 0, 1, 1, 1], [], []>} : vector<16x16x32xf32>, vector<32x32xf32>, vector<16x16x32xf32> -> vector<16x16x32xf32>
    %158 = arith.addf %153, %157 : vector<16x16x32xf32>
    %159 = vector.extract_strided_slice %1 {offsets = [4, 0, 0], sizes = [16, 16, 32], strides = [1, 1, 1]} : vector<20x20x32xf32> to vector<16x16x32xf32>
    %c4_152 = arith.constant 4 : index
    %c0_153 = arith.constant 0 : index
    %c0_154 = arith.constant 0 : index
    %c0_155 = arith.constant 0 : index
    %160 = vector.load %arg3[%c4_152, %c0_153, %c0_154, %c0_155] : memref<5x5x32x32xf32, #tpu.memory_space<vmem>>, vector<1x1x32x32xf32>
    %161 = vector.shape_cast %160 : vector<1x1x32x32xf32> to vector<32x32xf32>
    %cst_156 = arith.constant dense<0.000000e+00> : vector<16x16x32xf32>
    %162 = tpu.matmul %159, %161, %cst_156 {dimension_numbers = #tpu.dot_dimension_numbers<[2], [0], [0, 1], [1], [0, 0, 0, 1, 1, 1], [], []>} : vector<16x16x32xf32>, vector<32x32xf32>, vector<16x16x32xf32> -> vector<16x16x32xf32>
    %163 = arith.addf %158, %162 : vector<16x16x32xf32>
    %164 = vector.extract_strided_slice %1 {offsets = [4, 1, 0], sizes = [16, 16, 32], strides = [1, 1, 1]} : vector<20x20x32xf32> to vector<16x16x32xf32>
    %c4_157 = arith.constant 4 : index
    %c1_158 = arith.constant 1 : index
    %c0_159 = arith.constant 0 : index
    %c0_160 = arith.constant 0 : index
    %165 = vector.load %arg3[%c4_157, %c1_158, %c0_159, %c0_160] : memref<5x5x32x32xf32, #tpu.memory_space<vmem>>, vector<1x1x32x32xf32>
    %166 = vector.shape_cast %165 : vector<1x1x32x32xf32> to vector<32x32xf32>
    %cst_161 = arith.constant dense<0.000000e+00> : vector<16x16x32xf32>
    %167 = tpu.matmul %164, %166, %cst_161 {dimension_numbers = #tpu.dot_dimension_numbers<[2], [0], [0, 1], [1], [0, 0, 0, 1, 1, 1], [], []>} : vector<16x16x32xf32>, vector<32x32xf32>, vector<16x16x32xf32> -> vector<16x16x32xf32>
    %168 = arith.addf %163, %167 : vector<16x16x32xf32>
    %169 = vector.extract_strided_slice %1 {offsets = [4, 2, 0], sizes = [16, 16, 32], strides = [1, 1, 1]} : vector<20x20x32xf32> to vector<16x16x32xf32>
    %c4_162 = arith.constant 4 : index
    %c2_163 = arith.constant 2 : index
    %c0_164 = arith.constant 0 : index
    %c0_165 = arith.constant 0 : index
    %170 = vector.load %arg3[%c4_162, %c2_163, %c0_164, %c0_165] : memref<5x5x32x32xf32, #tpu.memory_space<vmem>>, vector<1x1x32x32xf32>
    %171 = vector.shape_cast %170 : vector<1x1x32x32xf32> to vector<32x32xf32>
    %cst_166 = arith.constant dense<0.000000e+00> : vector<16x16x32xf32>
    %172 = tpu.matmul %169, %171, %cst_166 {dimension_numbers = #tpu.dot_dimension_numbers<[2], [0], [0, 1], [1], [0, 0, 0, 1, 1, 1], [], []>} : vector<16x16x32xf32>, vector<32x32xf32>, vector<16x16x32xf32> -> vector<16x16x32xf32>
    %173 = arith.addf %168, %172 : vector<16x16x32xf32>
    %174 = vector.extract_strided_slice %1 {offsets = [4, 3, 0], sizes = [16, 16, 32], strides = [1, 1, 1]} : vector<20x20x32xf32> to vector<16x16x32xf32>
    %c4_167 = arith.constant 4 : index
    %c3_168 = arith.constant 3 : index
    %c0_169 = arith.constant 0 : index
    %c0_170 = arith.constant 0 : index
    %175 = vector.load %arg3[%c4_167, %c3_168, %c0_169, %c0_170] : memref<5x5x32x32xf32, #tpu.memory_space<vmem>>, vector<1x1x32x32xf32>
    %176 = vector.shape_cast %175 : vector<1x1x32x32xf32> to vector<32x32xf32>
    %cst_171 = arith.constant dense<0.000000e+00> : vector<16x16x32xf32>
    %177 = tpu.matmul %174, %176, %cst_171 {dimension_numbers = #tpu.dot_dimension_numbers<[2], [0], [0, 1], [1], [0, 0, 0, 1, 1, 1], [], []>} : vector<16x16x32xf32>, vector<32x32xf32>, vector<16x16x32xf32> -> vector<16x16x32xf32>
    %178 = arith.addf %173, %177 : vector<16x16x32xf32>
    %179 = vector.extract_strided_slice %1 {offsets = [4, 4, 0], sizes = [16, 16, 32], strides = [1, 1, 1]} : vector<20x20x32xf32> to vector<16x16x32xf32>
    %c4_172 = arith.constant 4 : index
    %c4_173 = arith.constant 4 : index
    %c0_174 = arith.constant 0 : index
    %c0_175 = arith.constant 0 : index
    %180 = vector.load %arg3[%c4_172, %c4_173, %c0_174, %c0_175] : memref<5x5x32x32xf32, #tpu.memory_space<vmem>>, vector<1x1x32x32xf32>
    %181 = vector.shape_cast %180 : vector<1x1x32x32xf32> to vector<32x32xf32>
    %cst_176 = arith.constant dense<0.000000e+00> : vector<16x16x32xf32>
    %182 = tpu.matmul %179, %181, %cst_176 {dimension_numbers = #tpu.dot_dimension_numbers<[2], [0], [0, 1], [1], [0, 0, 0, 1, 1, 1], [], []>} : vector<16x16x32xf32>, vector<32x32xf32>, vector<16x16x32xf32> -> vector<16x16x32xf32>
    %183 = arith.addf %178, %182 : vector<16x16x32xf32>
    %184 = vector.extract_strided_slice %2 {offsets = [1, 0], sizes = [1, 32], strides = [1, 1]} : vector<2x32xf32> to vector<1x32xf32>
    %185 = vector.shape_cast %184 : vector<1x32xf32> to vector<1x1x32xf32>
    %186 = vector.broadcast %185 : vector<1x1x32xf32> to vector<16x16x32xf32>
    %187 = arith.addf %183, %186 : vector<16x16x32xf32>
    %cst_177 = arith.constant 0.000000e+00 : f32
    %188 = vector.broadcast %cst_177 : f32 to vector<16x16x32xf32>
    %189 = arith.maximumf %187, %188 : vector<16x16x32xf32>
    %c1_178 = arith.constant 1 : index
    %c0_179 = arith.constant 0 : index
    %c0_180 = arith.constant 0 : index
    %c0_181 = arith.constant 0 : index
    %190 = vector.load %arg10[%c1_178, %c0_179, %c0_180, %c0_181] : memref<2x16x16x32xf32, #tpu.memory_space<vmem>>, vector<1x16x16x32xf32>
    %191 = vector.shape_cast %190 : vector<1x16x16x32xf32> to vector<16x16x32xf32>
    %192 = vector.shape_cast %189 : vector<16x16x32xf32> to vector<1x16x16x32xf32>
    tpu.vector_store %arg10[%c1_178, %c0_179, %c0_180, %c0_181], %192 {strides = array<i32>} : memref<2x16x16x32xf32, #tpu.memory_space<vmem>>, vector<1x16x16x32xf32>,
    %c0_182 = arith.constant 0 : index
    %c0_183 = arith.constant 0 : index
    %c0_184 = arith.constant 0 : index
    %c0_185 = arith.constant 0 : index
    %193 = vector.load %arg10[%c0_182, %c0_183, %c0_184, %c0_185] : memref<2x16x16x32xf32, #tpu.memory_space<vmem>>, vector<1x16x16x32xf32>
    %194 = vector.shape_cast %193 : vector<1x16x16x32xf32> to vector<16x16x32xf32>
    %c1_186 = arith.constant 1 : index
    %c0_187 = arith.constant 0 : index
    %c0_188 = arith.constant 0 : index
    %c0_189 = arith.constant 0 : index
    %195 = vector.load %arg10[%c1_186, %c0_187, %c0_188, %c0_189] : memref<2x16x16x32xf32, #tpu.memory_space<vmem>>, vector<1x16x16x32xf32>
    %196 = vector.shape_cast %195 : vector<1x16x16x32xf32> to vector<16x16x32xf32>
    %197 = arith.addf %194, %196 : vector<16x16x32xf32>
    %cst_190 = arith.constant dense<0.000000e+00> : vector<32xf32>
    %198 = vector.multi_reduction <add>, %197, %cst_190 [0, 1] : vector<16x16x32xf32> to vector<32xf32>
    %199 = vector.shape_cast %198 : vector<32xf32> to vector<1x1x32xf32>
    %200 = vector.shape_cast %199 : vector<1x1x32xf32> to vector<1x32xf32>
    %cst_191 = arith.constant 3.906250e-03 : f32
    %201 = vector.broadcast %cst_191 : f32 to vector<1x32xf32>
    %202 = arith.mulf %200, %201 : vector<1x32xf32>
    %c0_192 = arith.constant 0 : index
    %c0_193 = arith.constant 0 : index
    %203 = vector.load %arg5[%c0_192, %c0_193] : memref<32x32xf32, #tpu.memory_space<vmem>>, vector<32x32xf32>
    %cst_194 = arith.constant dense<0.000000e+00> : vector<1x32xf32>
    %204 = tpu.matmul %202, %203, %cst_194 {dimension_numbers = #tpu.dot_dimension_numbers<[1], [0], [0], [1], [0, 0, 1, 1], [], []>} : vector<1x32xf32>, vector<32x32xf32>, vector<1x32xf32> -> vector<1x32xf32>
    %c0_195 = arith.constant 0 : index
    %c0_196 = arith.constant 0 : index
    %205 = vector.load %arg6[%c0_195, %c0_196] : memref<1x32xf32, #tpu.memory_space<vmem>>, vector<1x32xf32>
    %206 = arith.addf %204, %205 : vector<1x32xf32>
    %c0_197 = arith.constant 0 : index
    %c0_198 = arith.constant 0 : index
    %207 = vector.load %arg7[%c0_197, %c0_198] : memref<32x64xf32, #tpu.memory_space<vmem>>, vector<32x64xf32>
    %cst_199 = arith.constant dense<0.000000e+00> : vector<1x64xf32>
    %208 = tpu.matmul %206, %207, %cst_199 {dimension_numbers = #tpu.dot_dimension_numbers<[1], [0], [0], [1], [0, 0, 1, 1], [], []>} : vector<1x32xf32>, vector<32x64xf32>, vector<1x64xf32> -> vector<1x64xf32>
    %c0_200 = arith.constant 0 : index
    %c0_201 = arith.constant 0 : index
    %209 = vector.load %arg8[%c0_200, %c0_201] : memref<1x64xf32, #tpu.memory_space<vmem>>, vector<1x64xf32>
    %210 = arith.addf %208, %209 : vector<1x64xf32>
    %211 = vector.extract_strided_slice %210 {offsets = [0, 0], sizes = [1, 32], strides = [1, 1]} : vector<1x64xf32> to vector<1x32xf32>
    %212 = vector.extract_strided_slice %210 {offsets = [0, 32], sizes = [1, 32], strides = [1, 1]} : vector<1x64xf32> to vector<1x32xf32>
    %213 = tpu.concatenate %211, %212 in 0 : vector<1x32xf32>, vector<1x32xf32> -> vector<2x32xf32>
    %cst_202 = arith.constant dense<0xFF800000> : vector<32xf32>
    %214 = vector.multi_reduction <maximumf>, %213, %cst_202 [0] : vector<2x32xf32> to vector<32xf32>
    %215 = vector.shape_cast %214 : vector<32xf32> to vector<1x32xf32>
    %216 = vector.broadcast %215 : vector<1x32xf32> to vector<2x32xf32>
    %217 = arith.subf %213, %216 : vector<2x32xf32>
    %218 = math.exp %217 : vector<2x32xf32>
    %cst_203 = arith.constant dense<0.000000e+00> : vector<32xf32>
    %219 = vector.multi_reduction <add>, %218, %cst_203 [0] : vector<2x32xf32> to vector<32xf32>
    %220 = vector.shape_cast %219 : vector<32xf32> to vector<1x32xf32>
    %221 = vector.broadcast %220 : vector<1x32xf32> to vector<2x32xf32>
    %222 = arith.divf %218, %221 : vector<2x32xf32>
    %c0_204 = arith.constant 0 : index
    %c0_205 = arith.constant 0 : index
    %c0_206 = arith.constant 0 : index
    %c0_207 = arith.constant 0 : index
    %223 = vector.load %arg10[%c0_204, %c0_205, %c0_206, %c0_207] : memref<2x16x16x32xf32, #tpu.memory_space<vmem>>, vector<1x16x16x32xf32>
    %224 = vector.shape_cast %223 : vector<1x16x16x32xf32> to vector<16x16x32xf32>
    %225 = vector.extract_strided_slice %222 {offsets = [0, 0], sizes = [1, 32], strides = [1, 1]} : vector<2x32xf32> to vector<1x32xf32>
    %226 = vector.shape_cast %225 : vector<1x32xf32> to vector<1x1x32xf32>
    %227 = vector.broadcast %226 : vector<1x1x32xf32> to vector<16x16x32xf32>
    %228 = arith.mulf %224, %227 : vector<16x16x32xf32>
    %c1_208 = arith.constant 1 : index
    %c0_209 = arith.constant 0 : index
    %c0_210 = arith.constant 0 : index
    %c0_211 = arith.constant 0 : index
    %229 = vector.load %arg10[%c1_208, %c0_209, %c0_210, %c0_211] : memref<2x16x16x32xf32, #tpu.memory_space<vmem>>, vector<1x16x16x32xf32>
    %230 = vector.shape_cast %229 : vector<1x16x16x32xf32> to vector<16x16x32xf32>
    %231 = vector.extract_strided_slice %222 {offsets = [1, 0], sizes = [1, 32], strides = [1, 1]} : vector<2x32xf32> to vector<1x32xf32>
    %232 = vector.shape_cast %231 : vector<1x32xf32> to vector<1x1x32xf32>
    %233 = vector.broadcast %232 : vector<1x1x32xf32> to vector<16x16x32xf32>
    %234 = arith.mulf %230, %233 : vector<16x16x32xf32>
    %235 = arith.addf %228, %234 : vector<16x16x32xf32>
    %c0_212 = arith.constant 0 : index
    %c0_213 = arith.constant 0 : index
    %c0_214 = arith.constant 0 : index
    %c0_215 = arith.constant 0 : index
    %236 = vector.load %arg9[%c0_212, %c0_213, %c0_214, %c0_215] : memref<1x16x16x32xf32, #tpu.memory_space<vmem>>, vector<1x16x16x32xf32>
    %237 = vector.shape_cast %236 : vector<1x16x16x32xf32> to vector<16x16x32xf32>
    %238 = vector.shape_cast %235 : vector<16x16x32xf32> to vector<1x16x16x32xf32>
    tpu.vector_store %arg9[%c0_212, %c0_213, %c0_214, %c0_215], %238 {strides = array<i32>} : memref<1x16x16x32xf32, #tpu.memory_space<vmem>>, vector<1x16x16x32xf32>,
    return
  }
  func.func @transform_0(%arg0: i32) -> (i32, i32, i32, i32) {
    %c0_i32 = arith.constant 0 : i32
    %c0_i32_0 = arith.constant 0 : i32
    %c0_i32_1 = arith.constant 0 : i32
    %c0_i32_2 = arith.constant 0 : i32
    return %arg0, %c0_i32, %c0_i32_0, %c0_i32_1 : i32, i32, i32, i32
  }
  func.func @transform_1(%arg0: i32) -> (i32, i32, i32, i32) {
    %c0_i32 = arith.constant 0 : i32
    %c0_i32_0 = arith.constant 0 : i32
    %c0_i32_1 = arith.constant 0 : i32
    %c0_i32_2 = arith.constant 0 : i32
    %c0_i32_3 = arith.constant 0 : i32
    return %c0_i32, %c0_i32_0, %c0_i32_1, %c0_i32_2 : i32, i32, i32, i32
  }
  func.func @transform_2(%arg0: i32) -> (i32, i32, i32, i32) {
    %c0_i32 = arith.constant 0 : i32
    %c0_i32_0 = arith.constant 0 : i32
    %c0_i32_1 = arith.constant 0 : i32
    %c0_i32_2 = arith.constant 0 : i32
    %c0_i32_3 = arith.constant 0 : i32
    return %c0_i32, %c0_i32_0, %c0_i32_1, %c0_i32_2 : i32, i32, i32, i32
  }
  func.func @transform_3(%arg0: i32) -> (i32, i32) {
    %c0_i32 = arith.constant 0 : i32
    %c0_i32_0 = arith.constant 0 : i32
    %c0_i32_1 = arith.constant 0 : i32
    return %c0_i32, %c0_i32_0 : i32, i32
  }
  func.func @transform_4(%arg0: i32) -> (i32, i32) {
    %c0_i32 = arith.constant 0 : i32
    %c0_i32_0 = arith.constant 0 : i32
    %c0_i32_1 = arith.constant 0 : i32
    return %c0_i32, %c0_i32_0 : i32, i32
  }
  func.func @transform_5(%arg0: i32) -> (i32, i32) {
    %c0_i32 = arith.constant 0 : i32
    %c0_i32_0 = arith.constant 0 : i32
    %c0_i32_1 = arith.constant 0 : i32
    return %c0_i32, %c0_i32_0 : i32, i32
  }
  func.func @transform_6(%arg0: i32) -> (i32, i32) {
    %c0_i32 = arith.constant 0 : i32
    %c0_i32_0 = arith.constant 0 : i32
    %c0_i32_1 = arith.constant 0 : i32
    return %c0_i32, %c0_i32_0 : i32, i32
  }
  func.func @transform_7(%arg0: i32) -> (i32, i32) {
    %c0_i32 = arith.constant 0 : i32
    %c0_i32_0 = arith.constant 0 : i32
    %c0_i32_1 = arith.constant 0 : i32
    return %c0_i32, %c0_i32_0 : i32, i32
  }
  func.func @transform_8(%arg0: i32) -> (i32, i32, i32, i32) {
    %c0_i32 = arith.constant 0 : i32
    %c0_i32_0 = arith.constant 0 : i32
    %c0_i32_1 = arith.constant 0 : i32
    %c0_i32_2 = arith.constant 0 : i32
    return %arg0, %c0_i32, %c0_i32_0, %c0_i32_1 : i32, i32, i32, i32
  }
}

</mosaic_0001>

<bundles_post_ra>
// kernel: skconv_pallas.1
= control target key start
LH: loop header
LB: loop body
LE: loop exit
PB: predicated region body
PF: predicated region fallthrough
CT: control target
= control target key end

     0   :  { %13 = vsyncpa [#allocation4], 0  ;;  %s21280_s0 = inlined_call_operand.vmem [shape: f32[2,20,20,32], index: 0, kind: input, shape index: {}]   ;;  %s21281_s1 = inlined_call_operand.vmem [shape: f32[3,3,32,32], index: 1, kind: input, shape index: {}]   ;;  %s21282_s2 = inlined_call_operand.vmem [shape: f32[5,5,32,32], index: 2, kind: input, shape index: {}]   ;;  %s21283_s3 = inlined_call_operand.vmem [shape: f32[2,32], index: 3, kind: input, shape index: {}]   ;;  %s21284_s4 = inlined_call_operand.vmem [shape: f32[32,32], index: 4, kind: input, shape index: {}]   ;;  %s21285_s5 = inlined_call_operand.vmem [shape: f32[1,32], index: 5, kind: input, shape index: {}]   ;;  %s21286_s6 = inlined_call_operand.vmem [shape: f32[32,64], index: 6, kind: input, shape index: {}]   ;;  %s21287_s7 = inlined_call_operand.vmem [shape: f32[1,64], index: 7, kind: input, shape index: {}]   ;;  %s21288_s8 = inlined_call_operand.hbm [shape: f32[2,16,16,32], index: 8, kind: output, shape index: {}]  }
   0x1   :  { %15 = vsyncpa [#allocation4 + $0x1], 0  ;;  %s16712_s27 = smov 0   ;;  %s16714_s28 = smov 0  }
   0x2   :  { %s16716_s29 = smov 0   ;;  %s16718_s30 = smov 0  }
   0x3 LB: > { %s16733_s9 = sadd.s32 4294967295, %s16658_s30   ;;  %s10770_s10 = sadd.s32 4294967294, %s16658_s30   ;;  %s16658_s30 = sphi %s16718_s30, %s22462_s30   ;;  %s16654_s29 = sphi %s16716_s29, %s22461_s29   ;;  %s16650_s28 = sphi %s16714_s28, %s22460_s28   ;;  %s16646_s27 = sphi %s16712_s27, %s22459_s27  }
   0x4   : > { %s16737_s11 = sadd.s32 1, %s16658_s30   ;;  %s201_s12 = sadd.s32 1, %s16654_s29 }
   0x5   : > { %s198_s13 = ssub.s32 %s16658_s30, %s16737_s11  ;;  %p211_p0 = scmp.ne.s32.totalorder %s16654_s29, %s16650_s28 }
   0x6   : > { %p199_p1 = scmp.eq.s32.totalorder %s198_s13, 0  ;;  %p212_p2 = scmp.eq.s32.totalorder %s16733_s9, 1 }
   0x7   : > { %p217_p3 = scmp.ne.s32.totalorder %s16650_s28, %s16646_s27  ;;  %p218_p4 = scmp.eq.s32.totalorder %s10770_s10, 1 }
   0x8   : > { %s16748_s14 = scalar_select %p199_p1, %s16654_s29, %s201_s12  }
   0x9   : > { %p16750_p5 = por %p212_p2, %p211_p0  ;;  %p16754_p6 = por %p218_p4, %p217_p3 }
   0xa   : > { %p10773_p7 = scmp.ge.s32.totalorder %s16658_s30, 1  ;;  %p265_p8 = scmp.lt.s32.totalorder %s16658_s30, 3 }
   0xc   : > { %p266_p9 = pnand %p10773_p7, %p265_p8 }
   0xe   : > { %269 = sbr.rel (%p266_p9) target bundleno = 2026 (0x7ea), region = 52 }
  0x15   : > { %v11344_v0 = vld [vmem:[%s21282_s2 + $0xe0] sm:$0xff]  ;;  %v11345_v1 = vld [vmem:[%s21282_s2 + $0xe8] sm:$0xff]  ;;  %p299_p10 = scmp.lt.s32.totalorder %s16733_s9, 1  ;;  %v11346_v5 = vld [vmem:[%s21282_s2 + $0xf0] sm:$0xff]  ;;  %vm422_vm0 = vcmask 1045504   ;;  %vm503_vm1 = vcmask 261120  }
  0x16   : > { %v10776_v2 = vld [vmem:[%s21281_s1 + $0x20] sm:$0xff]  ;;  %v16770_v3 = vpack.c.bf16 %v11345_v1, %v11344_v0  ;;  %v10777_v4 = vld [vmem:[%s21281_s1 + $0x28] sm:$0xff]  ;;  %v11347_v6 = vld [vmem:[%s21282_s2 + $0xf8] sm:$0xff]  ;;  %vm1168_vm2 = vcmask 1044480   ;;  %vm793_vm3 = vcmask 1046528   ;;  %vm4384_vm4 = vcmask 1043456  }
  0x17   : > { %v15160_v7 = vpack.c.bf16 %v10777_v4, %v10776_v2  ;;  %v16781_v8 = vpack.c.bf16 %v11347_v6, %v11346_v5  ;;  %v10778_v9 = vld [vmem:[%s21281_s1 + $0x30] sm:$0xff]  ;;  %v10779_v10 = vld [vmem:[%s21281_s1 + $0x38] sm:$0xff]  ;;  %s300_s20 = scalar_select %p299_p10, %s16733_s9, 1  ;;  %v11380_v11 = vld [vmem:[%s21282_s2 + $0x100] sm:$0xff]  ;;  %vm16661_vm5 = vmmov 0   ;;  %vm10536_vm6 = vcmask 1040384  }
  0x18   : > { %21758 = vst [vmem:[#allocation6_spill] sm:$0xff] %v16770_v3  ;;  %15444 = vmatprep.subr.bf16.mxu1 %v16770_v3  ;;  %v15164_v12 = vpack.c.bf16 %v10779_v10, %v10778_v9  ;;  %v11381_v13 = vld [vmem:[%s21282_s2 + $0x108] sm:$0xff]  ;;  %v365_v14 = vld [vmem:[%s21281_s1] sm:$0xff]  ;;  %v11382_v17 = vld [vmem:[%s21282_s2 + $0x110] sm:$0xff]  ;;  %s16663_s24 = smov 96   ;;  %vm10538_vm7 = vcmask 254976  }
  0x19   : > { %21759 = vst [vmem:[#allocation7_spill] sm:$0xff] %v16781_v8  ;;  %15161 = vmatprep.subr.bf16.mxu0 %v15160_v7  ;;  %15446 = vmatpush3.bf16.msra.mxu1 %v16770_v3  ;;  %s16472_s25 = smul.u32 480, %s300_s20  ;;  %v366_v15 = vld [vmem:[%s21281_s1 + $0x8] sm:$0xff]  ;;  %v15296_v16 = vpack.c.bf16 %v11381_v13, %v11380_v11  ;;  %v11383_v18 = vld [vmem:[%s21282_s2 + $0x118] sm:$0xff]  ;;  %v11416_v19 = vld [vmem:[%s21282_s2 + $0x120] sm:$0xff]  ;;  %s296_s10 = sand.u32 1, %s16650_s28  }
  0x1a   : > { %15163 = vmatpush3.bf16.msra.mxu0 %v15160_v7  ;;  %15445 = vmatprep.subr.bf16.mxu1 %v16781_v8  ;;  %v16819_v20 = vpack.c.bf16 %v366_v15, %v365_v14  ;;  %v11417_v21 = vld [vmem:[%s21282_s2 + $0x128] sm:$0xff]  ;;  %v367_v22 = vld [vmem:[%s21281_s1 + $0x10] sm:$0xff]  ;;  %v368_v23 = vld [vmem:[%s21281_s1 + $0x18] sm:$0xff]  ;;  %v16849_v32 = vpack.c.bf16 %v11383_v18, %v11382_v17  ;;  %s10774_s12 = sshll.u32 %s296_s10, 8  ;;  %s11999_s17 = sshll.u32 %s16733_s9, 12 }
  0x1b   : > { %15165 = vmatprep.subr.bf16.mxu0 %v15164_v12  ;;  %s16817_s26 = scalar_lea.vmem %s21280_s0, %s16472_s25  ;;  %v16862_v38 = vpack.c.bf16 %v11417_v21, %v11416_v19  ;;  %v16864_v39 = vpack.c.bf16 %v368_v23, %v367_v22  ;;  %v11418_v17 = vld [vmem:[%s21282_s2 + $0x130] sm:$0xff]  ;;  %v11419_v18 = vld [vmem:[%s21282_s2 + $0x138] sm:$0xff]  ;;  %s21142_s13 = scalar_lea.vmem [#allocation3], %s10774_s12 }
  0x1c   : > { %v16831_v24 = vld [vmem:[%s16817_s26 + $0x18] sm:$0xff]  ;;  %v16834_v25 = vld [vmem:[%s16817_s26 + $0x20] sm:$0xff]  ;;  %v16837_v26 = vld [vmem:[%s16817_s26 + $0x168] sm:$0xff]  ;;  %s21205_s19 = scalar_lea.hbm %s21288_s8, %s11999_s17  ;;  %s21239_s25 = scalar_lea.sflag [#allocation4], %s296_s10 }
  0x1d   : > { %15447 = vmatpush3.bf16.msra.mxu1 %v16781_v8  ;;  %v423_v27 = vrot.slane %v16831_v24, 2  ;;  %v424_v28 = vrot.slane %v16834_v25, 2  ;;  %v16843_v29 = vld [vmem:[%s16817_s26 + $0x170] sm:$0xff]  ;;  %v493_v30 = vrot.slane %v16837_v26, 2  ;;  %v16847_v31 = vld [vmem:[%s16817_s26 + $0x28] sm:$0xf] }
  0x1e   : > { %15167 = vmatpush3.bf16.msra.mxu0 %v15164_v12  ;;  %v494_v33 = vrot.slane %v16843_v29, 2  ;;  %15297 = vmatprep.subr.bf16.mxu1 %v15296_v16  ;;  %v426_v34 = vrot.slane %v16847_v31, 2  ;;  %v16854_v35 = vld [vmem:[%s16817_s26 + $0x178] sm:$0xf]  ;;  %v16857_v36 = vld [vmem:[%s16817_s26 + $0x30] sm:$0xff]  ;;  %v16873_v44 = vld [vmem:[%s16817_s26 + $0x180] sm:$0xff] }
  0x1f   : > { %v16860_v37 = vld [vmem:[%s16817_s26 + $0x38] sm:$0xff]  ;;  %v16867_v40 = vsel %vm422_vm0, %v423_v27, %v424_v28  ;;  %v496_v41 = vrot.slane %v16854_v35, 2  ;;  %v428_v42 = vrot.slane %v16857_v36, 2  ;;  %v16876_v45 = vld [vmem:[%s16817_s26 + $0x188] sm:$0xff]  ;;  %15169 = vmatprep.subr.bf16.mxu0 %v16819_v20  ;;  %v498_v49 = vrot.slane %v16873_v44, 2  ;;  %v16911_v57 = vld [vmem:[%s16817_s26 + $0x50] sm:$0xff] }
  0x20   : > { %21760 = vst [vmem:[#allocation8_spill] sm:$0xff] %v16867_v40  ;;  %v429_v43 = vrot.slane %v16860_v37, 2  ;;  %v16879_v46 = vld [vmem:[%s16817_s26 + $0x48] sm:$0xff]  ;;  %13242 = vmatprep.mubr.msk.f32.mxu0 %vm503_vm1, %v16867_v40  ;;  %v16885_v47 = vsel %vm422_vm0, %v493_v30, %v494_v33  ;;  %v16888_v48 = vsel %vm422_vm0, %v424_v28, %v426_v34  ;;  %v499_v50 = vrot.slane %v16876_v45, 2  ;;  %v16893_v51 = vld [vmem:[%s16817_s26 + $0x40] sm:$0xf] }
  0x21   : > { %21761 = vst [vmem:[#allocation9_spill] sm:$0xff] %v16885_v47  ;;  %21762 = vst [vmem:[#allocation10_spill] sm:$0xff] %v16888_v48  ;;  %v16896_v52 = vld [vmem:[%s16817_s26 + $0x190] sm:$0xf]  ;;  %14180 = vmatprep.mubr.msk.f32.mxu1 %vm503_vm1, %v16885_v47  ;;  %13243 = vmatmul.mubr.msk.f32.vlgmr.msra.gmra.mrb[0].mxu0 %vm503_vm1, %v16888_v48  ;;  %v16903_v53 = vsel %vm422_vm0, %v494_v33, %v496_v41  ;;  %v431_v55 = vrot.slane %v16893_v51, 2  ;;  %v16917_v59 = vld [vmem:[%s16817_s26 + $0x60] sm:$0xff] }
  0x22   : > { %21763 = vst [vmem:[#allocation11_spill] sm:$0xff] %v16903_v53  ;;  %v16906_v54 = vsel %vm422_vm0, %v428_v42, %v429_v43  ;;  %v501_v56 = vrot.slane %v16896_v52, 2  ;;  %v16914_v58 = vld [vmem:[%s16817_s26 + $0x58] sm:$0xf]  ;;  %14181 = vmatmul.mubr.msk.f32.vlgmr.msra.gmra.mrb[0].mxu1 %vm503_vm1, %v16903_v53  ;;  %v16924_v60 = vsel %vm422_vm0, %v498_v49, %v499_v50  ;;  %v433_v61 = vrot.slane %v16879_v46, 2  ;;  %v16930_v0 = vld [vmem:[%s16817_s26 + $0x68] sm:$0xff]  ;;  %15171 = vmatpush3.bf16.msra.mxu0 %v16819_v20 }
  0x23   : > { %21764 = vst [vmem:[#allocation12_spill] sm:$0xff] %v16906_v54  ;;  %13245 = vmatprep.mubr.msk.f32.mxu0 %vm503_vm1, %v16906_v54  ;;  %21765 = vst [vmem:[#allocation13_spill] sm:$0xff] %v16924_v60  ;;  %v434_v62 = vrot.slane %v16911_v57, 2  ;;  %v1169_v63 = vrot.slane %v16831_v24, 3  ;;  %15299 = vmatpush3.bf16.msra.mxu1 %v15296_v16  ;;  %v16935_v1 = vsel %vm422_vm0, %v429_v43, %v431_v55  ;;  %v1170_v4 = vrot.slane %v16834_v25, 3  ;;  %v16954_v12 = vld [vmem:[%s16817_s26 + $0x78] sm:$0xff] }
  0x24   : > { %14183 = vmatprep.mubr.msk.f32.mxu1 %vm503_vm1, %v16924_v60  ;;  %21766 = vst [vmem:[#allocation14_spill] sm:$0xff] %v16935_v1  ;;  %v16938_v2 = vsel %vm422_vm0, %v499_v50, %v501_v56  ;;  %v436_v5 = vrot.slane %v16914_v58, 2  ;;  %v16943_v6 = vld [vmem:[%s16817_s26 + $0x70] sm:$0xf]  ;;  %15301 = vmatprep.subr.bf16.mxu1 %v16849_v32  ;;  %v1172_v9 = vrot.slane %v16847_v31, 3  ;;  %v438_v10 = vrot.slane %v16917_v59, 2 }
  0x25   : > { %21767 = vst [vmem:[#allocation15_spill] sm:$0xff] %v16938_v2  ;;  %v16947_v7 = vsel %vm422_vm0, %v433_v61, %v434_v62  ;;  %v439_v11 = vrot.slane %v16930_v0, 2  ;;  %v16957_v13 = vld [vmem:[%s16817_s26 + $0x80] sm:$0xff]  ;;  %13246 = vmatmul.mubr.msk.f32.gmra.mrb[2].mxu0 %vm503_vm1, %v16935_v1  ;;  %v16962_v14 = vsel %vm1168_vm2, %v1169_v63, %v1170_v4  ;;  %v1174_v15 = vrot.slane %v16857_v36, 3  ;;  %15173 = vmatprep.subr.bf16.mxu0 %v16864_v39  ;;  %v16994_v30 = vld [vmem:[%s16817_s26 + $0x88] sm:$0xf] }
  0x26   : > { %21768 = vst [vmem:[#allocation16_spill] sm:$0xff] %v16947_v7  ;;  %21769 = vst [vmem:[#allocation17_spill] sm:$0xff] %v16962_v14  ;;  %v1175_v16 = vrot.slane %v16860_v37, 3  ;;  %14184 = vmatmul.mubr.msk.f32.gmra.mrb[2].mxu1 %vm503_vm1, %v16938_v2  ;;  %13248 = vmatprep.mubr.msk.f32.mxu0 %vm503_vm1, %v16947_v7  ;;  %v16978_v19 = vsel %vm422_vm0, %v434_v62, %v436_v5  ;;  %v441_v20 = vrot.slane %v16943_v6, 2  ;;  %v1177_v21 = vrot.slane %v16893_v51, 3  ;;  %v17003_v41 = vld [vmem:[%s16817_s26 + $0x90] sm:$0xff] }
  0x27   : > { %21770 = vst [vmem:[#allocation18_spill] sm:$0xff] %v16978_v19  ;;  %15303 = vmatpush3.bf16.msra.mxu1 %v16849_v32  ;;  %14194 = vmatprep.mubr.msk.f32.mxu1 %vm503_vm1, %v16962_v14  ;;  %v16986_v22 = vsel %vm1168_vm2, %v1170_v4, %v1172_v9  ;;  %v16989_v23 = vsel %vm422_vm0, %v438_v10, %v439_v11  ;;  %v443_v27 = vrot.slane %v16954_v12, 2  ;;  %v444_v28 = vrot.slane %v16957_v13, 2  ;;  %v17006_v42 = vld [vmem:[%s16817_s26 + $0x98] sm:$0xff]  ;;  %v17032_v63 = vld [vmem:[%s16817_s26 + $0xa0] sm:$0xf] }
  0x28   : > { %21771 = vst [vmem:[#allocation19_spill] sm:$0xff] %v16986_v22  ;;  %21772 = vst [vmem:[#allocation20_spill] sm:$0xff] %v16989_v23  ;;  %15305 = vmatprep.subr.bf16.mxu1 %v16862_v38  ;;  %v16998_v33 = vsel %vm1168_vm2, %v1174_v15, %v1175_v16  ;;  %v1179_v32 = vrot.slane %v16879_v46, 3  ;;  %v1180_v34 = vrot.slane %v16911_v57, 3  ;;  %v15308_v43 = vpack.c.bf16 %v11419_v18, %v11418_v17  ;;  %v17040_v9 = vld [vmem:[%s16817_s26 + $0xa8] sm:$0xff]  ;;  %v17043_v10 = vld [vmem:[%s16817_s26 + $0xb0] sm:$0xff] }
  0x29   : > { %21773 = vst [vmem:[#allocation21_spill] sm:$0xff] %v16998_v33  ;;  %15175 = vmatpush3.bf16.msra.mxu0 %v16864_v39  ;;  %v17016_v49 = vsel %vm422_vm0, %v439_v11, %v441_v20  ;;  %v17019_v50 = vsel %vm1168_vm2, %v1175_v16, %v1177_v21  ;;  %v446_v55 = vrot.slane %v16994_v30, 2  ;;  %v17026_v39 = vsel %vm422_vm0, %v443_v27, %v444_v28  ;;  %v17067_v27 = vld [vmem:[%s16817_s26 + $0xb8] sm:$0xf]  ;;  %v17145_v1 = vld [vmem:[%s16817_s26 + $0xf0] sm:$0xff]  ;;  %s16664_s20 = smov [#allocation3]  }
  0x2a   : > { %13249 = vmatmul.mubr.msk.f32.gmra.mrb[4].mxu0 %vm503_vm1, %v16978_v19  ;;  %14195 = vmatmul.mubr.msk.f32.vlgmr.msra.gmra.mrb[4].mxu1 %vm503_vm1, %v16986_v22  ;;  %21774 = vst [vmem:[#allocation22_spill] sm:$0xff] %v17016_v49  ;;  %21775 = vst [vmem:[#allocation23_spill] sm:$0xff] %v17019_v50  ;;  %v1182_v56 = vrot.slane %v16914_v58, 3  ;;  %v448_v61 = vrot.slane %v17003_v41, 2  ;;  %v449_v62 = vrot.slane %v17006_v42, 2  ;;  %v17035_v4 = vsel %vm1168_vm2, %v1179_v32, %v1180_v34  ;;  %s16600_s22 = sshll.u32 %s16664_s20, 4  ;;  %s16601_s22 = int_to_ptr.vmem [resolvable:$false] %s16600_s22 }
  0x2b   : > { %13251 = vmatprep.mubr.msk.f32.mxu0 %vm503_vm1, %v16989_v23  ;;  %15307 = vmatpush3.bf16.msra.mxu1 %v16862_v38  ;;  %21776 = vst [vmem:[#allocation24_spill] sm:$0xff] %v17026_v39  ;;  %21777 = vst [vmem:[#allocation25_spill] sm:$0xff] %v17035_v4  ;;  %v1184_v5 = vrot.slane %v16917_v59, 3  ;;  %v1185_v38 = vrot.slane %v16930_v0, 3  ;;  %v17052_v11 = vsel %vm422_vm0, %v444_v28, %v446_v55  ;;  %v451_v15 = vrot.slane %v17032_v63, 2  ;;  %s16602_s23 = scalar_lea.vmem %s16601_s22, 8192 }
  0x2c   : > { %14197 = vmatprep.mubr.msk.f32.mxu1 %vm503_vm1, %v16998_v33  ;;  %15309 = vmatprep.subr.bf16.mxu1 %v15308_v43  ;;  %21778 = vst [vmem:[#allocation26_spill] sm:$0xff] %v17052_v11  ;;  %v1187_v16 = vrot.slane %v16943_v6, 3  ;;  %v17059_v17 = vsel %vm1168_vm2, %v1180_v34, %v1182_v56  ;;  %v17062_v18 = vsel %vm422_vm0, %v448_v61, %v449_v62  ;;  %v453_v20 = vrot.slane %v17040_v9, 2  ;;  %v17075_v34 = vld [vmem:[%s16817_s26 + $0xc0] sm:$0xff]  ;;  %v17078_v56 = vld [vmem:[%s16817_s26 + $0xc8] sm:$0xff] }
  0x2d   : > { %21779 = vst [vmem:[#allocation27_spill] sm:$0xff] %v17059_v17  ;;  %21780 = vst [vmem:[#allocation28_spill] sm:$0xff] %v17062_v18  ;;  %v454_v21 = vrot.slane %v17043_v10, 2  ;;  %v17070_v28 = vsel %vm1168_vm2, %v1184_v5, %v1185_v38  ;;  %v1189_v32 = vrot.slane %v16954_v12, 3  ;;  %v1190_v55 = vrot.slane %v16957_v13, 3 }
  0x2e   : > { %13252 = vmatmul.mubr.msk.f32.gmra.mrb[6].mxu0 %vm503_vm1, %v17016_v49  ;;  %14198 = vmatmul.mubr.msk.f32.gmra.mrb[6].mxu1 %vm503_vm1, %v17019_v50  ;;  %21781 = vst [vmem:[#allocation29_spill] sm:$0xff] %v17070_v28  ;;  %v17090_v61 = vsel %vm1168_vm2, %v1185_v38, %v1187_v16  ;;  %v456_v5 = vrot.slane %v17067_v27, 2  ;;  %v1192_v3 = vrot.slane %v16994_v30, 3  ;;  %v458_v48 = vrot.slane %v17075_v34, 2  ;;  %v17110_v16 = vld [vmem:[%s16817_s26 + $0xd8] sm:$0xff]  ;;  %21793 = vst [vmem:[#allocation41_spill] sm:$0xff] %v17145_v1 }
  0x2f   : > { %13254 = vmatprep.mubr.msk.f32.mxu0 %vm503_vm1, %v17026_v39  ;;  %14200 = vmatprep.mubr.msk.f32.mxu1 %vm503_vm1, %v17035_v4  ;;  %21783 = vst [vmem:[#allocation31_spill] sm:$0xff] %v17090_v61  ;;  %v17096_v8 = vsel %vm422_vm0, %v453_v20, %v454_v21  ;;  %v459_v40 = vrot.slane %v17078_v56, 2  ;;  %v1194_v38 = vrot.slane %v17003_v41, 3  ;;  %21786 = vst [vmem:[#allocation34_spill] sm:$0xff] %v17110_v16  ;;  %v17113_v20 = vld [vmem:[%s16817_s26 + $0xe0] sm:$0xff]  ;;  %v1197_v39 = vrot.slane %v17032_v63, 3 }
  0x30   : > { %15311 = vmatpush3.bf16.msra.mxu1 %v15308_v43  ;;  %v17087_v43 = vsel %vm422_vm0, %v449_v62, %v451_v15  ;;  %21784 = vst [vmem:[#allocation32_spill] sm:$0xff] %v17096_v8  ;;  %v17105_v62 = vsel %vm1168_vm2, %v1189_v32, %v1190_v55  ;;  %v1195_v15 = vrot.slane %v17006_v42, 3  ;;  %21787 = vst [vmem:[#allocation35_spill] sm:$0xff] %v17113_v20  ;;  %v463_v23 = vrot.slane %v17110_v16, 2  ;;  %v17137_v19 = vld [vmem:[%s16817_s26 + $0xe8] sm:$0xf] }
  0x31   : > { %21782 = vst [vmem:[#allocation30_spill] sm:$0xff] %v17087_v43  ;;  %21785 = vst [vmem:[#allocation33_spill] sm:$0xff] %v17105_v62  ;;  %v17122_v32 = vsel %vm422_vm0, %v454_v21, %v456_v5  ;;  %v17129_v49 = vsel %vm1168_vm2, %v1190_v55, %v1192_v3  ;;  %v1199_v5 = vrot.slane %v17040_v9, 3  ;;  %v1200_v7 = vrot.slane %v17043_v10, 3  ;;  %v17148_v3 = vld [vmem:[%s16817_s26 + $0xf8] sm:$0xff]  ;;  %v17215_v4 = vld [vmem:[%s16817_s26 + $0x120] sm:$0xff] }
  0x32   : > { %13255 = vmatmul.mubr.msk.f32.gmra.mrb[8].mxu0 %vm503_vm1, %v17052_v11  ;;  %14201 = vmatmul.mubr.msk.f32.gmra.mrb[8].mxu1 %vm503_vm1, %v17059_v17  ;;  %21788 = vst [vmem:[#allocation36_spill] sm:$0xff] %v17122_v32  ;;  %21789 = vst [vmem:[#allocation37_spill] sm:$0xff] %v17129_v49  ;;  %v17140_v21 = vsel %vm1168_vm2, %v1194_v38, %v1195_v15  ;;  %v17160_v55 = vsel %vm1168_vm2, %v1195_v15, %v1197_v39  ;;  %v466_v38 = vrot.slane %v17137_v19, 2  ;;  %v17180_v15 = vld [vmem:[%s16817_s26 + $0x108] sm:$0xff]  ;;  %v17207_v17 = vld [vmem:[%s16817_s26 + $0x118] sm:$0xf] }
  0x33   : > { %13257 = vmatprep.mubr.msk.f32.mxu0 %vm503_vm1, %v17062_v18  ;;  %14203 = vmatprep.mubr.msk.f32.mxu1 %vm503_vm1, %v17070_v28  ;;  %v17102_v18 = vld [vmem:[%s16817_s26 + $0xd0] sm:$0xf]  ;;  %21791 = vst [vmem:[#allocation39_spill] sm:$0xff] %v17137_v19  ;;  %21792 = vst [vmem:[#allocation40_spill] sm:$0xff] %v17140_v21  ;;  %v1202_v54 = vrot.slane %v17067_v27, 3  ;;  %v1204_v39 = vrot.slane %v17075_v34, 3 }
  0x34   : > { %v461_v11 = vrot.slane %v17102_v18, 2  ;;  %21794 = vst [vmem:[#allocation42_spill] sm:$0xff] %v17148_v3  ;;  %21796 = vst [vmem:[#allocation44_spill] sm:$0xff] %v17160_v55  ;;  %v1212_v50 = vrot.slane %v17137_v19, 3  ;;  %v17242_v33 = vld [vmem:[%s16817_s26 + $0x130] sm:$0xf] }
  0x35   : > { %v17199_v28 = vsel %vm1168_vm2, %v1200_v7, %v1202_v54  ;;  %v17218_v54 = vld [vmem:[%s16817_s26 + $0x128] sm:$0xff] }
  0x36   : > { %13258 = vmatmul.mubr.msk.f32.gmra.mrb[10].mxu0 %vm503_vm1, %v17087_v43  ;;  %14204 = vmatmul.mubr.msk.f32.gmra.mrb[10].mxu1 %vm503_vm1, %v17090_v61  ;;  %v17132_v43 = vsel %vm422_vm0, %v458_v48, %v459_v40  ;;  %v17157_v48 = vsel %vm422_vm0, %v459_v40, %v461_v11  ;;  %v17175_v40 = vsel %vm1168_vm2, %v1199_v5, %v1200_v7  ;;  %v1205_v11 = vrot.slane %v17078_v56, 3 }
  0x37   : > { %13260 = vmatprep.mubr.msk.f32.mxu0 %vm503_vm1, %v17096_v8  ;;  %14206 = vmatprep.mubr.msk.f32.mxu1 %vm503_vm1, %v17105_v62  ;;  %21790 = vst [vmem:[#allocation38_spill] sm:$0xff] %v17132_v43  ;;  %v464_v8 = vrot.slane %v17113_v20, 2  ;;  %21795 = vst [vmem:[#allocation43_spill] sm:$0xff] %v17157_v48  ;;  %v17172_v62 = vld [vmem:[%s16817_s26 + $0x100] sm:$0xf]  ;;  %v1207_v61 = vrot.slane %v17102_v18, 3 }
  0x38   : > { %21798 = vst [vmem:[#allocation46_spill] sm:$0xff] %v17172_v62  ;;  %21799 = vst [vmem:[#allocation47_spill] sm:$0xff] %v17175_v40  ;;  %v1217_v14 = vrot.slane %v17172_v62, 3 }
  0x39   : > { %v17192_v5 = vsel %vm422_vm0, %v464_v8, %v466_v38  ;;  %21802 = vst [vmem:[#allocation50_spill] sm:$0xff] %v17199_v28  ;;  %v1209_v38 = vrot.slane %v17110_v16, 3 }
  0x3a   : > { %13261 = vmatmul.mubr.msk.f32.gmra.mrb[12].mxu0 %vm503_vm1, %v17122_v32  ;;  %14207 = vmatmul.mubr.msk.f32.gmra.mrb[12].mxu1 %vm503_vm1, %v17129_v49  ;;  %v17166_v32 = vsel %vm422_vm0, %v463_v23, %v464_v8  ;;  %v468_v49 = vrot.slane %v17145_v1, 2  ;;  %v17183_v23 = vld [vmem:[%s16817_s26 + $0x110] sm:$0xff]  ;;  %21801 = vst [vmem:[#allocation49_spill] sm:$0xff] %v17192_v5  ;;  %v17210_v8 = vsel %vm1168_vm2, %v1204_v39, %v1205_v11  ;;  %v476_v39 = vrot.slane %v17207_v17, 2 }
  0x3b   : > { %13263 = vmatprep.mubr.msk.f32.mxu0 %vm503_vm1, %v17132_v43  ;;  %14209 = vmatprep.mubr.msk.f32.mxu1 %vm503_vm1, %v17140_v21  ;;  %21797 = vst [vmem:[#allocation45_spill] sm:$0xff] %v17166_v32  ;;  %v469_v43 = vrot.slane %v17148_v3, 2  ;;  %21800 = vst [vmem:[#allocation48_spill] sm:$0xff] %v17183_v23  ;;  %v471_v21 = vrot.slane %v17172_v62, 2  ;;  %v1220_v16 = vrot.slane %v17183_v23, 3 }
  0x3c   : > { %21804 = vst [vmem:[#allocation52_spill] sm:$0xff] %v17210_v8 }
  0x3d   : > { %v17227_v7 = vsel %vm422_vm0, %v469_v43, %v471_v21  ;;  %v1215_v21 = vrot.slane %v17148_v3, 3  ;;  %v11452_v3 = vld [vmem:[%s21282_s2 + $0x140] sm:$0xff] }
  0x3e   : > { %13264 = vmatmul.mubr.msk.f32.gmra.mrb[14].mxu0 %vm503_vm1, %v17157_v48  ;;  %14210 = vmatmul.mubr.msk.f32.gmra.mrb[14].mxu1 %vm503_vm1, %v17160_v55  ;;  %v17202_v48 = vsel %vm422_vm0, %v468_v49, %v469_v43  ;;  %v473_v55 = vrot.slane %v17180_v15, 2  ;;  %21805 = vst [vmem:[#allocation53_spill] sm:$0xff] %v17227_v7  ;;  %v17230_v49 = vsel %vm1168_vm2, %v1205_v11, %v1207_v61  ;;  %v1214_v61 = vrot.slane %v17145_v1, 3  ;;  %v17250_v11 = vld [vmem:[%s16817_s26 + $0x138] sm:$0xff]  ;;  %v17289_v1 = vld [vmem:[%s16817_s26 + $0x148] sm:$0xf] }
  0x3f   : > { %13266 = vmatprep.mubr.msk.f32.mxu0 %vm503_vm1, %v17166_v32  ;;  %14212 = vmatprep.mubr.msk.f32.mxu1 %vm503_vm1, %v17175_v40  ;;  %21803 = vst [vmem:[#allocation51_spill] sm:$0xff] %v17202_v48  ;;  %v474_v32 = vrot.slane %v17183_v23, 2  ;;  %v1210_v40 = vrot.slane %v17113_v20, 3  ;;  %21806 = vst [vmem:[#allocation54_spill] sm:$0xff] %v17230_v49  ;;  %v1219_v20 = vrot.slane %v17180_v15, 3  ;;  %v17316_v23 = vsel %vm1168_vm2, %v1215_v21, %v1217_v14 }
  0x40   : > { %v17292_v19 = vsel %vm1168_vm2, %v1214_v61, %v1215_v21  ;;  %21814 = vst [vmem:[#allocation62_spill] sm:$0xff] %v17316_v23 }
  0x41   : > { %v17245_v43 = vsel %vm1168_vm2, %v1209_v38, %v1210_v40  ;;  %v10845_v38 = vld [vmem:[%s21281_s1 + $0x48] sm:$0xff]  ;;  %v17268_v22 = vsel %vm422_vm0, %v474_v32, %v476_v39  ;;  %v483_v39 = vrot.slane %v17250_v11, 2  ;;  %21812 = vst [vmem:[#allocation60_spill] sm:$0xff] %v17292_v19  ;;  %v17332_v14 = vsel %vm1168_vm2, %v1219_v20, %v1220_v16 }
  0x42   : > { %13267 = vmatmul.mubr.msk.f32.gmra.mrb[16].mxu0 %vm503_vm1, %v17192_v5  ;;  %14213 = vmatmul.mubr.msk.f32.gmra.mrb[16].mxu1 %vm503_vm1, %v17199_v28  ;;  %v17236_v5 = vsel %vm422_vm0, %v473_v55, %v474_v32  ;;  %v478_v28 = vrot.slane %v17215_v4, 2  ;;  %21808 = vst [vmem:[#allocation56_spill] sm:$0xff] %v17245_v43  ;;  %v10844_v55 = vld [vmem:[%s21281_s1 + $0x40] sm:$0xff]  ;;  %21809 = vst [vmem:[#allocation57_spill] sm:$0xff] %v17268_v22 }
  0x43   : > { %13269 = vmatprep.mubr.msk.f32.mxu0 %vm503_vm1, %v17202_v48  ;;  %14215 = vmatprep.mubr.msk.f32.mxu1 %vm503_vm1, %v17210_v8  ;;  %21807 = vst [vmem:[#allocation55_spill] sm:$0xff] %v17236_v5  ;;  %v479_v48 = vrot.slane %v17218_v54, 2  ;;  %v17253_v8 = vld [vmem:[%s16817_s26 + $0x140] sm:$0xff]  ;;  %21816 = vst [vmem:[#allocation64_spill] sm:$0xff] %v17332_v14 }
  0x44   : > { %v484_v62 = vrot.slane %v17253_v8, 2 }
  0x45   : > { %v17284_v32 = vsel %vm422_vm0, %v478_v28, %v479_v48  ;;  %v17302_v28 = vpack.c.bf16 %v10845_v38, %v10844_v55  ;;  %v486_v55 = vrot.slane %v17289_v1, 2 }
  0x46   : > { %13270 = vmatmul.mubr.msk.f32.gmra.mrb[18].mxu0 %vm503_vm1, %v17227_v7  ;;  %14216 = vmatmul.mubr.msk.f32.gmra.mrb[18].mxu1 %vm503_vm1, %v17230_v49  ;;  %v481_v7 = vrot.slane %v17242_v33, 2  ;;  %v11453_v49 = vld [vmem:[%s21282_s2 + $0x148] sm:$0xff]  ;;  %21811 = vst [vmem:[#allocation59_spill] sm:$0xff] %v17284_v32 }
  0x47   : > { %13272 = vmatprep.mubr.msk.f32.mxu0 %vm503_vm1, %v17236_v5  ;;  %14218 = vmatprep.mubr.msk.f32.mxu1 %vm503_vm1, %v17245_v43  ;;  %v17281_v5 = vsel %vm1168_vm2, %v1210_v40, %v1212_v50  ;;  %v17297_v43 = vld [vmem:[%s16817_s26 + $0x150] sm:$0xff]  ;;  %v17300_v50 = vld [vmem:[%s16817_s26 + $0x158] sm:$0xff]  ;;  %v17306_v40 = vpack.c.bf16 %v11453_v49, %v11452_v3  ;;  %v17322_v3 = vsel %vm422_vm0, %v483_v39, %v484_v62  ;;  %v1222_v49 = vrot.slane %v17207_v17, 3 }
  0x48   : > { %21810 = vst [vmem:[#allocation58_spill] sm:$0xff] %v17281_v5  ;;  %v17313_v61 = vsel %vm422_vm0, %v479_v48, %v481_v7  ;;  %21815 = vst [vmem:[#allocation63_spill] sm:$0xff] %v17322_v3  ;;  %v488_v38 = vrot.slane %v17297_v43, 2  ;;  %15177 = vmatprep.subr.bf16.mxu0 %v17302_v28  ;;  %v1224_v48 = vrot.slane %v17215_v4, 3  ;;  %v1225_v7 = vrot.slane %v17218_v54, 3 }
  0x49   : > { %21813 = vst [vmem:[#allocation61_spill] sm:$0xff] %v17313_v61  ;;  %15313 = vmatprep.subr.bf16.mxu1 %v17306_v40  ;;  %v17344_v21 = vsel %vm422_vm0, %v484_v62, %v486_v55  ;;  %v17350_v39 = vsel %vm1168_vm2, %v1220_v16, %v1222_v49  ;;  %v1230_v62 = vrot.slane %v17253_v8, 3  ;;  %v1232_v49 = vrot.slane %v17289_v1, 3 }
  0x4a   : > { %13273 = vmatmul.mubr.msk.f32.gmra.mrb[20].mxu0 %vm503_vm1, %v17268_v22  ;;  %14219 = vmatmul.mubr.msk.f32.gmra.mrb[20].mxu1 %vm503_vm1, %v17281_v5  ;;  %v17328_v22 = vld [vmem:[%s16817_s26 + $0x160] sm:$0xf]  ;;  %21817 = vst [vmem:[#allocation65_spill] sm:$0xff] %v17344_v21  ;;  %21818 = vst [vmem:[#allocation66_spill] sm:$0xff] %v17350_v39 }
  0x4b   : > { %13275 = vmatprep.mubr.msk.f32.mxu0 %vm503_vm1, %v17284_v32  ;;  %14221 = vmatprep.mubr.msk.f32.mxu1 %vm503_vm1, %v17292_v19  ;;  %v489_v32 = vrot.slane %v17300_v50, 2  ;;  %v491_v20 = vrot.slane %v17328_v22, 2 }
  0x4d   : > { %v17353_v19 = vsel %vm422_vm0, %v488_v38, %v489_v32  ;;  %v17368_v16 = vsel %vm422_vm0, %v489_v32, %v491_v20  ;;  %v1237_v32 = vrot.slane %v17328_v22, 3 }
  0x4e   : > { %13276 = vmatmul.mubr.msk.f32.gmra.mrb[22].mxu0 %vm503_vm1, %v17313_v61  ;;  %14222 = vmatmul.mubr.msk.f32.gmra.mrb[22].mxu1 %vm503_vm1, %v17316_v23  ;;  %21819 = vst [vmem:[#allocation67_spill] sm:$0xff] %v17353_v19  ;;  %v1227_v61 = vrot.slane %v17242_v33, 3  ;;  %v17357_v23 = vsel %vm1168_vm2, %v1224_v48, %v1225_v7  ;;  %21821 = vst [vmem:[#allocation69_spill] sm:$0xff] %v17368_v16  ;;  %v1234_v48 = vrot.slane %v17297_v43, 3 }
  0x4f   : > { %13278 = vmatprep.mubr.msk.f32.mxu0 %vm503_vm1, %v17322_v3  ;;  %14224 = vmatprep.mubr.msk.f32.mxu1 %vm503_vm1, %v17332_v14  ;;  %21820 = vst [vmem:[#allocation68_spill] sm:$0xff] %v17357_v23  ;;  %v1229_v3 = vrot.slane %v17250_v11, 3 }
  0x50   : > { %v17373_v55 = vsel %vm1168_vm2, %v1225_v7, %v1227_v61  ;;  %v17391_v61 = vsel %vm1168_vm2, %v1230_v62, %v1232_v49  ;;  %v795_v7 = vrot.slane %v16834_v25, 1  ;;  %v797_v49 = vrot.slane %v16847_v31, 1 }
  0x51   : > { %21822 = vst [vmem:[#allocation70_spill] sm:$0xff] %v17373_v55  ;;  %v17377_v38 = vsel %vm1168_vm2, %v1229_v3, %v1230_v62  ;;  %21824 = vst [vmem:[#allocation72_spill] sm:$0xff] %v17391_v61  ;;  %v794_v3 = vrot.slane %v16831_v24, 1 }
  0x52   : > { %13279 = vmatmul.mubr.msk.f32.gmra.mrb[24].mxu0 %vm503_vm1, %v17344_v21  ;;  %14225 = vmatmul.mubr.msk.f32.gmra.mrb[24].mxu1 %vm503_vm1, %v17350_v39  ;;  %21823 = vst [vmem:[#allocation71_spill] sm:$0xff] %v17377_v38  ;;  %v1235_v21 = vrot.slane %v17300_v50, 3  ;;  %v4391_v39 = vrot.slane %v16834_v25, 4 }
  0x53   : > { %13281 = vmatprep.mubr.msk.f32.mxu0 %vm503_vm1, %v17353_v19  ;;  %14227 = vmatprep.mubr.msk.f32.mxu1 %vm503_vm1, %v17357_v23  ;;  %v1242_v19 = vrot.slane %v16854_v35, 3 }
  0x54   : > { %v17396_v20 = vsel %vm1168_vm2, %v1234_v48, %v1235_v21  ;;  %v17407_v62 = vsel %vm1168_vm2, %v1235_v21, %v1237_v32  ;;  %v17413_v48 = vsel %vm793_vm3, %v794_v3, %v795_v7  ;;  %v1244_v21 = vrot.slane %v16873_v44, 3  ;;  %v10846_v3 = vld [vmem:[%s21281_s1 + $0x50] sm:$0xff] }
  0x55   : > { %21825 = vst [vmem:[#allocation73_spill] sm:$0xff] %v17396_v20  ;;  %21826 = vst [vmem:[#allocation74_spill] sm:$0xff] %v17407_v62  ;;  %v1245_v32 = vrot.slane %v16876_v45, 3 }
  0x56   : > { %13282 = vmatmul.mubr.msk.f32.gmra.mrb[26].mxu0 %vm503_vm1, %v17368_v16  ;;  %14228 = vmatmul.mubr.msk.f32.gmra.mrb[26].mxu1 %vm503_vm1, %v17373_v55  ;;  %v1239_v16 = vrot.slane %v16837_v26, 3  ;;  %21827 = vst [vmem:[#allocation75_spill] sm:$0xff] %v17413_v48 }
  0x57   : > { %13284 = vmatprep.mubr.msk.f32.mxu0 %vm503_vm1, %v16885_v47  ;;  %14230 = vmatprep.mubr.msk.f32.mxu1 %vm503_vm1, %v17377_v38  ;;  %v1240_v47 = vrot.slane %v16843_v29, 3 }
  0x59   : > { %v17419_v38 = vsel %vm1168_vm2, %v1239_v16, %v1240_v47  ;;  %v17436_v16 = vsel %vm793_vm3, %v795_v7, %v797_v49  ;;  %v17443_v55 = vsel %vm1168_vm2, %v1240_v47, %v1242_v19  ;;  %v17451_v7 = vsel %vm1168_vm2, %v1244_v21, %v1245_v32 }
  0x5a   : > { %13285 = vmatmul.mubr.msk.f32.gmra.mrb[28].mxu0 %vm503_vm1, %v16903_v53  ;;  %14231 = vmatmul.mubr.msk.f32.gmra.mrb[28].mxu1 %vm503_vm1, %v17391_v61  ;;  %v799_v53 = vrot.slane %v16857_v36, 1  ;;  %v800_v61 = vrot.slane %v16860_v37, 1  ;;  %21828 = vst [vmem:[#allocation76_spill] sm:$0xff] %v17419_v38  ;;  %21829 = vst [vmem:[#allocation77_spill] sm:$0xff] %v17436_v16  ;;  %v4390_v49 = vrot.slane %v16831_v24, 4  ;;  %v807_v24 = vrot.slane %v16914_v58, 1 }
  0x5b   : > { %13287 = vmatprep.mubr.msk.f32.mxu0 %vm503_vm1, %v16924_v60  ;;  %14233 = vmatprep.mubr.msk.f32.mxu1 %vm503_vm1, %v17396_v20  ;;  %v10847_v60 = vld [vmem:[%s21281_s1 + $0x58] sm:$0xff]  ;;  %v802_v20 = vrot.slane %v16893_v51, 1  ;;  %21830 = vst [vmem:[#allocation78_spill] sm:$0xff] %v17443_v55  ;;  %21832 = vst [vmem:[#allocation80_spill] sm:$0xff] %v17451_v7  ;;  %v809_v19 = vrot.slane %v16917_v59, 1  ;;  %v4396_v21 = vrot.slane %v16860_v37, 4 }
  0x5c   : > { %v17446_v23 = vsel %vm793_vm3, %v799_v53, %v800_v61  ;;  %v15180_v14 = vpack.c.bf16 %v10847_v60, %v10846_v3  ;;  %v4393_v60 = vrot.slane %v16847_v31, 4  ;;  %v11455_v31 = vld [vmem:[%s21282_s2 + $0x158] sm:$0xff]  ;;  %v812_v37 = vrot.slane %v16943_v6, 1 }
  0x5d   : > { %21831 = vst [vmem:[#allocation79_spill] sm:$0xff] %v17446_v23  ;;  %v17462_v47 = vsel %vm793_vm3, %v800_v61, %v802_v20  ;;  %v810_v61 = vrot.slane %v16930_v0, 1  ;;  %v17478_v20 = vsel %vm4384_vm4, %v4390_v49, %v4391_v39  ;;  %v814_v49 = vrot.slane %v16954_v12, 1 }
  0x5e   : > { %13288 = vmatmul.mubr.msk.f32.gmra.mrb[30].mxu0 %vm503_vm1, %v16938_v2  ;;  %14234 = vmatmul.mubr.msk.f32.gmra.mrb[30].mxu1 %vm503_vm1, %v17407_v62  ;;  %v1247_v2 = vrot.slane %v16896_v52, 3  ;;  %v804_v62 = vrot.slane %v16879_v46, 1  ;;  %21833 = vst [vmem:[#allocation81_spill] sm:$0xff] %v17462_v47  ;;  %21836 = vst [vmem:[#allocation84_spill] sm:$0xff] %v17478_v20 }
  0x5f   : > { %13298 = vmatprep.mubr.msk.f32.mxu0 %vm503_vm1, %v17413_v48  ;;  %14236 = vmatprep.mubr.msk.f32.mxu1 %vm503_vm1, %v17419_v38  ;;  %v805_v48 = vrot.slane %v16911_v57, 1  ;;  %v17505_v3 = vsel %vm793_vm3, %v809_v19, %v810_v61  ;;  %v4403_v19 = vrot.slane %v16914_v58, 4  ;;  %v4405_v58 = vrot.slane %v16917_v59, 4 }
  0x60   : > { %v17465_v53 = vsel %vm1168_vm2, %v1245_v32, %v1247_v2  ;;  %v4395_v2 = vrot.slane %v16857_v36, 4  ;;  %v17502_v32 = vsel %vm4384_vm4, %v4391_v39, %v4393_v60  ;;  %21839 = vst [vmem:[#allocation87_spill] sm:$0xff] %v17505_v3  ;;  %v817_v39 = vrot.slane %v16994_v30, 1 }
  0x61   : > { %21834 = vst [vmem:[#allocation82_spill] sm:$0xff] %v17465_v53  ;;  %v17471_v25 = vsel %vm793_vm3, %v804_v62, %v805_v48  ;;  %v17495_v36 = vsel %vm793_vm3, %v805_v48, %v807_v24  ;;  %v4398_v62 = vrot.slane %v16893_v51, 4  ;;  %21838 = vst [vmem:[#allocation86_spill] sm:$0xff] %v17502_v32  ;;  %v4400_v24 = vrot.slane %v16879_v46, 4  ;;  %v10880_v46 = vld [vmem:[%s21281_s1 + $0x60] sm:$0xff] }
  0x62   : > { %13299 = vmatmul.mubr.msk.f32.vlgmr.msra.gmra.mrb[0].mxu0 %vm503_vm1, %v17436_v16  ;;  %14237 = vmatmul.mubr.msk.f32.gmra.mrb[0].mxu1 %vm503_vm1, %v17443_v55  ;;  %21835 = vst [vmem:[#allocation83_spill] sm:$0xff] %v17471_v25  ;;  %21837 = vst [vmem:[#allocation85_spill] sm:$0xff] %v17495_v36  ;;  %v815_v16 = vrot.slane %v16957_v13, 1  ;;  %v17510_v48 = vsel %vm4384_vm4, %v4395_v2, %v4396_v21  ;;  %v4401_v51 = vrot.slane %v16911_v57, 4  ;;  %v820_v2 = vrot.slane %v17006_v42, 1 }
  0x63   : > { %13301 = vmatprep.mubr.msk.f32.mxu0 %vm503_vm1, %v17446_v23  ;;  %14239 = vmatprep.mubr.msk.f32.mxu1 %vm503_vm1, %v17451_v7  ;;  %21840 = vst [vmem:[#allocation88_spill] sm:$0xff] %v17510_v48  ;;  %v17525_v60 = vsel %vm4384_vm4, %v4396_v21, %v4398_v62  ;;  %v10881_v21 = vld [vmem:[%s21281_s1 + $0x68] sm:$0xff] }
  0x64   : > { %15179 = vmatpush3.bf16.msra.mxu0 %v17302_v28  ;;  %v11454_v28 = vld [vmem:[%s21282_s2 + $0x150] sm:$0xff]  ;;  %21842 = vst [vmem:[#allocation90_spill] sm:$0xff] %v17525_v60  ;;  %v17534_v57 = vsel %vm793_vm3, %v814_v49, %v815_v16  ;;  %v17556_v62 = vsel %vm793_vm3, %v815_v16, %v817_v39  ;;  %v822_v49 = vrot.slane %v17032_v63, 1  ;;  %v17564_v59 = vpack.c.bf16 %v10881_v21, %v10880_v46 }
  0x65   : > { %15181 = vmatprep.subr.bf16.mxu0 %v15180_v14  ;;  %21843 = vst [vmem:[#allocation91_spill] sm:$0xff] %v17534_v57  ;;  %21845 = vst [vmem:[#allocation93_spill] sm:$0xff] %v17556_v62  ;;  %v17571_v16 = vsel %vm4384_vm4, %v4401_v51, %v4403_v19  ;;  %v4410_v46 = vrot.slane %v16954_v12, 4  ;;  %v4411_v21 = vrot.slane %v16957_v13, 4  ;;  %v827_v13 = vrot.slane %v17067_v27, 1 }
  0x66   : > { %13302 = vmatmul.mubr.msk.f32.gmra.mrb[2].mxu0 %vm503_vm1, %v17462_v47  ;;  %14240 = vmatmul.mubr.msk.f32.gmra.mrb[2].mxu1 %vm503_vm1, %v17465_v53  ;;  %21846 = vst [vmem:[#allocation94_spill] sm:$0xff] %v17571_v16  ;;  %v4413_v19 = vrot.slane %v16994_v30, 4 }
  0x67   : > { %13304 = vmatprep.mubr.msk.f32.mxu0 %vm503_vm1, %v17471_v25  ;;  %14250 = vmatprep.mubr.msk.f32.mxu1 %vm503_vm1, %v17478_v20  ;;  %v15316_v25 = vpack.c.bf16 %v11455_v31, %v11454_v28  ;;  %v11489_v28 = vld [vmem:[%s21282_s2 + $0x168] sm:$0xff]  ;;  %v17549_v31 = vsel %vm4384_vm4, %v4400_v24, %v4401_v51  ;;  %v4408_v24 = vrot.slane %v16943_v6, 4  ;;  %v825_v20 = vrot.slane %v17043_v10, 1 }
  0x68   : > { %15183 = vmatpush3.bf16.msra.mxu0 %v15180_v14  ;;  %v17522_v14 = vsel %vm793_vm3, %v810_v61, %v812_v37  ;;  %v819_v61 = vrot.slane %v17003_v41, 1  ;;  %21844 = vst [vmem:[#allocation92_spill] sm:$0xff] %v17549_v31  ;;  %v4406_v37 = vrot.slane %v16930_v0, 4 }
  0x69   : > { %21841 = vst [vmem:[#allocation89_spill] sm:$0xff] %v17522_v14  ;;  %15185 = vmatprep.subr.bf16.mxu0 %v17564_v59  ;;  %v17618_v30 = vsel %vm793_vm3, %v825_v20, %v827_v13  ;;  %v4420_v13 = vrot.slane %v17040_v9, 4 }
  0x6a   : > { %13305 = vmatmul.mubr.msk.f32.gmra.mrb[4].mxu0 %vm503_vm1, %v17495_v36  ;;  %14251 = vmatmul.mubr.msk.f32.vlgmr.msra.gmra.mrb[4].mxu1 %vm503_vm1, %v17502_v32  ;;  %v17574_v39 = vsel %vm793_vm3, %v819_v61, %v820_v2  ;;  %v824_v32 = vrot.slane %v17040_v9, 1  ;;  %v17579_v6 = vsel %vm4384_vm4, %v4405_v58, %v4406_v37  ;;  %v17595_v12 = vsel %vm4384_vm4, %v4406_v37, %v4408_v24 }
  0x6b   : > { %13307 = vmatprep.mubr.msk.f32.mxu0 %vm503_vm1, %v17505_v3  ;;  %15315 = vmatpush3.bf16.msra.mxu1 %v17306_v40  ;;  %v11488_v40 = vld [vmem:[%s21282_s2 + $0x160] sm:$0xff]  ;;  %21847 = vst [vmem:[#allocation95_spill] sm:$0xff] %v17574_v39  ;;  %21848 = vst [vmem:[#allocation96_spill] sm:$0xff] %v17579_v6  ;;  %v829_v61 = vrot.slane %v17075_v34, 1  ;;  %v4416_v58 = vrot.slane %v17006_v42, 4  ;;  %v4418_v37 = vrot.slane %v17032_v63, 4 }
  0x6c   : > { %14253 = vmatprep.mubr.msk.f32.mxu1 %vm503_vm1, %v17510_v48  ;;  %15317 = vmatprep.subr.bf16.mxu1 %v15316_v25  ;;  %v17566_v0 = vpack.c.bf16 %v11489_v28, %v11488_v40  ;;  %21850 = vst [vmem:[#allocation98_spill] sm:$0xff] %v17595_v12  ;;  %v17601_v51 = vsel %vm793_vm3, %v824_v32, %v825_v20  ;;  %v830_v40 = vrot.slane %v17078_v56, 1  ;;  %v4415_v28 = vrot.slane %v17003_v41, 4  ;;  %v21864_v48 = vld [vmem:[#allocation42_spill] sm:$0xff] }
  0x6d   : > { %21851 = vst [vmem:[#allocation99_spill] sm:$0xff] %v17601_v51  ;;  %21853 = vst [vmem:[#allocation101_spill] sm:$0xff] %v17618_v30  ;;  %v832_v32 = vrot.slane %v17102_v18, 1  ;;  %v4421_v63 = vrot.slane %v17043_v10, 4 }
  0x6e   : > { %13308 = vmatmul.mubr.msk.f32.gmra.mrb[6].mxu0 %vm503_vm1, %v17522_v14  ;;  %14254 = vmatmul.mubr.msk.f32.gmra.mrb[6].mxu1 %vm503_vm1, %v17525_v60  ;;  %v17628_v24 = vsel %vm793_vm3, %v829_v61, %v830_v40  ;;  %v17633_v20 = vsel %vm4384_vm4, %v4415_v28, %v4416_v58  ;;  %v21861_v61 = vld [vmem:[#allocation39_spill] sm:$0xff] }
  0x6f   : > { %13310 = vmatprep.mubr.msk.f32.mxu0 %vm503_vm1, %v17534_v57  ;;  %14256 = vmatprep.mubr.msk.f32.mxu1 %vm503_vm1, %v17549_v31  ;;  %21855 = vst [vmem:[#allocation103_spill] sm:$0xff] %v17628_v24  ;;  %v837_v28 = vrot.slane %v21861_v61, 1  ;;  %v4423_v31 = vrot.slane %v17067_v27, 4 }
  0x70   : > { %15319 = vmatpush3.bf16.msra.mxu1 %v15316_v25  ;;  %v17592_v25 = vsel %vm793_vm3, %v820_v2, %v822_v49  ;;  %v17607_v2 = vsel %vm4384_vm4, %v4410_v46, %v4411_v21  ;;  %v17625_v49 = vsel %vm4384_vm4, %v4411_v21, %v4413_v19  ;;  %v21856_v46 = vld [vmem:[#allocation34_spill] sm:$0xff]  ;;  %v17644_v21 = vsel %vm793_vm3, %v830_v40, %v832_v32 }
  0x71   : > { %15321 = vmatprep.subr.bf16.mxu1 %v17566_v0  ;;  %21849 = vst [vmem:[#allocation97_spill] sm:$0xff] %v17592_v25  ;;  %21852 = vst [vmem:[#allocation100_spill] sm:$0xff] %v17607_v2  ;;  %v17647_v19 = vsel %vm4384_vm4, %v4416_v58, %v4418_v37  ;;  %v17659_v40 = vsel %vm4384_vm4, %v4420_v13, %v4421_v63  ;;  %v4425_v58 = vrot.slane %v17075_v34, 4  ;;  %v4426_v32 = vrot.slane %v17078_v56, 4 }
  0x72   : > { %13311 = vmatmul.mubr.msk.f32.gmra.mrb[8].mxu0 %vm503_vm1, %v17556_v62  ;;  %14257 = vmatmul.mubr.msk.f32.gmra.mrb[8].mxu1 %vm503_vm1, %v17571_v16  ;;  %21854 = vst [vmem:[#allocation102_spill] sm:$0xff] %v17625_v49  ;;  %21858 = vst [vmem:[#allocation34_spill] sm:$0xff] %v17633_v20  ;;  %v4428_v13 = vrot.slane %v17102_v18, 4 }
  0x73   : > { %13313 = vmatprep.mubr.msk.f32.mxu0 %vm503_vm1, %v17574_v39  ;;  %14259 = vmatprep.mubr.msk.f32.mxu1 %vm503_vm1, %v17579_v6  ;;  %v21857_v6 = vld [vmem:[#allocation35_spill] sm:$0xff]  ;;  %21860 = vst [vmem:[#allocation104_spill] sm:$0xff] %v17647_v19 }
  0x74   : > { %v835_v16 = vrot.slane %v21857_v6, 1  ;;  %21859 = vst [vmem:[#allocation35_spill] sm:$0xff] %v17644_v21  ;;  %v4431_v18 = vrot.slane %v21857_v6, 4 }
  0x76   : > { %13314 = vmatmul.mubr.msk.f32.gmra.mrb[10].mxu0 %vm503_vm1, %v17592_v25  ;;  %14260 = vmatmul.mubr.msk.f32.gmra.mrb[10].mxu1 %vm503_vm1, %v17595_v12  ;;  %v834_v12 = vrot.slane %v21856_v46, 1  ;;  %v17670_v27 = vsel %vm793_vm3, %v835_v16, %v837_v28  ;;  %v4430_v28 = vrot.slane %v21856_v46, 4 }
  0x77   : > { %13316 = vmatprep.mubr.msk.f32.mxu0 %vm503_vm1, %v17601_v51  ;;  %14262 = vmatprep.mubr.msk.f32.mxu1 %vm503_vm1, %v17607_v2  ;;  %21866 = vst [vmem:[#allocation42_spill] sm:$0xff] %v17670_v27 }
  0x78   : > { %v17653_v2 = vsel %vm793_vm3, %v834_v12, %v835_v16  ;;  %v21867_v12 = vld [vmem:[#allocation46_spill] sm:$0xff]  ;;  %v17685_v16 = vsel %vm4384_vm4, %v4425_v58, %v4426_v32 }
  0x79   : > { %21862 = vst [vmem:[#allocation39_spill] sm:$0xff] %v17653_v2  ;;  %v842_v37 = vrot.slane %v21867_v12, 1 }
  0x7a   : > { %13317 = vmatmul.mubr.msk.f32.gmra.mrb[12].mxu0 %vm503_vm1, %v17618_v30  ;;  %14263 = vmatmul.mubr.msk.f32.gmra.mrb[12].mxu1 %vm503_vm1, %v17625_v49  ;;  %v21863_v49 = vld [vmem:[#allocation41_spill] sm:$0xff]  ;;  %v21870_v30 = vld [vmem:[#allocation48_spill] sm:$0xff] }
  0x7b   : > { %13319 = vmatprep.mubr.msk.f32.mxu0 %vm503_vm1, %v17628_v24  ;;  %14265 = vmatprep.mubr.msk.f32.mxu1 %vm503_vm1, %v17633_v20  ;;  %v839_v60 = vrot.slane %v21863_v49, 1  ;;  %v840_v24 = vrot.slane %v21864_v48, 1  ;;  %21865 = vst [vmem:[#allocation41_spill] sm:$0xff] %v17659_v40  ;;  %v17677_v20 = vsel %vm4384_vm4, %v4421_v63, %v4423_v31  ;;  %21871 = vst [vmem:[#allocation48_spill] sm:$0xff] %v17685_v16  ;;  %v847_v63 = vrot.slane %v17207_v17, 1 }
  0x7c   : > { %21868 = vst [vmem:[#allocation46_spill] sm:$0xff] %v17677_v20  ;;  %v17699_v31 = vsel %vm4384_vm4, %v4426_v32, %v4428_v13  ;;  %v4435_v32 = vrot.slane %v21863_v49, 4  ;;  %v4438_v13 = vrot.slane %v21867_v12, 4  ;;  %v4441_v12 = vrot.slane %v21870_v30, 4 }
  0x7d   : > { %21873 = vst [vmem:[#allocation107_spill] sm:$0xff] %v17699_v31 }
  0x7e   : > { %13320 = vmatmul.mubr.msk.f32.gmra.mrb[14].mxu0 %vm503_vm1, %v17644_v21  ;;  %14266 = vmatmul.mubr.msk.f32.gmra.mrb[14].mxu1 %vm503_vm1, %v17647_v19  ;;  %v17680_v21 = vsel %vm793_vm3, %v839_v60, %v840_v24  ;;  %v844_v19 = vrot.slane %v17180_v15, 1  ;;  %v17696_v60 = vsel %vm793_vm3, %v840_v24, %v842_v37  ;;  %v17711_v24 = vsel %vm4384_vm4, %v4430_v28, %v4431_v18 }
  0x7f   : > { %13322 = vmatprep.mubr.msk.f32.mxu0 %vm503_vm1, %v17653_v2  ;;  %14268 = vmatprep.mubr.msk.f32.mxu1 %vm503_vm1, %v17659_v40  ;;  %21869 = vst [vmem:[#allocation105_spill] sm:$0xff] %v17680_v21  ;;  %v845_v2 = vrot.slane %v21870_v30, 1  ;;  %21872 = vst [vmem:[#allocation106_spill] sm:$0xff] %v17696_v60  ;;  %v4433_v40 = vrot.slane %v21861_v61, 4  ;;  %v4436_v37 = vrot.slane %v21864_v48, 4  ;;  %v852_v61 = vrot.slane %v17242_v33, 1 }
  0x80   : > { %21875 = vst [vmem:[#allocation109_spill] sm:$0xff] %v17711_v24 }
  0x81   : > { %v17705_v58 = vsel %vm793_vm3, %v844_v19, %v845_v2  ;;  %v17722_v19 = vsel %vm793_vm3, %v845_v2, %v847_v63  ;;  %v17729_v28 = vsel %vm4384_vm4, %v4431_v18, %v4433_v40  ;;  %v17737_v2 = vsel %vm4384_vm4, %v4435_v32, %v4436_v37 }
  0x82   : > { %13323 = vmatmul.mubr.msk.f32.gmra.mrb[16].mxu0 %vm503_vm1, %v17670_v27  ;;  %14269 = vmatmul.mubr.msk.f32.gmra.mrb[16].mxu1 %vm503_vm1, %v17677_v20  ;;  %21874 = vst [vmem:[#allocation108_spill] sm:$0xff] %v17705_v58  ;;  %v849_v20 = vrot.slane %v17215_v4, 1  ;;  %21876 = vst [vmem:[#allocation110_spill] sm:$0xff] %v17722_v19  ;;  %v4440_v63 = vrot.slane %v17180_v15, 4  ;;  %v17751_v40 = vsel %vm4384_vm4, %v4436_v37, %v4438_v13  ;;  %v857_v18 = vrot.slane %v17289_v1, 1 }
  0x83   : > { %13325 = vmatprep.mubr.msk.f32.mxu0 %vm503_vm1, %v17680_v21  ;;  %14271 = vmatprep.mubr.msk.f32.mxu1 %vm503_vm1, %v17685_v16  ;;  %v850_v21 = vrot.slane %v17218_v54, 1  ;;  %21877 = vst [vmem:[#allocation111_spill] sm:$0xff] %v17729_v28  ;;  %21879 = vst [vmem:[#allocation113_spill] sm:$0xff] %v17737_v2  ;;  %v4445_v37 = vrot.slane %v17215_v4, 4  ;;  %v4448_v13 = vrot.slane %v17242_v33, 4  ;;  %v4451_v33 = vrot.slane %v17253_v8, 4 }
  0x84   : > { %21881 = vst [vmem:[#allocation115_spill] sm:$0xff] %v17751_v40 }
  0x85   : > { %v17732_v16 = vsel %vm793_vm3, %v849_v20, %v850_v21  ;;  %v17748_v20 = vsel %vm793_vm3, %v850_v21, %v852_v61  ;;  %v17763_v21 = vsel %vm4384_vm4, %v4440_v63, %v4441_v12  ;;  %v4446_v61 = vrot.slane %v17218_v54, 4 }
  0x86   : > { %13326 = vmatmul.mubr.msk.f32.gmra.mrb[18].mxu0 %vm503_vm1, %v17696_v60  ;;  %14272 = vmatmul.mubr.msk.f32.gmra.mrb[18].mxu1 %vm503_vm1, %v17699_v31  ;;  %21878 = vst [vmem:[#allocation112_spill] sm:$0xff] %v17732_v16  ;;  %v854_v31 = vrot.slane %v17250_v11, 1  ;;  %21880 = vst [vmem:[#allocation114_spill] sm:$0xff] %v17748_v20 }
  0x87   : > { %13328 = vmatprep.mubr.msk.f32.mxu0 %vm503_vm1, %v17705_v58  ;;  %14274 = vmatprep.mubr.msk.f32.mxu1 %vm503_vm1, %v17711_v24  ;;  %v855_v58 = vrot.slane %v17253_v8, 1  ;;  %v4443_v24 = vrot.slane %v17207_v17, 4  ;;  %21883 = vst [vmem:[#allocation117_spill] sm:$0xff] %v17763_v21 }
  0x89   : > { %v17757_v32 = vsel %vm793_vm3, %v854_v31, %v855_v58  ;;  %v17774_v17 = vsel %vm793_vm3, %v855_v58, %v857_v18  ;;  %v862_v31 = vrot.slane %v17328_v22, 1  ;;  %v17781_v63 = vsel %vm4384_vm4, %v4441_v12, %v4443_v24 }
  0x8a   : > { %13329 = vmatmul.mubr.msk.f32.gmra.mrb[20].mxu0 %vm503_vm1, %v17722_v19  ;;  %14275 = vmatmul.mubr.msk.f32.gmra.mrb[20].mxu1 %vm503_vm1, %v17729_v28  ;;  %21882 = vst [vmem:[#allocation116_spill] sm:$0xff] %v17757_v32  ;;  %v859_v28 = vrot.slane %v17297_v43, 1  ;;  %21884 = vst [vmem:[#allocation118_spill] sm:$0xff] %v17774_v17  ;;  %v17789_v58 = vsel %vm4384_vm4, %v4445_v37, %v4446_v61  ;;  %v4450_v18 = vrot.slane %v17250_v11, 4  ;;  %v867_v24 = vrot.slane %v16854_v35, 1 }
  0x8b   : > { %13331 = vmatprep.mubr.msk.f32.mxu0 %vm503_vm1, %v17732_v16  ;;  %14277 = vmatprep.mubr.msk.f32.mxu1 %vm503_vm1, %v17737_v2  ;;  %v860_v16 = vrot.slane %v17300_v50, 1  ;;  %21885 = vst [vmem:[#allocation119_spill] sm:$0xff] %v17781_v63  ;;  %21887 = vst [vmem:[#allocation121_spill] sm:$0xff] %v17789_v58  ;;  %v4453_v12 = vrot.slane %v17289_v1, 4  ;;  %v869_v37 = vrot.slane %v16873_v44, 1  ;;  %v4456_v35 = vrot.slane %v17300_v50, 4 }
  0x8d   : > { %v17784_v2 = vsel %vm793_vm3, %v859_v28, %v860_v16  ;;  %v17832_v1 = vsel %vm4384_vm4, %v4451_v33, %v4453_v12  ;;  %v16524_v12 = vld [vmem:[%s16817_s26 + $0x178] sm:$0xf] }
  0x8e   : > { %13332 = vmatmul.mubr.msk.f32.gmra.mrb[22].mxu0 %vm503_vm1, %v17748_v20  ;;  %14278 = vmatmul.mubr.msk.f32.gmra.mrb[22].mxu1 %vm503_vm1, %v17751_v40  ;;  %21886 = vst [vmem:[#allocation120_spill] sm:$0xff] %v17784_v2  ;;  %v864_v40 = vrot.slane %v16837_v26, 1  ;;  %v17800_v26 = vsel %vm793_vm3, %v860_v16, %v862_v31  ;;  %v17815_v16 = vsel %vm4384_vm4, %v4450_v18, %v4451_v33  ;;  %21893 = vst [vmem:[#allocation127_spill] sm:$0xff] %v17832_v1  ;;  %v17846_v18 = vld [vmem:[%s16817_s26 + $0x170] sm:$0xff] }
  0x8f   : > { %13334 = vmatprep.mubr.msk.f32.mxu0 %vm503_vm1, %v17757_v32  ;;  %14280 = vmatprep.mubr.msk.f32.mxu1 %vm503_vm1, %v17763_v21  ;;  %v865_v32 = vrot.slane %v16843_v29, 1  ;;  %21888 = vst [vmem:[#allocation122_spill] sm:$0xff] %v17800_v26  ;;  %v17803_v29 = vsel %vm4384_vm4, %v4446_v61, %v4448_v13  ;;  %21891 = vst [vmem:[#allocation125_spill] sm:$0xff] %v17815_v16  ;;  %v4455_v61 = vrot.slane %v17297_v43, 4  ;;  %v4458_v31 = vrot.slane %v17328_v22, 4 }
  0x90   : > { %21889 = vst [vmem:[#allocation123_spill] sm:$0xff] %v17803_v29 }
  0x91   : > { %v17809_v28 = vsel %vm793_vm3, %v864_v40, %v865_v32  ;;  %v17826_v44 = vsel %vm793_vm3, %v865_v32, %v867_v24  ;;  %v17839_v13 = vsel %vm4384_vm4, %v4455_v61, %v4456_v35  ;;  %v17842_v32 = vld [vmem:[%s16817_s26 + $0x168] sm:$0xff]  ;;  %v4461_v24 = vrot.slane %v17846_v18, 4 }
  0x92   : > { %13335 = vmatmul.mubr.msk.f32.gmra.mrb[24].mxu0 %vm503_vm1, %v17774_v17  ;;  %14281 = vmatmul.mubr.msk.f32.gmra.mrb[24].mxu1 %vm503_vm1, %v17781_v63  ;;  %21890 = vst [vmem:[#allocation124_spill] sm:$0xff] %v17809_v28  ;;  %v870_v63 = vrot.slane %v16876_v45, 1  ;;  %21892 = vst [vmem:[#allocation126_spill] sm:$0xff] %v17826_v44  ;;  %v872_v45 = vrot.slane %v16896_v52, 1  ;;  %v4460_v52 = vrot.slane %v17842_v32, 4  ;;  %v17861_v33 = vsel %vm4384_vm4, %v4456_v35, %v4458_v31  ;;  %v10882_v35 = vld [vmem:[%s21281_s1 + $0x70] sm:$0xff] }
  0x93   : > { %13337 = vmatprep.mubr.msk.f32.mxu0 %vm503_vm1, %v17784_v2  ;;  %14283 = vmatprep.mubr.msk.f32.mxu1 %vm503_vm1, %v17789_v58  ;;  %21895 = vst [vmem:[#allocation129_spill] sm:$0xff] %v17839_v13  ;;  %21897 = vst [vmem:[#allocation131_spill] sm:$0xff] %v17861_v33  ;;  %v21899_v31 = vld [vmem:[#allocation17_spill] sm:$0xff] }
  0x94   : > { %v17835_v40 = vsel %vm793_vm3, %v869_v37, %v870_v63  ;;  %v17856_v22 = vsel %vm793_vm3, %v870_v63, %v872_v45  ;;  %v4463_v37 = vrot.slane %v16524_v12, 4  ;;  %v17865_v61 = vsel %vm4384_vm4, %v4460_v52, %v4461_v24  ;;  %v10883_v45 = vld [vmem:[%s21281_s1 + $0x78] sm:$0xff]  ;;  %v16527_v12 = vld [vmem:[%s16817_s26 + $0x190] sm:$0xf] }
  0x95   : > { %21894 = vst [vmem:[#allocation128_spill] sm:$0xff] %v17835_v40  ;;  %21896 = vst [vmem:[#allocation130_spill] sm:$0xff] %v17856_v22  ;;  %v15188_v21 = vpack.c.bf16 %v10883_v45, %v10882_v35  ;;  %v21905_v35 = vld [vmem:[#allocation23_spill] sm:$0xff]  ;;  %v11490_v45 = vld [vmem:[%s21282_s2 + $0x170] sm:$0xff] }
  0x96   : > { %13338 = vmatmul.mubr.msk.f32.gmra.mrb[26].mxu0 %vm503_vm1, %v17800_v26  ;;  %14284 = vmatmul.mubr.msk.f32.gmra.mrb[26].mxu1 %vm503_vm1, %v17803_v29  ;;  %21898 = vst [vmem:[#allocation132_spill] sm:$0xff] %v17865_v61  ;;  %v17872_v29 = vld [vmem:[%s16817_s26 + $0x188] sm:$0xff]  ;;  %v17890_v52 = vsel %vm4384_vm4, %v4461_v24, %v4463_v37  ;;  %v21903_v24 = vld [vmem:[#allocation21_spill] sm:$0xff] }
  0x97   : > { %13340 = vmatprep.mubr.msk.f32.mxu0 %vm503_vm1, %v17809_v28  ;;  %14286 = vmatprep.mubr.msk.f32.mxu1 %vm503_vm1, %v17815_v16  ;;  %v17868_v16 = vld [vmem:[%s16817_s26 + $0x180] sm:$0xff]  ;;  %v5844_v63 = vrot.slane %v17872_v29, 4  ;;  %21900 = vst [vmem:[#allocation133_spill] sm:$0xff] %v17890_v52 }
  0x9a   : > { %13341 = vmatmul.mubr.msk.f32.gmra.mrb[28].mxu0 %vm503_vm1, %v17826_v44  ;;  %14287 = vmatmul.mubr.msk.f32.gmra.mrb[28].mxu1 %vm503_vm1, %v17832_v1  ;;  %v5843_v1 = vrot.slane %v17868_v16, 4 }
  0x9b   : > { %13343 = vmatprep.mubr.msk.f32.mxu0 %vm503_vm1, %v17835_v40  ;;  %14289 = vmatprep.mubr.msk.f32.mxu1 %vm503_vm1, %v17839_v13  ;;  %v5846_v13 = vrot.slane %v16527_v12, 4  ;;  %v11491_v12 = vld [vmem:[%s21282_s2 + $0x178] sm:$0xff] }
  0x9c   : > { %v17894_v58 = vsel %vm4384_vm4, %v5843_v1, %v5844_v63 }
  0x9d   : > { %21901 = vst [vmem:[#allocation134_spill] sm:$0xff] %v17894_v58  ;;  %v17911_v1 = vsel %vm4384_vm4, %v5844_v63, %v5846_v13  ;;  %v16528_v13 = vld [vmem:[%s16817_s26 + $0x30] sm:$0xff]  ;;  %v21907_v63 = vld [vmem:[#allocation27_spill] sm:$0xff] }
  0x9e   : > { %13344 = vmatmul.mubr.msk.f32.gmra.mrb[30].mxu0 %vm503_vm1, %v17856_v22  ;;  %14290 = vmatmul.mubr.msk.f32.gmra.mrb[30].mxu1 %vm503_vm1, %v17861_v33  ;;  %v21902_v22 = vld [vmem:[#allocation19_spill] sm:$0xff]  ;;  %21904 = vst [vmem:[#allocation135_spill] sm:$0xff] %v17911_v1  ;;  %v21923_v33 = vld [vmem:[#allocation54_spill] sm:$0xff] }
  0x9f   : > { %13354 = vmatprep.mubr.msk.f32.mxu0 %vm503_vm1, %v21899_v31  ;;  %14292 = vmatprep.mubr.msk.f32.mxu1 %vm503_vm1, %v17865_v61  ;;  %v10916_v31 = vld [vmem:[%s21281_s1 + $0x80] sm:$0xff]  ;;  %v10917_v61 = vld [vmem:[%s21281_s1 + $0x88] sm:$0xff] }
  0xa0   : > { %v17914_v37 = vpack.c.bf16 %v10917_v61, %v10916_v31  ;;  %v15324_v61 = vpack.c.bf16 %v11491_v12, %v11490_v45  ;;  %v11524_v31 = vld [vmem:[%s21282_s2 + $0x180] sm:$0xff]  ;;  %v21910_v12 = vld [vmem:[#allocation31_spill] sm:$0xff] }
  0xa2   : > { %13355 = vmatmul.mubr.msk.f32.vlgmr.msra.gmra.mrb[0].mxu0 %vm503_vm1, %v21902_v22  ;;  %14293 = vmatmul.mubr.msk.f32.gmra.mrb[0].mxu1 %vm503_vm1, %v17890_v52  ;;  %v11525_v22 = vld [vmem:[%s21282_s2 + $0x188] sm:$0xff] }
  0xa3   : > { %13357 = vmatprep.mubr.msk.f32.mxu0 %vm503_vm1, %v21903_v24  ;;  %14295 = vmatprep.mubr.msk.f32.mxu1 %vm503_vm1, %v17894_v58  ;;  %v17949_v45 = vpack.c.bf16 %v11525_v22, %v11524_v31  ;;  %v21912_v58 = vld [vmem:[#allocation33_spill] sm:$0xff]  ;;  %v17969_v31 = vld [vmem:[%s16817_s26 + $0x68] sm:$0xff] }
  0xa4   : > { %15187 = vmatpush3.bf16.msra.mxu0 %v17564_v59  ;;  %v21906_v59 = vld [vmem:[#allocation25_spill] sm:$0xff]  ;;  %21915 = vst [vmem:[#allocation31_spill] sm:$0xff] %v17969_v31  ;;  %v21920_v52 = vld [vmem:[#allocation47_spill] sm:$0xff] }
  0xa5   : > { %15189 = vmatprep.subr.bf16.mxu0 %v15188_v21  ;;  %v21914_v22 = vld [vmem:[#allocation37_spill] sm:$0xff] }
  0xa6   : > { %13358 = vmatmul.mubr.msk.f32.gmra.mrb[2].mxu0 %vm503_vm1, %v21905_v35  ;;  %14296 = vmatmul.mubr.msk.f32.gmra.mrb[2].mxu1 %vm503_vm1, %v17911_v1  ;;  %v16529_v1 = vld [vmem:[%s16817_s26 + $0x38] sm:$0xff] }
  0xa7   : > { %13360 = vmatprep.mubr.msk.f32.mxu0 %vm503_vm1, %v21906_v59  ;;  %14306 = vmatprep.mubr.msk.f32.mxu1 %vm503_vm1, %v16528_v13  ;;  %v21908_v13 = vld [vmem:[#allocation29_spill] sm:$0xff] }
  0xa8   : > { %15191 = vmatpush3.bf16.msra.mxu0 %v15188_v21  ;;  %v17945_v21 = vld [vmem:[%s16817_s26 + $0x48] sm:$0xff] }
  0xa9   : > { %15193 = vmatprep.subr.bf16.mxu0 %v17914_v37  ;;  %21909 = vst [vmem:[#allocation25_spill] sm:$0xff] %v17945_v21 }
  0xaa   : > { %13361 = vmatmul.mubr.msk.f32.gmra.mrb[4].mxu0 %vm503_vm1, %v21907_v63  ;;  %14307 = vmatmul.mubr.msk.f32.vlgmr.msra.gmra.mrb[4].mxu1 %vm503_vm1, %v16529_v1  ;;  %v17954_v1 = vld [vmem:[%s16817_s26 + $0x50] sm:$0xff] }
  0xab   : > { %13363 = vmatprep.mubr.msk.f32.mxu0 %vm503_vm1, %v21908_v13  ;;  %15323 = vmatpush3.bf16.msra.mxu1 %v17566_v0  ;;  %21911 = vst [vmem:[#allocation27_spill] sm:$0xff] %v17954_v1  ;;  %v17961_v0 = vld [vmem:[%s16817_s26 + $0x60] sm:$0xff] }
  0xac   : > { %14309 = vmatprep.mubr.msk.f32.mxu1 %vm503_vm1, %v17945_v21  ;;  %15325 = vmatprep.subr.bf16.mxu1 %v15324_v61  ;;  %21913 = vst [vmem:[#allocation29_spill] sm:$0xff] %v17961_v0  ;;  %v17976_v21 = vld [vmem:[%s16817_s26 + $0x78] sm:$0xff] }
  0xad   : > { %21917 = vst [vmem:[#allocation33_spill] sm:$0xff] %v17976_v21 }
  0xae   : > { %13364 = vmatmul.mubr.msk.f32.gmra.mrb[6].mxu0 %vm503_vm1, %v21910_v12  ;;  %14310 = vmatmul.mubr.msk.f32.gmra.mrb[6].mxu1 %vm503_vm1, %v17954_v1  ;;  %v21916_v1 = vld [vmem:[#allocation40_spill] sm:$0xff] }
  0xaf   : > { %13366 = vmatprep.mubr.msk.f32.mxu0 %vm503_vm1, %v21912_v58  ;;  %14312 = vmatprep.mubr.msk.f32.mxu1 %vm503_vm1, %v17961_v0  ;;  %v21918_v0 = vld [vmem:[#allocation44_spill] sm:$0xff] }
  0xb0   : > { %15327 = vmatpush3.bf16.msra.mxu1 %v15324_v61  ;;  %v17983_v61 = vld [vmem:[%s16817_s26 + $0x80] sm:$0xff] }
  0xb1   : > { %15329 = vmatprep.subr.bf16.mxu1 %v17949_v45  ;;  %21919 = vst [vmem:[#allocation37_spill] sm:$0xff] %v17983_v61 }
  0xb2   : > { %13367 = vmatmul.mubr.msk.f32.gmra.mrb[8].mxu0 %vm503_vm1, %v21914_v22  ;;  %14313 = vmatmul.mubr.msk.f32.gmra.mrb[8].mxu1 %vm503_vm1, %v17969_v31  ;;  %v21921_v31 = vld [vmem:[#allocation50_spill] sm:$0xff] }
  0xb3   : > { %13369 = vmatprep.mubr.msk.f32.mxu0 %vm503_vm1, %v21916_v1  ;;  %14315 = vmatprep.mubr.msk.f32.mxu1 %vm503_vm1, %v17976_v21  ;;  %v21922_v21 = vld [vmem:[#allocation52_spill] sm:$0xff] }
  0xb6   : > { %13370 = vmatmul.mubr.msk.f32.gmra.mrb[10].mxu0 %vm503_vm1, %v21918_v0  ;;  %14316 = vmatmul.mubr.msk.f32.gmra.mrb[10].mxu1 %vm503_vm1, %v17983_v61  ;;  %v21924_v61 = vld [vmem:[#allocation56_spill] sm:$0xff] }
  0xb7   : > { %13372 = vmatprep.mubr.msk.f32.mxu0 %vm503_vm1, %v21920_v52  ;;  %14318 = vmatprep.mubr.msk.f32.mxu1 %vm503_vm1, %v17003_v41  ;;  %v21925_v41 = vld [vmem:[#allocation60_spill] sm:$0xff] }
  0xba   : > { %13373 = vmatmul.mubr.msk.f32.gmra.mrb[12].mxu0 %vm503_vm1, %v21921_v31  ;;  %14319 = vmatmul.mubr.msk.f32.gmra.mrb[12].mxu1 %vm503_vm1, %v17006_v42  ;;  %v21926_v42 = vld [vmem:[#allocation62_spill] sm:$0xff] }
  0xbb   : > { %13375 = vmatprep.mubr.msk.f32.mxu0 %vm503_vm1, %v21922_v21  ;;  %14321 = vmatprep.mubr.msk.f32.mxu1 %vm503_vm1, %v17040_v9  ;;  %v21927_v9 = vld [vmem:[#allocation64_spill] sm:$0xff] }
  0xbe   : > { %13376 = vmatmul.mubr.msk.f32.gmra.mrb[14].mxu0 %vm503_vm1, %v21923_v33  ;;  %14322 = vmatmul.mubr.msk.f32.gmra.mrb[14].mxu1 %vm503_vm1, %v17043_v10  ;;  %v21928_v10 = vld [vmem:[#allocation66_spill] sm:$0xff] }
  0xbf   : > { %13378 = vmatprep.mubr.msk.f32.mxu0 %vm503_vm1, %v21924_v61  ;;  %14324 = vmatprep.mubr.msk.f32.mxu1 %vm503_vm1, %v17075_v34  ;;  %v21929_v34 = vld [vmem:[#allocation68_spill] sm:$0xff] }
  0xc2   : > { %13379 = vmatmul.mubr.msk.f32.gmra.mrb[16].mxu0 %vm503_vm1, %v17281_v5  ;;  %14325 = vmatmul.mubr.msk.f32.gmra.mrb[16].mxu1 %vm503_vm1, %v17078_v56  ;;  %v21930_v56 = vld [vmem:[#allocation70_spill] sm:$0xff] }
  0xc3   : > { %13381 = vmatprep.mubr.msk.f32.mxu0 %vm503_vm1, %v21925_v41  ;;  %14327 = vmatprep.mubr.msk.f32.mxu1 %vm503_vm1, %v21856_v46  ;;  %v18095_v46 = vld [vmem:[%s16817_s26 + $0x1a0] sm:$0xff] }
  0xc6   : > { %13382 = vmatmul.mubr.msk.f32.gmra.mrb[18].mxu0 %vm503_vm1, %v21926_v42  ;;  %14328 = vmatmul.mubr.msk.f32.gmra.mrb[18].mxu1 %vm503_vm1, %v21857_v6  ;;  %v21931_v6 = vld [vmem:[#allocation71_spill] sm:$0xff] }
  0xc7   : > { %13384 = vmatprep.mubr.msk.f32.mxu0 %vm503_vm1, %v21927_v9  ;;  %14330 = vmatprep.mubr.msk.f32.mxu1 %vm503_vm1, %v21863_v49  ;;  %v21932_v49 = vld [vmem:[#allocation72_spill] sm:$0xff] }
  0xca   : > { %13385 = vmatmul.mubr.msk.f32.gmra.mrb[20].mxu0 %vm503_vm1, %v21928_v10  ;;  %14331 = vmatmul.mubr.msk.f32.gmra.mrb[20].mxu1 %vm503_vm1, %v21864_v48  ;;  %v21933_v48 = vld [vmem:[#allocation73_spill] sm:$0xff] }
  0xcb   : > { %13387 = vmatprep.mubr.msk.f32.mxu0 %vm503_vm1, %v21929_v34  ;;  %14333 = vmatprep.mubr.msk.f32.mxu1 %vm503_vm1, %v17180_v15  ;;  %v21934_v15 = vld [vmem:[#allocation74_spill] sm:$0xff] }
  0xce   : > { %13388 = vmatmul.mubr.msk.f32.gmra.mrb[22].mxu0 %vm503_vm1, %v21930_v56  ;;  %14334 = vmatmul.mubr.msk.f32.gmra.mrb[22].mxu1 %vm503_vm1, %v21870_v30  ;;  %v21935_v30 = vld [vmem:[#allocation83_spill] sm:$0xff] }
  0xcf   : > { %13390 = vmatprep.mubr.msk.f32.mxu0 %vm503_vm1, %v21931_v6  ;;  %14336 = vmatprep.mubr.msk.f32.mxu1 %vm503_vm1, %v17215_v4  ;;  %v10918_v4 = vld [vmem:[%s21281_s1 + $0x90] sm:$0xff] }
  0xd2   : > { %13391 = vmatmul.mubr.msk.f32.gmra.mrb[24].mxu0 %vm503_vm1, %v21932_v49  ;;  %14337 = vmatmul.mubr.msk.f32.gmra.mrb[24].mxu1 %vm503_vm1, %v17218_v54  ;;  %v18078_v54 = vld [vmem:[%s16817_s26 + $0x198] sm:$0xff] }
  0xd3   : > { %13393 = vmatprep.mubr.msk.f32.mxu0 %vm503_vm1, %v21933_v48  ;;  %14339 = vmatprep.mubr.msk.f32.mxu1 %vm503_vm1, %v17250_v11  ;;  %v10952_v11 = vld [vmem:[%s21281_s1 + $0xa0] sm:$0xff] }
  0xd6   : > { %13394 = vmatmul.mubr.msk.f32.gmra.mrb[26].mxu0 %vm503_vm1, %v21934_v15  ;;  %14340 = vmatmul.mubr.msk.f32.gmra.mrb[26].mxu1 %vm503_vm1, %v17253_v8  ;;  %v10919_v8 = vld [vmem:[%s21281_s1 + $0x98] sm:$0xff] }
  0xd7   : > { %13396 = vmatprep.mubr.msk.f32.mxu0 %vm503_vm1, %v17419_v38  ;;  %14342 = vmatprep.mubr.msk.f32.mxu1 %vm503_vm1, %v17297_v43  ;;  %v15196_v43 = vpack.c.bf16 %v10919_v8, %v10918_v4  ;;  %v11561_v4 = vld [vmem:[%s21282_s2 + $0x1a8] sm:$0xff] }
  0xda   : > { %13397 = vmatmul.mubr.msk.f32.gmra.mrb[28].mxu0 %vm503_vm1, %v17443_v55  ;;  %14343 = vmatmul.mubr.msk.f32.gmra.mrb[28].mxu1 %vm503_vm1, %v17300_v50  ;;  %v10953_v50 = vld [vmem:[%s21281_s1 + $0xa8] sm:$0xff] }
  0xdb   : > { %13399 = vmatprep.mubr.msk.f32.mxu0 %vm503_vm1, %v17451_v7  ;;  %14345 = vmatprep.mubr.msk.f32.mxu1 %vm503_vm1, %v17842_v32  ;;  %v11527_v32 = vld [vmem:[%s21282_s2 + $0x198] sm:$0xff] }
  0xde   : > { %13400 = vmatmul.mubr.msk.f32.gmra.mrb[30].mxu0 %vm503_vm1, %v17465_v53  ;;  %14346 = vmatmul.mubr.msk.f32.gmra.mrb[30].mxu1 %vm503_vm1, %v17846_v18 }
  0xdf   : > { %13410 = vmatprep.mubr.msk.f32.mxu0 %vm503_vm1, %v17446_v23  ;;  %14348 = vmatprep.mubr.msk.f32.mxu1 %vm503_vm1, %v17868_v16  ;;  %v18098_v16 = vpack.c.bf16 %v10953_v50, %v10952_v11  ;;  %v21938_v11 = vld [vmem:[#allocation35_spill] sm:$0xff] }
  0xe0   : > { %v21939_v50 = vld [vmem:[#allocation39_spill] sm:$0xff] }
  0xe2   : > { %13411 = vmatmul.mubr.msk.f32.vlgmr.msra.gmra.mrb[0].mxu0 %vm503_vm1, %v17462_v47  ;;  %14349 = vmatmul.mubr.msk.f32.gmra.mrb[0].mxu1 %vm503_vm1, %v17872_v29  ;;  %v11526_v29 = vld [vmem:[%s21282_s2 + $0x190] sm:$0xff] }
  0xe3   : > { %13413 = vmatprep.mubr.msk.f32.mxu0 %vm503_vm1, %v21935_v30  ;;  %14351 = vmatprep.mubr.msk.f32.mxu1 %vm503_vm1, %v18078_v54  ;;  %v15332_v18 = vpack.c.bf16 %v11527_v32, %v11526_v29  ;;  %v21940_v29 = vld [vmem:[#allocation105_spill] sm:$0xff]  ;;  %v21941_v32 = vld [vmem:[#allocation108_spill] sm:$0xff] }
  0xe4   : > { %15195 = vmatpush3.bf16.msra.mxu0 %v17914_v37  ;;  %v11560_v37 = vld [vmem:[%s21282_s2 + $0x1a0] sm:$0xff] }
  0xe5   : > { %15197 = vmatprep.subr.bf16.mxu0 %v15196_v43  ;;  %v18130_v8 = vpack.c.bf16 %v11561_v4, %v11560_v37  ;;  %v21943_v37 = vld [vmem:[#allocation116_spill] sm:$0xff]  ;;  %v1578_v4 = vrot.slane %v18078_v54, 1 }
  0xe6   : > { %13414 = vmatmul.mubr.msk.f32.gmra.mrb[2].mxu0 %vm503_vm1, %v17495_v36  ;;  %14352 = vmatmul.mubr.msk.f32.gmra.mrb[2].mxu1 %vm503_vm1, %v18095_v46 }
  0xe7   : > { %13416 = vmatprep.mubr.msk.f32.mxu0 %vm503_vm1, %v17505_v3  ;;  %14362 = vmatprep.mubr.msk.f32.mxu1 %vm503_vm1, %v17446_v23  ;;  %v18216_v23 = vld [vmem:[%s16817_s26 + $0x1a8] sm:$0xf] }
  0xe8   : > { %15199 = vmatpush3.bf16.msra.mxu0 %v15196_v43  ;;  %v21937_v43 = vld [vmem:[#allocation103_spill] sm:$0xff] }
  0xe9   : > { %15201 = vmatprep.subr.bf16.mxu0 %v18098_v16 }
  0xea   : > { %13417 = vmatmul.mubr.msk.f32.gmra.mrb[4].mxu0 %vm503_vm1, %v17522_v14  ;;  %14363 = vmatmul.mubr.msk.f32.vlgmr.msra.gmra.mrb[4].mxu1 %vm503_vm1, %v17462_v47  ;;  %v1579_v47 = vrot.slane %v18095_v46, 1 }
  0xeb   : > { %13419 = vmatprep.mubr.msk.f32.mxu0 %vm503_vm1, %v17534_v57  ;;  %15331 = vmatpush3.bf16.msra.mxu1 %v17949_v45  ;;  %v21936_v45 = vld [vmem:[#allocation101_spill] sm:$0xff] }
  0xec   : > { %14365 = vmatprep.mubr.msk.f32.mxu1 %vm503_vm1, %v21935_v30  ;;  %15333 = vmatprep.subr.bf16.mxu1 %v15332_v18 }
  0xee   : > { %13420 = vmatmul.mubr.msk.f32.gmra.mrb[6].mxu0 %vm503_vm1, %v17556_v62  ;;  %14366 = vmatmul.mubr.msk.f32.gmra.mrb[6].mxu1 %vm503_vm1, %v17495_v36 }
  0xef   : > { %13422 = vmatprep.mubr.msk.f32.mxu0 %vm503_vm1, %v17574_v39  ;;  %14368 = vmatprep.mubr.msk.f32.mxu1 %vm503_vm1, %v17505_v3 }
  0xf0   : > { %15335 = vmatpush3.bf16.msra.mxu1 %v15332_v18  ;;  %v21942_v18 = vld [vmem:[#allocation112_spill] sm:$0xff] }
  0xf1   : > { %15337 = vmatprep.subr.bf16.mxu1 %v18130_v8 }
  0xf2   : > { %13423 = vmatmul.mubr.msk.f32.gmra.mrb[8].mxu0 %vm503_vm1, %v17592_v25  ;;  %14369 = vmatmul.mubr.msk.f32.gmra.mrb[8].mxu1 %vm503_vm1, %v17522_v14 }
  0xf3   : > { %13425 = vmatprep.mubr.msk.f32.mxu0 %vm503_vm1, %v17601_v51  ;;  %14371 = vmatprep.mubr.msk.f32.mxu1 %vm503_vm1, %v17534_v57 }
  0xf6   : > { %13426 = vmatmul.mubr.msk.f32.gmra.mrb[10].mxu0 %vm503_vm1, %v21936_v45  ;;  %14372 = vmatmul.mubr.msk.f32.gmra.mrb[10].mxu1 %vm503_vm1, %v17556_v62 }
  0xf7   : > { %13428 = vmatprep.mubr.msk.f32.mxu0 %vm503_vm1, %v21937_v43  ;;  %14374 = vmatprep.mubr.msk.f32.mxu1 %vm503_vm1, %v17574_v39 }
  0xfa   : > { %13429 = vmatmul.mubr.msk.f32.gmra.mrb[12].mxu0 %vm503_vm1, %v21938_v11  ;;  %14375 = vmatmul.mubr.msk.f32.gmra.mrb[12].mxu1 %vm503_vm1, %v17592_v25 }
  0xfb   : > { %13431 = vmatprep.mubr.msk.f32.mxu0 %vm503_vm1, %v21939_v50  ;;  %14377 = vmatprep.mubr.msk.f32.mxu1 %vm503_vm1, %v17601_v51 }
  0xfe   : > { %13432 = vmatmul.mubr.msk.f32.gmra.mrb[14].mxu0 %vm503_vm1, %v17670_v27  ;;  %14378 = vmatmul.mubr.msk.f32.gmra.mrb[14].mxu1 %vm503_vm1, %v21936_v45 }
  0xff   : > { %13434 = vmatprep.mubr.msk.f32.mxu0 %vm503_vm1, %v21940_v29  ;;  %14380 = vmatprep.mubr.msk.f32.mxu1 %vm503_vm1, %v21937_v43 }
 0x102   : > { %13435 = vmatmul.mubr.msk.f32.gmra.mrb[16].mxu0 %vm503_vm1, %v17696_v60  ;;  %14381 = vmatmul.mubr.msk.f32.gmra.mrb[16].mxu1 %vm503_vm1, %v21938_v11 }
 0x103   : > { %13437 = vmatprep.mubr.msk.f32.mxu0 %vm503_vm1, %v21941_v32  ;;  %14383 = vmatprep.mubr.msk.f32.mxu1 %vm503_vm1, %v21939_v50 }
 0x106   : > { %13438 = vmatmul.mubr.msk.f32.gmra.mrb[18].mxu0 %vm503_vm1, %v17722_v19  ;;  %14384 = vmatmul.mubr.msk.f32.gmra.mrb[18].mxu1 %vm503_vm1, %v17670_v27 }
 0x107   : > { %13440 = vmatprep.mubr.msk.f32.mxu0 %vm503_vm1, %v21942_v18  ;;  %14386 = vmatprep.mubr.msk.f32.mxu1 %vm503_vm1, %v21940_v29 }
 0x10a   : > { %13441 = vmatmul.mubr.msk.f32.gmra.mrb[20].mxu0 %vm503_vm1, %v17748_v20  ;;  %14387 = vmatmul.mubr.msk.f32.gmra.mrb[20].mxu1 %vm503_vm1, %v17696_v60 }
 0x10b   : > { %13443 = vmatprep.mubr.msk.f32.mxu0 %vm503_vm1, %v21943_v37  ;;  %14389 = vmatprep.mubr.msk.f32.mxu1 %vm503_vm1, %v21941_v32  ;;  %v21953_v32 = vld [vmem:[#allocation24_spill] sm:$0xff] }
 0x10e   : > { %13444 = vmatmul.mubr.msk.f32.gmra.mrb[22].mxu0 %vm503_vm1, %v17774_v17  ;;  %14390 = vmatmul.mubr.msk.f32.gmra.mrb[22].mxu1 %vm503_vm1, %v17722_v19  ;;  %v10989_v19 = vld [vmem:[%s21281_s1 + $0xc8] sm:$0xff] }
 0x10f   : > { %13446 = vmatprep.mubr.msk.f32.mxu0 %vm503_vm1, %v17784_v2  ;;  %14392 = vmatprep.mubr.msk.f32.mxu1 %vm503_vm1, %v21942_v18  ;;  %v21945_v18 = vld [vmem:[#allocation130_spill] sm:$0xff] }
 0x112   : > { %13447 = vmatmul.mubr.msk.f32.gmra.mrb[24].mxu0 %vm503_vm1, %v17800_v26  ;;  %14393 = vmatmul.mubr.msk.f32.gmra.mrb[24].mxu1 %vm503_vm1, %v17748_v20  ;;  %v1581_v20 = vrot.slane %v18216_v23, 1 }
 0x113   : > { %13449 = vmatprep.mubr.msk.f32.mxu0 %vm503_vm1, %v17809_v28  ;;  %14395 = vmatprep.mubr.msk.f32.mxu1 %vm503_vm1, %v21943_v37  ;;  %v18228_v37 = vsel %vm793_vm3, %v1578_v4, %v1579_v47  ;;  %v10954_v4 = vld [vmem:[%s21281_s1 + $0xb0] sm:$0xff] }
 0x114   : > { %21944 = vst [vmem:[#allocation40_spill] sm:$0xff] %v18228_v37 }
 0x116   : > { %13450 = vmatmul.mubr.msk.f32.gmra.mrb[26].mxu0 %vm503_vm1, %v17826_v44  ;;  %14396 = vmatmul.mubr.msk.f32.gmra.mrb[26].mxu1 %vm503_vm1, %v17774_v17  ;;  %v18237_v17 = vsel %vm793_vm3, %v1579_v47, %v1581_v20  ;;  %v21948_v20 = vld [vmem:[#allocation14_spill] sm:$0xff] }
 0x117   : > { %13452 = vmatprep.mubr.msk.f32.mxu0 %vm503_vm1, %v17835_v40  ;;  %14398 = vmatprep.mubr.msk.f32.mxu1 %vm503_vm1, %v17784_v2  ;;  %21946 = vst [vmem:[#allocation44_spill] sm:$0xff] %v18237_v17  ;;  %v21947_v2 = vld [vmem:[#allocation12_spill] sm:$0xff] }
 0x11a   : > { %13453 = vmatmul.mubr.msk.f32.gmra.mrb[28].mxu0 %vm503_vm1, %v21945_v18  ;;  %14399 = vmatmul.mubr.msk.f32.gmra.mrb[28].mxu1 %vm503_vm1, %v17800_v26  ;;  %v10955_v26 = vld [vmem:[%s21281_s1 + $0xb8] sm:$0xff] }
 0x11b   : > { %13455 = vmatprep.mubr.msk.f32.mxu0 %vm503_vm1, %v18228_v37  ;;  %14401 = vmatprep.mubr.msk.f32.mxu1 %vm503_vm1, %v17809_v28  ;;  %v15204_v47 = vpack.c.bf16 %v10955_v26, %v10954_v4  ;;  %v10988_v28 = vld [vmem:[%s21281_s1 + $0xc0] sm:$0xff] }
 0x11c   : > { %v18270_v26 = vpack.c.bf16 %v10989_v19, %v10988_v28  ;;  %v21950_v4 = vld [vmem:[#allocation18_spill] sm:$0xff] }
 0x11d   : > { %v21952_v28 = vld [vmem:[#allocation22_spill] sm:$0xff] }
 0x11e   : > { %13456 = vmatmul.mubr.msk.f32.gmra.mrb[30].mxu0 %vm503_vm1, %v18237_v17  ;;  %14402 = vmatmul.mubr.msk.f32.gmra.mrb[30].mxu1 %vm503_vm1, %v17826_v44  ;;  %v21949_v44 = vld [vmem:[#allocation16_spill] sm:$0xff] }
 0x11f   : > { %13466 = vmatprep.mubr.msk.f32.mxu0 %vm503_vm1, %v21947_v2  ;;  %14404 = vmatprep.mubr.msk.f32.mxu1 %vm503_vm1, %v17835_v40  ;;  %v11562_v40 = vld [vmem:[%s21282_s2 + $0x1b0] sm:$0xff] }
 0x122   : > { %13467 = vmatmul.mubr.msk.f32.vlgmr.msra.gmra.mrb[0].mxu0 %vm503_vm1, %v21948_v20  ;;  %14405 = vmatmul.mubr.msk.f32.gmra.mrb[0].mxu1 %vm503_vm1, %v21945_v18  ;;  %v11563_v18 = vld [vmem:[%s21282_s2 + $0x1b8] sm:$0xff] }
 0x123   : > { %13469 = vmatprep.mubr.msk.f32.mxu0 %vm503_vm1, %v21949_v44  ;;  %14407 = vmatprep.mubr.msk.f32.mxu1 %vm503_vm1, %v18228_v37  ;;  %v21951_v37 = vld [vmem:[#allocation20_spill] sm:$0xff]  ;;  %v15340_v19 = vpack.c.bf16 %v11563_v18, %v11562_v40  ;;  %v21954_v18 = vld [vmem:[#allocation26_spill] sm:$0xff] }
 0x124   : > { %15203 = vmatpush3.bf16.msra.mxu0 %v18098_v16  ;;  %v11596_v16 = vld [vmem:[%s21282_s2 + $0x1c0] sm:$0xff] }
 0x125   : > { %15205 = vmatprep.subr.bf16.mxu0 %v15204_v47 }
 0x126   : > { %13470 = vmatmul.mubr.msk.f32.gmra.mrb[2].mxu0 %vm503_vm1, %v21950_v4  ;;  %14408 = vmatmul.mubr.msk.f32.gmra.mrb[2].mxu1 %vm503_vm1, %v18237_v17  ;;  %v11597_v17 = vld [vmem:[%s21282_s2 + $0x1c8] sm:$0xff] }
 0x127   : > { %13472 = vmatprep.mubr.msk.f32.mxu0 %vm503_vm1, %v21951_v37  ;;  %14418 = vmatprep.mubr.msk.f32.mxu1 %vm503_vm1, %v21947_v2  ;;  %v18302_v40 = vpack.c.bf16 %v11597_v17, %v11596_v16  ;;  %v21957_v17 = vld [vmem:[#allocation32_spill] sm:$0xff]  ;;  %v21961_v2 = vld [vmem:[#allocation45_spill] sm:$0xff] }
 0x128   : > { %15207 = vmatpush3.bf16.msra.mxu0 %v15204_v47  ;;  %v21955_v47 = vld [vmem:[#allocation28_spill] sm:$0xff] }
 0x129   : > { %15209 = vmatprep.subr.bf16.mxu0 %v18270_v26  ;;  %v21958_v16 = vld [vmem:[#allocation36_spill] sm:$0xff] }
 0x12a   : > { %13473 = vmatmul.mubr.msk.f32.gmra.mrb[4].mxu0 %vm503_vm1, %v21952_v28  ;;  %14419 = vmatmul.mubr.msk.f32.vlgmr.msra.gmra.mrb[4].mxu1 %vm503_vm1, %v21948_v20  ;;  %v21960_v20 = vld [vmem:[#allocation43_spill] sm:$0xff] }
 0x12b   : > { %13475 = vmatprep.mubr.msk.f32.mxu0 %vm503_vm1, %v21953_v32  ;;  %15339 = vmatpush3.bf16.msra.mxu1 %v18130_v8  ;;  %v21956_v8 = vld [vmem:[#allocation30_spill] sm:$0xff] }
 0x12c   : > { %14421 = vmatprep.mubr.msk.f32.mxu1 %vm503_vm1, %v21949_v44  ;;  %15341 = vmatprep.subr.bf16.mxu1 %v15340_v19 }
 0x12e   : > { %13476 = vmatmul.mubr.msk.f32.gmra.mrb[6].mxu0 %vm503_vm1, %v21954_v18  ;;  %14422 = vmatmul.mubr.msk.f32.gmra.mrb[6].mxu1 %vm503_vm1, %v21950_v4 }
 0x12f   : > { %13478 = vmatprep.mubr.msk.f32.mxu0 %vm503_vm1, %v21955_v47  ;;  %14424 = vmatprep.mubr.msk.f32.mxu1 %vm503_vm1, %v21951_v37  ;;  %v21977_v37 = vld [vmem:[#allocation15_spill] sm:$0xff] }
 0x130   : > { %15343 = vmatpush3.bf16.msra.mxu1 %v15340_v19  ;;  %v21959_v19 = vld [vmem:[#allocation38_spill] sm:$0xff] }
 0x131   : > { %15345 = vmatprep.subr.bf16.mxu1 %v18302_v40 }
 0x132   : > { %13479 = vmatmul.mubr.msk.f32.gmra.mrb[8].mxu0 %vm503_vm1, %v21956_v8  ;;  %14425 = vmatmul.mubr.msk.f32.gmra.mrb[8].mxu1 %vm503_vm1, %v21952_v28  ;;  %v21974_v28 = vld [vmem:[#allocation11_spill] sm:$0xff] }
 0x133   : > { %13481 = vmatprep.mubr.msk.f32.mxu0 %vm503_vm1, %v21957_v17  ;;  %14427 = vmatprep.mubr.msk.f32.mxu1 %vm503_vm1, %v21953_v32  ;;  %v21962_v32 = vld [vmem:[#allocation49_spill] sm:$0xff] }
 0x136   : > { %13482 = vmatmul.mubr.msk.f32.gmra.mrb[10].mxu0 %vm503_vm1, %v21958_v16  ;;  %14428 = vmatmul.mubr.msk.f32.gmra.mrb[10].mxu1 %vm503_vm1, %v21954_v18  ;;  %v21963_v18 = vld [vmem:[#allocation51_spill] sm:$0xff] }
 0x137   : > { %13484 = vmatprep.mubr.msk.f32.mxu0 %vm503_vm1, %v21959_v19  ;;  %14430 = vmatprep.mubr.msk.f32.mxu1 %vm503_vm1, %v21955_v47  ;;  %v21964_v47 = vld [vmem:[#allocation53_spill] sm:$0xff] }
 0x13a   : > { %13485 = vmatmul.mubr.msk.f32.gmra.mrb[12].mxu0 %vm503_vm1, %v21960_v20  ;;  %14431 = vmatmul.mubr.msk.f32.gmra.mrb[12].mxu1 %vm503_vm1, %v21956_v8  ;;  %v21965_v8 = vld [vmem:[#allocation55_spill] sm:$0xff] }
 0x13b   : > { %13487 = vmatprep.mubr.msk.f32.mxu0 %vm503_vm1, %v21961_v2  ;;  %14433 = vmatprep.mubr.msk.f32.mxu1 %vm503_vm1, %v21957_v17  ;;  %v21966_v17 = vld [vmem:[#allocation57_spill] sm:$0xff] }
 0x13e   : > { %13488 = vmatmul.mubr.msk.f32.gmra.mrb[14].mxu0 %vm503_vm1, %v21962_v32  ;;  %14434 = vmatmul.mubr.msk.f32.gmra.mrb[14].mxu1 %vm503_vm1, %v21958_v16  ;;  %v21967_v16 = vld [vmem:[#allocation59_spill] sm:$0xff] }
 0x13f   : > { %13490 = vmatprep.mubr.msk.f32.mxu0 %vm503_vm1, %v21963_v18  ;;  %14436 = vmatprep.mubr.msk.f32.mxu1 %vm503_vm1, %v21959_v19  ;;  %v21968_v19 = vld [vmem:[#allocation61_spill] sm:$0xff] }
 0x142   : > { %13491 = vmatmul.mubr.msk.f32.gmra.mrb[16].mxu0 %vm503_vm1, %v21964_v47  ;;  %14437 = vmatmul.mubr.msk.f32.gmra.mrb[16].mxu1 %vm503_vm1, %v21960_v20  ;;  %v21969_v20 = vld [vmem:[#allocation63_spill] sm:$0xff] }
 0x143   : > { %13493 = vmatprep.mubr.msk.f32.mxu0 %vm503_vm1, %v21965_v8  ;;  %14439 = vmatprep.mubr.msk.f32.mxu1 %vm503_vm1, %v21961_v2  ;;  %v21970_v2 = vld [vmem:[#allocation65_spill] sm:$0xff] }
 0x146   : > { %13494 = vmatmul.mubr.msk.f32.gmra.mrb[18].mxu0 %vm503_vm1, %v21966_v17  ;;  %14440 = vmatmul.mubr.msk.f32.gmra.mrb[18].mxu1 %vm503_vm1, %v21962_v32  ;;  %v21971_v32 = vld [vmem:[#allocation67_spill] sm:$0xff] }
 0x147   : > { %13496 = vmatprep.mubr.msk.f32.mxu0 %vm503_vm1, %v21967_v16  ;;  %14442 = vmatprep.mubr.msk.f32.mxu1 %vm503_vm1, %v21963_v18  ;;  %v21972_v18 = vld [vmem:[#allocation69_spill] sm:$0xff] }
 0x14a   : > { %13497 = vmatmul.mubr.msk.f32.gmra.mrb[20].mxu0 %vm503_vm1, %v21968_v19  ;;  %14443 = vmatmul.mubr.msk.f32.gmra.mrb[20].mxu1 %vm503_vm1, %v21964_v47  ;;  %v21973_v47 = vld [vmem:[#allocation9_spill] sm:$0xff] }
 0x14b   : > { %13499 = vmatprep.mubr.msk.f32.mxu0 %vm503_vm1, %v21969_v20  ;;  %14445 = vmatprep.mubr.msk.f32.mxu1 %vm503_vm1, %v21965_v8  ;;  %v1850_v8 = vrot.slane %v18095_v46, 2 }
 0x14e   : > { %13500 = vmatmul.mubr.msk.f32.gmra.mrb[22].mxu0 %vm503_vm1, %v21970_v2  ;;  %14446 = vmatmul.mubr.msk.f32.gmra.mrb[22].mxu1 %vm503_vm1, %v21966_v17  ;;  %v1849_v17 = vrot.slane %v18078_v54, 2 }
 0x14f   : > { %13502 = vmatprep.mubr.msk.f32.mxu0 %vm503_vm1, %v21971_v32  ;;  %14448 = vmatprep.mubr.msk.f32.mxu1 %vm503_vm1, %v21967_v16  ;;  %v21975_v16 = vld [vmem:[#allocation13_spill] sm:$0xff] }
 0x152   : > { %13503 = vmatmul.mubr.msk.f32.gmra.mrb[24].mxu0 %vm503_vm1, %v21972_v18  ;;  %14449 = vmatmul.mubr.msk.f32.gmra.mrb[24].mxu1 %vm503_vm1, %v21968_v19  ;;  %v1852_v19 = vrot.slane %v18216_v23, 2 }
 0x153   : > { %13505 = vmatprep.mubr.msk.f32.mxu0 %vm503_vm1, %v21973_v47  ;;  %14451 = vmatprep.mubr.msk.f32.mxu1 %vm503_vm1, %v21969_v20  ;;  %v18397_v20 = vsel %vm422_vm0, %v1849_v17, %v1850_v8  ;;  %v10990_v17 = vld [vmem:[%s21281_s1 + $0xd0] sm:$0xff] }
 0x154   : > { %21976 = vst [vmem:[#allocation47_spill] sm:$0xff] %v18397_v20 }
 0x156   : > { %13506 = vmatmul.mubr.msk.f32.gmra.mrb[26].mxu0 %vm503_vm1, %v21974_v28  ;;  %14452 = vmatmul.mubr.msk.f32.gmra.mrb[26].mxu1 %vm503_vm1, %v21970_v2  ;;  %v18406_v2 = vsel %vm422_vm0, %v1850_v8, %v1852_v19  ;;  %v11024_v19 = vld [vmem:[%s21281_s1 + $0xe0] sm:$0xff] }
 0x157   : > { %13508 = vmatprep.mubr.msk.f32.mxu0 %vm503_vm1, %v21975_v16  ;;  %14454 = vmatprep.mubr.msk.f32.mxu1 %vm503_vm1, %v21971_v32  ;;  %21978 = vst [vmem:[#allocation50_spill] sm:$0xff] %v18406_v2 }
 0x15a   : > { %13509 = vmatmul.mubr.msk.f32.gmra.mrb[28].mxu0 %vm503_vm1, %v21977_v37  ;;  %14455 = vmatmul.mubr.msk.f32.gmra.mrb[28].mxu1 %vm503_vm1, %v21972_v18  ;;  %v10991_v18 = vld [vmem:[%s21281_s1 + $0xd8] sm:$0xff] }
 0x15b   : > { %13511 = vmatprep.mubr.msk.f32.mxu0 %vm503_vm1, %v18397_v20  ;;  %14457 = vmatprep.mubr.msk.f32.mxu1 %vm503_vm1, %v21973_v47  ;;  %v15212_v8 = vpack.c.bf16 %v10991_v18, %v10990_v17  ;;  %v11025_v47 = vld [vmem:[%s21281_s1 + $0xe8] sm:$0xff]  ;;  %v11598_v17 = vld [vmem:[%s21282_s2 + $0x1d0] sm:$0xff] }
 0x15c   : > { %v18439_v18 = vpack.c.bf16 %v11025_v47, %v11024_v19  ;;  %v11632_v47 = vld [vmem:[%s21282_s2 + $0x1e0] sm:$0xff]  ;;  %v11633_v19 = vld [vmem:[%s21282_s2 + $0x1e8] sm:$0xff] }
 0x15e   : > { %13512 = vmatmul.mubr.msk.f32.gmra.mrb[30].mxu0 %vm503_vm1, %v18406_v2  ;;  %14458 = vmatmul.mubr.msk.f32.gmra.mrb[30].mxu1 %vm503_vm1, %v21974_v28 }
 0x15f   : > { %13522 = vmatprep.mubr.msk.f32.mxu0 %vm503_vm1, %v21903_v24  ;;  %14460 = vmatprep.mubr.msk.f32.mxu1 %vm503_vm1, %v21975_v16 }
 0x162   : > { %13523 = vmatmul.mubr.msk.f32.vlgmr.msra.gmra.mrb[0].mxu0 %vm503_vm1, %v21905_v35  ;;  %14461 = vmatmul.mubr.msk.f32.gmra.mrb[0].mxu1 %vm503_vm1, %v21977_v37  ;;  %v11599_v37 = vld [vmem:[%s21282_s2 + $0x1d8] sm:$0xff] }
 0x163   : > { %13525 = vmatprep.mubr.msk.f32.mxu0 %vm503_vm1, %v21906_v59  ;;  %14463 = vmatprep.mubr.msk.f32.mxu1 %vm503_vm1, %v18397_v20 }
 0x164   : > { %15211 = vmatpush3.bf16.msra.mxu0 %v18270_v26  ;;  %v15348_v26 = vpack.c.bf16 %v11599_v37, %v11598_v17  ;;  %v18471_v37 = vpack.c.bf16 %v11633_v19, %v11632_v47  ;;  %v2123_v17 = vrot.slane %v18216_v23, 3  ;;  %v11026_v19 = vld [vmem:[%s21281_s1 + $0xf0] sm:$0xff] }
 0x165   : > { %15213 = vmatprep.subr.bf16.mxu0 %v15212_v8 }
 0x166   : > { %13526 = vmatmul.mubr.msk.f32.gmra.mrb[2].mxu0 %vm503_vm1, %v21907_v63  ;;  %14464 = vmatmul.mubr.msk.f32.gmra.mrb[2].mxu1 %vm503_vm1, %v18406_v2 }
 0x167   : > { %13528 = vmatprep.mubr.msk.f32.mxu0 %vm503_vm1, %v21908_v13  ;;  %14474 = vmatprep.mubr.msk.f32.mxu1 %vm503_vm1, %v21903_v24  ;;  %v11635_v24 = vld [vmem:[%s21282_s2 + $0x1f8] sm:$0xff] }
 0x168   : > { %15215 = vmatpush3.bf16.msra.mxu0 %v15212_v8  ;;  %v2121_v8 = vrot.slane %v18095_v46, 3 }
 0x169   : > { %15217 = vmatprep.subr.bf16.mxu0 %v18439_v18 }
 0x16a   : > { %13529 = vmatmul.mubr.msk.f32.gmra.mrb[4].mxu0 %vm503_vm1, %v21910_v12  ;;  %14475 = vmatmul.mubr.msk.f32.vlgmr.msra.gmra.mrb[4].mxu1 %vm503_vm1, %v21905_v35  ;;  %v18575_v47 = vsel %vm1168_vm2, %v2121_v8, %v2123_v17  ;;  %v11060_v17 = vld [vmem:[%s21281_s1 + $0x100] sm:$0xff]  ;;  %v11061_v35 = vld [vmem:[%s21281_s1 + $0x108] sm:$0xff] }
 0x16b   : > { %13531 = vmatprep.mubr.msk.f32.mxu0 %vm503_vm1, %v21912_v58  ;;  %15347 = vmatpush3.bf16.msra.mxu1 %v18302_v40  ;;  %v2120_v40 = vrot.slane %v18078_v54, 3  ;;  %21980 = vst [vmem:[#allocation137_spill] sm:$0xff] %v18575_v47 }
 0x16c   : > { %14477 = vmatprep.mubr.msk.f32.mxu1 %vm503_vm1, %v21906_v59  ;;  %15349 = vmatprep.subr.bf16.mxu1 %v15348_v26 }
 0x16e   : > { %13532 = vmatmul.mubr.msk.f32.gmra.mrb[6].mxu0 %vm503_vm1, %v21914_v22  ;;  %14478 = vmatmul.mubr.msk.f32.gmra.mrb[6].mxu1 %vm503_vm1, %v21907_v63 }
 0x16f   : > { %13534 = vmatprep.mubr.msk.f32.mxu0 %vm503_vm1, %v21916_v1  ;;  %14480 = vmatprep.mubr.msk.f32.mxu1 %vm503_vm1, %v21908_v13 }
 0x170   : > { %15351 = vmatpush3.bf16.msra.mxu1 %v15348_v26  ;;  %v18566_v26 = vsel %vm1168_vm2, %v2120_v40, %v2121_v8  ;;  %v11027_v40 = vld [vmem:[%s21281_s1 + $0xf8] sm:$0xff] }
 0x171   : > { %15353 = vmatprep.subr.bf16.mxu1 %v18471_v37  ;;  %21979 = vst [vmem:[#allocation136_spill] sm:$0xff] %v18566_v26  ;;  %v15220_v8 = vpack.c.bf16 %v11027_v40, %v11026_v19  ;;  %v18608_v19 = vpack.c.bf16 %v11061_v35, %v11060_v17  ;;  %v11634_v40 = vld [vmem:[%s21282_s2 + $0x1f0] sm:$0xff]  ;;  %v11668_v17 = vld [vmem:[%s21282_s2 + $0x200] sm:$0xff] }
 0x172   : > { %13535 = vmatmul.mubr.msk.f32.gmra.mrb[8].mxu0 %vm503_vm1, %v21918_v0  ;;  %14481 = vmatmul.mubr.msk.f32.gmra.mrb[8].mxu1 %vm503_vm1, %v21910_v12  ;;  %v15356_v35 = vpack.c.bf16 %v11635_v24, %v11634_v40  ;;  %v21983_v24 = vld [vmem:[#allocation92_spill] sm:$0xff]  ;;  %v21984_v40 = vld [vmem:[#allocation94_spill] sm:$0xff] }
 0x173   : > { %13537 = vmatprep.mubr.msk.f32.mxu0 %vm503_vm1, %v21920_v52  ;;  %14483 = vmatprep.mubr.msk.f32.mxu1 %vm503_vm1, %v21912_v58 }
 0x176   : > { %13538 = vmatmul.mubr.msk.f32.gmra.mrb[10].mxu0 %vm503_vm1, %v21921_v31  ;;  %14484 = vmatmul.mubr.msk.f32.gmra.mrb[10].mxu1 %vm503_vm1, %v21914_v22 }
 0x177   : > { %13540 = vmatprep.mubr.msk.f32.mxu0 %vm503_vm1, %v21922_v21  ;;  %14486 = vmatprep.mubr.msk.f32.mxu1 %vm503_vm1, %v21916_v1 }
 0x17a   : > { %13541 = vmatmul.mubr.msk.f32.gmra.mrb[12].mxu0 %vm503_vm1, %v21923_v33  ;;  %14487 = vmatmul.mubr.msk.f32.gmra.mrb[12].mxu1 %vm503_vm1, %v21918_v0 }
 0x17b   : > { %13543 = vmatprep.mubr.msk.f32.mxu0 %vm503_vm1, %v21924_v61  ;;  %14489 = vmatprep.mubr.msk.f32.mxu1 %vm503_vm1, %v21920_v52 }
 0x17e   : > { %13544 = vmatmul.mubr.msk.f32.gmra.mrb[14].mxu0 %vm503_vm1, %v17281_v5  ;;  %14490 = vmatmul.mubr.msk.f32.gmra.mrb[14].mxu1 %vm503_vm1, %v21921_v31 }
 0x17f   : > { %13546 = vmatprep.mubr.msk.f32.mxu0 %vm503_vm1, %v21925_v41  ;;  %14492 = vmatprep.mubr.msk.f32.mxu1 %vm503_vm1, %v21922_v21 }
 0x182   : > { %13547 = vmatmul.mubr.msk.f32.gmra.mrb[16].mxu0 %vm503_vm1, %v21926_v42  ;;  %14493 = vmatmul.mubr.msk.f32.gmra.mrb[16].mxu1 %vm503_vm1, %v21923_v33 }
 0x183   : > { %13549 = vmatprep.mubr.msk.f32.mxu0 %vm503_vm1, %v21927_v9  ;;  %14495 = vmatprep.mubr.msk.f32.mxu1 %vm503_vm1, %v21924_v61 }
 0x186   : > { %13550 = vmatmul.mubr.msk.f32.gmra.mrb[18].mxu0 %vm503_vm1, %v21928_v10  ;;  %14496 = vmatmul.mubr.msk.f32.gmra.mrb[18].mxu1 %vm503_vm1, %v17281_v5 }
 0x187   : > { %13552 = vmatprep.mubr.msk.f32.mxu0 %vm503_vm1, %v21929_v34  ;;  %14498 = vmatprep.mubr.msk.f32.mxu1 %vm503_vm1, %v21925_v41 }
 0x18a   : > { %13553 = vmatmul.mubr.msk.f32.gmra.mrb[20].mxu0 %vm503_vm1, %v21930_v56  ;;  %14499 = vmatmul.mubr.msk.f32.gmra.mrb[20].mxu1 %vm503_vm1, %v21926_v42 }
 0x18b   : > { %13555 = vmatprep.mubr.msk.f32.mxu0 %vm503_vm1, %v21931_v6  ;;  %14501 = vmatprep.mubr.msk.f32.mxu1 %vm503_vm1, %v21927_v9 }
 0x18e   : > { %13556 = vmatmul.mubr.msk.f32.gmra.mrb[22].mxu0 %vm503_vm1, %v21932_v49  ;;  %14502 = vmatmul.mubr.msk.f32.gmra.mrb[22].mxu1 %vm503_vm1, %v21928_v10 }
 0x18f   : > { %13558 = vmatprep.mubr.msk.f32.mxu0 %vm503_vm1, %v21933_v48  ;;  %14504 = vmatprep.mubr.msk.f32.mxu1 %vm503_vm1, %v21929_v34 }
 0x192   : > { %13559 = vmatmul.mubr.msk.f32.gmra.mrb[24].mxu0 %vm503_vm1, %v21934_v15  ;;  %14505 = vmatmul.mubr.msk.f32.gmra.mrb[24].mxu1 %vm503_vm1, %v21930_v56 }
 0x193   : > { %13561 = vmatprep.mubr.msk.f32.mxu0 %vm503_vm1, %v17419_v38  ;;  %14507 = vmatprep.mubr.msk.f32.mxu1 %vm503_vm1, %v21931_v6 }
 0x196   : > { %13562 = vmatmul.mubr.msk.f32.gmra.mrb[26].mxu0 %vm503_vm1, %v17443_v55  ;;  %14508 = vmatmul.mubr.msk.f32.gmra.mrb[26].mxu1 %vm503_vm1, %v21932_v49 }
 0x197   : > { %13564 = vmatprep.mubr.msk.f32.mxu0 %vm503_vm1, %v17451_v7  ;;  %14510 = vmatprep.mubr.msk.f32.mxu1 %vm503_vm1, %v21933_v48  ;;  %v22020_v48 = vld [vmem:[#allocation44_spill] sm:$0xff] }
 0x19a   : > { %13565 = vmatmul.mubr.msk.f32.gmra.mrb[28].mxu0 %vm503_vm1, %v17465_v53  ;;  %14511 = vmatmul.mubr.msk.f32.gmra.mrb[28].mxu1 %vm503_vm1, %v21934_v15  ;;  %v22015_v15 = vld [vmem:[#allocation130_spill] sm:$0xff] }
 0x19b   : > { %13567 = vmatprep.mubr.msk.f32.mxu0 %vm503_vm1, %v18566_v26  ;;  %14513 = vmatprep.mubr.msk.f32.mxu1 %vm503_vm1, %v17419_v38  ;;  %v18716_v38 = vld [vmem:[%s16817_s26 + $0x1b0] sm:$0xff] }
 0x19e   : > { %13568 = vmatmul.mubr.msk.f32.gmra.mrb[30].mxu0 %vm503_vm1, %v18575_v47  ;;  %14514 = vmatmul.mubr.msk.f32.gmra.mrb[30].mxu1 %vm503_vm1, %v17443_v55  ;;  %v22006_v55 = vld [vmem:[#allocation117_spill] sm:$0xff] }
 0x19f   : > { %13578 = vmatprep.mubr.msk.f32.mxu0 %vm503_vm1, %v21935_v30  ;;  %14516 = vmatprep.mubr.msk.f32.mxu1 %vm503_vm1, %v17451_v7  ;;  %v22004_v7 = vld [vmem:[#allocation115_spill] sm:$0xff] }
 0x1a2   : > { %13579 = vmatmul.mubr.msk.f32.vlgmr.msra.gmra.mrb[0].mxu0 %vm503_vm1, %v17495_v36  ;;  %14517 = vmatmul.mubr.msk.f32.gmra.mrb[0].mxu1 %vm503_vm1, %v17465_v53  ;;  %v22002_v53 = vld [vmem:[#allocation113_spill] sm:$0xff] }
 0x1a3   : > { %13581 = vmatprep.mubr.msk.f32.mxu0 %vm503_vm1, %v17505_v3  ;;  %14519 = vmatprep.mubr.msk.f32.mxu1 %vm503_vm1, %v18566_v26  ;;  %v21982_v26 = vld [vmem:[#allocation90_spill] sm:$0xff] }
 0x1a4   : > { %15219 = vmatpush3.bf16.msra.mxu0 %v18439_v18  ;;  %v21981_v18 = vld [vmem:[#allocation88_spill] sm:$0xff] }
 0x1a5   : > { %15221 = vmatprep.subr.bf16.mxu0 %v15220_v8 }
 0x1a6   : > { %13582 = vmatmul.mubr.msk.f32.gmra.mrb[2].mxu0 %vm503_vm1, %v17522_v14  ;;  %14520 = vmatmul.mubr.msk.f32.gmra.mrb[2].mxu1 %vm503_vm1, %v18575_v47  ;;  %v11669_v47 = vld [vmem:[%s21282_s2 + $0x208] sm:$0xff] }
 0x1a7   : > { %13584 = vmatprep.mubr.msk.f32.mxu0 %vm503_vm1, %v17534_v57  ;;  %14530 = vmatprep.mubr.msk.f32.mxu1 %vm503_vm1, %v21981_v18  ;;  %v21990_v18 = vld [vmem:[#allocation104_spill] sm:$0xff] }
 0x1a8   : > { %15223 = vmatpush3.bf16.msra.mxu0 %v15220_v8  ;;  %v18640_v8 = vpack.c.bf16 %v11669_v47, %v11668_v17  ;;  %v21987_v47 = vld [vmem:[#allocation100_spill] sm:$0xff]  ;;  %v21988_v17 = vld [vmem:[#allocation102_spill] sm:$0xff] }
 0x1a9   : > { %15225 = vmatprep.subr.bf16.mxu0 %v18608_v19 }
 0x1aa   : > { %13585 = vmatmul.mubr.msk.f32.gmra.mrb[4].mxu0 %vm503_vm1, %v17556_v62  ;;  %14531 = vmatmul.mubr.msk.f32.vlgmr.msra.gmra.mrb[4].mxu1 %vm503_vm1, %v21982_v26  ;;  %v21985_v26 = vld [vmem:[#allocation96_spill] sm:$0xff] }
 0x1ab   : > { %13587 = vmatprep.mubr.msk.f32.mxu0 %vm503_vm1, %v17574_v39  ;;  %15355 = vmatpush3.bf16.msra.mxu1 %v18471_v37  ;;  %v21986_v37 = vld [vmem:[#allocation98_spill] sm:$0xff] }
 0x1ac   : > { %14533 = vmatprep.mubr.msk.f32.mxu1 %vm503_vm1, %v21983_v24  ;;  %15357 = vmatprep.subr.bf16.mxu1 %v15356_v35  ;;  %v22000_v24 = vld [vmem:[#allocation111_spill] sm:$0xff] }
 0x1ae   : > { %13588 = vmatmul.mubr.msk.f32.gmra.mrb[6].mxu0 %vm503_vm1, %v17592_v25  ;;  %14534 = vmatmul.mubr.msk.f32.gmra.mrb[6].mxu1 %vm503_vm1, %v21984_v40  ;;  %v21998_v40 = vld [vmem:[#allocation109_spill] sm:$0xff] }
 0x1af   : > { %13590 = vmatprep.mubr.msk.f32.mxu0 %vm503_vm1, %v17601_v51  ;;  %14536 = vmatprep.mubr.msk.f32.mxu1 %vm503_vm1, %v21985_v26  ;;  %v21995_v26 = vld [vmem:[#allocation110_spill] sm:$0xff] }
 0x1b0   : > { %15359 = vmatpush3.bf16.msra.mxu1 %v15356_v35  ;;  %v21989_v35 = vld [vmem:[#allocation34_spill] sm:$0xff] }
 0x1b1   : > { %15361 = vmatprep.subr.bf16.mxu1 %v18640_v8 }
 0x1b2   : > { %13591 = vmatmul.mubr.msk.f32.gmra.mrb[8].mxu0 %vm503_vm1, %v21936_v45  ;;  %14537 = vmatmul.mubr.msk.f32.gmra.mrb[8].mxu1 %vm503_vm1, %v21986_v37  ;;  %v21993_v37 = vld [vmem:[#allocation108_spill] sm:$0xff] }
 0x1b3   : > { %13593 = vmatprep.mubr.msk.f32.mxu0 %vm503_vm1, %v21937_v43  ;;  %14539 = vmatprep.mubr.msk.f32.mxu1 %vm503_vm1, %v21987_v47  ;;  %v21991_v47 = vld [vmem:[#allocation41_spill] sm:$0xff] }
 0x1b6   : > { %13594 = vmatmul.mubr.msk.f32.gmra.mrb[10].mxu0 %vm503_vm1, %v21938_v11  ;;  %14540 = vmatmul.mubr.msk.f32.gmra.mrb[10].mxu1 %vm503_vm1, %v21988_v17  ;;  %v21992_v17 = vld [vmem:[#allocation46_spill] sm:$0xff] }
 0x1b7   : > { %13596 = vmatprep.mubr.msk.f32.mxu0 %vm503_vm1, %v21939_v50  ;;  %14542 = vmatprep.mubr.msk.f32.mxu1 %vm503_vm1, %v21989_v35  ;;  %v21994_v35 = vld [vmem:[#allocation48_spill] sm:$0xff] }
 0x1ba   : > { %13597 = vmatmul.mubr.msk.f32.gmra.mrb[12].mxu0 %vm503_vm1, %v17670_v27  ;;  %14543 = vmatmul.mubr.msk.f32.gmra.mrb[12].mxu1 %vm503_vm1, %v21990_v18  ;;  %v21996_v18 = vld [vmem:[#allocation107_spill] sm:$0xff] }
 0x1bb   : > { %13599 = vmatprep.mubr.msk.f32.mxu0 %vm503_vm1, %v21940_v29  ;;  %14545 = vmatprep.mubr.msk.f32.mxu1 %vm503_vm1, %v21991_v47  ;;  %v21997_v47 = vld [vmem:[#allocation112_spill] sm:$0xff] }
 0x1be   : > { %13600 = vmatmul.mubr.msk.f32.gmra.mrb[14].mxu0 %vm503_vm1, %v17696_v60  ;;  %14546 = vmatmul.mubr.msk.f32.gmra.mrb[14].mxu1 %vm503_vm1, %v21992_v17  ;;  %v21999_v17 = vld [vmem:[#allocation114_spill] sm:$0xff] }
 0x1bf   : > { %13602 = vmatprep.mubr.msk.f32.mxu0 %vm503_vm1, %v21993_v37  ;;  %14548 = vmatprep.mubr.msk.f32.mxu1 %vm503_vm1, %v21994_v35  ;;  %v22001_v35 = vld [vmem:[#allocation116_spill] sm:$0xff] }
 0x1c2   : > { %13603 = vmatmul.mubr.msk.f32.gmra.mrb[16].mxu0 %vm503_vm1, %v21995_v26  ;;  %14549 = vmatmul.mubr.msk.f32.gmra.mrb[16].mxu1 %vm503_vm1, %v21996_v18  ;;  %v22003_v18 = vld [vmem:[#allocation118_spill] sm:$0xff]  ;;  %v22021_v26 = vld [vmem:[#allocation131_spill] sm:$0xff] }
 0x1c3   : > { %13605 = vmatprep.mubr.msk.f32.mxu0 %vm503_vm1, %v21997_v47  ;;  %14551 = vmatprep.mubr.msk.f32.mxu1 %vm503_vm1, %v21998_v40  ;;  %v22005_v40 = vld [vmem:[#allocation120_spill] sm:$0xff]  ;;  %v22016_v47 = vld [vmem:[#allocation127_spill] sm:$0xff] }
 0x1c6   : > { %13606 = vmatmul.mubr.msk.f32.gmra.mrb[18].mxu0 %vm503_vm1, %v21999_v17  ;;  %14552 = vmatmul.mubr.msk.f32.gmra.mrb[18].mxu1 %vm503_vm1, %v22000_v24  ;;  %v22007_v24 = vld [vmem:[#allocation122_spill] sm:$0xff] }
 0x1c7   : > { %13608 = vmatprep.mubr.msk.f32.mxu0 %vm503_vm1, %v22001_v35  ;;  %14554 = vmatprep.mubr.msk.f32.mxu1 %vm503_vm1, %v22002_v53  ;;  %v22008_v35 = vld [vmem:[#allocation119_spill] sm:$0xff]  ;;  %v22009_v53 = vld [vmem:[#allocation124_spill] sm:$0xff]  ;;  %v18732_v17 = vld [vmem:[%s16817_s26 + $0x1c0] sm:$0xf] }
 0x1ca   : > { %13609 = vmatmul.mubr.msk.f32.gmra.mrb[20].mxu0 %vm503_vm1, %v22003_v18  ;;  %14555 = vmatmul.mubr.msk.f32.gmra.mrb[20].mxu1 %vm503_vm1, %v22004_v7  ;;  %v22010_v18 = vld [vmem:[#allocation121_spill] sm:$0xff] }
 0x1cb   : > { %13611 = vmatprep.mubr.msk.f32.mxu0 %vm503_vm1, %v22005_v40  ;;  %14557 = vmatprep.mubr.msk.f32.mxu1 %vm503_vm1, %v22006_v55  ;;  %v18719_v7 = vld [vmem:[%s16817_s26 + $0x1b8] sm:$0xff]  ;;  %v22011_v40 = vld [vmem:[#allocation126_spill] sm:$0xff]  ;;  %v22012_v55 = vld [vmem:[#allocation123_spill] sm:$0xff] }
 0x1ce   : > { %13612 = vmatmul.mubr.msk.f32.gmra.mrb[22].mxu0 %vm503_vm1, %v22007_v24  ;;  %14558 = vmatmul.mubr.msk.f32.gmra.mrb[22].mxu1 %vm503_vm1, %v22008_v35  ;;  %v22013_v24 = vld [vmem:[#allocation128_spill] sm:$0xff]  ;;  %v22014_v35 = vld [vmem:[#allocation125_spill] sm:$0xff] }
 0x1cf   : > { %13614 = vmatprep.mubr.msk.f32.mxu0 %vm503_vm1, %v22009_v53  ;;  %14560 = vmatprep.mubr.msk.f32.mxu1 %vm503_vm1, %v22010_v18  ;;  %v2394_v53 = vrot.slane %v18716_v38, 1  ;;  %v2395_v18 = vrot.slane %v18719_v7, 1 }
 0x1d2   : > { %13615 = vmatmul.mubr.msk.f32.gmra.mrb[24].mxu0 %vm503_vm1, %v22011_v40  ;;  %14561 = vmatmul.mubr.msk.f32.gmra.mrb[24].mxu1 %vm503_vm1, %v22012_v55  ;;  %v22017_v40 = vld [vmem:[#allocation40_spill] sm:$0xff]  ;;  %v2397_v55 = vrot.slane %v18732_v17, 1 }
 0x1d3   : > { %13617 = vmatprep.mubr.msk.f32.mxu0 %vm503_vm1, %v22013_v24  ;;  %14563 = vmatprep.mubr.msk.f32.mxu1 %vm503_vm1, %v22014_v35  ;;  %v22018_v24 = vld [vmem:[#allocation129_spill] sm:$0xff]  ;;  %v18744_v35 = vsel %vm793_vm3, %v2394_v53, %v2395_v18  ;;  %v7167_v53 = vrot.slane %v18095_v46, 4 }
 0x1d4   : > { %22019 = vst [vmem:[#allocation138_spill] sm:$0xff] %v18744_v35 }
 0x1d6   : > { %13618 = vmatmul.mubr.msk.f32.gmra.mrb[26].mxu0 %vm503_vm1, %v22015_v15  ;;  %14564 = vmatmul.mubr.msk.f32.gmra.mrb[26].mxu1 %vm503_vm1, %v22016_v47  ;;  %v18753_v47 = vsel %vm793_vm3, %v2395_v18, %v2397_v55  ;;  %v22024_v55 = vld [vmem:[#allocation133_spill] sm:$0xff]  ;;  %v22025_v18 = vld [vmem:[#allocation134_spill] sm:$0xff] }
 0x1d7   : > { %13620 = vmatprep.mubr.msk.f32.mxu0 %vm503_vm1, %v22017_v40  ;;  %14566 = vmatprep.mubr.msk.f32.mxu1 %vm503_vm1, %v22018_v24  ;;  %22022 = vst [vmem:[#allocation139_spill] sm:$0xff] %v18753_v47  ;;  %v22023_v40 = vld [vmem:[#allocation132_spill] sm:$0xff]  ;;  %v7166_v24 = vrot.slane %v18078_v54, 4  ;;  %v11096_v15 = vld [vmem:[%s21282_s2 + $0x20] sm:$0xff] }
 0x1da   : > { %13621 = vmatmul.mubr.msk.f32.gmra.mrb[28].mxu0 %vm503_vm1, %v22020_v48  ;;  %14567 = vmatmul.mubr.msk.f32.gmra.mrb[28].mxu1 %vm503_vm1, %v22021_v26  ;;  %v11062_v26 = vld [vmem:[%s21281_s1 + $0x110] sm:$0xff] }
 0x1db   : > { %13623 = vmatprep.mubr.msk.f32.mxu0 %vm503_vm1, %v18744_v35  ;;  %14569 = vmatprep.mubr.msk.f32.mxu1 %vm503_vm1, %v22023_v40  ;;  %v11063_v35 = vld [vmem:[%s21281_s1 + $0x118] sm:$0xff]  ;;  %v7169_v40 = vrot.slane %v18216_v23, 4 }
 0x1dc   : > { %v15228_v48 = vpack.c.bf16 %v11063_v35, %v11062_v26  ;;  %v11670_v35 = vld [vmem:[%s21282_s2 + $0x210] sm:$0xff] }
 0x1dd   : > { %v18792_v23 = vsel %vm4384_vm4, %v7167_v53, %v7169_v40  ;;  %v22031_v40 = vld [vmem:[#allocation24_spill] sm:$0xff] }
 0x1de   : > { %13624 = vmatmul.mubr.msk.f32.gmra.mrb[30].mxu0 %vm503_vm1, %v18753_v47  ;;  %14570 = vmatmul.mubr.msk.f32.gmra.mrb[30].mxu1 %vm503_vm1, %v22024_v55  ;;  %v18775_v47 = vsel %vm4384_vm4, %v7166_v24, %v7167_v53  ;;  %v11097_v55 = vld [vmem:[%s21282_s2 + $0x28] sm:$0xff]  ;;  %22029 = vst [vmem:[#allocation141_spill] sm:$0xff] %v18792_v23  ;;  %v22030_v24 = vld [vmem:[#allocation22_spill] sm:$0xff] }
 0x1df   : > { %13634 = vmatprep.mubr.msk.f32.mxu0 %vm503_vm1, %v21949_v44  ;;  %14572 = vmatprep.mubr.msk.f32.mxu1 %vm503_vm1, %v22025_v18  ;;  %22026 = vst [vmem:[#allocation140_spill] sm:$0xff] %v18775_v47  ;;  %v22027_v44 = vld [vmem:[#allocation135_spill] sm:$0xff]  ;;  %v22028_v18 = vld [vmem:[#allocation20_spill] sm:$0xff]  ;;  %v18795_v26 = vpack.c.bf16 %v11097_v55, %v11096_v15  ;;  %v22033_v53 = vld [vmem:[#allocation26_spill] sm:$0xff] }
 0x1e0   : > { %v11704_v55 = vld [vmem:[%s21282_s2 + $0x220] sm:$0xff] }
 0x1e2   : > { %13635 = vmatmul.mubr.msk.f32.vlgmr.msra.gmra.mrb[0].mxu0 %vm503_vm1, %v21950_v4  ;;  %14573 = vmatmul.mubr.msk.f32.gmra.mrb[0].mxu1 %vm503_vm1, %v22027_v44  ;;  %v11671_v44 = vld [vmem:[%s21282_s2 + $0x218] sm:$0xff] }
 0x1e3   : > { %13637 = vmatprep.mubr.msk.f32.mxu0 %vm503_vm1, %v22028_v18  ;;  %14575 = vmatprep.mubr.msk.f32.mxu1 %vm503_vm1, %v18775_v47  ;;  %v15364_v15 = vpack.c.bf16 %v11671_v44, %v11670_v35  ;;  %v22034_v47 = vld [vmem:[#allocation27_spill] sm:$0xff]  ;;  %v22036_v44 = vld [vmem:[#allocation29_spill] sm:$0xff]  ;;  %v22037_v35 = vld [vmem:[#allocation30_spill] sm:$0xff] }
 0x1e4   : > { %15227 = vmatpush3.bf16.msra.mxu0 %v18608_v19  ;;  %v22032_v19 = vld [vmem:[#allocation25_spill] sm:$0xff] }
 0x1e5   : > { %15229 = vmatprep.subr.bf16.mxu0 %v15228_v48 }
 0x1e6   : > { %13638 = vmatmul.mubr.msk.f32.gmra.mrb[2].mxu0 %vm503_vm1, %v22030_v24  ;;  %14576 = vmatmul.mubr.msk.f32.gmra.mrb[2].mxu1 %vm503_vm1, %v18792_v23  ;;  %v11705_v23 = vld [vmem:[%s21282_s2 + $0x228] sm:$0xff] }
 0x1e7   : > { %13640 = vmatprep.mubr.msk.f32.mxu0 %vm503_vm1, %v22031_v40  ;;  %14586 = vmatprep.mubr.msk.f32.mxu1 %vm503_vm1, %v22032_v19  ;;  %v22035_v19 = vld [vmem:[#allocation28_spill] sm:$0xff] }
 0x1e8   : > { %15231 = vmatpush3.bf16.msra.mxu0 %v15228_v48  ;;  %v18827_v48 = vpack.c.bf16 %v11705_v23, %v11704_v55  ;;  %v22042_v23 = vld [vmem:[#allocation37_spill] sm:$0xff]  ;;  %v22043_v55 = vld [vmem:[#allocation38_spill] sm:$0xff] }
 0x1e9   : > { %15233 = vmatprep.subr.bf16.mxu0 %v18795_v26 }
 0x1ea   : > { %13641 = vmatmul.mubr.msk.f32.gmra.mrb[4].mxu0 %vm503_vm1, %v22033_v53  ;;  %14587 = vmatmul.mubr.msk.f32.vlgmr.msra.gmra.mrb[4].mxu1 %vm503_vm1, %v22034_v47  ;;  %v22038_v53 = vld [vmem:[#allocation31_spill] sm:$0xff]  ;;  %v22039_v47 = vld [vmem:[#allocation32_spill] sm:$0xff] }
 0x1eb   : > { %13643 = vmatprep.mubr.msk.f32.mxu0 %vm503_vm1, %v22035_v19  ;;  %15363 = vmatpush3.bf16.msra.mxu1 %v18640_v8  ;;  %v22040_v19 = vld [vmem:[#allocation33_spill] sm:$0xff]  ;;  %v22041_v8 = vld [vmem:[#allocation36_spill] sm:$0xff] }
 0x1ec   : > { %14589 = vmatprep.mubr.msk.f32.mxu1 %vm503_vm1, %v22036_v44  ;;  %15365 = vmatprep.subr.bf16.mxu1 %v15364_v15  ;;  %v22047_v44 = vld [vmem:[#allocation45_spill] sm:$0xff] }
 0x1ee   : > { %13644 = vmatmul.mubr.msk.f32.gmra.mrb[6].mxu0 %vm503_vm1, %v22037_v35  ;;  %14590 = vmatmul.mubr.msk.f32.gmra.mrb[6].mxu1 %vm503_vm1, %v22038_v53  ;;  %v18845_v53 = vld [vmem:[%s16817_s26 + $0x90] sm:$0xff] }
 0x1ef   : > { %13646 = vmatprep.mubr.msk.f32.mxu0 %vm503_vm1, %v22039_v47  ;;  %14592 = vmatprep.mubr.msk.f32.mxu1 %vm503_vm1, %v22040_v19  ;;  %22044 = vst [vmem:[#allocation25_spill] sm:$0xff] %v18845_v53  ;;  %v22045_v19 = vld [vmem:[#allocation43_spill] sm:$0xff] }
 0x1f0   : > { %15367 = vmatpush3.bf16.msra.mxu1 %v15364_v15  ;;  %v18852_v15 = vld [vmem:[%s16817_s26 + $0x98] sm:$0xff] }
 0x1f1   : > { %15369 = vmatprep.subr.bf16.mxu1 %v18827_v48  ;;  %22046 = vst [vmem:[#allocation27_spill] sm:$0xff] %v18852_v15 }
 0x1f2   : > { %13647 = vmatmul.mubr.msk.f32.gmra.mrb[8].mxu0 %vm503_vm1, %v22041_v8  ;;  %14593 = vmatmul.mubr.msk.f32.gmra.mrb[8].mxu1 %vm503_vm1, %v22042_v23  ;;  %v18859_v23 = vld [vmem:[%s16817_s26 + $0xa8] sm:$0xff] }
 0x1f3   : > { %13649 = vmatprep.mubr.msk.f32.mxu0 %vm503_vm1, %v22043_v55  ;;  %14595 = vmatprep.mubr.msk.f32.mxu1 %vm503_vm1, %v18845_v53  ;;  %22048 = vst [vmem:[#allocation29_spill] sm:$0xff] %v18859_v23  ;;  %v22049_v55 = vld [vmem:[#allocation49_spill] sm:$0xff]  ;;  %v18866_v53 = vld [vmem:[%s16817_s26 + $0xb0] sm:$0xff] }
 0x1f4   : > { %22050 = vst [vmem:[#allocation31_spill] sm:$0xff] %v18866_v53 }
 0x1f6   : > { %13650 = vmatmul.mubr.msk.f32.gmra.mrb[10].mxu0 %vm503_vm1, %v22045_v19  ;;  %14596 = vmatmul.mubr.msk.f32.gmra.mrb[10].mxu1 %vm503_vm1, %v18852_v15  ;;  %v22051_v19 = vld [vmem:[#allocation51_spill] sm:$0xff]  ;;  %v18873_v15 = vld [vmem:[%s16817_s26 + $0xc0] sm:$0xff] }
 0x1f7   : > { %13652 = vmatprep.mubr.msk.f32.mxu0 %vm503_vm1, %v22047_v44  ;;  %14598 = vmatprep.mubr.msk.f32.mxu1 %vm503_vm1, %v18859_v23  ;;  %22052 = vst [vmem:[#allocation33_spill] sm:$0xff] %v18873_v15  ;;  %v22053_v44 = vld [vmem:[#allocation53_spill] sm:$0xff]  ;;  %v18880_v23 = vld [vmem:[%s16817_s26 + $0xc8] sm:$0xff] }
 0x1f8   : > { %22054 = vst [vmem:[#allocation37_spill] sm:$0xff] %v18880_v23 }
 0x1fa   : > { %13653 = vmatmul.mubr.msk.f32.gmra.mrb[12].mxu0 %vm503_vm1, %v22049_v55  ;;  %14599 = vmatmul.mubr.msk.f32.gmra.mrb[12].mxu1 %vm503_vm1, %v18866_v53  ;;  %v22055_v55 = vld [vmem:[#allocation55_spill] sm:$0xff]  ;;  %v18887_v53 = vld [vmem:[%s16817_s26 + $0xd8] sm:$0xff] }
 0x1fb   : > { %13655 = vmatprep.mubr.msk.f32.mxu0 %vm503_vm1, %v22051_v19  ;;  %14601 = vmatprep.mubr.msk.f32.mxu1 %vm503_vm1, %v18873_v15  ;;  %22056 = vst [vmem:[#allocation142_spill] sm:$0xff] %v18887_v53  ;;  %v22057_v19 = vld [vmem:[#allocation57_spill] sm:$0xff]  ;;  %v18894_v15 = vld [vmem:[%s16817_s26 + $0xe0] sm:$0xff] }
 0x1fc   : > { %22058 = vst [vmem:[#allocation143_spill] sm:$0xff] %v18894_v15 }
 0x1fe   : > { %13656 = vmatmul.mubr.msk.f32.gmra.mrb[14].mxu0 %vm503_vm1, %v22053_v44  ;;  %14602 = vmatmul.mubr.msk.f32.gmra.mrb[14].mxu1 %vm503_vm1, %v18880_v23  ;;  %v22059_v44 = vld [vmem:[#allocation59_spill] sm:$0xff]  ;;  %v18901_v23 = vld [vmem:[%s16817_s26 + $0xf0] sm:$0xff] }
 0x1ff   : > { %13658 = vmatprep.mubr.msk.f32.mxu0 %vm503_vm1, %v22055_v55  ;;  %14604 = vmatprep.mubr.msk.f32.mxu1 %vm503_vm1, %v18887_v53  ;;  %22060 = vst [vmem:[#allocation144_spill] sm:$0xff] %v18901_v23  ;;  %v22061_v55 = vld [vmem:[#allocation61_spill] sm:$0xff] }
 0x200   : > { %v18908_v53 = vld [vmem:[%s16817_s26 + $0xf8] sm:$0xff] }
 0x201   : > { %22062 = vst [vmem:[#allocation145_spill] sm:$0xff] %v18908_v53 }
 0x202   : > { %13659 = vmatmul.mubr.msk.f32.gmra.mrb[16].mxu0 %vm503_vm1, %v22057_v19  ;;  %14605 = vmatmul.mubr.msk.f32.gmra.mrb[16].mxu1 %vm503_vm1, %v18894_v15  ;;  %v22063_v19 = vld [vmem:[#allocation63_spill] sm:$0xff] }
 0x203   : > { %13661 = vmatprep.mubr.msk.f32.mxu0 %vm503_vm1, %v22059_v44  ;;  %14607 = vmatprep.mubr.msk.f32.mxu1 %vm503_vm1, %v18901_v23  ;;  %v18915_v15 = vld [vmem:[%s16817_s26 + $0x108] sm:$0xff]  ;;  %v22065_v44 = vld [vmem:[#allocation65_spill] sm:$0xff]  ;;  %v18922_v23 = vld [vmem:[%s16817_s26 + $0x110] sm:$0xff] }
 0x204   : > { %22064 = vst [vmem:[#allocation146_spill] sm:$0xff] %v18915_v15  ;;  %22066 = vst [vmem:[#allocation147_spill] sm:$0xff] %v18922_v23 }
 0x206   : > { %13662 = vmatmul.mubr.msk.f32.gmra.mrb[18].mxu0 %vm503_vm1, %v22061_v55  ;;  %14608 = vmatmul.mubr.msk.f32.gmra.mrb[18].mxu1 %vm503_vm1, %v18908_v53  ;;  %v18929_v53 = vld [vmem:[%s16817_s26 + $0x120] sm:$0xff] }
 0x207   : > { %13664 = vmatprep.mubr.msk.f32.mxu0 %vm503_vm1, %v22063_v19  ;;  %14610 = vmatprep.mubr.msk.f32.mxu1 %vm503_vm1, %v18915_v15  ;;  %22067 = vst [vmem:[#allocation148_spill] sm:$0xff] %v18929_v53  ;;  %v22068_v19 = vld [vmem:[#allocation69_spill] sm:$0xff]  ;;  %v18936_v15 = vld [vmem:[%s16817_s26 + $0x128] sm:$0xff] }
 0x208   : > { %22069 = vst [vmem:[#allocation149_spill] sm:$0xff] %v18936_v15 }
 0x20a   : > { %13665 = vmatmul.mubr.msk.f32.gmra.mrb[20].mxu0 %vm503_vm1, %v22065_v44  ;;  %14611 = vmatmul.mubr.msk.f32.gmra.mrb[20].mxu1 %vm503_vm1, %v18922_v23  ;;  %v22070_v44 = vld [vmem:[#allocation9_spill] sm:$0xff] }
 0x20b   : > { %13667 = vmatprep.mubr.msk.f32.mxu0 %vm503_vm1, %v21971_v32  ;;  %14613 = vmatprep.mubr.msk.f32.mxu1 %vm503_vm1, %v18929_v53  ;;  %v18943_v23 = vld [vmem:[%s16817_s26 + $0x138] sm:$0xff]  ;;  %v18950_v53 = vld [vmem:[%s16817_s26 + $0x140] sm:$0xff] }
 0x20c   : > { %22071 = vst [vmem:[#allocation150_spill] sm:$0xff] %v18943_v23  ;;  %22072 = vst [vmem:[#allocation151_spill] sm:$0xff] %v18950_v53 }
 0x20e   : > { %13668 = vmatmul.mubr.msk.f32.gmra.mrb[22].mxu0 %vm503_vm1, %v22068_v19  ;;  %14614 = vmatmul.mubr.msk.f32.gmra.mrb[22].mxu1 %vm503_vm1, %v18936_v15  ;;  %v18957_v15 = vld [vmem:[%s16817_s26 + $0x150] sm:$0xff]  ;;  %v18966_v19 = vld [vmem:[%s16817_s26 + $0x158] sm:$0xff] }
 0x20f   : > { %13670 = vmatprep.mubr.msk.f32.mxu0 %vm503_vm1, %v22070_v44  ;;  %14616 = vmatprep.mubr.msk.f32.mxu1 %vm503_vm1, %v18943_v23  ;;  %22073 = vst [vmem:[#allocation152_spill] sm:$0xff] %v18957_v15  ;;  %v2665_v23 = vrot.slane %v18716_v38, 2  ;;  %v2666_v44 = vrot.slane %v18719_v7, 2  ;;  %22075 = vst [vmem:[#allocation153_spill] sm:$0xff] %v18966_v19 }
 0x212   : > { %13671 = vmatmul.mubr.msk.f32.gmra.mrb[24].mxu0 %vm503_vm1, %v21974_v28  ;;  %14617 = vmatmul.mubr.msk.f32.gmra.mrb[24].mxu1 %vm503_vm1, %v18950_v53  ;;  %v22074_v28 = vld [vmem:[#allocation15_spill] sm:$0xff]  ;;  %v2668_v53 = vrot.slane %v18732_v17, 2 }
 0x213   : > { %13673 = vmatprep.mubr.msk.f32.mxu0 %vm503_vm1, %v21975_v16  ;;  %14619 = vmatprep.mubr.msk.f32.mxu1 %vm503_vm1, %v18957_v15  ;;  %v18974_v15 = vld [vmem:[%s16817_s26 + $0x168] sm:$0xff]  ;;  %v18979_v16 = vsel %vm422_vm0, %v2665_v23, %v2666_v44  ;;  %v11098_v23 = vld [vmem:[%s21282_s2 + $0x30] sm:$0xff] }
 0x214   : > { %22076 = vst [vmem:[#allocation154_spill] sm:$0xff] %v18974_v15  ;;  %22077 = vst [vmem:[#allocation155_spill] sm:$0xff] %v18979_v16 }
 0x216   : > { %13674 = vmatmul.mubr.msk.f32.gmra.mrb[26].mxu0 %vm503_vm1, %v22074_v28  ;;  %14620 = vmatmul.mubr.msk.f32.gmra.mrb[26].mxu1 %vm503_vm1, %v18966_v19  ;;  %v18984_v28 = vld [vmem:[%s16817_s26 + $0x170] sm:$0xff]  ;;  %v18991_v19 = vsel %vm422_vm0, %v2666_v44, %v2668_v53  ;;  %v3302_v53 = vld [vmem:[%s21282_s2] sm:$0xff]  ;;  %v3303_v44 = vld [vmem:[%s21282_s2 + $0x8] sm:$0xff] }
 0x217   : > { %13676 = vmatprep.mubr.msk.f32.mxu0 %vm503_vm1, %v18397_v20  ;;  %14622 = vmatprep.mubr.msk.f32.mxu1 %vm503_vm1, %v18974_v15  ;;  %22078 = vst [vmem:[#allocation156_spill] sm:$0xff] %v18984_v28  ;;  %22079 = vst [vmem:[#allocation157_spill] sm:$0xff] %v18991_v19  ;;  %v16556_v20 = vld [vmem:[%s16817_s26 + $0x180] sm:$0xff]  ;;  %v16557_v15 = vld [vmem:[%s16817_s26 + $0x188] sm:$0xff] }
 0x21a   : > { %13677 = vmatmul.mubr.msk.f32.gmra.mrb[28].mxu0 %vm503_vm1, %v18406_v2  ;;  %14623 = vmatmul.mubr.msk.f32.gmra.mrb[28].mxu1 %vm503_vm1, %v18984_v28  ;;  %v11099_v28 = vld [vmem:[%s21282_s2 + $0x38] sm:$0xff] }
 0x21b   : > { %13679 = vmatprep.mubr.msk.f32.mxu0 %vm503_vm1, %v18979_v16  ;;  %14625 = vmatprep.mubr.msk.f32.mxu1 %vm503_vm1, %v16556_v20  ;;  %v15236_v20 = vpack.c.bf16 %v11099_v28, %v11098_v23  ;;  %v11706_v28 = vld [vmem:[%s21282_s2 + $0x230] sm:$0xff]  ;;  %v11741_v23 = vld [vmem:[%s21282_s2 + $0x248] sm:$0xff] }
 0x21e   : > { %13680 = vmatmul.mubr.msk.f32.gmra.mrb[30].mxu0 %vm503_vm1, %v18991_v19  ;;  %14626 = vmatmul.mubr.msk.f32.gmra.mrb[30].mxu1 %vm503_vm1, %v16557_v15  ;;  %v11740_v15 = vld [vmem:[%s21282_s2 + $0x240] sm:$0xff] }
 0x21f   : > { %13690 = vmatprep.mubr.msk.f32.mxu0 %vm503_vm1, %v21906_v59  ;;  %14628 = vmatprep.mubr.msk.f32.mxu1 %vm503_vm1, %v18078_v54  ;;  %v19024_v54 = vpack.c.bf16 %v3303_v44, %v3302_v53  ;;  %v22081_v53 = vld [vmem:[#allocation73_spill] sm:$0xff]  ;;  %v22082_v44 = vld [vmem:[#allocation112_spill] sm:$0xff] }
 0x222   : > { %13691 = vmatmul.mubr.msk.f32.vlgmr.msra.gmra.mrb[0].mxu0 %vm503_vm1, %v21907_v63  ;;  %14629 = vmatmul.mubr.msk.f32.gmra.mrb[0].mxu1 %vm503_vm1, %v18095_v46  ;;  %v11707_v46 = vld [vmem:[%s21282_s2 + $0x238] sm:$0xff] }
 0x223   : > { %13693 = vmatprep.mubr.msk.f32.mxu0 %vm503_vm1, %v21908_v13  ;;  %14631 = vmatprep.mubr.msk.f32.mxu1 %vm503_vm1, %v18716_v38 }
 0x224   : > { %15235 = vmatpush3.bf16.msra.mxu0 %v18795_v26  ;;  %v15372_v26 = vpack.c.bf16 %v11707_v46, %v11706_v28  ;;  %v22083_v28 = vld [vmem:[#allocation74_spill] sm:$0xff] }
 0x225   : > { %15237 = vmatprep.subr.bf16.mxu0 %v15236_v20  ;;  %v22084_v46 = vld [vmem:[#allocation114_spill] sm:$0xff] }
 0x226   : > { %13694 = vmatmul.mubr.msk.f32.gmra.mrb[2].mxu0 %vm503_vm1, %v21910_v12  ;;  %14632 = vmatmul.mubr.msk.f32.gmra.mrb[2].mxu1 %vm503_vm1, %v18719_v7 }
 0x227   : > { %13696 = vmatprep.mubr.msk.f32.mxu0 %vm503_vm1, %v21912_v58  ;;  %14642 = vmatprep.mubr.msk.f32.mxu1 %vm503_vm1, %v21935_v30 }
 0x228   : > { %15239 = vmatpush3.bf16.msra.mxu0 %v15236_v20  ;;  %v19056_v20 = vpack.c.bf16 %v11741_v23, %v11740_v15  ;;  %v22086_v15 = vld [vmem:[#allocation116_spill] sm:$0xff]  ;;  %v22087_v23 = vld [vmem:[#allocation78_spill] sm:$0xff] }
 0x229   : > { %15241 = vmatprep.subr.bf16.mxu0 %v19024_v54 }
 0x22a   : > { %13697 = vmatmul.mubr.msk.f32.gmra.mrb[4].mxu0 %vm503_vm1, %v21914_v22  ;;  %14643 = vmatmul.mubr.msk.f32.vlgmr.msra.gmra.mrb[4].mxu1 %vm503_vm1, %v17495_v36 }
 0x22b   : > { %13699 = vmatprep.mubr.msk.f32.mxu0 %vm503_vm1, %v21916_v1  ;;  %15371 = vmatpush3.bf16.msra.mxu1 %v18827_v48  ;;  %v22080_v48 = vld [vmem:[#allocation110_spill] sm:$0xff] }
 0x22c   : > { %14645 = vmatprep.mubr.msk.f32.mxu1 %vm503_vm1, %v17505_v3  ;;  %15373 = vmatprep.subr.bf16.mxu1 %v15372_v26 }
 0x22e   : > { %13700 = vmatmul.mubr.msk.f32.gmra.mrb[6].mxu0 %vm503_vm1, %v21918_v0  ;;  %14646 = vmatmul.mubr.msk.f32.gmra.mrb[6].mxu1 %vm503_vm1, %v17522_v14 }
 0x22f   : > { %13702 = vmatprep.mubr.msk.f32.mxu0 %vm503_vm1, %v21920_v52  ;;  %14648 = vmatprep.mubr.msk.f32.mxu1 %vm503_vm1, %v17534_v57 }
 0x230   : > { %15375 = vmatpush3.bf16.msra.mxu1 %v15372_v26  ;;  %v22085_v26 = vld [vmem:[#allocation76_spill] sm:$0xff] }
 0x231   : > { %15377 = vmatprep.subr.bf16.mxu1 %v19056_v20 }
 0x232   : > { %13703 = vmatmul.mubr.msk.f32.gmra.mrb[8].mxu0 %vm503_vm1, %v21921_v31  ;;  %14649 = vmatmul.mubr.msk.f32.gmra.mrb[8].mxu1 %vm503_vm1, %v17556_v62 }
 0x233   : > { %13705 = vmatprep.mubr.msk.f32.mxu0 %vm503_vm1, %v21922_v21  ;;  %14651 = vmatprep.mubr.msk.f32.mxu1 %vm503_vm1, %v17574_v39  ;;  %v22103_v21 = vld [vmem:[#allocation44_spill] sm:$0xff] }
 0x236   : > { %13706 = vmatmul.mubr.msk.f32.gmra.mrb[10].mxu0 %vm503_vm1, %v21923_v33  ;;  %14652 = vmatmul.mubr.msk.f32.gmra.mrb[10].mxu1 %vm503_vm1, %v17592_v25 }
 0x237   : > { %13708 = vmatprep.mubr.msk.f32.mxu0 %vm503_vm1, %v21924_v61  ;;  %14654 = vmatprep.mubr.msk.f32.mxu1 %vm503_vm1, %v17601_v51  ;;  %v22098_v61 = vld [vmem:[#allocation126_spill] sm:$0xff] }
 0x23a   : > { %13709 = vmatmul.mubr.msk.f32.gmra.mrb[12].mxu0 %vm503_vm1, %v17281_v5  ;;  %14655 = vmatmul.mubr.msk.f32.gmra.mrb[12].mxu1 %vm503_vm1, %v21936_v45  ;;  %v19162_v5 = vld [vmem:[%s16817_s26 + $0x10] sm:$0xf] }
 0x23b   : > { %13711 = vmatprep.mubr.msk.f32.mxu0 %vm503_vm1, %v21925_v41  ;;  %14657 = vmatprep.mubr.msk.f32.mxu1 %vm503_vm1, %v21937_v43  ;;  %22096 = vst [vmem:[#allocation159_spill] sm:$0xff] %v19162_v5 }
 0x23e   : > { %13712 = vmatmul.mubr.msk.f32.gmra.mrb[14].mxu0 %vm503_vm1, %v21926_v42  ;;  %14658 = vmatmul.mubr.msk.f32.gmra.mrb[14].mxu1 %vm503_vm1, %v21938_v11  ;;  %v22094_v42 = vld [vmem:[#allocation124_spill] sm:$0xff] }
 0x23f   : > { %13714 = vmatprep.mubr.msk.f32.mxu0 %vm503_vm1, %v21927_v9  ;;  %14660 = vmatprep.mubr.msk.f32.mxu1 %vm503_vm1, %v21939_v50  ;;  %v22093_v9 = vld [vmem:[#allocation136_spill] sm:$0xff] }
 0x242   : > { %13715 = vmatmul.mubr.msk.f32.gmra.mrb[16].mxu0 %vm503_vm1, %v21928_v10  ;;  %14661 = vmatmul.mubr.msk.f32.gmra.mrb[16].mxu1 %vm503_vm1, %v17670_v27  ;;  %v22091_v10 = vld [vmem:[#allocation82_spill] sm:$0xff] }
 0x243   : > { %13717 = vmatprep.mubr.msk.f32.mxu0 %vm503_vm1, %v21929_v34  ;;  %14663 = vmatprep.mubr.msk.f32.mxu1 %vm503_vm1, %v21940_v29  ;;  %v19145_v34 = vld [vmem:[%s16817_s26 + $0x8] sm:$0xff] }
 0x244   : > { %v3315_v41 = vrot.slane %v19145_v34, 1 }
 0x246   : > { %13718 = vmatmul.mubr.msk.f32.gmra.mrb[18].mxu0 %vm503_vm1, %v21930_v56  ;;  %14664 = vmatmul.mubr.msk.f32.gmra.mrb[18].mxu1 %vm503_vm1, %v17696_v60  ;;  %v19142_v56 = vld [vmem:[%s16817_s26] sm:$0xff] }
 0x247   : > { %13720 = vmatprep.mubr.msk.f32.mxu0 %vm503_vm1, %v21931_v6  ;;  %14666 = vmatprep.mubr.msk.f32.mxu1 %vm503_vm1, %v21993_v37  ;;  %v2936_v6 = vrot.slane %v18716_v38, 3 }
 0x24a   : > { %13721 = vmatmul.mubr.msk.f32.gmra.mrb[20].mxu0 %vm503_vm1, %v21932_v49  ;;  %14667 = vmatmul.mubr.msk.f32.gmra.mrb[20].mxu1 %vm503_vm1, %v22080_v48  ;;  %v22088_v49 = vld [vmem:[#allocation118_spill] sm:$0xff] }
 0x24b   : > { %13723 = vmatprep.mubr.msk.f32.mxu0 %vm503_vm1, %v22081_v53  ;;  %14669 = vmatprep.mubr.msk.f32.mxu1 %vm503_vm1, %v22082_v44  ;;  %v22089_v53 = vld [vmem:[#allocation80_spill] sm:$0xff] }
 0x24e   : > { %13724 = vmatmul.mubr.msk.f32.gmra.mrb[22].mxu0 %vm503_vm1, %v22083_v28  ;;  %14670 = vmatmul.mubr.msk.f32.gmra.mrb[22].mxu1 %vm503_vm1, %v22084_v46  ;;  %v22090_v28 = vld [vmem:[#allocation120_spill] sm:$0xff] }
 0x24f   : > { %13726 = vmatprep.mubr.msk.f32.mxu0 %vm503_vm1, %v22085_v26  ;;  %14672 = vmatprep.mubr.msk.f32.mxu1 %vm503_vm1, %v22086_v15  ;;  %v2937_v26 = vrot.slane %v18719_v7, 3  ;;  %v3314_v7 = vrot.slane %v19142_v56, 1 }
 0x251   : > { %v19157_v38 = vsel %vm1168_vm2, %v2936_v6, %v2937_v26  ;;  %v3317_v6 = vrot.slane %v19162_v5, 1  ;;  %v3316_v33 = vsel %vm793_vm3, %v3314_v7, %v3315_v41  ;;  %v11165_v5 = vld [vmem:[%s21282_s2 + $0x48] sm:$0xff] }
 0x252   : > { %13727 = vmatmul.mubr.msk.f32.gmra.mrb[24].mxu0 %vm503_vm1, %v22087_v23  ;;  %14673 = vmatmul.mubr.msk.f32.gmra.mrb[24].mxu1 %vm503_vm1, %v22088_v49  ;;  %v22092_v23 = vld [vmem:[#allocation122_spill] sm:$0xff]  ;;  %22095 = vst [vmem:[#allocation158_spill] sm:$0xff] %v19157_v38 }
 0x253   : > { %13729 = vmatprep.mubr.msk.f32.mxu0 %vm503_vm1, %v22089_v53  ;;  %14675 = vmatprep.mubr.msk.f32.mxu1 %vm503_vm1, %v22090_v28  ;;  %v2939_v53 = vrot.slane %v18732_v17, 3 }
 0x255   : > { %v19171_v17 = vsel %vm1168_vm2, %v2937_v26, %v2939_v53  ;;  %v22101_v53 = vld [vmem:[#allocation130_spill] sm:$0xff]  ;;  %v3318_v26 = vsel %vm793_vm3, %v3315_v41, %v3317_v6  ;;  %v11742_v6 = vld [vmem:[%s21282_s2 + $0x250] sm:$0xff] }
 0x256   : > { %13730 = vmatmul.mubr.msk.f32.gmra.mrb[26].mxu0 %vm503_vm1, %v22091_v10  ;;  %14676 = vmatmul.mubr.msk.f32.gmra.mrb[26].mxu1 %vm503_vm1, %v22092_v23  ;;  %v22097_v10 = vld [vmem:[#allocation137_spill] sm:$0xff]  ;;  %22099 = vst [vmem:[#allocation160_spill] sm:$0xff] %v19171_v17  ;;  %v22105_v41 = vld [vmem:[#allocation138_spill] sm:$0xff] }
 0x257   : > { %13732 = vmatprep.mubr.msk.f32.mxu0 %vm503_vm1, %v22093_v9  ;;  %14678 = vmatprep.mubr.msk.f32.mxu1 %vm503_vm1, %v22094_v42  ;;  %v22100_v9 = vld [vmem:[#allocation128_spill] sm:$0xff] }
 0x25a   : > { %13733 = vmatmul.mubr.msk.f32.gmra.mrb[28].mxu0 %vm503_vm1, %v22097_v10  ;;  %14679 = vmatmul.mubr.msk.f32.gmra.mrb[28].mxu1 %vm503_vm1, %v22098_v61  ;;  %v3304_v10 = vld [vmem:[%s21282_s2 + $0x10] sm:$0xff] }
 0x25b   : > { %13735 = vmatprep.mubr.msk.f32.mxu0 %vm503_vm1, %v19157_v38  ;;  %14681 = vmatprep.mubr.msk.f32.mxu1 %vm503_vm1, %v22100_v9  ;;  %v3305_v38 = vld [vmem:[%s21282_s2 + $0x18] sm:$0xff]  ;;  %v22102_v9 = vld [vmem:[#allocation40_spill] sm:$0xff] }
 0x25c   : > { %v15244_v7 = vpack.c.bf16 %v3305_v38, %v3304_v10  ;;  %v22106_v38 = vld [vmem:[#allocation77_spill] sm:$0xff] }
 0x25e   : > { %13736 = vmatmul.mubr.msk.f32.gmra.mrb[30].mxu0 %vm503_vm1, %v19171_v17  ;;  %14682 = vmatmul.mubr.msk.f32.gmra.mrb[30].mxu1 %vm503_vm1, %v22101_v53  ;;  %v11164_v17 = vld [vmem:[%s21282_s2 + $0x40] sm:$0xff]  ;;  %v22123_v53 = vld [vmem:[#allocation65_spill] sm:$0xff] }
 0x25f   : > { %13746 = vmatprep.mubr.msk.f32.mxu0 %vm503_vm1, %v3316_v33  ;;  %14684 = vmatprep.mubr.msk.f32.mxu1 %vm503_vm1, %v22102_v9  ;;  %v22104_v33 = vld [vmem:[#allocation75_spill] sm:$0xff]  ;;  %v19205_v10 = vpack.c.bf16 %v11165_v5, %v11164_v17  ;;  %v22110_v17 = vld [vmem:[#allocation81_spill] sm:$0xff] }
 0x260   : > { %v22122_v9 = vld [vmem:[#allocation63_spill] sm:$0xff] }
 0x262   : > { %13747 = vmatmul.mubr.msk.f32.vlgmr.msra.gmra.mrb[32].mxu0 %vm503_vm1, %v3318_v26  ;;  %14685 = vmatmul.mubr.msk.f32.gmra.mrb[0].mxu1 %vm503_vm1, %v22103_v21  ;;  %v11743_v26 = vld [vmem:[%s21282_s2 + $0x258] sm:$0xff]  ;;  %v22121_v21 = vld [vmem:[#allocation59_spill] sm:$0xff] }
 0x263   : > { %13749 = vmatprep.mubr.msk.f32.mxu0 %vm503_vm1, %v22104_v33  ;;  %14687 = vmatprep.mubr.msk.f32.mxu1 %vm503_vm1, %v22105_v41  ;;  %v22107_v33 = vld [vmem:[#allocation139_spill] sm:$0xff]  ;;  %v15380_v5 = vpack.c.bf16 %v11743_v26, %v11742_v6  ;;  %v22115_v26 = vld [vmem:[#allocation45_spill] sm:$0xff] }
 0x264   : > { %15243 = vmatpush3.bf16.msra.mxu0 %v19024_v54  ;;  %v22108_v41 = vld [vmem:[#allocation79_spill] sm:$0xff]  ;;  %v22109_v54 = vld [vmem:[#allocation16_spill] sm:$0xff] }
 0x265   : > { %15245 = vmatprep.subr.bf16.mxu0 %v15244_v7  ;;  %v22114_v6 = vld [vmem:[#allocation43_spill] sm:$0xff] }
 0x266   : > { %13750 = vmatmul.mubr.msk.f32.gmra.mrb[34].mxu0 %vm503_vm1, %v22106_v38  ;;  %14688 = vmatmul.mubr.msk.f32.gmra.mrb[2].mxu1 %vm503_vm1, %v22107_v33  ;;  %v11776_v38 = vld [vmem:[%s21282_s2 + $0x260] sm:$0xff]  ;;  %v11777_v33 = vld [vmem:[%s21282_s2 + $0x268] sm:$0xff] }
 0x267   : > { %13752 = vmatprep.mubr.msk.f32.mxu0 %vm503_vm1, %v22108_v41  ;;  %14698 = vmatprep.mubr.msk.f32.mxu1 %vm503_vm1, %v22109_v54  ;;  %v22120_v41 = vld [vmem:[#allocation57_spill] sm:$0xff] }
 0x268   : > { %15247 = vmatpush3.bf16.msra.mxu0 %v15244_v7  ;;  %v19237_v7 = vpack.c.bf16 %v11777_v33, %v11776_v38  ;;  %v22112_v33 = vld [vmem:[#allocation28_spill] sm:$0xff]  ;;  %v22113_v38 = vld [vmem:[#allocation38_spill] sm:$0xff] }
 0x269   : > { %15249 = vmatprep.subr.bf16.mxu0 %v19205_v10 }
 0x26a   : > { %13753 = vmatmul.mubr.msk.f32.gmra.mrb[36].mxu0 %vm503_vm1, %v22110_v17  ;;  %14699 = vmatmul.mubr.msk.f32.vlgmr.msra.gmra.mrb[4].mxu1 %vm503_vm1, %v21950_v4  ;;  %v22119_v17 = vld [vmem:[#allocation55_spill] sm:$0xff] }
 0x26b   : > { %13755 = vmatprep.mubr.msk.f32.mxu0 %vm503_vm1, %v21935_v30  ;;  %15379 = vmatpush3.bf16.msra.mxu1 %v19056_v20  ;;  %v22111_v20 = vld [vmem:[#allocation26_spill] sm:$0xff]  ;;  %v22118_v30 = vld [vmem:[#allocation53_spill] sm:$0xff] }
 0x26c   : > { %14701 = vmatprep.mubr.msk.f32.mxu1 %vm503_vm1, %v22028_v18  ;;  %15381 = vmatprep.subr.bf16.mxu1 %v15380_v5 }
 0x26e   : > { %13756 = vmatmul.mubr.msk.f32.gmra.mrb[38].mxu0 %vm503_vm1, %v17495_v36  ;;  %14702 = vmatmul.mubr.msk.f32.gmra.mrb[6].mxu1 %vm503_vm1, %v22030_v24  ;;  %v22117_v36 = vld [vmem:[#allocation51_spill] sm:$0xff] }
 0x26f   : > { %13758 = vmatprep.mubr.msk.f32.mxu0 %vm503_vm1, %v17505_v3  ;;  %14704 = vmatprep.mubr.msk.f32.mxu1 %vm503_vm1, %v22031_v40  ;;  %v3843_v3 = vrot.slane %v19145_v34, 2 }
 0x270   : > { %15383 = vmatpush3.bf16.msra.mxu1 %v15380_v5  ;;  %v22116_v5 = vld [vmem:[#allocation49_spill] sm:$0xff] }
 0x271   : > { %15385 = vmatprep.subr.bf16.mxu1 %v19237_v7 }
 0x272   : > { %13759 = vmatmul.mubr.msk.f32.gmra.mrb[40].mxu0 %vm503_vm1, %v17522_v14  ;;  %14705 = vmatmul.mubr.msk.f32.gmra.mrb[8].mxu1 %vm503_vm1, %v22111_v20  ;;  %v22167_v14 = vld [vmem:[#allocation76_spill] sm:$0xff] }
 0x273   : > { %13761 = vmatprep.mubr.msk.f32.mxu0 %vm503_vm1, %v17534_v57  ;;  %14707 = vmatprep.mubr.msk.f32.mxu1 %vm503_vm1, %v22112_v33  ;;  %v22165_v57 = vld [vmem:[#allocation74_spill] sm:$0xff] }
 0x276   : > { %13762 = vmatmul.mubr.msk.f32.gmra.mrb[42].mxu0 %vm503_vm1, %v17556_v62  ;;  %14708 = vmatmul.mubr.msk.f32.gmra.mrb[10].mxu1 %vm503_vm1, %v22037_v35  ;;  %v22163_v62 = vld [vmem:[#allocation73_spill] sm:$0xff] }
 0x277   : > { %13764 = vmatprep.mubr.msk.f32.mxu0 %vm503_vm1, %v17574_v39  ;;  %14710 = vmatprep.mubr.msk.f32.mxu1 %vm503_vm1, %v22039_v47  ;;  %v22161_v39 = vld [vmem:[#allocation72_spill] sm:$0xff] }
 0x27a   : > { %13765 = vmatmul.mubr.msk.f32.gmra.mrb[44].mxu0 %vm503_vm1, %v17592_v25  ;;  %14711 = vmatmul.mubr.msk.f32.gmra.mrb[12].mxu1 %vm503_vm1, %v22041_v8  ;;  %v22159_v25 = vld [vmem:[#allocation71_spill] sm:$0xff] }
 0x27b   : > { %13767 = vmatprep.mubr.msk.f32.mxu0 %vm503_vm1, %v17601_v51  ;;  %14713 = vmatprep.mubr.msk.f32.mxu1 %vm503_vm1, %v22113_v38  ;;  %v22157_v51 = vld [vmem:[#allocation70_spill] sm:$0xff] }
 0x27e   : > { %13768 = vmatmul.mubr.msk.f32.gmra.mrb[46].mxu0 %vm503_vm1, %v21936_v45  ;;  %14714 = vmatmul.mubr.msk.f32.gmra.mrb[14].mxu1 %vm503_vm1, %v22114_v6  ;;  %v22155_v45 = vld [vmem:[#allocation68_spill] sm:$0xff] }
 0x27f   : > { %13770 = vmatprep.mubr.msk.f32.mxu0 %vm503_vm1, %v21937_v43  ;;  %14716 = vmatprep.mubr.msk.f32.mxu1 %vm503_vm1, %v22115_v26  ;;  %v22153_v43 = vld [vmem:[#allocation66_spill] sm:$0xff] }
 0x282   : > { %13771 = vmatmul.mubr.msk.f32.gmra.mrb[48].mxu0 %vm503_vm1, %v21938_v11  ;;  %14717 = vmatmul.mubr.msk.f32.gmra.mrb[16].mxu1 %vm503_vm1, %v22116_v5  ;;  %v22151_v11 = vld [vmem:[#allocation64_spill] sm:$0xff] }
 0x283   : > { %13773 = vmatprep.mubr.msk.f32.mxu0 %vm503_vm1, %v21939_v50  ;;  %14719 = vmatprep.mubr.msk.f32.mxu1 %vm503_vm1, %v22117_v36  ;;  %v22149_v50 = vld [vmem:[#allocation62_spill] sm:$0xff] }
 0x286   : > { %13774 = vmatmul.mubr.msk.f32.gmra.mrb[50].mxu0 %vm503_vm1, %v17670_v27  ;;  %14720 = vmatmul.mubr.msk.f32.gmra.mrb[18].mxu1 %vm503_vm1, %v22118_v30  ;;  %v22147_v27 = vld [vmem:[#allocation60_spill] sm:$0xff] }
 0x287   : > { %13776 = vmatprep.mubr.msk.f32.mxu0 %vm503_vm1, %v21940_v29  ;;  %14722 = vmatprep.mubr.msk.f32.mxu1 %vm503_vm1, %v22119_v17  ;;  %v22145_v29 = vld [vmem:[#allocation58_spill] sm:$0xff] }
 0x28a   : > { %13777 = vmatmul.mubr.msk.f32.gmra.mrb[52].mxu0 %vm503_vm1, %v17696_v60  ;;  %14723 = vmatmul.mubr.msk.f32.gmra.mrb[20].mxu1 %vm503_vm1, %v22120_v41  ;;  %v22143_v60 = vld [vmem:[#allocation56_spill] sm:$0xff] }
 0x28b   : > { %13779 = vmatprep.mubr.msk.f32.mxu0 %vm503_vm1, %v21993_v37  ;;  %14725 = vmatprep.mubr.msk.f32.mxu1 %vm503_vm1, %v22121_v21  ;;  %v11201_v37 = vld [vmem:[%s21282_s2 + $0x68] sm:$0xff] }
 0x28e   : > { %13780 = vmatmul.mubr.msk.f32.gmra.mrb[54].mxu0 %vm503_vm1, %v22080_v48  ;;  %14726 = vmatmul.mubr.msk.f32.gmra.mrb[22].mxu1 %vm503_vm1, %v22061_v55  ;;  %v22124_v48 = vld [vmem:[#allocation69_spill] sm:$0xff] }
 0x28f   : > { %13782 = vmatprep.mubr.msk.f32.mxu0 %vm503_vm1, %v22082_v44  ;;  %14728 = vmatprep.mubr.msk.f32.mxu1 %vm503_vm1, %v22122_v9  ;;  %v22125_v44 = vld [vmem:[#allocation9_spill] sm:$0xff] }
 0x292   : > { %13783 = vmatmul.mubr.msk.f32.gmra.mrb[56].mxu0 %vm503_vm1, %v22084_v46  ;;  %14729 = vmatmul.mubr.msk.f32.gmra.mrb[24].mxu1 %vm503_vm1, %v22123_v53  ;;  %v22128_v46 = vld [vmem:[#allocation15_spill] sm:$0xff] }
 0x293   : > { %13785 = vmatprep.mubr.msk.f32.mxu0 %vm503_vm1, %v22086_v15  ;;  %14731 = vmatprep.mubr.msk.f32.mxu1 %vm503_vm1, %v21971_v32  ;;  %v22126_v15 = vld [vmem:[#allocation11_spill] sm:$0xff] }
 0x296   : > { %13786 = vmatmul.mubr.msk.f32.gmra.mrb[58].mxu0 %vm503_vm1, %v22088_v49  ;;  %14732 = vmatmul.mubr.msk.f32.gmra.mrb[26].mxu1 %vm503_vm1, %v22124_v48  ;;  %v22127_v49 = vld [vmem:[#allocation13_spill] sm:$0xff] }
 0x297   : > { %13788 = vmatprep.mubr.msk.f32.mxu0 %vm503_vm1, %v22090_v28  ;;  %14734 = vmatprep.mubr.msk.f32.mxu1 %vm503_vm1, %v22125_v44  ;;  %v11166_v28 = vld [vmem:[%s21282_s2 + $0x50] sm:$0xff] }
 0x29a   : > { %13789 = vmatmul.mubr.msk.f32.gmra.mrb[60].mxu0 %vm503_vm1, %v22092_v23  ;;  %14735 = vmatmul.mubr.msk.f32.gmra.mrb[28].mxu1 %vm503_vm1, %v22126_v15  ;;  %v11167_v23 = vld [vmem:[%s21282_s2 + $0x58] sm:$0xff] }
 0x29b   : > { %13791 = vmatprep.mubr.msk.f32.mxu0 %vm503_vm1, %v22094_v42  ;;  %14737 = vmatprep.mubr.msk.f32.mxu1 %vm503_vm1, %v22127_v49  ;;  %v22129_v42 = vld [vmem:[#allocation47_spill] sm:$0xff]  ;;  %v15252_v49 = vpack.c.bf16 %v11167_v23, %v11166_v28  ;;  %v19371_v23 = vld [vmem:[%s16817_s26 + $0x20] sm:$0xff] }
 0x29c   : > { %22131 = vst [vmem:[#allocation162_spill] sm:$0xff] %v19371_v23 }
 0x29e   : > { %13792 = vmatmul.mubr.msk.f32.gmra.mrb[62].mxu0 %vm503_vm1, %v22098_v61  ;;  %14738 = vmatmul.mubr.msk.f32.gmra.mrb[30].mxu1 %vm503_vm1, %v22128_v46  ;;  %v11200_v61 = vld [vmem:[%s21282_s2 + $0x60] sm:$0xff]  ;;  %v19361_v46 = vld [vmem:[%s16817_s26 + $0x18] sm:$0xff] }
 0x29f   : > { %13802 = vmatprep.mubr.msk.f32.mxu0 %vm503_vm1, %v19142_v56  ;;  %14740 = vmatprep.mubr.msk.f32.mxu1 %vm503_vm1, %v22129_v42  ;;  %22130 = vst [vmem:[#allocation161_spill] sm:$0xff] %v19361_v46  ;;  %v19368_v28 = vpack.c.bf16 %v11201_v37, %v11200_v61  ;;  %v11779_v42 = vld [vmem:[%s21282_s2 + $0x278] sm:$0xff] }
 0x2a0   : > { %v19392_v37 = vld [vmem:[%s16817_s26 + $0x38] sm:$0xff] }
 0x2a1   : > { %22133 = vst [vmem:[#allocation164_spill] sm:$0xff] %v19392_v37 }
 0x2a2   : > { %13803 = vmatmul.mubr.msk.f32.vlgmr.msra.gmra.mrb[32].mxu0 %vm503_vm1, %v19145_v34  ;;  %14741 = vmatmul.mubr.msk.f32.gmra.mrb[0].mxu1 %vm503_vm1, %v18406_v2  ;;  %v11778_v2 = vld [vmem:[%s21282_s2 + $0x270] sm:$0xff] }
 0x2a3   : > { %13805 = vmatprep.mubr.msk.f32.mxu0 %vm503_vm1, %v19361_v46  ;;  %14743 = vmatprep.mubr.msk.f32.mxu1 %vm503_vm1, %v18979_v16  ;;  %v15388_v61 = vpack.c.bf16 %v11779_v42, %v11778_v2  ;;  %v11813_v16 = vld [vmem:[%s21282_s2 + $0x288] sm:$0xff]  ;;  %v22141_v46 = vld [vmem:[#allocation54_spill] sm:$0xff] }
 0x2a4   : > { %15251 = vmatpush3.bf16.msra.mxu0 %v19205_v10  ;;  %v19384_v10 = vld [vmem:[%s16817_s26 + $0x30] sm:$0xff]  ;;  %v19405_v2 = vld [vmem:[%s16817_s26 + $0x48] sm:$0xff] }
 0x2a5   : > { %15253 = vmatprep.subr.bf16.mxu0 %v15252_v49  ;;  %22132 = vst [vmem:[#allocation163_spill] sm:$0xff] %v19384_v10  ;;  %22134 = vst [vmem:[#allocation165_spill] sm:$0xff] %v19405_v2 }
 0x2a6   : > { %13806 = vmatmul.mubr.msk.f32.gmra.mrb[34].mxu0 %vm503_vm1, %v19371_v23  ;;  %14744 = vmatmul.mubr.msk.f32.gmra.mrb[2].mxu1 %vm503_vm1, %v18991_v19  ;;  %v11812_v19 = vld [vmem:[%s21282_s2 + $0x280] sm:$0xff]  ;;  %v22140_v23 = vld [vmem:[#allocation31_spill] sm:$0xff] }
 0x2a7   : > { %13808 = vmatprep.mubr.msk.f32.mxu0 %vm503_vm1, %v19384_v10  ;;  %14754 = vmatprep.mubr.msk.f32.mxu1 %vm503_vm1, %v21906_v59  ;;  %v19412_v42 = vpack.c.bf16 %v11813_v16, %v11812_v19  ;;  %v19430_v16 = vld [vmem:[%s16817_s26 + $0x68] sm:$0xff]  ;;  %v19437_v19 = vld [vmem:[%s16817_s26 + $0x78] sm:$0xff]  ;;  %v22139_v10 = vld [vmem:[#allocation52_spill] sm:$0xff] }
 0x2a8   : > { %15255 = vmatpush3.bf16.msra.mxu0 %v15252_v49  ;;  %v19415_v49 = vld [vmem:[%s16817_s26 + $0x50] sm:$0xff] }
 0x2a9   : > { %15257 = vmatprep.subr.bf16.mxu0 %v19368_v28  ;;  %22135 = vst [vmem:[#allocation166_spill] sm:$0xff] %v19415_v49 }
 0x2aa   : > { %13809 = vmatmul.mubr.msk.f32.gmra.mrb[36].mxu0 %vm503_vm1, %v19392_v37  ;;  %14755 = vmatmul.mubr.msk.f32.vlgmr.msra.gmra.mrb[4].mxu1 %vm503_vm1, %v21907_v63  ;;  %v19422_v37 = vld [vmem:[%s16817_s26 + $0x60] sm:$0xff] }
 0x2ab   : > { %13811 = vmatprep.mubr.msk.f32.mxu0 %vm503_vm1, %v19405_v2  ;;  %15387 = vmatpush3.bf16.msra.mxu1 %v19237_v7  ;;  %v19444_v7 = vld [vmem:[%s16817_s26 + $0x80] sm:$0xff]  ;;  %v22138_v2 = vld [vmem:[#allocation29_spill] sm:$0xff] }
 0x2ac   : > { %14757 = vmatprep.mubr.msk.f32.mxu1 %vm503_vm1, %v21908_v13  ;;  %15389 = vmatprep.subr.bf16.mxu1 %v15388_v61 }
 0x2ae   : > { %13812 = vmatmul.mubr.msk.f32.gmra.mrb[38].mxu0 %vm503_vm1, %v19415_v49  ;;  %14758 = vmatmul.mubr.msk.f32.gmra.mrb[6].mxu1 %vm503_vm1, %v21910_v12  ;;  %v22137_v49 = vld [vmem:[#allocation27_spill] sm:$0xff] }
 0x2af   : > { %13814 = vmatprep.mubr.msk.f32.mxu0 %vm503_vm1, %v19422_v37  ;;  %14760 = vmatprep.mubr.msk.f32.mxu1 %vm503_vm1, %v21912_v58 }
 0x2b0   : > { %15391 = vmatpush3.bf16.msra.mxu1 %v15388_v61  ;;  %v22136_v61 = vld [vmem:[#allocation25_spill] sm:$0xff] }
 0x2b1   : > { %15393 = vmatprep.subr.bf16.mxu1 %v19412_v42 }
 0x2b2   : > { %13815 = vmatmul.mubr.msk.f32.gmra.mrb[40].mxu0 %vm503_vm1, %v19430_v16  ;;  %14761 = vmatmul.mubr.msk.f32.gmra.mrb[8].mxu1 %vm503_vm1, %v21914_v22 }
 0x2b3   : > { %13817 = vmatprep.mubr.msk.f32.mxu0 %vm503_vm1, %v19437_v19  ;;  %14763 = vmatprep.mubr.msk.f32.mxu1 %vm503_vm1, %v21916_v1 }
 0x2b6   : > { %13818 = vmatmul.mubr.msk.f32.gmra.mrb[42].mxu0 %vm503_vm1, %v19444_v7  ;;  %14764 = vmatmul.mubr.msk.f32.gmra.mrb[10].mxu1 %vm503_vm1, %v21918_v0 }
 0x2b7   : > { %13820 = vmatprep.mubr.msk.f32.mxu0 %vm503_vm1, %v22136_v61  ;;  %14766 = vmatprep.mubr.msk.f32.mxu1 %vm503_vm1, %v21920_v52  ;;  %v22142_v61 = vld [vmem:[#allocation33_spill] sm:$0xff] }
 0x2ba   : > { %13821 = vmatmul.mubr.msk.f32.gmra.mrb[44].mxu0 %vm503_vm1, %v22137_v49  ;;  %14767 = vmatmul.mubr.msk.f32.gmra.mrb[12].mxu1 %vm503_vm1, %v21921_v31  ;;  %v22144_v49 = vld [vmem:[#allocation37_spill] sm:$0xff] }
 0x2bb   : > { %13823 = vmatprep.mubr.msk.f32.mxu0 %vm503_vm1, %v22138_v2  ;;  %14769 = vmatprep.mubr.msk.f32.mxu1 %vm503_vm1, %v22139_v10  ;;  %v22146_v2 = vld [vmem:[#allocation142_spill] sm:$0xff] }
 0x2be   : > { %13824 = vmatmul.mubr.msk.f32.gmra.mrb[46].mxu0 %vm503_vm1, %v22140_v23  ;;  %14770 = vmatmul.mubr.msk.f32.gmra.mrb[14].mxu1 %vm503_vm1, %v22141_v46  ;;  %v22148_v23 = vld [vmem:[#allocation143_spill] sm:$0xff] }
 0x2bf   : > { %13826 = vmatprep.mubr.msk.f32.mxu0 %vm503_vm1, %v22142_v61  ;;  %14772 = vmatprep.mubr.msk.f32.mxu1 %vm503_vm1, %v22143_v60  ;;  %v22150_v61 = vld [vmem:[#allocation144_spill] sm:$0xff] }
 0x2c2   : > { %13827 = vmatmul.mubr.msk.f32.gmra.mrb[48].mxu0 %vm503_vm1, %v22144_v49  ;;  %14773 = vmatmul.mubr.msk.f32.gmra.mrb[16].mxu1 %vm503_vm1, %v22145_v29  ;;  %v22152_v49 = vld [vmem:[#allocation145_spill] sm:$0xff] }
 0x2c3   : > { %13829 = vmatprep.mubr.msk.f32.mxu0 %vm503_vm1, %v22146_v2  ;;  %14775 = vmatprep.mubr.msk.f32.mxu1 %vm503_vm1, %v22147_v27  ;;  %v22154_v2 = vld [vmem:[#allocation146_spill] sm:$0xff] }
 0x2c6   : > { %13830 = vmatmul.mubr.msk.f32.gmra.mrb[50].mxu0 %vm503_vm1, %v22148_v23  ;;  %14776 = vmatmul.mubr.msk.f32.gmra.mrb[18].mxu1 %vm503_vm1, %v22149_v50  ;;  %v22156_v23 = vld [vmem:[#allocation147_spill] sm:$0xff] }
 0x2c7   : > { %13832 = vmatprep.mubr.msk.f32.mxu0 %vm503_vm1, %v22150_v61  ;;  %14778 = vmatprep.mubr.msk.f32.mxu1 %vm503_vm1, %v22151_v11  ;;  %v22158_v61 = vld [vmem:[#allocation148_spill] sm:$0xff] }
 0x2ca   : > { %13833 = vmatmul.mubr.msk.f32.gmra.mrb[52].mxu0 %vm503_vm1, %v22152_v49  ;;  %14779 = vmatmul.mubr.msk.f32.gmra.mrb[20].mxu1 %vm503_vm1, %v22153_v43  ;;  %v22160_v49 = vld [vmem:[#allocation149_spill] sm:$0xff] }
 0x2cb   : > { %13835 = vmatprep.mubr.msk.f32.mxu0 %vm503_vm1, %v22154_v2  ;;  %14781 = vmatprep.mubr.msk.f32.mxu1 %vm503_vm1, %v22155_v45  ;;  %v22162_v2 = vld [vmem:[#allocation150_spill] sm:$0xff]  ;;  %v11237_v45 = vld [vmem:[%s21282_s2 + $0x88] sm:$0xff]  ;;  %v22176_v43 = vld [vmem:[#allocation137_spill] sm:$0xff] }
 0x2ce   : > { %13836 = vmatmul.mubr.msk.f32.gmra.mrb[54].mxu0 %vm503_vm1, %v22156_v23  ;;  %14782 = vmatmul.mubr.msk.f32.gmra.mrb[22].mxu1 %vm503_vm1, %v22157_v51  ;;  %v22164_v23 = vld [vmem:[#allocation151_spill] sm:$0xff]  ;;  %v22174_v51 = vld [vmem:[#allocation82_spill] sm:$0xff] }
 0x2cf   : > { %13838 = vmatprep.mubr.msk.f32.mxu0 %vm503_vm1, %v22158_v61  ;;  %14784 = vmatprep.mubr.msk.f32.mxu1 %vm503_vm1, %v22159_v25  ;;  %v22166_v61 = vld [vmem:[#allocation152_spill] sm:$0xff] }
 0x2d0   : > { %v22172_v25 = vld [vmem:[#allocation80_spill] sm:$0xff] }
 0x2d2   : > { %13839 = vmatmul.mubr.msk.f32.gmra.mrb[56].mxu0 %vm503_vm1, %v22160_v49  ;;  %14785 = vmatmul.mubr.msk.f32.gmra.mrb[24].mxu1 %vm503_vm1, %v22161_v39  ;;  %v3842_v49 = vrot.slane %v19142_v56, 2 }
 0x2d3   : > { %13841 = vmatprep.mubr.msk.f32.mxu0 %vm503_vm1, %v22162_v2  ;;  %14787 = vmatprep.mubr.msk.f32.mxu1 %vm503_vm1, %v22163_v62  ;;  %v22168_v2 = vld [vmem:[#allocation153_spill] sm:$0xff]  ;;  %v22169_v62 = vld [vmem:[#allocation78_spill] sm:$0xff] }
 0x2d6   : > { %13842 = vmatmul.mubr.msk.f32.gmra.mrb[58].mxu0 %vm503_vm1, %v22164_v23  ;;  %14788 = vmatmul.mubr.msk.f32.gmra.mrb[26].mxu1 %vm503_vm1, %v22165_v57  ;;  %v22170_v23 = vld [vmem:[#allocation154_spill] sm:$0xff]  ;;  %v22171_v57 = vld [vmem:[#allocation159_spill] sm:$0xff] }
 0x2d7   : > { %13844 = vmatprep.mubr.msk.f32.mxu0 %vm503_vm1, %v22166_v61  ;;  %14790 = vmatprep.mubr.msk.f32.mxu1 %vm503_vm1, %v22167_v14  ;;  %v3845_v39 = vrot.slane %v22171_v57, 2  ;;  %v3844_v61 = vsel %vm422_vm0, %v3842_v49, %v3843_v3  ;;  %v22173_v14 = vld [vmem:[#allocation156_spill] sm:$0xff] }
 0x2da   : > { %13845 = vmatmul.mubr.msk.f32.gmra.mrb[60].mxu0 %vm503_vm1, %v22168_v2  ;;  %14791 = vmatmul.mubr.msk.f32.gmra.mrb[28].mxu1 %vm503_vm1, %v22169_v62  ;;  %v11202_v2 = vld [vmem:[%s21282_s2 + $0x70] sm:$0xff]  ;;  %v11203_v62 = vld [vmem:[%s21282_s2 + $0x78] sm:$0xff] }
 0x2db   : > { %13847 = vmatprep.mubr.msk.f32.mxu0 %vm503_vm1, %v22170_v23  ;;  %14793 = vmatprep.mubr.msk.f32.mxu1 %vm503_vm1, %v22172_v25  ;;  %v3846_v23 = vsel %vm422_vm0, %v3843_v3, %v3845_v39  ;;  %v22175_v25 = vld [vmem:[#allocation136_spill] sm:$0xff]  ;;  %v15260_v49 = vpack.c.bf16 %v11203_v62, %v11202_v2  ;;  %v22178_v3 = vld [vmem:[#allocation158_spill] sm:$0xff]  ;;  %v3202_v2 = vlaneseq }
 0x2dc   : > { %v22179_v39 = vld [vmem:[#allocation10_spill] sm:$0xff] }
 0x2de   : > { %13848 = vmatmul.mubr.msk.f32.gmra.mrb[62].mxu0 %vm503_vm1, %v22173_v14  ;;  %14794 = vmatmul.mubr.msk.f32.gmra.mrb[30].mxu1 %vm503_vm1, %v22174_v51  ;;  %v11236_v14 = vld [vmem:[%s21282_s2 + $0x80] sm:$0xff] }
 0x2df   : > { %13858 = vmatprep.mubr.msk.f32.mxu0 %vm503_vm1, %v3844_v61  ;;  %14796 = vmatprep.mubr.msk.f32.mxu1 %vm503_vm1, %v22175_v25  ;;  %v22177_v61 = vld [vmem:[#allocation8_spill] sm:$0xff]  ;;  %v19558_v62 = vpack.c.bf16 %v11237_v45, %v11236_v14  ;;  %v22183_v14 = vld [vmem:[#allocation14_spill] sm:$0xff] }
 0x2e0   : > { %v22182_v45 = vld [vmem:[#allocation92_spill] sm:$0xff]  ;;  %v11848_v25 = vld [vmem:[%s21282_s2 + $0x2a0] sm:$0xff] }
 0x2e2   : > { %13859 = vmatmul.mubr.msk.f32.vlgmr.msra.gmra.mrb[32].mxu0 %vm503_vm1, %v3846_v23  ;;  %14797 = vmatmul.mubr.msk.f32.gmra.mrb[0].mxu1 %vm503_vm1, %v22176_v43  ;;  %v11814_v23 = vld [vmem:[%s21282_s2 + $0x290] sm:$0xff] }
 0x2e3   : > { %13861 = vmatprep.mubr.msk.f32.mxu0 %vm503_vm1, %v22177_v61  ;;  %14799 = vmatprep.mubr.msk.f32.mxu1 %vm503_vm1, %v22178_v3  ;;  %v11815_v61 = vld [vmem:[%s21282_s2 + $0x298] sm:$0xff]  ;;  %v22180_v43 = vld [vmem:[#allocation160_spill] sm:$0xff] }
 0x2e4   : > { %15259 = vmatpush3.bf16.msra.mxu0 %v19368_v28  ;;  %v22181_v3 = vld [vmem:[#allocation12_spill] sm:$0xff]  ;;  %v15396_v28 = vpack.c.bf16 %v11815_v61, %v11814_v23  ;;  %v22187_v23 = vld [vmem:[#allocation98_spill] sm:$0xff] }
 0x2e5   : > { %15261 = vmatprep.subr.bf16.mxu0 %v15260_v49 }
 0x2e6   : > { %13862 = vmatmul.mubr.msk.f32.gmra.mrb[34].mxu0 %vm503_vm1, %v22179_v39  ;;  %14800 = vmatmul.mubr.msk.f32.gmra.mrb[2].mxu1 %vm503_vm1, %v22180_v43  ;;  %v19577_v39 = vshrl.u32 %v3202_v2, 7  ;;  %v22185_v43 = vld [vmem:[#allocation94_spill] sm:$0xff] }
 0x2e7   : > { %13864 = vmatprep.mubr.msk.f32.mxu0 %vm503_vm1, %v22181_v3  ;;  %14810 = vmatprep.mubr.msk.f32.mxu1 %vm503_vm1, %v22182_v45  ;;  %v11849_v3 = vld [vmem:[%s21282_s2 + $0x2a8] sm:$0xff] }
 0x2e8   : > { %15263 = vmatpush3.bf16.msra.mxu0 %v15260_v49  ;;  %22184 = vst [vmem:[#allocation25_spill] sm:$0xff] %v19577_v39  ;;  %v22186_v49 = vld [vmem:[#allocation96_spill] sm:$0xff]  ;;  %v19592_v61 = vpack.c.bf16 %v11849_v3, %v11848_v25  ;;  %v21686_v2 = vsub.s32 0, %v19577_v39  ;;  %v22189_v3 = vld [vmem:[#allocation102_spill] sm:$0xff] }
 0x2e9   : > { %15265 = vmatprep.subr.bf16.mxu0 %v19558_v62 }
 0x2ea   : > { %13865 = vmatmul.mubr.msk.f32.gmra.mrb[36].mxu0 %vm503_vm1, %v22183_v14  ;;  %14811 = vmatmul.mubr.msk.f32.vlgmr.msra.gmra.mrb[4].mxu1 %vm503_vm1, %v22185_v43 }
 0x2eb   : > { %13867 = vmatprep.mubr.msk.f32.mxu0 %vm503_vm1, %v22109_v54  ;;  %15395 = vmatpush3.bf16.msra.mxu1 %v19412_v42  ;;  %v364_v42 = vld [vmem:[%s21283_s3] sm:$0x3]  ;;  %v22188_v54 = vld [vmem:[#allocation100_spill] sm:$0xff] }
 0x2ec   : > { %14813 = vmatprep.mubr.msk.f32.mxu1 %vm503_vm1, %v22186_v49  ;;  %15397 = vmatprep.subr.bf16.mxu1 %v15396_v28  ;;  %v19611_v25 = vrot.slane %v364_v42, %v21686_v2  ;;  %v22191_v42 = vld [vmem:[#allocation104_spill] sm:$0xff] }
 0x2ee   : > { %13868 = vmatmul.mubr.msk.f32.gmra.mrb[38].mxu0 %vm503_vm1, %v21950_v4  ;;  %14814 = vmatmul.mubr.msk.f32.gmra.mrb[6].mxu1 %vm503_vm1, %v22187_v23  ;;  %v22190_v4 = vld [vmem:[#allocation34_spill] sm:$0xff] }
 0x2ef   : > { %13870 = vmatprep.mubr.msk.f32.mxu0 %vm503_vm1, %v22028_v18  ;;  %14816 = vmatprep.mubr.msk.f32.mxu1 %vm503_vm1, %v22188_v54 }
 0x2f0   : > { %15399 = vmatpush3.bf16.msra.mxu1 %v15396_v28 }
 0x2f1   : > { %15401 = vmatprep.subr.bf16.mxu1 %v19592_v61 }
 0x2f2   : > { %13871 = vmatmul.mubr.msk.f32.gmra.mrb[40].mxu0 %vm503_vm1, %v22030_v24  ;;  %14817 = vmatmul.mubr.msk.f32.gmra.mrb[8].mxu1 %vm503_vm1, %v22189_v3 }
 0x2f3   : > { %13873 = vmatprep.mubr.msk.f32.mxu0 %vm503_vm1, %v22031_v40  ;;  %14819 = vmatprep.mubr.msk.f32.mxu1 %vm503_vm1, %v22190_v4  ;;  %v22192_v40 = vld [vmem:[#allocation41_spill] sm:$0xff] }
 0x2f5   : > { %v13692_v14 = vpop.f32.mrb[0].mxu0 }
 0x2f6   : > { %v3207_v28 = vadd.f32 %v13692_v14, %v19611_v25  ;;  %v3011_v51 = vpop.f32.mrb[1].mxu0  ;;  %13874 = vmatmul.mubr.msk.f32.gmra.mrb[42].mxu0 %vm503_vm1, %v22111_v20  ;;  %14820 = vmatmul.mubr.msk.f32.gmra.mrb[10].mxu1 %vm503_vm1, %v22191_v42  ;;  %v22193_v20 = vld [vmem:[#allocation46_spill] sm:$0xff] }
 0x2f7   : > { %v3206_v39 = vadd.f32 %v19611_v25, %v3011_v51  ;;  %13876 = vmatprep.mubr.msk.f32.mxu0 %vm503_vm1, %v22112_v33  ;;  %14822 = vmatprep.mubr.msk.f32.mxu1 %vm503_vm1, %v22192_v40 }
 0x2f8   : > { %v3239_v2 = vmax.f32 %v3207_v28, 0.0  ;;  %v22194_v28 = vld [vmem:[#allocation48_spill] sm:$0xff] }
 0x2f9   : > { %v3238_v24 = vmax.f32 %v3206_v39, 0.0  ;;  %v13695_v18 = vpop.f32.mrb[2].mxu0 }
 0x2fa   : > { %3271 = vst.msk [vmem:[#allocation2 + $0x8] sm:$0xff] %vm503_vm1, %v3239_v2  ;;  %v3209_v14 = vadd.f32 %v13695_v18, %v19611_v25  ;;  %v3021_v4 = vpop.f32.mrb[3].mxu0  ;;  %13877 = vmatmul.mubr.msk.f32.gmra.mrb[44].mxu0 %vm503_vm1, %v22037_v35  ;;  %14823 = vmatmul.mubr.msk.f32.gmra.mrb[12].mxu1 %vm503_vm1, %v22193_v20 }
 0x2fb   : > { %3270 = vst.msk [vmem:[#allocation2] sm:$0xff] %vm503_vm1, %v3238_v24  ;;  %v3208_v51 = vadd.f32 %v19611_v25, %v3021_v4  ;;  %13879 = vmatprep.mubr.msk.f32.mxu0 %vm503_vm1, %v22039_v47  ;;  %14825 = vmatprep.mubr.msk.f32.mxu1 %vm503_vm1, %v22194_v28  ;;  %v22195_v24 = vld [vmem:[#allocation107_spill] sm:$0xff] }
 0x2fc   : > { %v3241_v39 = vmax.f32 %v3209_v14, 0.0 }
 0x2fd   : > { %v3240_v2 = vmax.f32 %v3208_v51, 0.0  ;;  %v13698_v18 = vpop.f32.mrb[4].mxu0  ;;  %v22196_v51 = vld [vmem:[#allocation109_spill] sm:$0xff] }
 0x2fe   : > { %3273 = vst.msk [vmem:[#allocation2 + $0x18] sm:$0xff] %vm503_vm1, %v3241_v39  ;;  %v3211_v35 = vadd.f32 %v13698_v18, %v19611_v25  ;;  %v3031_v33 = vpop.f32.mrb[5].mxu0  ;;  %13880 = vmatmul.mubr.msk.f32.gmra.mrb[46].mxu0 %vm503_vm1, %v22041_v8  ;;  %14826 = vmatmul.mubr.msk.f32.gmra.mrb[14].mxu1 %vm503_vm1, %v22195_v24 }
 0x2ff   : > { %3272 = vst.msk [vmem:[#allocation2 + $0x10] sm:$0xff] %vm503_vm1, %v3240_v2  ;;  %v3210_v4 = vadd.f32 %v19611_v25, %v3031_v33  ;;  %13882 = vmatprep.mubr.msk.f32.mxu0 %vm503_vm1, %v22113_v38  ;;  %14828 = vmatprep.mubr.msk.f32.mxu1 %vm503_vm1, %v22196_v51  ;;  %v22197_v2 = vld [vmem:[#allocation111_spill] sm:$0xff] }
 0x300   : > { %v3243_v14 = vmax.f32 %v3211_v35, 0.0 }
 0x301   : > { %v3242_v39 = vmax.f32 %v3210_v4, 0.0  ;;  %v13701_v18 = vpop.f32.mrb[6].mxu0  ;;  %v22198_v4 = vld [vmem:[#allocation113_spill] sm:$0xff] }
 0x302   : > { %3275 = vst.msk [vmem:[#allocation2 + $0x28] sm:$0xff] %vm503_vm1, %v3243_v14  ;;  %v3213_v8 = vadd.f32 %v13701_v18, %v19611_v25  ;;  %v3041_v47 = vpop.f32.mrb[7].mxu0  ;;  %13883 = vmatmul.mubr.msk.f32.gmra.mrb[48].mxu0 %vm503_vm1, %v22114_v6  ;;  %14829 = vmatmul.mubr.msk.f32.gmra.mrb[16].mxu1 %vm503_vm1, %v22197_v2 }
 0x303   : > { %3274 = vst.msk [vmem:[#allocation2 + $0x20] sm:$0xff] %vm503_vm1, %v3242_v39  ;;  %v3212_v33 = vadd.f32 %v19611_v25, %v3041_v47  ;;  %13885 = vmatprep.mubr.msk.f32.mxu0 %vm503_vm1, %v22115_v26  ;;  %14831 = vmatprep.mubr.msk.f32.mxu1 %vm503_vm1, %v22198_v4  ;;  %v22199_v39 = vld [vmem:[#allocation115_spill] sm:$0xff] }
 0x304   : > { %v3245_v35 = vmax.f32 %v3213_v8, 0.0 }
 0x305   : > { %v3244_v14 = vmax.f32 %v3212_v33, 0.0  ;;  %v13704_v18 = vpop.f32.mrb[8].mxu0  ;;  %v22200_v33 = vld [vmem:[#allocation117_spill] sm:$0xff] }
 0x306   : > { %3277 = vst.msk [vmem:[#allocation2 + $0x38] sm:$0xff] %vm503_vm1, %v3245_v35  ;;  %v3215_v6 = vadd.f32 %v13704_v18, %v19611_v25  ;;  %v3051_v38 = vpop.f32.mrb[9].mxu0  ;;  %13886 = vmatmul.mubr.msk.f32.gmra.mrb[50].mxu0 %vm503_vm1, %v22116_v5  ;;  %14832 = vmatmul.mubr.msk.f32.gmra.mrb[18].mxu1 %vm503_vm1, %v22199_v39 }
 0x307   : > { %3276 = vst.msk [vmem:[#allocation2 + $0x30] sm:$0xff] %vm503_vm1, %v3244_v14  ;;  %v3214_v47 = vadd.f32 %v19611_v25, %v3051_v38  ;;  %13888 = vmatprep.mubr.msk.f32.mxu0 %vm503_vm1, %v22117_v36  ;;  %14834 = vmatprep.mubr.msk.f32.mxu1 %vm503_vm1, %v22200_v33  ;;  %v22201_v14 = vld [vmem:[#allocation119_spill] sm:$0xff] }
 0x308   : > { %v3247_v8 = vmax.f32 %v3215_v6, 0.0 }
 0x309   : > { %v3246_v35 = vmax.f32 %v3214_v47, 0.0  ;;  %v13707_v18 = vpop.f32.mrb[10].mxu0  ;;  %v22202_v47 = vld [vmem:[#allocation121_spill] sm:$0xff] }
 0x30a   : > { %3279 = vst.msk [vmem:[#allocation2 + $0x48] sm:$0xff] %vm503_vm1, %v3247_v8  ;;  %v3217_v5 = vadd.f32 %v13707_v18, %v19611_v25  ;;  %v3061_v26 = vpop.f32.mrb[11].mxu0  ;;  %13889 = vmatmul.mubr.msk.f32.gmra.mrb[52].mxu0 %vm503_vm1, %v22118_v30  ;;  %14835 = vmatmul.mubr.msk.f32.gmra.mrb[20].mxu1 %vm503_vm1, %v22201_v14 }
 0x30b   : > { %3278 = vst.msk [vmem:[#allocation2 + $0x40] sm:$0xff] %vm503_vm1, %v3246_v35  ;;  %v3216_v38 = vadd.f32 %v19611_v25, %v3061_v26  ;;  %13891 = vmatprep.mubr.msk.f32.mxu0 %vm503_vm1, %v22119_v17  ;;  %14837 = vmatprep.mubr.msk.f32.mxu1 %vm503_vm1, %v22202_v47  ;;  %v22203_v35 = vld [vmem:[#allocation123_spill] sm:$0xff] }
 0x30c   : > { %v3249_v6 = vmax.f32 %v3217_v5, 0.0 }
 0x30d   : > { %v3248_v8 = vmax.f32 %v3216_v38, 0.0  ;;  %v13710_v18 = vpop.f32.mrb[12].mxu0  ;;  %v22204_v38 = vld [vmem:[#allocation125_spill] sm:$0xff] }
 0x30e   : > { %3281 = vst.msk [vmem:[#allocation2 + $0x58] sm:$0xff] %vm503_vm1, %v3249_v6  ;;  %v3219_v30 = vadd.f32 %v13710_v18, %v19611_v25  ;;  %v3071_v36 = vpop.f32.mrb[13].mxu0  ;;  %13892 = vmatmul.mubr.msk.f32.gmra.mrb[54].mxu0 %vm503_vm1, %v22120_v41  ;;  %14838 = vmatmul.mubr.msk.f32.gmra.mrb[22].mxu1 %vm503_vm1, %v22203_v35 }
 0x30f   : > { %3280 = vst.msk [vmem:[#allocation2 + $0x50] sm:$0xff] %vm503_vm1, %v3248_v8  ;;  %v3218_v26 = vadd.f32 %v19611_v25, %v3071_v36  ;;  %13894 = vmatprep.mubr.msk.f32.mxu0 %vm503_vm1, %v22121_v21  ;;  %14840 = vmatprep.mubr.msk.f32.mxu1 %vm503_vm1, %v22204_v38  ;;  %v22205_v8 = vld [vmem:[#allocation127_spill] sm:$0xff]  ;;  %v16570_v38 = vld [vmem:[%s16817_s26 + $0x1c0] sm:$0xf] }
 0x310   : > { %v3251_v5 = vmax.f32 %v3219_v30, 0.0  ;;  %v8492_v35 = vrot.slane %v16570_v38, 4  ;;  %v11273_v38 = vld [vmem:[%s21282_s2 + $0xa8] sm:$0xff] }
 0x311   : > { %v3250_v6 = vmax.f32 %v3218_v26, 0.0  ;;  %v13713_v18 = vpop.f32.mrb[14].mxu0  ;;  %v22206_v26 = vld [vmem:[#allocation129_spill] sm:$0xff] }
 0x312   : > { %3283 = vst.msk [vmem:[#allocation2 + $0x68] sm:$0xff] %vm503_vm1, %v3251_v5  ;;  %v3221_v41 = vadd.f32 %v13713_v18, %v19611_v25  ;;  %v3081_v17 = vpop.f32.mrb[15].mxu0  ;;  %13895 = vmatmul.mubr.msk.f32.gmra.mrb[56].mxu0 %vm503_vm1, %v22061_v55  ;;  %14841 = vmatmul.mubr.msk.f32.gmra.mrb[24].mxu1 %vm503_vm1, %v22205_v8  ;;  %v22211_v8 = vld [vmem:[#allocation135_spill] sm:$0xff] }
 0x313   : > { %3282 = vst.msk [vmem:[#allocation2 + $0x60] sm:$0xff] %vm503_vm1, %v3250_v6  ;;  %v3220_v36 = vadd.f32 %v19611_v25, %v3081_v17  ;;  %13897 = vmatprep.mubr.msk.f32.mxu0 %vm503_vm1, %v22122_v9  ;;  %14843 = vmatprep.mubr.msk.f32.mxu1 %vm503_vm1, %v22206_v26  ;;  %v22207_v6 = vld [vmem:[#allocation131_spill] sm:$0xff]  ;;  %v19742_v26 = vld [vmem:[%s16817_s26 + $0x1b0] sm:$0xff] }
 0x314   : > { %v3253_v30 = vmax.f32 %v3221_v41, 0.0 }
 0x315   : > { %v3252_v5 = vmax.f32 %v3220_v36, 0.0  ;;  %v13716_v18 = vpop.f32.mrb[16].mxu0  ;;  %v22208_v36 = vld [vmem:[#allocation132_spill] sm:$0xff] }
 0x316   : > { %3285 = vst.msk [vmem:[#allocation2 + $0x78] sm:$0xff] %vm503_vm1, %v3253_v30  ;;  %v3223_v55 = vadd.f32 %v13716_v18, %v19611_v25  ;;  %v3091_v21 = vpop.f32.mrb[17].mxu0  ;;  %13898 = vmatmul.mubr.msk.f32.gmra.mrb[58].mxu0 %vm503_vm1, %v22123_v53  ;;  %14844 = vmatmul.mubr.msk.f32.gmra.mrb[26].mxu1 %vm503_vm1, %v22207_v6  ;;  %v4113_v30 = vrot.slane %v19142_v56, 3  ;;  %v4114_v18 = vrot.slane %v19145_v34, 3 }
 0x317   : > { %3284 = vst.msk [vmem:[#allocation2 + $0x70] sm:$0xff] %vm503_vm1, %v3252_v5  ;;  %v3222_v17 = vadd.f32 %v19611_v25, %v3091_v21  ;;  %13900 = vmatprep.mubr.msk.f32.mxu0 %vm503_vm1, %v21971_v32  ;;  %14846 = vmatprep.mubr.msk.f32.mxu1 %vm503_vm1, %v22208_v36  ;;  %v22209_v32 = vld [vmem:[#allocation133_spill] sm:$0xff]  ;;  %v22210_v36 = vld [vmem:[#allocation134_spill] sm:$0xff] }
 0x318   : > { %v3255_v41 = vmax.f32 %v3223_v55, 0.0 }
 0x319   : > { %v3254_v9 = vmax.f32 %v3222_v17, 0.0  ;;  %v13719_v53 = vpop.f32.mrb[18].mxu0  ;;  %v4116_v17 = vrot.slane %v22171_v57, 3 }
 0x31a   : > { %3287 = vst.msk [vmem:[#allocation2 + $0x88] sm:$0xff] %vm503_vm1, %v3255_v41  ;;  %v3225_v21 = vadd.f32 %v13719_v53, %v19611_v25  ;;  %v3101_v5 = vpop.f32.mrb[19].mxu0  ;;  %13901 = vmatmul.mubr.msk.f32.gmra.mrb[60].mxu0 %vm503_vm1, %v22124_v48  ;;  %14847 = vmatmul.mubr.msk.f32.gmra.mrb[28].mxu1 %vm503_vm1, %v22209_v32  ;;  %v4115_v53 = vsel %vm1168_vm2, %v4113_v30, %v4114_v18  ;;  %v11238_v30 = vld [vmem:[%s21282_s2 + $0x90] sm:$0xff] }
 0x31b   : > { %3286 = vst.msk [vmem:[#allocation2 + $0x80] sm:$0xff] %vm503_vm1, %v3254_v9  ;;  %v3224_v55 = vadd.f32 %v19611_v25, %v3101_v5  ;;  %13903 = vmatprep.mubr.msk.f32.mxu0 %vm503_vm1, %v22125_v44  ;;  %14849 = vmatprep.mubr.msk.f32.mxu1 %vm503_vm1, %v22210_v36  ;;  %v8489_v9 = vrot.slane %v19742_v26, 4  ;;  %v19746_v5 = vld [vmem:[%s16817_s26 + $0x1b8] sm:$0xff] }
 0x31c   : > { %v3257_v41 = vmax.f32 %v3225_v21, 0.0  ;;  %v8490_v32 = vrot.slane %v19746_v5, 4 }
 0x31d   : > { %v3256_v6 = vmax.f32 %v3224_v55, 0.0  ;;  %v13722_v48 = vpop.f32.mrb[20].mxu0  ;;  %v11239_v55 = vld [vmem:[%s21282_s2 + $0x98] sm:$0xff] }
 0x31e   : > { %3289 = vst.msk [vmem:[#allocation2 + $0x98] sm:$0xff] %vm503_vm1, %v3257_v41  ;;  %v3227_v21 = vadd.f32 %v13722_v48, %v19611_v25  ;;  %v3111_v44 = vpop.f32.mrb[21].mxu0  ;;  %13904 = vmatmul.mubr.msk.f32.gmra.mrb[62].mxu0 %vm503_vm1, %v22126_v15  ;;  %14850 = vmatmul.mubr.msk.f32.gmra.mrb[30].mxu1 %vm503_vm1, %v22211_v8  ;;  %v4117_v48 = vsel %vm1168_vm2, %v4114_v18, %v4116_v17  ;;  %v22212_v15 = vld [vmem:[#allocation140_spill] sm:$0xff]  ;;  %v11272_v18 = vld [vmem:[%s21282_s2 + $0xa0] sm:$0xff]  ;;  %v22214_v17 = vld [vmem:[#allocation141_spill] sm:$0xff] }
 0x31f   : > { %3288 = vst.msk [vmem:[#allocation2 + $0x90] sm:$0xff] %vm503_vm1, %v3256_v6  ;;  %v3226_v36 = vadd.f32 %v19611_v25, %v3111_v44  ;;  %13914 = vmatprep.mubr.msk.f32.mxu0 %vm503_vm1, %v4115_v53  ;;  %14852 = vmatprep.mubr.msk.f32.mxu1 %vm503_vm1, %v22212_v15  ;;  %v19769_v33 = vsel %vm4384_vm4, %v8489_v9, %v8490_v32  ;;  %v22215_v53 = vld [vmem:[#allocation17_spill] sm:$0xff]  ;;  %v19978_v15 = vld [vmem:[%s16817_s26 + $0x168] sm:$0xff] }
 0x320   : > { %v3259_v41 = vmax.f32 %v3227_v21, 0.0  ;;  %22213 = vst [vmem:[#allocation27_spill] sm:$0xff] %v19769_v33  ;;  %v15268_v6 = vpack.c.bf16 %v11239_v55, %v11238_v30  ;;  %v19789_v9 = vsel %vm4384_vm4, %v8490_v32, %v8492_v35  ;;  %v11850_v32 = vld [vmem:[%s21282_s2 + $0x2b0] sm:$0xff] }
 0x321   : > { %v3258_v47 = vmax.f32 %v3226_v36, 0.0  ;;  %v13725_v14 = vpop.f32.mrb[22].mxu0  ;;  %22216 = vst [vmem:[#allocation29_spill] sm:$0xff] %v19789_v9 }
 0x322   : > { %3291 = vst.msk [vmem:[#allocation2 + $0xa8] sm:$0xff] %vm503_vm1, %v3259_v41  ;;  %v3229_v44 = vadd.f32 %v13725_v14, %v19611_v25  ;;  %v3121_v8 = vpop.f32.mrb[23].mxu0  ;;  %13915 = vmatmul.mubr.msk.f32.vlgmr.msra.gmra.mrb[32].mxu0 %vm503_vm1, %v4117_v48  ;;  %14853 = vmatmul.mubr.msk.f32.gmra.mrb[0].mxu1 %vm503_vm1, %v22214_v17  ;;  %v22217_v48 = vld [vmem:[#allocation19_spill] sm:$0xff]  ;;  %v22218_v41 = vld [vmem:[#allocation21_spill] sm:$0xff] }
 0x323   : > { %3290 = vst.msk [vmem:[#allocation2 + $0xa0] sm:$0xff] %vm503_vm1, %v3258_v47  ;;  %v3228_v36 = vadd.f32 %v19611_v25, %v3121_v8  ;;  %13917 = vmatprep.mubr.msk.f32.mxu0 %vm503_vm1, %v22215_v53  ;;  %14855 = vmatprep.mubr.msk.f32.mxu1 %vm503_vm1, %v19769_v33  ;;  %v19792_v47 = vpack.c.bf16 %v11273_v38, %v11272_v18  ;;  %v19971_v33 = vld [vmem:[%s16817_s26 + $0x158] sm:$0xff]  ;;  %v22223_v17 = vld [vmem:[#allocation71_spill] sm:$0xff] }
 0x324   : > { %v3261_v14 = vmax.f32 %v3229_v44, 0.0  ;;  %15267 = vmatpush3.bf16.msra.mxu0 %v19558_v62  ;;  %v11851_v62 = vld [vmem:[%s21282_s2 + $0x2b8] sm:$0xff] }
 0x325   : > { %v3260_v21 = vmax.f32 %v3228_v36, 0.0  ;;  %v13728_v30 = vpop.f32.mrb[24].mxu0  ;;  %15269 = vmatprep.subr.bf16.mxu0 %v15268_v6  ;;  %v15404_v36 = vpack.c.bf16 %v11851_v62, %v11850_v32 }
 0x326   : > { %3293 = vst.msk [vmem:[#allocation2 + $0xb8] sm:$0xff] %vm503_vm1, %v3261_v14  ;;  %v3231_v8 = vadd.f32 %v13728_v30, %v19611_v25  ;;  %v3131_v55 = vpop.f32.mrb[25].mxu0  ;;  %13918 = vmatmul.mubr.msk.f32.gmra.mrb[34].mxu0 %vm503_vm1, %v22217_v48  ;;  %14856 = vmatmul.mubr.msk.f32.gmra.mrb[2].mxu1 %vm503_vm1, %v19789_v9  ;;  %v11884_v30 = vld [vmem:[%s21282_s2 + $0x2c0] sm:$0xff] }
 0x327   : > { %3292 = vst.msk [vmem:[#allocation2 + $0xb0] sm:$0xff] %vm503_vm1, %v3260_v21  ;;  %v3230_v35 = vadd.f32 %v19611_v25, %v3131_v55  ;;  %13920 = vmatprep.mubr.msk.f32.mxu0 %vm503_vm1, %v22218_v41  ;;  %14866 = vmatprep.mubr.msk.f32.mxu1 %vm503_vm1, %v19422_v37  ;;  %v22219_v21 = vld [vmem:[#allocation23_spill] sm:$0xff]  ;;  %v22222_v9 = vld [vmem:[#allocation70_spill] sm:$0xff] }
 0x328   : > { %v3263_v44 = vmax.f32 %v3231_v8, 0.0  ;;  %15271 = vmatpush3.bf16.msra.mxu0 %v15268_v6  ;;  %v11885_v6 = vld [vmem:[%s21282_s2 + $0x2c8] sm:$0xff] }
 0x329   : > { %v3262_v18 = vmax.f32 %v3230_v35, 0.0  ;;  %v13731_v38 = vpop.f32.mrb[26].mxu0  ;;  %15273 = vmatprep.subr.bf16.mxu0 %v19792_v47  ;;  %v19832_v62 = vpack.c.bf16 %v11885_v6, %v11884_v30  ;;  %v19864_v30 = vld [vmem:[%s16817_s26 + $0xa8] sm:$0xff] }
 0x32a   : > { %3295 = vst.msk [vmem:[#allocation2 + $0xc8] sm:$0xff] %vm503_vm1, %v3263_v44  ;;  %v3233_v53 = vadd.f32 %v13731_v38, %v19611_v25  ;;  %v3141_v14 = vpop.f32.mrb[27].mxu0  ;;  %13921 = vmatmul.mubr.msk.f32.gmra.mrb[36].mxu0 %vm503_vm1, %v22219_v21  ;;  %14867 = vmatmul.mubr.msk.f32.vlgmr.msra.gmra.mrb[4].mxu1 %vm503_vm1, %v19430_v16  ;;  %v19845_v44 = vld [vmem:[%s16817_s26 + $0x90] sm:$0xff]  ;;  %v19857_v21 = vld [vmem:[%s16817_s26 + $0x98] sm:$0xff] }
 0x32b   : > { %3294 = vst.msk [vmem:[#allocation2 + $0xc0] sm:$0xff] %vm503_vm1, %v3262_v18  ;;  %v3232_v8 = vadd.f32 %v19611_v25, %v3141_v14  ;;  %13923 = vmatprep.mubr.msk.f32.mxu0 %vm503_vm1, %v21906_v59  ;;  %15403 = vmatpush3.bf16.msra.mxu1 %v19592_v61 }
 0x32c   : > { %v3265_v55 = vmax.f32 %v3233_v53, 0.0  ;;  %14869 = vmatprep.mubr.msk.f32.mxu1 %vm503_vm1, %v19437_v19  ;;  %15405 = vmatprep.subr.bf16.mxu1 %v15404_v36 }
 0x32d   : > { %v3264_v48 = vmax.f32 %v3232_v8, 0.0  ;;  %v13734_v32 = vpop.f32.mrb[28].mxu0  ;;  %v19880_v8 = vld [vmem:[%s16817_s26 + $0xc0] sm:$0xff] }
 0x32e   : > { %3297 = vst.msk [vmem:[#allocation2 + $0xd8] sm:$0xff] %vm503_vm1, %v3265_v55  ;;  %v3235_v35 = vadd.f32 %v13734_v32, %v19611_v25  ;;  %v3151_v41 = vpop.f32.mrb[29].mxu0  ;;  %13924 = vmatmul.mubr.msk.f32.gmra.mrb[38].mxu0 %vm503_vm1, %v21907_v63  ;;  %14870 = vmatmul.mubr.msk.f32.gmra.mrb[6].mxu1 %vm503_vm1, %v19444_v7  ;;  %v19887_v55 = vld [vmem:[%s16817_s26 + $0xc8] sm:$0xff]  ;;  %v19901_v32 = vld [vmem:[%s16817_s26 + $0xe0] sm:$0xff] }
 0x32f   : > { %3296 = vst.msk [vmem:[#allocation2 + $0xd0] sm:$0xff] %vm503_vm1, %v3264_v48  ;;  %v3234_v59 = vadd.f32 %v19611_v25, %v3151_v41  ;;  %13926 = vmatprep.mubr.msk.f32.mxu0 %vm503_vm1, %v21908_v13  ;;  %14872 = vmatprep.mubr.msk.f32.mxu1 %vm503_vm1, %v19845_v44  ;;  %v19894_v48 = vld [vmem:[%s16817_s26 + $0xd8] sm:$0xff] }
 0x330   : > { %v3267_v61 = vmax.f32 %v3235_v35, 0.0  ;;  %15407 = vmatpush3.bf16.msra.mxu1 %v15404_v36  ;;  %v19908_v35 = vld [vmem:[%s16817_s26 + $0xf0] sm:$0xff]  ;;  %v19915_v41 = vld [vmem:[%s16817_s26 + $0xf8] sm:$0xff] }
 0x331   : > { %v3266_v63 = vmax.f32 %v3234_v59, 0.0  ;;  %v13737_v18 = vpop.f32.mrb[30].mxu0  ;;  %15409 = vmatprep.subr.bf16.mxu1 %v19832_v62  ;;  %v19922_v59 = vld [vmem:[%s16817_s26 + $0x108] sm:$0xff] }
 0x332   : > { %3299 = vst.msk [vmem:[#allocation2 + $0xe8] sm:$0xff] %vm503_vm1, %v3267_v61  ;;  %v3237_v38 = vadd.f32 %v13737_v18, %v19611_v25  ;;  %v3161_v53 = vpop.f32.mrb[31].mxu0  ;;  %13927 = vmatmul.mubr.msk.f32.gmra.mrb[40].mxu0 %vm503_vm1, %v21910_v12  ;;  %14873 = vmatmul.mubr.msk.f32.gmra.mrb[8].mxu1 %vm503_vm1, %v19857_v21  ;;  %v19929_v61 = vld [vmem:[%s16817_s26 + $0x110] sm:$0xff]  ;;  %v19943_v18 = vld [vmem:[%s16817_s26 + $0x128] sm:$0xff] }
 0x333   : > { %3298 = vst.msk [vmem:[#allocation2 + $0xe0] sm:$0xff] %vm503_vm1, %v3266_v63  ;;  %v3236_v14 = vadd.f32 %v19611_v25, %v3161_v53  ;;  %13929 = vmatprep.mubr.msk.f32.mxu0 %vm503_vm1, %v21912_v58  ;;  %14875 = vmatprep.mubr.msk.f32.mxu1 %vm503_vm1, %v19864_v30  ;;  %v19873_v25 = vld [vmem:[%s16817_s26 + $0xb0] sm:$0xff]  ;;  %v19936_v63 = vld [vmem:[%s16817_s26 + $0x120] sm:$0xff] }
 0x334   : > { %v3269_v36 = vmax.f32 %v3237_v38, 0.0  ;;  %v19950_v38 = vld [vmem:[%s16817_s26 + $0x138] sm:$0xff]  ;;  %v22220_v53 = vld [vmem:[#allocation66_spill] sm:$0xff] }
 0x335   : > { %v3268_v6 = vmax.f32 %v3236_v14, 0.0  ;;  %v19957_v14 = vld [vmem:[%s16817_s26 + $0x140] sm:$0xff] }
 0x336   : > { %3301 = vst.msk [vmem:[#allocation2 + $0xf8] sm:$0xff] %vm503_vm1, %v3269_v36  ;;  %13930 = vmatmul.mubr.msk.f32.gmra.mrb[42].mxu0 %vm503_vm1, %v21914_v22  ;;  %14876 = vmatmul.mubr.msk.f32.gmra.mrb[10].mxu1 %vm503_vm1, %v19873_v25  ;;  %v22221_v36 = vld [vmem:[#allocation68_spill] sm:$0xff] }
 0x337   : > { %3300 = vst.msk [vmem:[#allocation2 + $0xf0] sm:$0xff] %vm503_vm1, %v3268_v6  ;;  %13932 = vmatprep.mubr.msk.f32.mxu0 %vm503_vm1, %v21916_v1  ;;  %14878 = vmatprep.mubr.msk.f32.mxu1 %vm503_vm1, %v19880_v8  ;;  %v19964_v6 = vld [vmem:[%s16817_s26 + $0x150] sm:$0xff] }
 0x33a   : > { %13933 = vmatmul.mubr.msk.f32.gmra.mrb[44].mxu0 %vm503_vm1, %v21918_v0  ;;  %14879 = vmatmul.mubr.msk.f32.gmra.mrb[12].mxu1 %vm503_vm1, %v19887_v55 }
 0x33b   : > { %13935 = vmatprep.mubr.msk.f32.mxu0 %vm503_vm1, %v21920_v52  ;;  %14881 = vmatprep.mubr.msk.f32.mxu1 %vm503_vm1, %v19894_v48 }
 0x33e   : > { %13936 = vmatmul.mubr.msk.f32.gmra.mrb[46].mxu0 %vm503_vm1, %v21921_v31  ;;  %14882 = vmatmul.mubr.msk.f32.gmra.mrb[14].mxu1 %vm503_vm1, %v19901_v32 }
 0x33f   : > { %13938 = vmatprep.mubr.msk.f32.mxu0 %vm503_vm1, %v22139_v10  ;;  %14884 = vmatprep.mubr.msk.f32.mxu1 %vm503_vm1, %v19908_v35 }
 0x342   : > { %13939 = vmatmul.mubr.msk.f32.gmra.mrb[48].mxu0 %vm503_vm1, %v22141_v46  ;;  %14885 = vmatmul.mubr.msk.f32.gmra.mrb[16].mxu1 %vm503_vm1, %v19915_v41  ;;  %v11275_v46 = vld [vmem:[%s21282_s2 + $0xb8] sm:$0xff] }
 0x343   : > { %13941 = vmatprep.mubr.msk.f32.mxu0 %vm503_vm1, %v22143_v60  ;;  %14887 = vmatprep.mubr.msk.f32.mxu1 %vm503_vm1, %v19922_v59  ;;  %v16593_v60 = vld [vmem:[%s16817_s26 + $0x198] sm:$0xff] }
 0x346   : > { %13942 = vmatmul.mubr.msk.f32.gmra.mrb[50].mxu0 %vm503_vm1, %v22145_v29  ;;  %14888 = vmatmul.mubr.msk.f32.gmra.mrb[18].mxu1 %vm503_vm1, %v19929_v61  ;;  %v4388_v29 = vrot.slane %v22171_v57, 4 }
 0x347   : > { %13944 = vmatprep.mubr.msk.f32.mxu0 %vm503_vm1, %v22147_v27  ;;  %14890 = vmatprep.mubr.msk.f32.mxu1 %vm503_vm1, %v19936_v63  ;;  %v22226_v27 = vld [vmem:[#allocation74_spill] sm:$0xff] }
 0x34a   : > { %13945 = vmatmul.mubr.msk.f32.gmra.mrb[52].mxu0 %vm503_vm1, %v22149_v50  ;;  %14891 = vmatmul.mubr.msk.f32.gmra.mrb[20].mxu1 %vm503_vm1, %v19943_v18  ;;  %v4386_v50 = vrot.slane %v19145_v34, 4  ;;  %v22228_v34 = vld [vmem:[#allocation78_spill] sm:$0xff] }
 0x34b   : > { %13947 = vmatprep.mubr.msk.f32.mxu0 %vm503_vm1, %v22151_v11  ;;  %14893 = vmatprep.mubr.msk.f32.mxu1 %vm503_vm1, %v19950_v38  ;;  %v19992_v11 = vld [vmem:[%s16817_s26 + $0x180] sm:$0xff] }
 0x34c   : > { %v4389_v57 = vsel %vm4384_vm4, %v4386_v50, %v4388_v29 }
 0x34e   : > { %13948 = vmatmul.mubr.msk.f32.gmra.mrb[54].mxu0 %vm503_vm1, %v22220_v53  ;;  %14894 = vmatmul.mubr.msk.f32.gmra.mrb[22].mxu1 %vm503_vm1, %v19957_v14  ;;  %v19985_v53 = vld [vmem:[%s16817_s26 + $0x170] sm:$0xff] }
 0x34f   : > { %13950 = vmatprep.mubr.msk.f32.mxu0 %vm503_vm1, %v22221_v36  ;;  %14896 = vmatprep.mubr.msk.f32.mxu1 %vm503_vm1, %v19964_v6  ;;  %v22224_v36 = vld [vmem:[#allocation72_spill] sm:$0xff] }
 0x352   : > { %13951 = vmatmul.mubr.msk.f32.gmra.mrb[56].mxu0 %vm503_vm1, %v22222_v9  ;;  %14897 = vmatmul.mubr.msk.f32.gmra.mrb[24].mxu1 %vm503_vm1, %v19971_v33  ;;  %v22225_v9 = vld [vmem:[#allocation73_spill] sm:$0xff] }
 0x353   : > { %13953 = vmatprep.mubr.msk.f32.mxu0 %vm503_vm1, %v22223_v17  ;;  %14899 = vmatprep.mubr.msk.f32.mxu1 %vm503_vm1, %v19978_v15  ;;  %v4385_v17 = vrot.slane %v19142_v56, 4 }
 0x355   : > { %v4387_v56 = vsel %vm4384_vm4, %v4385_v17, %v4386_v50  ;;  %v22229_v50 = vld [vmem:[#allocation84_spill] sm:$0xff] }
 0x356   : > { %13954 = vmatmul.mubr.msk.f32.gmra.mrb[58].mxu0 %vm503_vm1, %v22224_v36  ;;  %14900 = vmatmul.mubr.msk.f32.gmra.mrb[26].mxu1 %vm503_vm1, %v19985_v53  ;;  %v20001_v36 = vld [vmem:[%s16817_s26 + $0x188] sm:$0xff] }
 0x357   : > { %13956 = vmatprep.mubr.msk.f32.mxu0 %vm503_vm1, %v22225_v9  ;;  %14902 = vmatprep.mubr.msk.f32.mxu1 %vm503_vm1, %v19992_v11  ;;  %v22227_v9 = vld [vmem:[#allocation76_spill] sm:$0xff] }
 0x35a   : > { %13957 = vmatmul.mubr.msk.f32.gmra.mrb[60].mxu0 %vm503_vm1, %v22226_v27  ;;  %14903 = vmatmul.mubr.msk.f32.gmra.mrb[28].mxu1 %vm503_vm1, %v20001_v36  ;;  %v11274_v27 = vld [vmem:[%s21282_s2 + $0xb0] sm:$0xff] }
 0x35b   : > { %13959 = vmatprep.mubr.msk.f32.mxu0 %vm503_vm1, %v22227_v9  ;;  %14905 = vmatprep.mubr.msk.f32.mxu1 %vm503_vm1, %v16593_v60  ;;  %v16594_v9 = vld [vmem:[%s16817_s26 + $0x1a0] sm:$0xff]  ;;  %v20026_v60 = vld [vmem:[%s16817_s26 + $0x1c8] sm:$0xff]  ;;  %v15276_v17 = vpack.c.bf16 %v11275_v46, %v11274_v27  ;;  %v20042_v27 = vld [vmem:[%s16817_s26 + $0x1d0] sm:$0xff] }
 0x35c   : > { %v22230_v46 = vld [vmem:[#allocation86_spill] sm:$0xff] }
 0x35e   : > { %13960 = vmatmul.mubr.msk.f32.gmra.mrb[62].mxu0 %vm503_vm1, %v22228_v34  ;;  %14906 = vmatmul.mubr.msk.f32.gmra.mrb[30].mxu1 %vm503_vm1, %v16594_v9  ;;  %v11308_v34 = vld [vmem:[%s21282_s2 + $0xc0] sm:$0xff]  ;;  %v11309_v9 = vld [vmem:[%s21282_s2 + $0xc8] sm:$0xff] }
 0x35f   : > { %13970 = vmatprep.mubr.msk.f32.mxu0 %vm503_vm1, %v4387_v56  ;;  %14908 = vmatprep.mubr.msk.f32.mxu1 %vm503_vm1, %v19742_v26  ;;  %v20045_v29 = vpack.c.bf16 %v11309_v9, %v11308_v34  ;;  %v11886_v26 = vld [vmem:[%s21282_s2 + $0x2d0] sm:$0xff]  ;;  %v11920_v9 = vld [vmem:[%s21282_s2 + $0x2e0] sm:$0xff] }
 0x360   : > { %v22231_v56 = vld [vmem:[#allocation88_spill] sm:$0xff] }
 0x362   : > { %13971 = vmatmul.mubr.msk.f32.vlgmr.msra.gmra.mrb[32].mxu0 %vm503_vm1, %v4389_v57  ;;  %14909 = vmatmul.mubr.msk.f32.gmra.mrb[0].mxu1 %vm503_vm1, %v19746_v5  ;;  %v11887_v5 = vld [vmem:[%s21282_s2 + $0x2d8] sm:$0xff]  ;;  %v22233_v57 = vld [vmem:[#allocation90_spill] sm:$0xff] }
 0x363   : > { %13973 = vmatprep.mubr.msk.f32.mxu0 %vm503_vm1, %v22229_v50  ;;  %14911 = vmatprep.mubr.msk.f32.mxu1 %vm503_vm1, %v20026_v60  ;;  %v15412_v34 = vpack.c.bf16 %v11887_v5, %v11886_v26  ;;  %v11921_v50 = vld [vmem:[%s21282_s2 + $0x2e8] sm:$0xff]  ;;  %v22236_v5 = vld [vmem:[#allocation93_spill] sm:$0xff] }
 0x364   : > { %15275 = vmatpush3.bf16.msra.mxu0 %v19792_v47  ;;  %v22232_v47 = vld [vmem:[#allocation87_spill] sm:$0xff]  ;;  %v20077_v26 = vpack.c.bf16 %v11921_v50, %v11920_v9 }
 0x365   : > { %15277 = vmatprep.subr.bf16.mxu0 %v15276_v17  ;;  %v22243_v9 = vld [vmem:[#allocation35_spill] sm:$0xff] }
 0x366   : > { %13974 = vmatmul.mubr.msk.f32.gmra.mrb[34].mxu0 %vm503_vm1, %v22230_v46  ;;  %14912 = vmatmul.mubr.msk.f32.gmra.mrb[2].mxu1 %vm503_vm1, %v20042_v27  ;;  %v22234_v46 = vld [vmem:[#allocation89_spill] sm:$0xff]  ;;  %v22244_v50 = vld [vmem:[#allocation39_spill] sm:$0xff] }
 0x367   : > { %13976 = vmatprep.mubr.msk.f32.mxu0 %vm503_vm1, %v22231_v56  ;;  %14922 = vmatprep.mubr.msk.f32.mxu1 %vm503_vm1, %v22232_v47  ;;  %v22237_v56 = vld [vmem:[#allocation95_spill] sm:$0xff] }
 0x368   : > { %15279 = vmatpush3.bf16.msra.mxu0 %v15276_v17  ;;  %v22235_v17 = vld [vmem:[#allocation91_spill] sm:$0xff] }
 0x369   : > { %15281 = vmatprep.subr.bf16.mxu0 %v20045_v29 }
 0x36a   : > { %13977 = vmatmul.mubr.msk.f32.gmra.mrb[36].mxu0 %vm503_vm1, %v22233_v57  ;;  %14923 = vmatmul.mubr.msk.f32.vlgmr.msra.gmra.mrb[4].mxu1 %vm503_vm1, %v22234_v46  ;;  %v22242_v57 = vld [vmem:[#allocation103_spill] sm:$0xff] }
 0x36b   : > { %13979 = vmatprep.mubr.msk.f32.mxu0 %vm503_vm1, %v22182_v45  ;;  %15411 = vmatpush3.bf16.msra.mxu1 %v19832_v62  ;;  %v22238_v45 = vld [vmem:[#allocation97_spill] sm:$0xff] }
 0x36c   : > { %14925 = vmatprep.mubr.msk.f32.mxu1 %vm503_vm1, %v22235_v17  ;;  %15413 = vmatprep.subr.bf16.mxu1 %v15412_v34  ;;  %v22240_v62 = vld [vmem:[#allocation101_spill] sm:$0xff] }
 0x36e   : > { %13980 = vmatmul.mubr.msk.f32.gmra.mrb[38].mxu0 %vm503_vm1, %v22185_v43  ;;  %14926 = vmatmul.mubr.msk.f32.gmra.mrb[6].mxu1 %vm503_vm1, %v22236_v5  ;;  %v22239_v43 = vld [vmem:[#allocation99_spill] sm:$0xff] }
 0x36f   : > { %13982 = vmatprep.mubr.msk.f32.mxu0 %vm503_vm1, %v22186_v49  ;;  %14928 = vmatprep.mubr.msk.f32.mxu1 %vm503_vm1, %v22237_v56  ;;  %v22257_v49 = vld [vmem:[#allocation120_spill] sm:$0xff] }
 0x370   : > { %15415 = vmatpush3.bf16.msra.mxu1 %v15412_v34  ;;  %v22241_v34 = vld [vmem:[#allocation34_spill] sm:$0xff] }
 0x371   : > { %15417 = vmatprep.subr.bf16.mxu1 %v20077_v26 }
 0x372   : > { %13983 = vmatmul.mubr.msk.f32.gmra.mrb[40].mxu0 %vm503_vm1, %v22187_v23  ;;  %14929 = vmatmul.mubr.msk.f32.gmra.mrb[8].mxu1 %vm503_vm1, %v22238_v45  ;;  %v22255_v23 = vld [vmem:[#allocation118_spill] sm:$0xff] }
 0x373   : > { %13985 = vmatprep.mubr.msk.f32.mxu0 %vm503_vm1, %v22188_v54  ;;  %14931 = vmatprep.mubr.msk.f32.mxu1 %vm503_vm1, %v22239_v43  ;;  %v22253_v54 = vld [vmem:[#allocation116_spill] sm:$0xff] }
 0x376   : > { %13986 = vmatmul.mubr.msk.f32.gmra.mrb[42].mxu0 %vm503_vm1, %v22189_v3  ;;  %14932 = vmatmul.mubr.msk.f32.gmra.mrb[10].mxu1 %vm503_vm1, %v22240_v62  ;;  %v22245_v3 = vld [vmem:[#allocation42_spill] sm:$0xff] }
 0x377   : > { %13988 = vmatprep.mubr.msk.f32.mxu0 %vm503_vm1, %v22241_v34  ;;  %14934 = vmatprep.mubr.msk.f32.mxu1 %vm503_vm1, %v22242_v57  ;;  %v22246_v34 = vld [vmem:[#allocation105_spill] sm:$0xff] }
 0x37a   : > { %13989 = vmatmul.mubr.msk.f32.gmra.mrb[44].mxu0 %vm503_vm1, %v22191_v42  ;;  %14935 = vmatmul.mubr.msk.f32.gmra.mrb[12].mxu1 %vm503_vm1, %v22243_v9  ;;  %v22247_v42 = vld [vmem:[#allocation106_spill] sm:$0xff] }
 0x37b   : > { %13991 = vmatprep.mubr.msk.f32.mxu0 %vm503_vm1, %v22192_v40  ;;  %14937 = vmatprep.mubr.msk.f32.mxu1 %vm503_vm1, %v22244_v50  ;;  %v22248_v40 = vld [vmem:[#allocation108_spill] sm:$0xff] }
 0x37e   : > { %13992 = vmatmul.mubr.msk.f32.gmra.mrb[46].mxu0 %vm503_vm1, %v22193_v20  ;;  %14938 = vmatmul.mubr.msk.f32.gmra.mrb[14].mxu1 %vm503_vm1, %v22245_v3  ;;  %v22249_v20 = vld [vmem:[#allocation110_spill] sm:$0xff]  ;;  %v22276_v3 = vld [vmem:[#allocation163_spill] sm:$0xff] }
 0x37f   : > { %13994 = vmatprep.mubr.msk.f32.mxu0 %vm503_vm1, %v22194_v28  ;;  %14940 = vmatprep.mubr.msk.f32.mxu1 %vm503_vm1, %v22246_v34  ;;  %v22250_v28 = vld [vmem:[#allocation112_spill] sm:$0xff]  ;;  %v22275_v34 = vld [vmem:[#allocation139_spill] sm:$0xff] }
 0x382   : > { %13995 = vmatmul.mubr.msk.f32.gmra.mrb[48].mxu0 %vm503_vm1, %v22195_v24  ;;  %14941 = vmatmul.mubr.msk.f32.gmra.mrb[16].mxu1 %vm503_vm1, %v22247_v42  ;;  %v22251_v24 = vld [vmem:[#allocation114_spill] sm:$0xff] }
 0x383   : > { %13997 = vmatprep.mubr.msk.f32.mxu0 %vm503_vm1, %v22196_v51  ;;  %14943 = vmatprep.mubr.msk.f32.mxu1 %vm503_vm1, %v22248_v40  ;;  %v22252_v51 = vld [vmem:[#allocation117_spill] sm:$0xff]  ;;  %v22274_v42 = vld [vmem:[#allocation162_spill] sm:$0xff] }
 0x386   : > { %13998 = vmatmul.mubr.msk.f32.gmra.mrb[50].mxu0 %vm503_vm1, %v22197_v2  ;;  %14944 = vmatmul.mubr.msk.f32.gmra.mrb[18].mxu1 %vm503_vm1, %v22249_v20  ;;  %v22254_v2 = vld [vmem:[#allocation119_spill] sm:$0xff] }
 0x387   : > { %14000 = vmatprep.mubr.msk.f32.mxu0 %vm503_vm1, %v22198_v4  ;;  %14946 = vmatprep.mubr.msk.f32.mxu1 %vm503_vm1, %v22250_v28  ;;  %v22256_v4 = vld [vmem:[#allocation121_spill] sm:$0xff] }
 0x388   : > { %v22270_v28 = vld [vmem:[#allocation133_spill] sm:$0xff] }
 0x38a   : > { %14001 = vmatmul.mubr.msk.f32.gmra.mrb[52].mxu0 %vm503_vm1, %v22199_v39  ;;  %14947 = vmatmul.mubr.msk.f32.gmra.mrb[20].mxu1 %vm503_vm1, %v22251_v24  ;;  %v22258_v39 = vld [vmem:[#allocation123_spill] sm:$0xff]  ;;  %v22264_v24 = vld [vmem:[#allocation129_spill] sm:$0xff] }
 0x38b   : > { %14003 = vmatprep.mubr.msk.f32.mxu0 %vm503_vm1, %v22252_v51  ;;  %14949 = vmatprep.mubr.msk.f32.mxu1 %vm503_vm1, %v22253_v54  ;;  %v22259_v51 = vld [vmem:[#allocation122_spill] sm:$0xff]  ;;  %v22260_v54 = vld [vmem:[#allocation125_spill] sm:$0xff] }
 0x38e   : > { %14004 = vmatmul.mubr.msk.f32.gmra.mrb[54].mxu0 %vm503_vm1, %v22254_v2  ;;  %14950 = vmatmul.mubr.msk.f32.gmra.mrb[22].mxu1 %vm503_vm1, %v22255_v23  ;;  %v22261_v2 = vld [vmem:[#allocation124_spill] sm:$0xff]  ;;  %v22262_v23 = vld [vmem:[#allocation127_spill] sm:$0xff] }
 0x38f   : > { %14006 = vmatprep.mubr.msk.f32.mxu0 %vm503_vm1, %v22256_v4  ;;  %14952 = vmatprep.mubr.msk.f32.mxu1 %vm503_vm1, %v22257_v49  ;;  %v22263_v4 = vld [vmem:[#allocation126_spill] sm:$0xff]  ;;  %v22265_v49 = vld [vmem:[#allocation128_spill] sm:$0xff] }
 0x392   : > { %14007 = vmatmul.mubr.msk.f32.gmra.mrb[56].mxu0 %vm503_vm1, %v22258_v39  ;;  %14953 = vmatmul.mubr.msk.f32.gmra.mrb[24].mxu1 %vm503_vm1, %v22259_v51  ;;  %v22266_v39 = vld [vmem:[#allocation131_spill] sm:$0xff]  ;;  %v22267_v51 = vld [vmem:[#allocation130_spill] sm:$0xff] }
 0x393   : > { %14009 = vmatprep.mubr.msk.f32.mxu0 %vm503_vm1, %v22260_v54  ;;  %14955 = vmatprep.mubr.msk.f32.mxu1 %vm503_vm1, %v22261_v2  ;;  %v22268_v54 = vld [vmem:[#allocation132_spill] sm:$0xff] }
 0x394   : > { %v22269_v2 = vld [vmem:[#allocation40_spill] sm:$0xff] }
 0x396   : > { %14010 = vmatmul.mubr.msk.f32.gmra.mrb[58].mxu0 %vm503_vm1, %v22262_v23  ;;  %14956 = vmatmul.mubr.msk.f32.gmra.mrb[26].mxu1 %vm503_vm1, %v22263_v4  ;;  %v9029_v23 = vrot.slane %v20026_v60, 1  ;;  %v9030_v4 = vrot.slane %v20042_v27, 1 }
 0x397   : > { %14012 = vmatprep.mubr.msk.f32.mxu0 %vm503_vm1, %v22264_v24  ;;  %14958 = vmatprep.mubr.msk.f32.mxu1 %vm503_vm1, %v22265_v49  ;;  %v20179_v24 = vld [vmem:[%s16817_s26 + $0x1d8] sm:$0xf]  ;;  %v22273_v49 = vld [vmem:[#allocation138_spill] sm:$0xff]  ;;  %s10708_s26 = sshll.u32 %s21142_s13, 4  ;;  %s21207_s26 = int_to_ptr.vmem [resolvable:$true] %s10708_s26 }
 0x398   : > { %v9032_v20 = vrot.slane %v20179_v24, 1  ;;  %s16596_s21 = scalar_lea.vmem %s21207_s26, 4096  ;;  %p16603_p0 = scmp.lt.s32.totalorder %s21207_s26, %s16601_s22 }
 0x399   : > { %p16597_p11 = scmp.ne.s32.totalorder %s21207_s26, %s16596_s21  ;;  %p16604_p1 = scmp.lt.s32.totalorder %s16602_s23, %s16596_s21 }
 0x39a   : > { %14013 = vmatmul.mubr.msk.f32.gmra.mrb[60].mxu0 %vm503_vm1, %v22266_v39  ;;  %14959 = vmatmul.mubr.msk.f32.gmra.mrb[28].mxu1 %vm503_vm1, %v22267_v51  ;;  %v11310_v39 = vld [vmem:[%s21282_s2 + $0xd0] sm:$0xff] }
 0x39b   : > { %14015 = vmatprep.mubr.msk.f32.mxu0 %vm503_vm1, %v22268_v54  ;;  %14961 = vmatprep.mubr.msk.f32.mxu1 %vm503_vm1, %v22269_v2  ;;  %v11311_v54 = vld [vmem:[%s21282_s2 + $0xd8] sm:$0xff]  ;;  %v22271_v51 = vld [vmem:[#allocation44_spill] sm:$0xff]  ;;  %p16598_p12 = pnand %p16597_p11, %p16750_p5  ;;  %p16605_p2 = por %p16604_p1, %p16603_p0 }
 0x39c   : > { %v22272_v2 = vld [vmem:[#allocation161_spill] sm:$0xff]  ;;  %v15284_v40 = vpack.c.bf16 %v11311_v54, %v11310_v39  ;;  %v11922_v54 = vld [vmem:[%s21282_s2 + $0x2f0] sm:$0xff]  ;;  %v11956_v39 = vld [vmem:[%s21282_s2 + $0x300] sm:$0xff] }
 0x39d   : > { %p16599_p13 = pneg %p16598_p12 }
 0x39e   : > { %14016 = vmatmul.mubr.msk.f32.gmra.mrb[62].mxu0 %vm503_vm1, %v22270_v28  ;;  %14962 = vmatmul.mubr.msk.f32.gmra.mrb[30].mxu1 %vm503_vm1, %v22271_v51  ;;  %v9031_v28 = vsel %vm793_vm3, %v9029_v23, %v9030_v4  ;;  %v9033_v51 = vsel %vm793_vm3, %v9030_v4, %v9032_v20  ;;  %v11923_v23 = vld [vmem:[%s21282_s2 + $0x2f8] sm:$0xff]  ;;  %v22279_v20 = vld [vmem:[#allocation20_spill] sm:$0xff]  ;;  %v22281_v4 = vld [vmem:[#allocation166_spill] sm:$0xff] }
 0x39f   : > { %14026 = vmatprep.mubr.msk.f32.mxu0 %vm503_vm1, %v22272_v2  ;;  %14964 = vmatprep.mubr.msk.f32.mxu1 %vm503_vm1, %v22273_v49  ;;  %v22277_v49 = vld [vmem:[#allocation164_spill] sm:$0xff]  ;;  %p16606_p3 = pnand %p16605_p2, %p16599_p13 }
 0x3a2   : > { %14027 = vmatmul.mubr.msk.f32.vlgmr.msra.gmra.mrb[32].mxu0 %vm503_vm1, %v22274_v42  ;;  %14965 = vmatmul.mubr.msk.f32.gmra.mrb[0].mxu1 %vm503_vm1, %v22275_v34  ;;  %v15420_v42 = vpack.c.bf16 %v11923_v23, %v11922_v54  ;;  %v22282_v34 = vld [vmem:[#allocation22_spill] sm:$0xff]  ;;  %v9301_v54 = vrot.slane %v20042_v27, 2  ;;  %v22310_v23 = vld [vmem:[#allocation155_spill] sm:$0xff] }
 0x3a3   : > { %14029 = vmatprep.mubr.msk.f32.mxu0 %vm503_vm1, %v22276_v3  ;;  %14967 = vmatprep.mubr.msk.f32.mxu1 %vm503_vm1, %v9031_v28  ;;  %v22278_v3 = vld [vmem:[#allocation165_spill] sm:$0xff]  ;;  %v22280_v28 = vld [vmem:[#allocation6_spill] sm:$0xff] }
 0x3a4   : > { %15283 = vmatpush3.bf16.msra.mxu0 %v20045_v29  ;;  %v11957_v29 = vld [vmem:[%s21282_s2 + $0x308] sm:$0xff] }
 0x3a5   : > { %15285 = vmatprep.subr.bf16.mxu0 %v15284_v40  ;;  %v20235_v2 = vpack.c.bf16 %v11957_v29, %v11956_v39  ;;  %v22314_v29 = vld [vmem:[#allocation7_spill] sm:$0xff] }
 0x3a6   : > { %14030 = vmatmul.mubr.msk.f32.gmra.mrb[34].mxu0 %vm503_vm1, %v22277_v49  ;;  %14968 = vmatmul.mubr.msk.f32.gmra.mrb[2].mxu1 %vm503_vm1, %v9033_v51  ;;  %v22284_v51 = vld [vmem:[#allocation26_spill] sm:$0xff]  ;;  %v22285_v49 = vld [vmem:[#allocation28_spill] sm:$0xff] }
 0x3a7   : > { %14032 = vmatprep.mubr.msk.f32.mxu0 %vm503_vm1, %v22278_v3  ;;  %14978 = vmatprep.mubr.msk.f32.mxu1 %vm503_vm1, %v22279_v20 }
 0x3a8   : > { %15287 = vmatpush3.bf16.msra.mxu0 %v15284_v40  ;;  %v22283_v40 = vld [vmem:[#allocation24_spill] sm:$0xff] }
 0x3a9   : > { %15289 = vmatprep.subr.bf16.mxu0 %v22280_v28 }
 0x3aa   : > { %14033 = vmatmul.mubr.msk.f32.gmra.mrb[36].mxu0 %vm503_vm1, %v22281_v4  ;;  %14979 = vmatmul.mubr.msk.f32.vlgmr.msra.gmra.mrb[4].mxu1 %vm503_vm1, %v22282_v34  ;;  %v22312_v4 = vld [vmem:[#allocation157_spill] sm:$0xff] }
 0x3ab   : > { %14035 = vmatprep.mubr.msk.f32.mxu0 %vm503_vm1, %v19422_v37  ;;  %15419 = vmatpush3.bf16.msra.mxu1 %v20077_v26  ;;  %v22286_v37 = vld [vmem:[#allocation30_spill] sm:$0xff] }
 0x3ac   : > { %14981 = vmatprep.mubr.msk.f32.mxu1 %vm503_vm1, %v22283_v40  ;;  %15421 = vmatprep.subr.bf16.mxu1 %v15420_v42  ;;  %v22289_v26 = vld [vmem:[#allocation38_spill] sm:$0xff] }
 0x3ae   : > { %14036 = vmatmul.mubr.msk.f32.gmra.mrb[38].mxu0 %vm503_vm1, %v19430_v16  ;;  %14982 = vmatmul.mubr.msk.f32.gmra.mrb[6].mxu1 %vm503_vm1, %v22284_v51  ;;  %v22287_v16 = vld [vmem:[#allocation32_spill] sm:$0xff] }
 0x3af   : > { %14038 = vmatprep.mubr.msk.f32.mxu0 %vm503_vm1, %v19437_v19  ;;  %14984 = vmatprep.mubr.msk.f32.mxu1 %vm503_vm1, %v22285_v49  ;;  %v22288_v19 = vld [vmem:[#allocation36_spill] sm:$0xff] }
 0x3b0   : > { %15423 = vmatpush3.bf16.msra.mxu1 %v15420_v42  ;;  %v22311_v42 = vld [vmem:[#allocation77_spill] sm:$0xff] }
 0x3b1   : > { %15425 = vmatprep.subr.bf16.mxu1 %v20235_v2 }
 0x3b2   : > { %14039 = vmatmul.mubr.msk.f32.gmra.mrb[40].mxu0 %vm503_vm1, %v19444_v7  ;;  %14985 = vmatmul.mubr.msk.f32.gmra.mrb[8].mxu1 %vm503_vm1, %v22286_v37  ;;  %v22290_v7 = vld [vmem:[#allocation43_spill] sm:$0xff] }
 0x3b3   : > { %14041 = vmatprep.mubr.msk.f32.mxu0 %vm503_vm1, %v19845_v44  ;;  %14987 = vmatprep.mubr.msk.f32.mxu1 %vm503_vm1, %v22287_v16  ;;  %v22291_v44 = vld [vmem:[#allocation45_spill] sm:$0xff] }
 0x3b6   : > { %14042 = vmatmul.mubr.msk.f32.gmra.mrb[42].mxu0 %vm503_vm1, %v19857_v21  ;;  %14988 = vmatmul.mubr.msk.f32.gmra.mrb[10].mxu1 %vm503_vm1, %v22288_v19  ;;  %v22292_v21 = vld [vmem:[#allocation49_spill] sm:$0xff] }
 0x3b7   : > { %14044 = vmatprep.mubr.msk.f32.mxu0 %vm503_vm1, %v19864_v30  ;;  %14990 = vmatprep.mubr.msk.f32.mxu1 %vm503_vm1, %v22289_v26  ;;  %v22293_v30 = vld [vmem:[#allocation51_spill] sm:$0xff] }
 0x3ba   : > { %14045 = vmatmul.mubr.msk.f32.gmra.mrb[44].mxu0 %vm503_vm1, %v19873_v25  ;;  %14991 = vmatmul.mubr.msk.f32.gmra.mrb[12].mxu1 %vm503_vm1, %v22290_v7  ;;  %v22294_v25 = vld [vmem:[#allocation53_spill] sm:$0xff] }
 0x3bb   : > { %14047 = vmatprep.mubr.msk.f32.mxu0 %vm503_vm1, %v19880_v8  ;;  %14993 = vmatprep.mubr.msk.f32.mxu1 %vm503_vm1, %v22291_v44  ;;  %v22295_v8 = vld [vmem:[#allocation55_spill] sm:$0xff] }
 0x3be   : > { %14048 = vmatmul.mubr.msk.f32.gmra.mrb[46].mxu0 %vm503_vm1, %v19887_v55  ;;  %14994 = vmatmul.mubr.msk.f32.gmra.mrb[14].mxu1 %vm503_vm1, %v22292_v21  ;;  %v22296_v55 = vld [vmem:[#allocation57_spill] sm:$0xff] }
 0x3bf   : > { %14050 = vmatprep.mubr.msk.f32.mxu0 %vm503_vm1, %v19894_v48  ;;  %14996 = vmatprep.mubr.msk.f32.mxu1 %vm503_vm1, %v22293_v30  ;;  %v22297_v48 = vld [vmem:[#allocation59_spill] sm:$0xff] }
 0x3c2   : > { %14051 = vmatmul.mubr.msk.f32.gmra.mrb[48].mxu0 %vm503_vm1, %v19901_v32  ;;  %14997 = vmatmul.mubr.msk.f32.gmra.mrb[16].mxu1 %vm503_vm1, %v22294_v25  ;;  %v22298_v32 = vld [vmem:[#allocation61_spill] sm:$0xff] }
 0x3c3   : > { %14053 = vmatprep.mubr.msk.f32.mxu0 %vm503_vm1, %v19908_v35  ;;  %14999 = vmatprep.mubr.msk.f32.mxu1 %vm503_vm1, %v22295_v8  ;;  %v22299_v35 = vld [vmem:[#allocation63_spill] sm:$0xff] }
 0x3c6   : > { %14054 = vmatmul.mubr.msk.f32.gmra.mrb[50].mxu0 %vm503_vm1, %v19915_v41  ;;  %15000 = vmatmul.mubr.msk.f32.gmra.mrb[18].mxu1 %vm503_vm1, %v22296_v55  ;;  %v22300_v41 = vld [vmem:[#allocation65_spill] sm:$0xff] }
 0x3c7   : > { %14056 = vmatprep.mubr.msk.f32.mxu0 %vm503_vm1, %v19922_v59  ;;  %15002 = vmatprep.mubr.msk.f32.mxu1 %vm503_vm1, %v22297_v48  ;;  %v22301_v59 = vld [vmem:[#allocation67_spill] sm:$0xff] }
 0x3ca   : > { %14057 = vmatmul.mubr.msk.f32.gmra.mrb[52].mxu0 %vm503_vm1, %v19929_v61  ;;  %15003 = vmatmul.mubr.msk.f32.gmra.mrb[20].mxu1 %vm503_vm1, %v22298_v32  ;;  %v22302_v61 = vld [vmem:[#allocation69_spill] sm:$0xff] }
 0x3cb   : > { %14059 = vmatprep.mubr.msk.f32.mxu0 %vm503_vm1, %v19936_v63  ;;  %15005 = vmatprep.mubr.msk.f32.mxu1 %vm503_vm1, %v22299_v35  ;;  %v22303_v63 = vld [vmem:[#allocation9_spill] sm:$0xff] }
 0x3ce   : > { %14060 = vmatmul.mubr.msk.f32.gmra.mrb[54].mxu0 %vm503_vm1, %v19943_v18  ;;  %15006 = vmatmul.mubr.msk.f32.gmra.mrb[22].mxu1 %vm503_vm1, %v22300_v41  ;;  %v22304_v18 = vld [vmem:[#allocation11_spill] sm:$0xff] }
 0x3cf   : > { %14062 = vmatprep.mubr.msk.f32.mxu0 %vm503_vm1, %v19950_v38  ;;  %15008 = vmatprep.mubr.msk.f32.mxu1 %vm503_vm1, %v22301_v59  ;;  %v22305_v38 = vld [vmem:[#allocation13_spill] sm:$0xff] }
 0x3d2   : > { %14063 = vmatmul.mubr.msk.f32.gmra.mrb[56].mxu0 %vm503_vm1, %v19957_v14  ;;  %15009 = vmatmul.mubr.msk.f32.gmra.mrb[24].mxu1 %vm503_vm1, %v22302_v61  ;;  %v22306_v14 = vld [vmem:[#allocation15_spill] sm:$0xff] }
 0x3d3   : > { %14065 = vmatprep.mubr.msk.f32.mxu0 %vm503_vm1, %v19964_v6  ;;  %15011 = vmatprep.mubr.msk.f32.mxu1 %vm503_vm1, %v22303_v63  ;;  %v22307_v6 = vld [vmem:[#allocation47_spill] sm:$0xff]  ;;  %v22315_v63 = vld [vmem:[#allocation81_spill] sm:$0xff] }
 0x3d6   : > { %14066 = vmatmul.mubr.msk.f32.gmra.mrb[58].mxu0 %vm503_vm1, %v19971_v33  ;;  %15012 = vmatmul.mubr.msk.f32.gmra.mrb[26].mxu1 %vm503_vm1, %v22304_v18  ;;  %v9300_v33 = vrot.slane %v20026_v60, 2  ;;  %v11958_v18 = vld [vmem:[%s21282_s2 + $0x310] sm:$0xff] }
 0x3d7   : > { %14068 = vmatprep.mubr.msk.f32.mxu0 %vm503_vm1, %v19978_v15  ;;  %15014 = vmatprep.mubr.msk.f32.mxu1 %vm503_vm1, %v22305_v38  ;;  %v22308_v15 = vld [vmem:[#allocation50_spill] sm:$0xff]  ;;  %v11959_v38 = vld [vmem:[%s21282_s2 + $0x318] sm:$0xff] }
 0x3d8   : > { %v9302_v3 = vsel %vm422_vm0, %v9300_v33, %v9301_v54  ;;  %v22339_v33 = vld [vmem:[#allocation74_spill] sm:$0xff] }
 0x3da   : > { %14069 = vmatmul.mubr.msk.f32.gmra.mrb[60].mxu0 %vm503_vm1, %v19985_v53  ;;  %15015 = vmatmul.mubr.msk.f32.gmra.mrb[28].mxu1 %vm503_vm1, %v22306_v14  ;;  %v22309_v53 = vld [vmem:[#allocation75_spill] sm:$0xff] }
 0x3db   : > { %14071 = vmatprep.mubr.msk.f32.mxu0 %vm503_vm1, %v19992_v11  ;;  %15017 = vmatprep.mubr.msk.f32.mxu1 %vm503_vm1, %v22307_v6  ;;  %v9303_v11 = vrot.slane %v20179_v24, 2  ;;  %v22316_v14 = vld [vmem:[#allocation83_spill] sm:$0xff]  ;;  %v22317_v6 = vld [vmem:[#allocation85_spill] sm:$0xff] }
 0x3dd   : > { %v9304_v39 = vsel %vm422_vm0, %v9301_v54, %v9303_v11  ;;  %v22340_v54 = vld [vmem:[#allocation120_spill] sm:$0xff] }
 0x3de   : > { %14072 = vmatmul.mubr.msk.f32.gmra.mrb[62].mxu0 %vm503_vm1, %v20001_v36  ;;  %15018 = vmatmul.mubr.msk.f32.gmra.mrb[30].mxu1 %vm503_vm1, %v22308_v15  ;;  %v22313_v36 = vld [vmem:[#allocation79_spill] sm:$0xff]  ;;  %v22341_v15 = vld [vmem:[#allocation76_spill] sm:$0xff] }
 0x3df   : > { %14082 = vmatprep.mubr.msk.f32.mxu0 %vm503_vm1, %v22309_v53  ;;  %15020 = vmatprep.mubr.msk.f32.mxu1 %vm503_vm1, %v22310_v23  ;;  %v22342_v53 = vld [vmem:[#allocation122_spill] sm:$0xff]  ;;  %v22344_v11 = vld [vmem:[#allocation124_spill] sm:$0xff] }
 0x3e0   : > { %v22343_v23 = vld [vmem:[#allocation78_spill] sm:$0xff] }
 0x3e2   : > { %14083 = vmatmul.mubr.msk.f32.vlgmr.msra.gmra.mrb[32].mxu0 %vm503_vm1, %v22311_v42  ;;  %15021 = vmatmul.mubr.msk.f32.gmra.mrb[0].mxu1 %vm503_vm1, %v22312_v4  ;;  %v22346_v42 = vld [vmem:[#allocation126_spill] sm:$0xff] }
 0x3e3   : > { %14085 = vmatprep.mubr.msk.f32.mxu0 %vm503_vm1, %v22313_v36  ;;  %15023 = vmatprep.mubr.msk.f32.mxu1 %vm503_vm1, %v9302_v3  ;;  %v22345_v3 = vld [vmem:[#allocation80_spill] sm:$0xff]  ;;  %v22347_v4 = vld [vmem:[#allocation82_spill] sm:$0xff] }
 0x3e4   : > { %15291 = vmatpush3.bf16.msra.mxu0 %v22280_v28  ;;  %v15428_v28 = vpack.c.bf16 %v11959_v38, %v11958_v18  ;;  %v22348_v36 = vld [vmem:[#allocation128_spill] sm:$0xff]  ;;  %v22350_v18 = vld [vmem:[#allocation130_spill] sm:$0xff]  ;;  %v22351_v38 = vld [vmem:[#allocation137_spill] sm:$0xff] }
 0x3e5   : > { %15293 = vmatprep.subr.bf16.mxu0 %v22314_v29 }
 0x3e6   : > { %14086 = vmatmul.mubr.msk.f32.gmra.mrb[34].mxu0 %vm503_vm1, %v22315_v63  ;;  %15024 = vmatmul.mubr.msk.f32.gmra.mrb[2].mxu1 %vm503_vm1, %v9304_v39  ;;  %v22349_v39 = vld [vmem:[#allocation136_spill] sm:$0xff]  ;;  %v9572_v63 = vrot.slane %v20042_v27, 3 }
 0x3e7   : > { %14088 = vmatprep.mubr.msk.f32.mxu0 %vm503_vm1, %v22316_v14  ;;  %15034 = vmatprep.mubr.msk.f32.mxu1 %vm503_vm1, %v21908_v13  ;;  %v22320_v13 = vld [vmem:[#allocation58_spill] sm:$0xff]  ;;  %v22352_v14 = vld [vmem:[#allocation8_spill] sm:$0xff] }
 0x3e8   : > { %15295 = vmatpush3.bf16.msra.mxu0 %v22314_v29  ;;  %v9571_v29 = vrot.slane %v20026_v60, 3 }
 0x3ea   : > { %14089 = vmatmul.mubr.msk.f32.gmra.mrb[36].mxu0 %vm503_vm1, %v22317_v6  ;;  %15035 = vmatmul.mubr.msk.f32.vlgmr.msra.gmra.mrb[4].mxu1 %vm503_vm1, %v21910_v12  ;;  %v22321_v12 = vld [vmem:[#allocation60_spill] sm:$0xff]  ;;  %v9574_v6 = vrot.slane %v20179_v24, 3 }
 0x3eb   : > { %14091 = vmatprep.mubr.msk.f32.mxu0 %vm503_vm1, %v22232_v47  ;;  %15427 = vmatpush3.bf16.msra.mxu1 %v20235_v2  ;;  %v22327_v47 = vld [vmem:[#allocation66_spill] sm:$0xff] }
 0x3ec   : > { %15037 = vmatprep.mubr.msk.f32.mxu1 %vm503_vm1, %v21912_v58  ;;  %15429 = vmatprep.subr.bf16.mxu1 %v15428_v28  ;;  %v22318_v58 = vld [vmem:[#allocation54_spill] sm:$0xff] }
 0x3ed   : > { %v22338_v2 = vld [vmem:[#allocation118_spill] sm:$0xff] }
 0x3ee   : > { %14092 = vmatmul.mubr.msk.f32.gmra.mrb[38].mxu0 %vm503_vm1, %v22234_v46  ;;  %15038 = vmatmul.mubr.msk.f32.gmra.mrb[6].mxu1 %vm503_vm1, %v21914_v22  ;;  %v22324_v22 = vld [vmem:[#allocation105_spill] sm:$0xff]  ;;  %v22328_v46 = vld [vmem:[#allocation108_spill] sm:$0xff] }
 0x3ef   : > { %14094 = vmatprep.mubr.msk.f32.mxu0 %vm503_vm1, %v22235_v17  ;;  %15040 = vmatprep.mubr.msk.f32.mxu1 %vm503_vm1, %v21916_v1  ;;  %v22322_v1 = vld [vmem:[#allocation42_spill] sm:$0xff]  ;;  %v22329_v17 = vld [vmem:[#allocation68_spill] sm:$0xff] }
 0x3f0   : > { %15431 = vmatpush3.bf16.msra.mxu1 %v15428_v28  ;;  %v22353_v28 = vld [vmem:[#allocation158_spill] sm:$0xff] }
 0x3f2   : > { %14095 = vmatmul.mubr.msk.f32.gmra.mrb[40].mxu0 %vm503_vm1, %v22236_v5  ;;  %15041 = vmatmul.mubr.msk.f32.gmra.mrb[8].mxu1 %vm503_vm1, %v21918_v0  ;;  %v22323_v0 = vld [vmem:[#allocation62_spill] sm:$0xff] }
 0x3f3   : > { %14097 = vmatprep.mubr.msk.f32.mxu0 %vm503_vm1, %v22237_v56  ;;  %15043 = vmatprep.mubr.msk.f32.mxu1 %vm503_vm1, %v21920_v52  ;;  %v22319_v52 = vld [vmem:[#allocation56_spill] sm:$0xff]  ;;  %v22330_v5 = vld [vmem:[#allocation110_spill] sm:$0xff] }
 0x3f4   : > { %v22331_v56 = vld [vmem:[#allocation70_spill] sm:$0xff] }
 0x3f6   : > { %14098 = vmatmul.mubr.msk.f32.gmra.mrb[42].mxu0 %vm503_vm1, %v22238_v45  ;;  %15044 = vmatmul.mubr.msk.f32.gmra.mrb[10].mxu1 %vm503_vm1, %v21921_v31  ;;  %v22325_v31 = vld [vmem:[#allocation64_spill] sm:$0xff] }
 0x3f7   : > { %14100 = vmatprep.mubr.msk.f32.mxu0 %vm503_vm1, %v22239_v43  ;;  %15046 = vmatprep.mubr.msk.f32.mxu1 %vm503_vm1, %v22139_v10  ;;  %v22326_v10 = vld [vmem:[#allocation106_spill] sm:$0xff]  ;;  %v22332_v45 = vld [vmem:[#allocation112_spill] sm:$0xff]  ;;  %v22333_v43 = vld [vmem:[#allocation71_spill] sm:$0xff] }
 0x3fa   : > { %14101 = vmatmul.mubr.msk.f32.gmra.mrb[44].mxu0 %vm503_vm1, %v22240_v62  ;;  %15047 = vmatmul.mubr.msk.f32.gmra.mrb[12].mxu1 %vm503_vm1, %v22318_v58  ;;  %v22334_v62 = vld [vmem:[#allocation114_spill] sm:$0xff]  ;;  %v9573_v58 = vsel %vm1168_vm2, %v9571_v29, %v9572_v63 }
 0x3fb   : > { %14103 = vmatprep.mubr.msk.f32.mxu0 %vm503_vm1, %v22242_v57  ;;  %15049 = vmatprep.mubr.msk.f32.mxu1 %vm503_vm1, %v22319_v52  ;;  %v22335_v57 = vld [vmem:[#allocation72_spill] sm:$0xff]  ;;  %v22354_v52 = vld [vmem:[#allocation10_spill] sm:$0xff] }
 0x3fe   : > { %14104 = vmatmul.mubr.msk.f32.gmra.mrb[46].mxu0 %vm503_vm1, %v22243_v9  ;;  %15050 = vmatmul.mubr.msk.f32.gmra.mrb[14].mxu1 %vm503_vm1, %v22320_v13  ;;  %v22336_v9 = vld [vmem:[#allocation116_spill] sm:$0xff] }
 0x3ff   : > { %14106 = vmatprep.mubr.msk.f32.mxu0 %vm503_vm1, %v22244_v50  ;;  %15052 = vmatprep.mubr.msk.f32.mxu1 %vm503_vm1, %v22321_v12  ;;  %v22337_v50 = vld [vmem:[#allocation73_spill] sm:$0xff]  ;;  %v22355_v13 = vld [vmem:[#allocation160_spill] sm:$0xff] }
 0x400   : > { %v22356_v12 = vld [vmem:[#allocation12_spill] sm:$0xff] }
 0x402   : > { %14107 = vmatmul.mubr.msk.f32.gmra.mrb[48].mxu0 %vm503_vm1, %v22322_v1  ;;  %15053 = vmatmul.mubr.msk.f32.gmra.mrb[16].mxu1 %vm503_vm1, %v22323_v0  ;;  %v9575_v1 = vsel %vm1168_vm2, %v9572_v63, %v9574_v6  ;;  %v22357_v0 = vld [vmem:[#allocation14_spill] sm:$0xff]  ;;  %v22390_v63 = vld [vmem:[#allocation25_spill] sm:$0xff] }
 0x403   : > { %14109 = vmatprep.mubr.msk.f32.mxu0 %vm503_vm1, %v22324_v22  ;;  %15055 = vmatprep.mubr.msk.f32.mxu1 %vm503_vm1, %v22325_v31  ;;  %v22358_v22 = vld [vmem:[#allocation16_spill] sm:$0xff] }
 0x404   : > { %v22359_v31 = vld [vmem:[#allocation96_spill] sm:$0xff] }
 0x406   : > { %14110 = vmatmul.mubr.msk.f32.gmra.mrb[50].mxu0 %vm503_vm1, %v22326_v10  ;;  %15056 = vmatmul.mubr.msk.f32.gmra.mrb[18].mxu1 %vm503_vm1, %v22327_v47  ;;  %v22360_v10 = vld [vmem:[#allocation18_spill] sm:$0xff] }
 0x407   : > { %14112 = vmatprep.mubr.msk.f32.mxu0 %vm503_vm1, %v22328_v46  ;;  %15058 = vmatprep.mubr.msk.f32.mxu1 %vm503_vm1, %v22329_v17  ;;  %v22361_v47 = vld [vmem:[#allocation98_spill] sm:$0xff]  ;;  %v22362_v46 = vld [vmem:[#allocation100_spill] sm:$0xff] }
 0x408   : > { %v22363_v17 = vld [vmem:[#allocation102_spill] sm:$0xff] }
 0x40a   : > { %14113 = vmatmul.mubr.msk.f32.gmra.mrb[52].mxu0 %vm503_vm1, %v22330_v5  ;;  %15059 = vmatmul.mubr.msk.f32.gmra.mrb[20].mxu1 %vm503_vm1, %v22331_v56  ;;  %v22364_v5 = vld [vmem:[#allocation34_spill] sm:$0xff]  ;;  %v22365_v56 = vld [vmem:[#allocation104_spill] sm:$0xff] }
 0x40b   : > { %14115 = vmatprep.mubr.msk.f32.mxu0 %vm503_vm1, %v22332_v45  ;;  %15061 = vmatprep.mubr.msk.f32.mxu1 %vm503_vm1, %v22333_v43  ;;  %v22385_v45 = vld [vmem:[#allocation135_spill] sm:$0xff]  ;;  %v9843_v43 = vrot.slane %v20042_v27, 4  ;;  %v10375_v27 = vld [vmem:[%s21284_s4] sm:$0xff] }
 0x40e   : > { %14116 = vmatmul.mubr.msk.f32.gmra.mrb[54].mxu0 %vm503_vm1, %v22334_v62  ;;  %15062 = vmatmul.mubr.msk.f32.gmra.mrb[22].mxu1 %vm503_vm1, %v22335_v57  ;;  %v22387_v62 = vld [vmem:[#allocation141_spill] sm:$0xff]  ;;  %v9845_v57 = vrot.slane %v20179_v24, 4  ;;  %v10376_v24 = vld [vmem:[%s21284_s4 + $0x8] sm:$0xff] }
 0x40f   : > { %14118 = vmatprep.mubr.msk.f32.mxu0 %vm503_vm1, %v22336_v9  ;;  %15064 = vmatprep.mubr.msk.f32.mxu1 %vm503_vm1, %v22337_v50  ;;  %v22389_v50 = vld [vmem:[#allocation29_spill] sm:$0xff] }
 0x412   : > { %14119 = vmatmul.mubr.msk.f32.gmra.mrb[56].mxu0 %vm503_vm1, %v22338_v2  ;;  %15065 = vmatmul.mubr.msk.f32.gmra.mrb[24].mxu1 %vm503_vm1, %v22339_v33  ;;  %v9846_v2 = vsel %vm4384_vm4, %v9843_v43, %v9845_v57  ;;  %v15433_v33 = vpack.c.bf16 %v10376_v24, %v10375_v27 }
 0x413   : > { %14121 = vmatprep.mubr.msk.f32.mxu0 %vm503_vm1, %v22340_v54  ;;  %15067 = vmatprep.mubr.msk.f32.mxu1 %vm503_vm1, %v22341_v15  ;;  %v10377_v54 = vld [vmem:[%s21284_s4 + $0x10] sm:$0xff]  ;;  %v10378_v15 = vld [vmem:[%s21284_s4 + $0x18] sm:$0xff] }
 0x416   : > { %14122 = vmatmul.mubr.msk.f32.gmra.mrb[58].mxu0 %vm503_vm1, %v22342_v53  ;;  %15068 = vmatmul.mubr.msk.f32.gmra.mrb[26].mxu1 %vm503_vm1, %v22343_v23  ;;  %v15436_v53 = vpack.c.bf16 %v10378_v15, %v10377_v54  ;;  %v21734_v23 = vmov 0.0  }
 0x417   : > { %14124 = vmatprep.mubr.msk.f32.mxu0 %vm503_vm1, %v22344_v11  ;;  %15070 = vmatprep.mubr.msk.f32.mxu1 %vm503_vm1, %v22345_v3 }
 0x41a   : > { %14125 = vmatmul.mubr.msk.f32.gmra.mrb[60].mxu0 %vm503_vm1, %v22346_v42  ;;  %15071 = vmatmul.mubr.msk.f32.gmra.mrb[28].mxu1 %vm503_vm1, %v22347_v4 }
 0x41b   : > { %14127 = vmatprep.mubr.msk.f32.mxu0 %vm503_vm1, %v22348_v36  ;;  %15073 = vmatprep.mubr.msk.f32.mxu1 %vm503_vm1, %v22349_v39 }
 0x41e   : > { %14128 = vmatmul.mubr.msk.f32.gmra.mrb[62].mxu0 %vm503_vm1, %v22350_v18  ;;  %15074 = vmatmul.mubr.msk.f32.gmra.mrb[30].mxu1 %vm503_vm1, %v22351_v38  ;;  %v21732_v18 = vsub.s32 1, %v22390_v63 }
 0x41f   : > { %14138 = vmatprep.mubr.msk.f32.mxu0 %vm503_vm1, %v22352_v14  ;;  %15076 = vmatprep.mubr.msk.f32.mxu1 %vm503_vm1, %v22353_v28  ;;  %v16595_v28 = vld [vmem:[%s21283_s3] sm:$0x3] }
 0x420   : > { %v20644_v6 = vrot.slane %v16595_v28, %v21732_v18  ;;  %v20676_v28 = vld [vmem:[#allocation2 + $0x18] sm:$0xff]  ;;  %v20801_v18 = vld [vmem:[#allocation2 + $0x88] sm:$0xff] }
 0x422   : > { %14139 = vmatmul.mubr.msk.f32.vlgmr.msra.gmra.mrb[32].mxu0 %vm503_vm1, %v22354_v52  ;;  %15077 = vmatmul.mubr.msk.f32.gmra.mrb[0].mxu1 %vm503_vm1, %v22355_v13 }
 0x423   : > { %14141 = vmatprep.mubr.msk.f32.mxu0 %vm503_vm1, %v22356_v12  ;;  %15079 = vmatprep.mubr.msk.f32.mxu1 %vm503_vm1, %v9573_v58 }
 0x426   : > { %14142 = vmatmul.mubr.msk.f32.gmra.mrb[34].mxu0 %vm503_vm1, %v22357_v0  ;;  %15080 = vmatmul.mubr.msk.f32.gmra.mrb[2].mxu1 %vm503_vm1, %v9575_v1 }
 0x427   : > { %14144 = vmatprep.mubr.msk.f32.mxu0 %vm503_vm1, %v22358_v22  ;;  %15090 = vmatprep.mubr.msk.f32.mxu1 %vm503_vm1, %v22359_v31 }
 0x42a   : > { %14145 = vmatmul.mubr.msk.f32.gmra.mrb[36].mxu0 %vm503_vm1, %v22360_v10  ;;  %15091 = vmatmul.mubr.msk.f32.vlgmr.msra.gmra.mrb[4].mxu1 %vm503_vm1, %v22361_v47 }
 0x42b   : > { %14147 = vmatprep.mubr.msk.f32.mxu0 %vm503_vm1, %v22279_v20  ;;  %15093 = vmatprep.mubr.msk.f32.mxu1 %vm503_vm1, %v22362_v46  ;;  %v22366_v20 = vld [vmem:[#allocation41_spill] sm:$0xff] }
 0x42e   : > { %14148 = vmatmul.mubr.msk.f32.gmra.mrb[38].mxu0 %vm503_vm1, %v22282_v34  ;;  %15094 = vmatmul.mubr.msk.f32.gmra.mrb[6].mxu1 %vm503_vm1, %v22363_v17  ;;  %v22367_v34 = vld [vmem:[#allocation46_spill] sm:$0xff] }
 0x42f   : > { %14150 = vmatprep.mubr.msk.f32.mxu0 %vm503_vm1, %v22283_v40  ;;  %15096 = vmatprep.mubr.msk.f32.mxu1 %vm503_vm1, %v22364_v5  ;;  %v22368_v40 = vld [vmem:[#allocation48_spill] sm:$0xff] }
 0x432   : > { %14151 = vmatmul.mubr.msk.f32.gmra.mrb[40].mxu0 %vm503_vm1, %v22284_v51  ;;  %15097 = vmatmul.mubr.msk.f32.gmra.mrb[8].mxu1 %vm503_vm1, %v22365_v56  ;;  %v22369_v51 = vld [vmem:[#allocation107_spill] sm:$0xff] }
 0x433   : > { %14153 = vmatprep.mubr.msk.f32.mxu0 %vm503_vm1, %v22285_v49  ;;  %15099 = vmatprep.mubr.msk.f32.mxu1 %vm503_vm1, %v22366_v20  ;;  %v22370_v49 = vld [vmem:[#allocation109_spill] sm:$0xff] }
 0x436   : > { %14154 = vmatmul.mubr.msk.f32.gmra.mrb[42].mxu0 %vm503_vm1, %v22286_v37  ;;  %15100 = vmatmul.mubr.msk.f32.gmra.mrb[10].mxu1 %vm503_vm1, %v22367_v34  ;;  %v22371_v37 = vld [vmem:[#allocation111_spill] sm:$0xff] }
 0x437   : > { %14156 = vmatprep.mubr.msk.f32.mxu0 %vm503_vm1, %v22287_v16  ;;  %15102 = vmatprep.mubr.msk.f32.mxu1 %vm503_vm1, %v22368_v40  ;;  %v22372_v16 = vld [vmem:[#allocation113_spill] sm:$0xff] }
 0x43a   : > { %14157 = vmatmul.mubr.msk.f32.gmra.mrb[44].mxu0 %vm503_vm1, %v22288_v19  ;;  %15103 = vmatmul.mubr.msk.f32.gmra.mrb[12].mxu1 %vm503_vm1, %v22369_v51  ;;  %v22373_v19 = vld [vmem:[#allocation115_spill] sm:$0xff] }
 0x43b   : > { %14159 = vmatprep.mubr.msk.f32.mxu0 %vm503_vm1, %v22289_v26  ;;  %15105 = vmatprep.mubr.msk.f32.mxu1 %vm503_vm1, %v22370_v49  ;;  %v22374_v26 = vld [vmem:[#allocation117_spill] sm:$0xff] }
 0x43e   : > { %14160 = vmatmul.mubr.msk.f32.gmra.mrb[46].mxu0 %vm503_vm1, %v22290_v7  ;;  %15106 = vmatmul.mubr.msk.f32.gmra.mrb[14].mxu1 %vm503_vm1, %v22371_v37  ;;  %v22375_v7 = vld [vmem:[#allocation119_spill] sm:$0xff] }
 0x43f   : > { %14162 = vmatprep.mubr.msk.f32.mxu0 %vm503_vm1, %v22291_v44  ;;  %15108 = vmatprep.mubr.msk.f32.mxu1 %vm503_vm1, %v22372_v16  ;;  %v22376_v44 = vld [vmem:[#allocation121_spill] sm:$0xff] }
 0x442   : > { %14163 = vmatmul.mubr.msk.f32.gmra.mrb[48].mxu0 %vm503_vm1, %v22292_v21  ;;  %15109 = vmatmul.mubr.msk.f32.gmra.mrb[16].mxu1 %vm503_vm1, %v22373_v19  ;;  %v22377_v21 = vld [vmem:[#allocation123_spill] sm:$0xff] }
 0x443   : > { %14165 = vmatprep.mubr.msk.f32.mxu0 %vm503_vm1, %v22293_v30  ;;  %15111 = vmatprep.mubr.msk.f32.mxu1 %vm503_vm1, %v22374_v26  ;;  %v22378_v30 = vld [vmem:[#allocation125_spill] sm:$0xff] }
 0x446   : > { %14166 = vmatmul.mubr.msk.f32.gmra.mrb[50].mxu0 %vm503_vm1, %v22294_v25  ;;  %15112 = vmatmul.mubr.msk.f32.gmra.mrb[18].mxu1 %vm503_vm1, %v22375_v7  ;;  %v22379_v25 = vld [vmem:[#allocation127_spill] sm:$0xff] }
 0x447   : > { %14168 = vmatprep.mubr.msk.f32.mxu0 %vm503_vm1, %v22295_v8  ;;  %15114 = vmatprep.mubr.msk.f32.mxu1 %vm503_vm1, %v22376_v44  ;;  %v22380_v8 = vld [vmem:[#allocation129_spill] sm:$0xff] }
 0x44a   : > { %14169 = vmatmul.mubr.msk.f32.gmra.mrb[52].mxu0 %vm503_vm1, %v22296_v55  ;;  %15115 = vmatmul.mubr.msk.f32.gmra.mrb[20].mxu1 %vm503_vm1, %v22377_v21  ;;  %v22381_v55 = vld [vmem:[#allocation131_spill] sm:$0xff] }
 0x44b   : > { %14171 = vmatprep.mubr.msk.f32.mxu0 %vm503_vm1, %v22297_v48  ;;  %15117 = vmatprep.mubr.msk.f32.mxu1 %vm503_vm1, %v22378_v30  ;;  %v22382_v48 = vld [vmem:[#allocation132_spill] sm:$0xff] }
 0x44e   : > { %14172 = vmatmul.mubr.msk.f32.gmra.mrb[54].mxu0 %vm503_vm1, %v22298_v32  ;;  %15118 = vmatmul.mubr.msk.f32.gmra.mrb[22].mxu1 %vm503_vm1, %v22379_v25  ;;  %v22383_v32 = vld [vmem:[#allocation133_spill] sm:$0xff] }
 0x44f   : > { %14174 = vmatprep.mubr.msk.f32.mxu0 %vm503_vm1, %v22299_v35  ;;  %15120 = vmatprep.mubr.msk.f32.mxu1 %vm503_vm1, %v22380_v8  ;;  %v22384_v35 = vld [vmem:[#allocation134_spill] sm:$0xff] }
 0x452   : > { %14175 = vmatmul.mubr.msk.f32.gmra.mrb[56].mxu0 %vm503_vm1, %v22300_v41  ;;  %15121 = vmatmul.mubr.msk.f32.gmra.mrb[24].mxu1 %vm503_vm1, %v22381_v55  ;;  %v22386_v41 = vld [vmem:[#allocation140_spill] sm:$0xff] }
 0x453   : > { %14177 = vmatprep.mubr.msk.f32.mxu0 %vm503_vm1, %v22301_v59  ;;  %15123 = vmatprep.mubr.msk.f32.mxu1 %vm503_vm1, %v22382_v48  ;;  %v9842_v59 = vrot.slane %v20026_v60, 4  ;;  %v21733_v60 = vmov 0.0|0.0  }
 0x454   : > { %15432 = vmatprep.subr.bf16.mxu0 %v21733_v60 }
 0x455   : > { %v9844_v9 = vsel %vm4384_vm4, %v9842_v59, %v9843_v43  ;;  %15434 = vmatpush3.bf16.msra.mxu0 %v15433_v33 }
 0x456   : > { %14178 = vmatmul.mubr.msk.f32.gmra.mrb[58].mxu0 %vm503_vm1, %v22302_v61  ;;  %15124 = vmatmul.mubr.msk.f32.gmra.mrb[26].mxu1 %vm503_vm1, %v22383_v32  ;;  %v22388_v61 = vld [vmem:[#allocation27_spill] sm:$0xff] }
 0x457   : > { %15126 = vmatprep.mubr.msk.f32.mxu1 %vm503_vm1, %v22384_v35  ;;  %15435 = vmatprep.subr.bf16.mxu0 %v21733_v60 }
 0x458   : > { %15146 = vmatprep.mubr.msk.f32.mxu0 %vm16661_vm5, %v21734_v23 }
 0x459   : > { %15437 = vmatpush3.bf16.msra.mxu0 %v15436_v53 }
 0x45a   : > { %15127 = vmatmul.mubr.msk.f32.gmra.mrb[28].mxu1 %vm503_vm1, %v22385_v45  ;;  %15438 = vmatprep.subr.bf16.mxu0 %v21733_v60  ;;  %v20656_v45 = vld [vmem:[#allocation2 + $0x8] sm:$0xff]  ;;  %v20803_v60 = vld [vmem:[#allocation2 + $0x80] sm:$0xff] }
 0x45b   : > { %15129 = vmatprep.mubr.msk.f32.mxu1 %vm503_vm1, %v22386_v41 }
 0x45e   : > { %15130 = vmatmul.mubr.msk.f32.gmra.mrb[30].mxu1 %vm503_vm1, %v22387_v62  ;;  %v20660_v62 = vld [vmem:[#allocation2] sm:$0xff] }
 0x45f   : > { %15132 = vmatprep.mubr.msk.f32.mxu1 %vm503_vm1, %v22388_v61 }
 0x462   : > { %15133 = vmatmul.mubr.msk.f32.gmra.mrb[0].mxu1 %vm503_vm1, %v22389_v50 }
 0x463   : > { %15135 = vmatprep.mubr.msk.f32.mxu1 %vm503_vm1, %v9844_v9 }
 0x466   : > { %15136 = vmatmul.mubr.msk.f32.gmra.mrb[2].mxu1 %vm503_vm1, %v9846_v2 }
 0x4ed   : > { %v20630_v11 = vpop.f32.mrb[60].mxu0 }
 0x4ee   : > { %v20632_v3 = vpop.f32.mrb[61].mxu0 }
 0x4f1   : > { %v20634_v42 = vpop.f32.mrb[62].mxu0 }
 0x4f2   : > { %v20636_v4 = vpop.f32.mrb[63].mxu0 }
 0x4f5   : > { %v14140_v36 = vpop.f32.mrb[32].mxu0 }
 0x4f6   : > { %v5385_v39 = vpop.f32.mrb[33].mxu0 }
 0x4f9   : > { %v14143_v29 = vpop.f32.mrb[34].mxu0 }
 0x4fa   : > { %v5395_v38 = vpop.f32.mrb[35].mxu0 }
 0x4fd   : > { %v14146_v14 = vpop.f32.mrb[36].mxu0  ;;  %v15092_v58 = vpop.f32.mrb[4].mxu1 }
 0x4fe   : > { %v5405_v52 = vpop.f32.mrb[37].mxu0  ;;  %v15448_v13 = vadd.f32 %v15092_v58, %v14140_v36  ;;  %v9917_v12 = vpop.f32.mrb[5].mxu1  ;;  %v20678_v58 = vld [vmem:[#allocation2 + $0x10] sm:$0xff] }
 0x4ff   : > { %v15449_v1 = vadd.f32 %v9917_v12, %v5385_v39 }
 0x500   : > { %v10113_v0 = vadd.f32 %v15448_v13, %v20644_v6 }
 0x501   : > { %v14149_v22 = vpop.f32.mrb[38].mxu0  ;;  %v10112_v31 = vadd.f32 %v15449_v1, %v20644_v6  ;;  %v15095_v10 = vpop.f32.mrb[6].mxu1 }
 0x502   : > { %v5415_v47 = vpop.f32.mrb[39].mxu0  ;;  %v10145_v46 = vmax.f32 %v10113_v0, 0.0  ;;  %v15450_v17 = vadd.f32 %v15095_v10, %v14143_v29  ;;  %v9927_v5 = vpop.f32.mrb[7].mxu1 }
 0x503   : > { %v10144_v56 = vmax.f32 %v10112_v31, 0.0  ;;  %v15451_v20 = vadd.f32 %v9927_v5, %v5395_v38 }
 0x504   : > { %10178 = vst.msk [vmem:[#allocation2 + $0x108] sm:$0xff] %vm503_vm1, %v10145_v46  ;;  %v10115_v34 = vadd.f32 %v15450_v17, %v20644_v6 }
 0x505   : > { %v14152_v40 = vpop.f32.mrb[40].mxu0  ;;  %10177 = vst.msk [vmem:[#allocation2 + $0x100] sm:$0xff] %vm503_vm1, %v10144_v56  ;;  %v10114_v51 = vadd.f32 %v15451_v20, %v20644_v6  ;;  %v15098_v49 = vpop.f32.mrb[8].mxu1 }
 0x506   : > { %v5425_v37 = vpop.f32.mrb[41].mxu0  ;;  %v10147_v16 = vmax.f32 %v10115_v34, 0.0  ;;  %v15452_v19 = vadd.f32 %v15098_v49, %v14146_v14  ;;  %v9937_v26 = vpop.f32.mrb[9].mxu1  ;;  %v20695_v49 = vld [vmem:[#allocation2 + $0x20] sm:$0xff] }
 0x507   : > { %v10146_v7 = vmax.f32 %v10114_v51, 0.0  ;;  %v15453_v44 = vadd.f32 %v9937_v26, %v5405_v52  ;;  %v20693_v51 = vld [vmem:[#allocation2 + $0x28] sm:$0xff] }
 0x508   : > { %10180 = vst.msk [vmem:[#allocation2 + $0x118] sm:$0xff] %vm503_vm1, %v10147_v16  ;;  %v10117_v21 = vadd.f32 %v15452_v19, %v20644_v6 }
 0x509   : > { %v14155_v30 = vpop.f32.mrb[42].mxu0  ;;  %10179 = vst.msk [vmem:[#allocation2 + $0x110] sm:$0xff] %vm503_vm1, %v10146_v7  ;;  %v10116_v25 = vadd.f32 %v15453_v44, %v20644_v6  ;;  %v15101_v8 = vpop.f32.mrb[10].mxu1 }
 0x50a   : > { %v5435_v55 = vpop.f32.mrb[43].mxu0  ;;  %v10149_v48 = vmax.f32 %v10117_v21, 0.0  ;;  %v15454_v32 = vadd.f32 %v15101_v8, %v14149_v22  ;;  %v9947_v35 = vpop.f32.mrb[11].mxu1 }
 0x50b   : > { %v20658_v41 = vld [vmem:[#allocation2 + $0x108] sm:$0xff]  ;;  %v10148_v59 = vmax.f32 %v10116_v25, 0.0  ;;  %v15455_v43 = vadd.f32 %v9947_v35, %v5415_v47 }
 0x50c   : > { %v10274_v61 = vadd.f32 %v20658_v41, %v20656_v45  ;;  %v20664_v57 = vld [vmem:[#allocation2 + $0x100] sm:$0xff]  ;;  %10182 = vst.msk [vmem:[#allocation2 + $0x128] sm:$0xff] %vm503_vm1, %v10149_v48  ;;  %v10119_v9 = vadd.f32 %v15454_v32, %v20644_v6 }
 0x50d   : > { %v14158_v50 = vpop.f32.mrb[44].mxu0  ;;  %v10273_v2 = vadd.f32 %v20664_v57, %v20660_v62  ;;  %10181 = vst.msk [vmem:[#allocation2 + $0x120] sm:$0xff] %vm503_vm1, %v10148_v59  ;;  %v10118_v27 = vadd.f32 %v15455_v43, %v20644_v6  ;;  %v15104_v24 = vpop.f32.mrb[12].mxu1 }
 0x50e   : > { %v5445_v33 = vpop.f32.mrb[45].mxu0  ;;  %v10151_v54 = vmax.f32 %v10119_v9, 0.0  ;;  %v15456_v15 = vadd.f32 %v15104_v24, %v14152_v40  ;;  %v9957_v53 = vpop.f32.mrb[13].mxu1  ;;  %v10306_v36 = vsel %vm503_vm1, %v10274_v61, 0.0 }
 0x50f   : > { %v10305_v39 = vsel %vm503_vm1, %v10273_v2, 0.0  ;;  %v20674_v29 = vld [vmem:[#allocation2 + $0x118] sm:$0xff]  ;;  %v10150_v38 = vmax.f32 %v10118_v27, 0.0  ;;  %v15457_v14 = vadd.f32 %v9957_v53, %v5425_v37  ;;  %v20713_v27 = vld [vmem:[#allocation2 + $0x30] sm:$0xff] }
 0x510   : > { %v20680_v52 = vld [vmem:[#allocation2 + $0x110] sm:$0xff]  ;;  %10184 = vst.msk [vmem:[#allocation2 + $0x138] sm:$0xff] %vm503_vm1, %v10151_v54  ;;  %v10121_v13 = vadd.f32 %v15456_v15, %v20644_v6  ;;  %v10276_v1 = vadd.f32 %v20674_v29, %v20676_v28  ;;  %v10307_v47 = vadd.f32 %v10306_v36, %v10305_v39  ;;  %v20711_v2 = vld [vmem:[#allocation2 + $0x38] sm:$0xff] }
 0x511   : > { %v14161_v12 = vpop.f32.mrb[46].mxu0  ;;  %v10275_v0 = vadd.f32 %v20680_v52, %v20678_v58  ;;  %10183 = vst.msk [vmem:[#allocation2 + $0x130] sm:$0xff] %vm503_vm1, %v10150_v38  ;;  %v10120_v22 = vadd.f32 %v15457_v14, %v20644_v6  ;;  %v15107_v31 = vpop.f32.mrb[14].mxu1 }
 0x512   : > { %v5455_v10 = vpop.f32.mrb[47].mxu0  ;;  %v10153_v46 = vmax.f32 %v10121_v13, 0.0  ;;  %v15458_v17 = vadd.f32 %v15107_v31, %v14155_v30  ;;  %v9967_v5 = vpop.f32.mrb[15].mxu1  ;;  %v10310_v7 = vsel %vm503_vm1, %v10276_v1, 0.0 }
 0x513   : > { %v10308_v56 = vsel %vm503_vm1, %v10275_v0, 0.0  ;;  %v20691_v20 = vld [vmem:[#allocation2 + $0x128] sm:$0xff]  ;;  %v10152_v34 = vmax.f32 %v10120_v22, 0.0  ;;  %v15459_v40 = vadd.f32 %v9967_v5, %v5435_v55 }
 0x514   : > { %v10309_v37 = vadd.f32 %v10308_v56, %v10307_v47  ;;  %v20697_v16 = vld [vmem:[#allocation2 + $0x120] sm:$0xff]  ;;  %10186 = vst.msk [vmem:[#allocation2 + $0x148] sm:$0xff] %vm503_vm1, %v10153_v46  ;;  %v10123_v19 = vadd.f32 %v15458_v17, %v20644_v6  ;;  %v10278_v44 = vadd.f32 %v20691_v20, %v20693_v51  ;;  %v20729_v5 = vld [vmem:[#allocation2 + $0x48] sm:$0xff] }
 0x515   : > { %v14164_v26 = vpop.f32.mrb[48].mxu0  ;;  %v10277_v21 = vadd.f32 %v20697_v16, %v20695_v49  ;;  %10185 = vst.msk [vmem:[#allocation2 + $0x140] sm:$0xff] %vm503_vm1, %v10152_v34  ;;  %v10122_v30 = vadd.f32 %v15459_v40, %v20644_v6  ;;  %v15110_v25 = vpop.f32.mrb[16].mxu1  ;;  %v20731_v56 = vld [vmem:[#allocation2 + $0x40] sm:$0xff] }
 0x516   : > { %v5465_v8 = vpop.f32.mrb[49].mxu0  ;;  %v10311_v55 = vadd.f32 %v10310_v7, %v10309_v37  ;;  %v10155_v48 = vmax.f32 %v10123_v19, 0.0  ;;  %v15460_v32 = vadd.f32 %v15110_v25, %v14158_v50  ;;  %v9977_v35 = vpop.f32.mrb[17].mxu1  ;;  %v10314_v50 = vsel %vm503_vm1, %v10278_v44, 0.0 }
 0x517   : > { %v10312_v59 = vsel %vm503_vm1, %v10277_v21, 0.0  ;;  %v20709_v43 = vld [vmem:[#allocation2 + $0x138] sm:$0xff]  ;;  %v10154_v61 = vmax.f32 %v10122_v30, 0.0  ;;  %v15461_v9 = vadd.f32 %v9977_v35, %v5445_v33 }
 0x518   : > { %v10313_v24 = vadd.f32 %v10312_v59, %v10311_v55  ;;  %v20715_v54 = vld [vmem:[#allocation2 + $0x130] sm:$0xff]  ;;  %10188 = vst.msk [vmem:[#allocation2 + $0x158] sm:$0xff] %vm503_vm1, %v10155_v48  ;;  %v10125_v15 = vadd.f32 %v15460_v32, %v20644_v6  ;;  %v10280_v36 = vadd.f32 %v20709_v43, %v20711_v2 }
 0x519   : > { %v14167_v53 = vpop.f32.mrb[50].mxu0  ;;  %v10279_v33 = vadd.f32 %v20715_v54, %v20713_v27  ;;  %10187 = vst.msk [vmem:[#allocation2 + $0x150] sm:$0xff] %vm503_vm1, %v10154_v61  ;;  %v10124_v39 = vadd.f32 %v15461_v9, %v20644_v6  ;;  %v15113_v38 = vpop.f32.mrb[18].mxu1 }
 0x51a   : > { %v5475_v14 = vpop.f32.mrb[51].mxu0  ;;  %v10315_v13 = vadd.f32 %v10314_v50, %v10313_v24  ;;  %v10157_v1 = vmax.f32 %v10125_v15, 0.0  ;;  %v15462_v0 = vadd.f32 %v15113_v38, %v14161_v12  ;;  %v9987_v22 = vpop.f32.mrb[19].mxu1  ;;  %v10318_v12 = vsel %vm503_vm1, %v10280_v36, 0.0  ;;  %v20747_v24 = vld [vmem:[#allocation2 + $0x58] sm:$0xff]  ;;  %v20749_v15 = vld [vmem:[#allocation2 + $0x50] sm:$0xff] }
 0x51b   : > { %v10316_v31 = vsel %vm503_vm1, %v10279_v33, 0.0  ;;  %v20727_v47 = vld [vmem:[#allocation2 + $0x148] sm:$0xff]  ;;  %v10156_v46 = vmax.f32 %v10124_v39, 0.0  ;;  %v15463_v17 = vadd.f32 %v9987_v22, %v5455_v10 }
 0x51c   : > { %v10317_v34 = vadd.f32 %v10316_v31, %v10315_v13  ;;  %v20733_v40 = vld [vmem:[#allocation2 + $0x140] sm:$0xff]  ;;  %10190 = vst.msk [vmem:[#allocation2 + $0x168] sm:$0xff] %vm503_vm1, %v10157_v1  ;;  %v10127_v37 = vadd.f32 %v15462_v0, %v20644_v6  ;;  %v10282_v7 = vadd.f32 %v20727_v47, %v20729_v5 }
 0x51d   : > { %v14170_v19 = vpop.f32.mrb[52].mxu0  ;;  %v10281_v10 = vadd.f32 %v20733_v40, %v20731_v56  ;;  %10189 = vst.msk [vmem:[#allocation2 + $0x160] sm:$0xff] %vm503_vm1, %v10156_v46  ;;  %v10126_v44 = vadd.f32 %v15463_v17, %v20644_v6  ;;  %v15116_v21 = vpop.f32.mrb[20].mxu1 }
 0x51e   : > { %v5485_v30 = vpop.f32.mrb[53].mxu0  ;;  %v10319_v25 = vadd.f32 %v10318_v12, %v10317_v34  ;;  %v10159_v55 = vmax.f32 %v10127_v37, 0.0  ;;  %v15464_v48 = vadd.f32 %v15116_v21, %v14164_v26  ;;  %v9997_v32 = vpop.f32.mrb[21].mxu1  ;;  %v10322_v26 = vsel %vm503_vm1, %v10282_v7, 0.0 }
 0x51f   : > { %v10320_v35 = vsel %vm503_vm1, %v10281_v10, 0.0  ;;  %v20745_v59 = vld [vmem:[#allocation2 + $0x158] sm:$0xff]  ;;  %v10158_v61 = vmax.f32 %v10126_v44, 0.0  ;;  %v15465_v9 = vadd.f32 %v9997_v32, %v5465_v8  ;;  %v20765_v10 = vld [vmem:[#allocation2 + $0x68] sm:$0xff]  ;;  %v20767_v44 = vld [vmem:[#allocation2 + $0x60] sm:$0xff] }
 0x520   : > { %22391 = vst [vmem:[#allocation52_spill] sm:$0xff] %v20745_v59  ;;  %v10321_v50 = vadd.f32 %v10320_v35, %v10319_v25  ;;  %v20751_v36 = vld [vmem:[#allocation2 + $0x150] sm:$0xff]  ;;  %10192 = vst.msk [vmem:[#allocation2 + $0x178] sm:$0xff] %vm503_vm1, %v10159_v55  ;;  %v10129_v33 = vadd.f32 %v15464_v48, %v20644_v6  ;;  %v10284_v38 = vadd.f32 %v20745_v59, %v20747_v24 }
 0x521   : > { %v14173_v39 = vpop.f32.mrb[54].mxu0  ;;  %v10283_v8 = vadd.f32 %v20751_v36, %v20749_v15  ;;  %10191 = vst.msk [vmem:[#allocation2 + $0x170] sm:$0xff] %vm503_vm1, %v10158_v61  ;;  %v10128_v13 = vadd.f32 %v15465_v9, %v20644_v6  ;;  %v15119_v1 = vpop.f32.mrb[22].mxu1 }
 0x522   : > { %v5495_v0 = vpop.f32.mrb[55].mxu0  ;;  %v10323_v22 = vadd.f32 %v10322_v26, %v10321_v50  ;;  %v10161_v31 = vmax.f32 %v10129_v33, 0.0  ;;  %v15466_v46 = vadd.f32 %v15119_v1, %v14167_v53  ;;  %v10007_v17 = vpop.f32.mrb[23].mxu1  ;;  %v10326_v53 = vsel %vm503_vm1, %v10284_v38, 0.0 }
 0x523   : > { %v10324_v34 = vsel %vm503_vm1, %v10283_v8, 0.0  ;;  %v20763_v37 = vld [vmem:[#allocation2 + $0x168] sm:$0xff]  ;;  %v10160_v12 = vmax.f32 %v10128_v13, 0.0  ;;  %v15467_v7 = vadd.f32 %v10007_v17, %v5475_v14 }
 0x524   : > { %22392 = vst [vmem:[#allocation31_spill] sm:$0xff] %v20763_v37  ;;  %v10325_v21 = vadd.f32 %v10324_v34, %v10323_v22  ;;  %v20769_v25 = vld [vmem:[#allocation2 + $0x160] sm:$0xff]  ;;  %10194 = vst.msk [vmem:[#allocation2 + $0x188] sm:$0xff] %vm503_vm1, %v10161_v31  ;;  %v10131_v55 = vadd.f32 %v15466_v46, %v20644_v6  ;;  %v10286_v32 = vadd.f32 %v20763_v37, %v20765_v10  ;;  %v20783_v31 = vld [vmem:[#allocation2 + $0x78] sm:$0xff] }
 0x525   : > { %22393 = vst [vmem:[#allocation33_spill] sm:$0xff] %v20769_v25  ;;  %v14176_v48 = vpop.f32.mrb[56].mxu0  ;;  %v10285_v14 = vadd.f32 %v20769_v25, %v20767_v44  ;;  %10193 = vst.msk [vmem:[#allocation2 + $0x180] sm:$0xff] %vm503_vm1, %v10160_v12  ;;  %v10130_v35 = vadd.f32 %v15467_v7, %v20644_v6  ;;  %v15122_v61 = vpop.f32.mrb[24].mxu1  ;;  %v20785_v46 = vld [vmem:[#allocation2 + $0x70] sm:$0xff] }
 0x526   : > { %v5505_v9 = vpop.f32.mrb[57].mxu0  ;;  %v10327_v50 = vadd.f32 %v10326_v53, %v10325_v21  ;;  %v10163_v33 = vmax.f32 %v10131_v55, 0.0  ;;  %v15468_v26 = vadd.f32 %v15122_v61, %v14170_v19  ;;  %v10017_v8 = vpop.f32.mrb[25].mxu1  ;;  %v10330_v19 = vsel %vm503_vm1, %v10286_v32, 0.0 }
 0x527   : > { %v10328_v13 = vsel %vm503_vm1, %v10285_v14, 0.0  ;;  %v20781_v1 = vld [vmem:[#allocation2 + $0x178] sm:$0xff]  ;;  %v10162_v38 = vmax.f32 %v10130_v35, 0.0  ;;  %v15469_v22 = vadd.f32 %v10017_v8, %v5485_v30 }
 0x528   : > { %22394 = vst [vmem:[#allocation37_spill] sm:$0xff] %v20781_v1  ;;  %v10329_v17 = vadd.f32 %v10328_v13, %v10327_v50  ;;  %v20787_v34 = vld [vmem:[#allocation2 + $0x170] sm:$0xff]  ;;  %10196 = vst.msk [vmem:[#allocation2 + $0x198] sm:$0xff] %vm503_vm1, %v10163_v33  ;;  %v10133_v12 = vadd.f32 %v15468_v26, %v20644_v6  ;;  %v10288_v21 = vadd.f32 %v20781_v1, %v20783_v31 }
 0x529   : > { %22395 = vst [vmem:[#allocation142_spill] sm:$0xff] %v20787_v34  ;;  %v14179_v7 = vpop.f32.mrb[58].mxu0  ;;  %v10287_v30 = vadd.f32 %v20787_v34, %v20785_v46  ;;  %10195 = vst.msk [vmem:[#allocation2 + $0x190] sm:$0xff] %vm503_vm1, %v10162_v38  ;;  %v10132_v55 = vadd.f32 %v15469_v22, %v20644_v6  ;;  %v15125_v53 = vpop.f32.mrb[26].mxu1 }
 0x52a   : > { %v5515_v14 = vpop.f32.mrb[59].mxu0  ;;  %v10331_v35 = vadd.f32 %v10330_v19, %v10329_v17  ;;  %v10165_v61 = vmax.f32 %v10133_v12, 0.0  ;;  %v15470_v50 = vadd.f32 %v15125_v53, %v14173_v39  ;;  %v10027_v33 = vpop.f32.mrb[27].mxu1  ;;  %v10334_v39 = vsel %vm503_vm1, %v10288_v21, 0.0 }
 0x52b   : > { %v10332_v26 = vsel %vm503_vm1, %v10287_v30, 0.0  ;;  %v20799_v8 = vld [vmem:[#allocation2 + $0x188] sm:$0xff]  ;;  %v10164_v32 = vmax.f32 %v10132_v55, 0.0  ;;  %v15471_v13 = vadd.f32 %v10027_v33, %v5495_v0 }
 0x52c   : > { %22396 = vst [vmem:[#allocation143_spill] sm:$0xff] %v20799_v8  ;;  %v10333_v23 = vadd.f32 %v10332_v26, %v10331_v35  ;;  %v20805_v38 = vld [vmem:[#allocation2 + $0x180] sm:$0xff]  ;;  %10198 = vst.msk [vmem:[#allocation2 + $0x1a8] sm:$0xff] %vm503_vm1, %v10165_v61  ;;  %v10135_v22 = vadd.f32 %v15470_v50, %v20644_v6  ;;  %v10290_v17 = vadd.f32 %v20799_v8, %v20801_v18  ;;  %v20819_v26 = vld [vmem:[#allocation2 + $0x98] sm:$0xff] }
 0x52d   : > { %22397 = vst [vmem:[#allocation144_spill] sm:$0xff] %v20805_v38  ;;  %v10289_v12 = vadd.f32 %v20805_v38, %v20803_v60  ;;  %10197 = vst.msk [vmem:[#allocation2 + $0x1a0] sm:$0xff] %vm503_vm1, %v10164_v32  ;;  %v10134_v0 = vadd.f32 %v15471_v13, %v20644_v6  ;;  %v15128_v19 = vpop.f32.mrb[28].mxu1  ;;  %v20821_v8 = vld [vmem:[#allocation2 + $0x90] sm:$0xff] }
 0x52e   : > { %v10335_v30 = vadd.f32 %v10334_v39, %v10333_v23  ;;  %v10167_v55 = vmax.f32 %v10135_v22, 0.0  ;;  %v15472_v53 = vadd.f32 %v15128_v19, %v14176_v48  ;;  %v10037_v35 = vpop.f32.mrb[29].mxu1  ;;  %v10338_v48 = vsel %vm503_vm1, %v10290_v17, 0.0 }
 0x52f   : > { %v10336_v61 = vsel %vm503_vm1, %v10289_v12, 0.0  ;;  %v20817_v50 = vld [vmem:[#allocation2 + $0x198] sm:$0xff]  ;;  %v10166_v21 = vmax.f32 %v10134_v0, 0.0  ;;  %v15473_v33 = vadd.f32 %v10037_v35, %v5505_v9  ;;  %v20837_v35 = vld [vmem:[#allocation2 + $0xa8] sm:$0xff] }
 0x530   : > { %22398 = vst [vmem:[#allocation145_spill] sm:$0xff] %v20817_v50  ;;  %v10337_v38 = vadd.f32 %v10336_v61, %v10335_v30  ;;  %v20823_v1 = vld [vmem:[#allocation2 + $0x190] sm:$0xff]  ;;  %10200 = vst.msk [vmem:[#allocation2 + $0x1b8] sm:$0xff] %vm503_vm1, %v10167_v55  ;;  %v10137_v23 = vadd.f32 %v15472_v53, %v20644_v6  ;;  %v10292_v32 = vadd.f32 %v20817_v50, %v20819_v26  ;;  %v20839_v61 = vld [vmem:[#allocation2 + $0xa0] sm:$0xff] }
 0x531   : > { %22399 = vst [vmem:[#allocation146_spill] sm:$0xff] %v20823_v1  ;;  %v10291_v13 = vadd.f32 %v20823_v1, %v20821_v8  ;;  %10199 = vst.msk [vmem:[#allocation2 + $0x1b0] sm:$0xff] %vm503_vm1, %v10166_v21  ;;  %v10136_v9 = vadd.f32 %v15473_v33, %v20644_v6  ;;  %v15131_v22 = vpop.f32.mrb[30].mxu1 }
 0x532   : > { %v10339_v39 = vadd.f32 %v10338_v48, %v10337_v38  ;;  %v10169_v12 = vmax.f32 %v10137_v23, 0.0  ;;  %v15474_v0 = vadd.f32 %v15131_v22, %v14179_v7  ;;  %v10047_v19 = vpop.f32.mrb[31].mxu1  ;;  %v10342_v7 = vsel %vm503_vm1, %v10292_v32, 0.0 }
 0x533   : > { %v10340_v30 = vsel %vm503_vm1, %v10291_v13, 0.0  ;;  %v20835_v55 = vld [vmem:[#allocation2 + $0x1a8] sm:$0xff]  ;;  %v10168_v17 = vmax.f32 %v10136_v9, 0.0  ;;  %v15475_v53 = vadd.f32 %v10047_v19, %v5515_v14  ;;  %v20857_v19 = vld [vmem:[#allocation2 + $0xb8] sm:$0xff] }
 0x534   : > { %22400 = vst [vmem:[#allocation147_spill] sm:$0xff] %v20835_v55  ;;  %v10341_v50 = vadd.f32 %v10340_v30, %v10339_v39  ;;  %v20841_v1 = vld [vmem:[#allocation2 + $0x1a0] sm:$0xff]  ;;  %10202 = vst.msk [vmem:[#allocation2 + $0x1c8] sm:$0xff] %vm503_vm1, %v10169_v12  ;;  %v10139_v38 = vadd.f32 %v15474_v0, %v20644_v6  ;;  %v10294_v21 = vadd.f32 %v20835_v55, %v20837_v35  ;;  %v20859_v30 = vld [vmem:[#allocation2 + $0xb0] sm:$0xff] }
 0x535   : > { %22401 = vst [vmem:[#allocation148_spill] sm:$0xff] %v20841_v1  ;;  %v10293_v33 = vadd.f32 %v20841_v1, %v20839_v61  ;;  %10201 = vst.msk [vmem:[#allocation2 + $0x1c0] sm:$0xff] %vm503_vm1, %v10168_v17  ;;  %v10138_v14 = vadd.f32 %v15475_v53, %v20644_v6  ;;  %v15134_v23 = vpop.f32.mrb[0].mxu1 }
 0x536   : > { %v10343_v48 = vadd.f32 %v10342_v7, %v10341_v50  ;;  %v10171_v13 = vmax.f32 %v10139_v38, 0.0  ;;  %v15476_v9 = vadd.f32 %v15134_v23, %v20630_v11  ;;  %v10057_v22 = vpop.f32.mrb[1].mxu1  ;;  %v10346_v11 = vsel %vm503_vm1, %v10294_v21, 0.0 }
 0x537   : > { %v10344_v39 = vsel %vm503_vm1, %v10293_v33, 0.0  ;;  %v20854_v12 = vld [vmem:[#allocation2 + $0x1b8] sm:$0xff]  ;;  %v10170_v32 = vmax.f32 %v10138_v14, 0.0  ;;  %v15477_v0 = vadd.f32 %v10057_v22, %v20632_v3 }
 0x538   : > { %22402 = vst [vmem:[#allocation149_spill] sm:$0xff] %v20854_v12  ;;  %v10345_v17 = vadd.f32 %v10344_v39, %v10343_v48  ;;  %v20861_v55 = vld [vmem:[#allocation2 + $0x1b0] sm:$0xff]  ;;  %10204 = vst.msk [vmem:[#allocation2 + $0x1d8] sm:$0xff] %vm503_vm1, %v10171_v13  ;;  %v10141_v50 = vadd.f32 %v15476_v9, %v20644_v6  ;;  %v10296_v53 = vadd.f32 %v20854_v12, %v20857_v19  ;;  %v20877_v39 = vld [vmem:[#allocation2 + $0xc8] sm:$0xff] }
 0x539   : > { %22403 = vst [vmem:[#allocation150_spill] sm:$0xff] %v20861_v55  ;;  %v10295_v38 = vadd.f32 %v20861_v55, %v20859_v30  ;;  %10203 = vst.msk [vmem:[#allocation2 + $0x1d0] sm:$0xff] %vm503_vm1, %v10170_v32  ;;  %v10140_v3 = vadd.f32 %v15477_v0, %v20644_v6  ;;  %v15137_v7 = vpop.f32.mrb[2].mxu1  ;;  %v20879_v12 = vld [vmem:[#allocation2 + $0xc0] sm:$0xff] }
 0x53a   : > { %v10347_v33 = vadd.f32 %v10346_v11, %v10345_v17  ;;  %v10173_v14 = vmax.f32 %v10141_v50, 0.0  ;;  %v15478_v23 = vadd.f32 %v15137_v7, %v20634_v42  ;;  %v10067_v48 = vpop.f32.mrb[3].mxu1  ;;  %v10350_v42 = vsel %vm503_vm1, %v10296_v53, 0.0  ;;  %v20897_v53 = vld [vmem:[#allocation2 + $0xd0] sm:$0xff] }
 0x53b   : > { %v10348_v13 = vsel %vm503_vm1, %v10295_v38, 0.0  ;;  %v20874_v9 = vld [vmem:[#allocation2 + $0x1c8] sm:$0xff]  ;;  %v10172_v21 = vmax.f32 %v10140_v3, 0.0  ;;  %v15479_v22 = vadd.f32 %v10067_v48, %v20636_v4 }
 0x53c   : > { %22404 = vst [vmem:[#allocation151_spill] sm:$0xff] %v20874_v9  ;;  %v10349_v32 = vadd.f32 %v10348_v13, %v10347_v33  ;;  %v20881_v55 = vld [vmem:[#allocation2 + $0x1c0] sm:$0xff]  ;;  %10206 = vst.msk [vmem:[#allocation2 + $0x1e8] sm:$0xff] %vm503_vm1, %v10173_v14  ;;  %v10143_v0 = vadd.f32 %v15478_v23, %v20644_v6  ;;  %v10298_v17 = vadd.f32 %v20874_v9, %v20877_v39  ;;  %v20895_v14 = vld [vmem:[#allocation2 + $0xd8] sm:$0xff] }
 0x53d   : > { %22405 = vst [vmem:[#allocation152_spill] sm:$0xff] %v20881_v55  ;;  %v10297_v50 = vadd.f32 %v20881_v55, %v20879_v12  ;;  %10205 = vst.msk [vmem:[#allocation2 + $0x1e0] sm:$0xff] %vm503_vm1, %v10172_v21  ;;  %v10142_v4 = vadd.f32 %v15479_v22, %v20644_v6 }
 0x53e   : > { %v10175_v11 = vmax.f32 %v10143_v0, 0.0  ;;  %v10351_v38 = vadd.f32 %v10350_v42, %v10349_v32  ;;  %v10354_v21 = vsel %vm503_vm1, %v10298_v17, 0.0  ;;  %v20911_v42 = vld [vmem:[#allocation2 + $0xe0] sm:$0xff] }
 0x53f   : > { %v10174_v3 = vmax.f32 %v10142_v4, 0.0  ;;  %v20892_v7 = vld [vmem:[#allocation2 + $0x1d8] sm:$0xff]  ;;  %v10352_v33 = vsel %vm503_vm1, %v10297_v50, 0.0  ;;  %v20913_v50 = vld [vmem:[#allocation2 + $0xe8] sm:$0xff] }
 0x540   : > { %22406 = vst [vmem:[#allocation153_spill] sm:$0xff] %v20892_v7  ;;  %v20899_v23 = vld [vmem:[#allocation2 + $0x1d0] sm:$0xff]  ;;  %10208 = vst.msk [vmem:[#allocation2 + $0x1f8] sm:$0xff] %vm503_vm1, %v10175_v11  ;;  %v10353_v48 = vadd.f32 %v10352_v33, %v10351_v38  ;;  %v10300_v13 = vadd.f32 %v20892_v7, %v20895_v14  ;;  %v20927_v7 = vld [vmem:[#allocation2 + $0xf8] sm:$0xff] }
 0x541   : > { %22407 = vst [vmem:[#allocation154_spill] sm:$0xff] %v20899_v23  ;;  %10207 = vst.msk [vmem:[#allocation2 + $0x1f0] sm:$0xff] %vm503_vm1, %v10174_v3  ;;  %v10299_v6 = vadd.f32 %v20899_v23, %v20897_v53 }
 0x542   : > { %v10355_v22 = vadd.f32 %v10354_v21, %v10353_v48  ;;  %v10358_v17 = vsel %vm503_vm1, %v10300_v13, 0.0  ;;  %v20925_v21 = vld [vmem:[#allocation2 + $0xf0] sm:$0xff] }
 0x543   : > { %v20908_v32 = vld [vmem:[#allocation2 + $0x1e8] sm:$0xff]  ;;  %v10356_v0 = vsel %vm503_vm1, %v10299_v6, 0.0 }
 0x544   : > { %22408 = vst [vmem:[#allocation159_spill] sm:$0xff] %v20908_v32  ;;  %v20915_v4 = vld [vmem:[#allocation2 + $0x1e0] sm:$0xff]  ;;  %v10357_v11 = vadd.f32 %v10356_v0, %v10355_v22  ;;  %v10302_v3 = vadd.f32 %v20908_v32, %v20913_v50 }
 0x545   : > { %22409 = vst [vmem:[#allocation156_spill] sm:$0xff] %v20915_v4  ;;  %v10301_v38 = vadd.f32 %v20915_v4, %v20911_v42 }
 0x546   : > { %v10359_v33 = vadd.f32 %v10358_v17, %v10357_v11  ;;  %v10362_v13 = vsel %vm503_vm1, %v10302_v3, 0.0  ;;  %v10454_v3 = vld [vmem:[%s21286_s6 + $0x8] sm:$0xff] }
 0x547   : > { %v20922_v48 = vld [vmem:[#allocation2 + $0x1f8] sm:$0xff]  ;;  %v10360_v6 = vsel %vm503_vm1, %v10301_v38, 0.0 }
 0x548   : > { %22410 = vst [vmem:[#allocation92_spill] sm:$0xff] %v20922_v48  ;;  %v20929_v23 = vld [vmem:[#allocation2 + $0x1f0] sm:$0xff]  ;;  %v10361_v22 = vadd.f32 %v10360_v6, %v10359_v33  ;;  %v10304_v32 = vadd.f32 %v20922_v48, %v20927_v7  ;;  %v10453_v6 = vld [vmem:[%s21286_s6] sm:$0xff] }
 0x549   : > { %22411 = vst [vmem:[#allocation94_spill] sm:$0xff] %v20929_v23  ;;  %v10303_v0 = vadd.f32 %v20929_v23, %v20925_v21 }
 0x54a   : > { %v10363_v11 = vadd.f32 %v10362_v13, %v10361_v22  ;;  %v10366_v38 = vsel %vm503_vm1, %v10304_v32, 0.0  ;;  %v15439_v13 = vpack.c.bf16 %v10454_v3, %v10453_v6  ;;  %v22412_v32 = vmov 0.0  }
 0x54b   : > { %v10364_v17 = vsel %vm503_vm1, %v10303_v0, 0.0 }
 0x54c   : > { %v10365_v4 = vadd.f32 %v10364_v17, %v10363_v11 }
 0x54e   : > { %v10367_v9 = vadd.f32 %v10366_v38, %v10365_v4  ;;  %v10457_v38 = vld [vmem:[%s21287_s7] sm:$0x1] }
 0x550   : > { %v10368_v55 = vrot.slane %v10367_v9, 4 }
 0x552   : > { %v10369_v1 = vadd.f32 %v10368_v55, %v10367_v9  ;;  %v22413_v55 = vmov 0.0|0.0  }
 0x554   : > { %v10370_v34 = vrot.slane %v10369_v1, 2 }
 0x556   : > { %v10371_v37 = vadd.f32 %v10370_v34, %v10369_v1  ;;  %v10455_v1 = vld [vmem:[%s21286_s6 + $0x10] sm:$0xff]  ;;  %v10456_v34 = vld [vmem:[%s21286_s6 + $0x18] sm:$0xff] }
 0x557   : > { %v15442_v9 = vpack.c.bf16 %v10456_v34, %v10455_v1 }
 0x558   : > { %v10372_v33 = vrot.slane %v10371_v37, 1 }
 0x55a   : > { %v10373_v22 = vadd.f32 %v10372_v33, %v10371_v37  ;;  %v10379_v37 = vld [vmem:[%s21285_s5] sm:$0x1] }
 0x55c   : > { %v10374_v0 = vmul.f32 0.00390625, %v10373_v22 }
 0x55e   : > { %15147 = vmatmul.mubr.msk.f32.vlgmr.msra.gmra.mrb[64].mxu0 %vm503_vm1, %v10374_v0 }
 0x55f   : > { %15440 = vmatpush3.bf16.msra.mxu0 %v15439_v13  ;;  %15157 = vmatprep.mubr.msk.f32.mxu0 %vm16661_vm5, %v22412_v32 }
 0x560   : > { %15441 = vmatprep.subr.bf16.mxu0 %v22413_v55 }
 0x563   : > { %15443 = vmatpush3.bf16.msra.mxu0 %v15442_v9 }
 0x631   : > { %v10449_v4 = vpop.f32.mrb[64].mxu0 }
 0x632   : > { %v10450_v11 = vadd.f32 %v10449_v4, %v10379_v37  ;;  %v15148_v17 = vpop.f32.mrb[65].mxu0 }
 0x634   : > { %15158 = vmatmul.mubr.msk.f32.vlgmr.msra.gmra.mrb[66].mxu0 %vm503_vm1, %v10450_v11 }
 0x707   : > { %v10527_v33 = vpop.f32.mrb[66].mxu0 }
 0x708   : > { %v10528_v6 = vadd.f32 %v10527_v33, %v10457_v38  ;;  %v15159_v3 = vpop.f32.mrb[67].mxu0 }
 0x70a   : > { %v10532_v22 = vrot.slane %v10528_v6, 7 }
 0x70c   : > { %10533 = vrot.lane.b32.xlu0 %v10532_v22, %s16663_s24 }
 0x77e   : > { %v10534_v13 = vpop.permute.xlu0 %10533 }
 0x77f   : > { %v10537_v0 = vsel %vm10536_vm6, %v10528_v6, %v10534_v13 }
 0x780   : > { %v10539_v32 = vsel %vm10538_vm7, %v10537_v0, -inf }
 0x781   : > { %v10540_v55 = vrot.slane %v10539_v32, 4 }
 0x783   : > { %v10541_v1 = vmax.f32 %v10539_v32, %v10540_v55  ;;  %v22414_v32 = vsub.s32 0, %v22390_v63 }
 0x785   : > { %v10542_v34 = vrot.slane %v10541_v1, 2 }
 0x787   : > { %v10543_v9 = vmax.f32 %v10541_v1, %v10542_v34  ;;  %v22415_v1 = vsub.s32 1, %v22390_v63 }
 0x789   : > { %v10544_v37 = vrot.slane %v10543_v9, 1 }
 0x78b   : > { %v10545_v4 = vmax.f32 %v10543_v9, %v10544_v37  ;;  %v22427_v37 = vld [vmem:[#allocation52_spill] sm:$0xff] }
 0x78d   : > { %v10546_v11 = vsub.f32 %v10537_v0, %v10545_v4  ;;  %v22428_v4 = vld [vmem:[#allocation33_spill] sm:$0xff] }
 0x78f   : > { %v10547_v17 = vmul.f32 1.442695, %v10546_v11  ;;  %v22429_v11 = vld [vmem:[#allocation31_spill] sm:$0xff] }
 0x791   : > { %16518 = vpow2.f32 %v10547_v17  ;;  %v22430_v17 = vld [vmem:[#allocation142_spill] sm:$0xff] }
 0x79b   : > { %v16519_v48 = vpop.eup %16518 }
 0x79c   : > { %v10549_v38 = vsel %vm10538_vm7, %v16519_v48, 0.0 }
 0x79d   : > { %v10550_v33 = vrot.slane %v10549_v38, 4 }
 0x79f   : > { %v10551_v3 = vadd.f32 %v10550_v33, %v10549_v38  ;;  %v22431_v38 = vld [vmem:[#allocation37_spill] sm:$0xff]  ;;  %v22433_v33 = vld [vmem:[#allocation143_spill] sm:$0xff] }
 0x7a1   : > { %v10552_v23 = vrot.slane %v10551_v3, 2 }
 0x7a3   : > { %v10553_v22 = vadd.f32 %v10552_v23, %v10551_v3 }
 0x7a5   : > { %v10554_v25 = vrot.slane %v10553_v22, 1 }
 0x7a7   : > { %v10555_v59 = vadd.f32 %v10554_v25, %v10553_v22  ;;  %v22434_v22 = vld [vmem:[#allocation146_spill] sm:$0xff] }
 0x7a9   : > { %16520 = vrcp.f32 %v10555_v59 }
 0x7b3   : > { %v16521_v6 = vpop.eup %16520 }
 0x7b4   : > { %v10557_v13 = vmul.f32 %v16521_v6, %v16519_v48 }
 0x7b6   : > { %v10561_v55 = vrot.slane %v10557_v13, %v22414_v32  ;;  %v20965_v34 = vrot.slane %v10557_v13, %v22415_v1  ;;  %v22435_v13 = vld [vmem:[#allocation145_spill] sm:$0xff] }
 0x7b8   : > { %v20968_v0 = vmul.f32 %v10561_v55, %v20660_v62  ;;  %v20971_v9 = vmul.f32 %v10561_v55, %v20656_v45  ;;  %v20974_v23 = vmul.f32 %v10561_v55, %v20678_v58  ;;  %v20977_v59 = vmul.f32 %v10561_v55, %v20676_v28 }
 0x7b9   : > { %v20980_v25 = vmul.f32 %v10561_v55, %v20695_v49  ;;  %v20983_v48 = vmul.f32 %v10561_v55, %v20693_v51  ;;  %v20986_v63 = vmul.f32 %v10561_v55, %v20713_v27  ;;  %v20989_v62 = vmul.f32 %v10561_v55, %v20711_v2 }
 0x7ba   : > { %v20992_v45 = vmul.f32 %v10561_v55, %v20731_v56  ;;  %v20995_v58 = vmul.f32 %v10561_v55, %v20729_v5  ;;  %v20998_v28 = vmul.f32 %v10561_v55, %v20749_v15  ;;  %v21001_v49 = vmul.f32 %v10561_v55, %v20747_v24 }
 0x7bb   : > { %v21004_v51 = vmul.f32 %v10561_v55, %v20767_v44  ;;  %v21007_v27 = vmul.f32 %v10561_v55, %v20765_v10  ;;  %v21010_v2 = vmul.f32 %v10561_v55, %v20785_v46  ;;  %v21013_v56 = vmul.f32 %v10561_v55, %v20783_v31 }
 0x7bc   : > { %v21016_v5 = vmul.f32 %v10561_v55, %v20803_v60  ;;  %v21019_v15 = vmul.f32 %v10561_v55, %v20801_v18  ;;  %v21022_v24 = vmul.f32 %v10561_v55, %v20821_v8  ;;  %v21025_v44 = vmul.f32 %v10561_v55, %v20819_v26 }
 0x7bd   : > { %v21028_v10 = vmul.f32 %v10561_v55, %v20839_v61  ;;  %v21031_v46 = vmul.f32 %v10561_v55, %v20837_v35  ;;  %v21034_v31 = vmul.f32 %v10561_v55, %v20859_v30  ;;  %v21037_v60 = vmul.f32 %v10561_v55, %v20857_v19 }
 0x7be   : > { %v21040_v18 = vmul.f32 %v10561_v55, %v20879_v12  ;;  %v21043_v8 = vmul.f32 %v10561_v55, %v20877_v39  ;;  %v21046_v26 = vmul.f32 %v10561_v55, %v20897_v53  ;;  %v21049_v61 = vmul.f32 %v10561_v55, %v20895_v14 }
 0x7bf   : > { %22416 = vst [vmem:[#allocation17_spill] sm:$0xff] %v21031_v46  ;;  %22417 = vst [vmem:[#allocation19_spill] sm:$0xff] %v21034_v31  ;;  %v21052_v35 = vmul.f32 %v10561_v55, %v20911_v42  ;;  %v21055_v30 = vmul.f32 %v10561_v55, %v20913_v50  ;;  %v21058_v19 = vmul.f32 %v10561_v55, %v20925_v21 }
 0x7c0   : > { %22418 = vst [vmem:[#allocation21_spill] sm:$0xff] %v21037_v60  ;;  %22419 = vst [vmem:[#allocation23_spill] sm:$0xff] %v21040_v18  ;;  %v21061_v12 = vmul.f32 %v10561_v55, %v20927_v7  ;;  %v10598_v39 = vmul.f32 %v20965_v34, %v20664_v57  ;;  %v10599_v53 = vmul.f32 %v20965_v34, %v20658_v41  ;;  %v22436_v55 = vld [vmem:[#allocation148_spill] sm:$0xff] }
 0x7c1   : > { %22420 = vst [vmem:[#allocation84_spill] sm:$0xff] %v21043_v8  ;;  %22421 = vst [vmem:[#allocation86_spill] sm:$0xff] %v21046_v26  ;;  %v10600_v14 = vmul.f32 %v20965_v34, %v20680_v52  ;;  %v10601_v42 = vmul.f32 %v20965_v34, %v20674_v29  ;;  %v10602_v50 = vmul.f32 %v20965_v34, %v20697_v16  ;;  %v22445_v26 = vld [vmem:[#allocation159_spill] sm:$0xff]  ;;  %v22446_v8 = vld [vmem:[#allocation94_spill] sm:$0xff] }
 0x7c2   : > { %22422 = vst [vmem:[#allocation88_spill] sm:$0xff] %v21049_v61  ;;  %22423 = vst [vmem:[#allocation87_spill] sm:$0xff] %v21052_v35  ;;  %v10603_v7 = vmul.f32 %v20965_v34, %v20691_v20  ;;  %v10604_v57 = vmul.f32 %v20965_v34, %v20715_v54  ;;  %v10605_v41 = vmul.f32 %v20965_v34, %v20709_v43  ;;  %v22443_v35 = vld [vmem:[#allocation153_spill] sm:$0xff]  ;;  %v22444_v61 = vld [vmem:[#allocation156_spill] sm:$0xff] }
 0x7c3   : > { %22424 = vst [vmem:[#allocation90_spill] sm:$0xff] %v21055_v30  ;;  %22425 = vst [vmem:[#allocation89_spill] sm:$0xff] %v21058_v19  ;;  %v10606_v21 = vmul.f32 %v20965_v34, %v20733_v40  ;;  %v10607_v52 = vmul.f32 %v20965_v34, %v20727_v47  ;;  %v10608_v29 = vmul.f32 %v20965_v34, %v20751_v36  ;;  %v22432_v47 = vld [vmem:[#allocation144_spill] sm:$0xff]  ;;  %v22441_v19 = vld [vmem:[#allocation151_spill] sm:$0xff] }
 0x7c4   : > { %22426 = vst [vmem:[#allocation91_spill] sm:$0xff] %v21061_v12  ;;  %v10609_v16 = vmul.f32 %v20965_v34, %v22427_v37  ;;  %v10610_v20 = vmul.f32 %v20965_v34, %v22428_v4  ;;  %v10611_v54 = vmul.f32 %v20965_v34, %v22429_v11  ;;  %v10612_v43 = vmul.f32 %v20965_v34, %v22430_v17  ;;  %v22437_v37 = vld [vmem:[#allocation147_spill] sm:$0xff]  ;;  %v22438_v11 = vld [vmem:[#allocation150_spill] sm:$0xff]  ;;  %v22440_v12 = vld [vmem:[#allocation152_spill] sm:$0xff] }
 0x7c5   : > { %v10613_v40 = vmul.f32 %v20965_v34, %v22431_v38  ;;  %v10614_v36 = vmul.f32 %v20965_v34, %v22432_v47  ;;  %v10615_v3 = vmul.f32 %v20965_v34, %v22433_v33  ;;  %v10616_v6 = vmul.f32 %v20965_v34, %v22434_v22  ;;  %v22439_v38 = vld [vmem:[#allocation149_spill] sm:$0xff]  ;;  %v22442_v30 = vld [vmem:[#allocation154_spill] sm:$0xff]  ;;  %v22447_v18 = vld [vmem:[#allocation92_spill] sm:$0xff] }
 0x7c6   : > { %v10617_v32 = vmul.f32 %v20965_v34, %v22435_v13  ;;  %v10618_v1 = vmul.f32 %v20965_v34, %v22436_v55  ;;  %v10619_v4 = vmul.f32 %v20965_v34, %v22437_v37  ;;  %v10620_v17 = vmul.f32 %v20965_v34, %v22438_v11 }
 0x7c7   : > { %v10621_v47 = vmul.f32 %v20965_v34, %v22439_v38  ;;  %v10622_v33 = vmul.f32 %v20965_v34, %v22440_v12  ;;  %v10623_v22 = vmul.f32 %v20965_v34, %v22441_v19  ;;  %v10624_v13 = vmul.f32 %v20965_v34, %v22442_v30 }
 0x7c8   : > { %v10625_v55 = vmul.f32 %v20965_v34, %v22443_v35  ;;  %v10626_v37 = vmul.f32 %v20965_v34, %v22444_v61  ;;  %v10627_v11 = vmul.f32 %v20965_v34, %v22445_v26  ;;  %v10628_v38 = vmul.f32 %v20965_v34, %v22446_v8 }
 0x7c9   : > { %v10629_v12 = vmul.f32 %v20965_v34, %v22447_v18  ;;  %v10630_v19 = vadd.f32 %v10598_v39, %v20968_v0  ;;  %v10631_v60 = vadd.f32 %v10599_v53, %v20971_v9  ;;  %v10632_v30 = vadd.f32 %v10600_v14, %v20974_v23  ;;  %v22455_v39 = vld [vmem:[#allocation87_spill] sm:$0xff] }
 0x7ca   : > { %v10633_v35 = vadd.f32 %v10601_v42, %v20977_v59  ;;  %v10634_v31 = vadd.f32 %v10602_v50, %v20980_v25  ;;  %v10635_v61 = vadd.f32 %v10603_v7, %v20983_v48  ;;  %v10636_v26 = vadd.f32 %v10604_v57, %v20986_v63  ;;  %v22456_v14 = vld [vmem:[#allocation90_spill] sm:$0xff]  ;;  %v22457_v50 = vld [vmem:[#allocation89_spill] sm:$0xff] }
 0x7cb   : > { %v10637_v46 = vadd.f32 %v10605_v41, %v20989_v62  ;;  %v10638_v8 = vadd.f32 %v10606_v21, %v20992_v45  ;;  %v10639_v34 = vadd.f32 %v10607_v52, %v20995_v58  ;;  %v10640_v0 = vadd.f32 %v10608_v29, %v20998_v28  ;;  %10662 = vst.msk [vmem:[%s21142_s13] sm:$0xff] %vm503_vm1, %v10630_v19  ;;  %v22458_v57 = vld [vmem:[#allocation91_spill] sm:$0xff] }
 0x7cc   : > { %v10641_v9 = vadd.f32 %v10609_v16, %v21001_v49  ;;  %10663 = vst.msk [vmem:[%s21142_s13 + $0x8] sm:$0xff] %vm503_vm1, %v10631_v60  ;;  %10664 = vst.msk [vmem:[%s21142_s13 + $0x10] sm:$0xff] %vm503_vm1, %v10632_v30  ;;  %v10642_v23 = vadd.f32 %v10610_v20, %v21004_v51  ;;  %v10643_v59 = vadd.f32 %v10611_v54, %v21007_v27  ;;  %v22448_v49 = vld [vmem:[#allocation17_spill] sm:$0xff]  ;;  %v22449_v27 = vld [vmem:[#allocation19_spill] sm:$0xff] }
 0x7cd   : > { %10665 = vst.msk [vmem:[%s21142_s13 + $0x18] sm:$0xff] %vm503_vm1, %v10633_v35  ;;  %v10644_v25 = vadd.f32 %v10612_v43, %v21010_v2  ;;  %v10645_v48 = vadd.f32 %v10613_v40, %v21013_v56  ;;  %10666 = vst.msk [vmem:[%s21142_s13 + $0x20] sm:$0xff] %vm503_vm1, %v10634_v31  ;;  %v10646_v63 = vadd.f32 %v10614_v36, %v21016_v5  ;;  %v22450_v56 = vld [vmem:[#allocation21_spill] sm:$0xff]  ;;  %v22454_v60 = vld [vmem:[#allocation88_spill] sm:$0xff] }
 0x7ce   : > { %10667 = vst.msk [vmem:[%s21142_s13 + $0x28] sm:$0xff] %vm503_vm1, %v10635_v61  ;;  %10668 = vst.msk [vmem:[%s21142_s13 + $0x30] sm:$0xff] %vm503_vm1, %v10636_v26  ;;  %v10647_v62 = vadd.f32 %v10615_v3, %v21019_v15  ;;  %v10648_v45 = vadd.f32 %v10616_v6, %v21022_v24  ;;  %v10649_v58 = vadd.f32 %v10617_v32, %v21025_v44  ;;  %v22451_v15 = vld [vmem:[#allocation23_spill] sm:$0xff]  ;;  %v22452_v44 = vld [vmem:[#allocation84_spill] sm:$0xff] }
 0x7cf   : > { %10669 = vst.msk [vmem:[%s21142_s13 + $0x38] sm:$0xff] %vm503_vm1, %v10637_v46  ;;  %10670 = vst.msk [vmem:[%s21142_s13 + $0x40] sm:$0xff] %vm503_vm1, %v10638_v8  ;;  %v10650_v28 = vadd.f32 %v10618_v1, %v21028_v10  ;;  %v10651_v51 = vadd.f32 %v10619_v4, %v22448_v49  ;;  %v10652_v2 = vadd.f32 %v10620_v17, %v22449_v27  ;;  %v22453_v46 = vld [vmem:[#allocation86_spill] sm:$0xff] }
 0x7d0   : > { %10671 = vst.msk [vmem:[%s21142_s13 + $0x48] sm:$0xff] %vm503_vm1, %v10639_v34  ;;  %10672 = vst.msk [vmem:[%s21142_s13 + $0x50] sm:$0xff] %vm503_vm1, %v10640_v0  ;;  %v10653_v5 = vadd.f32 %v10621_v47, %v22450_v56  ;;  %v10654_v24 = vadd.f32 %v10622_v33, %v22451_v15  ;;  %v10655_v10 = vadd.f32 %v10623_v22, %v22452_v44 }
 0x7d1   : > { %10673 = vst.msk [vmem:[%s21142_s13 + $0x58] sm:$0xff] %vm503_vm1, %v10641_v9  ;;  %10674 = vst.msk [vmem:[%s21142_s13 + $0x60] sm:$0xff] %vm503_vm1, %v10642_v23  ;;  %v10656_v31 = vadd.f32 %v10624_v13, %v22453_v46  ;;  %v10657_v18 = vadd.f32 %v10625_v55, %v22454_v60  ;;  %v10658_v53 = vadd.f32 %v10626_v37, %v22455_v39 }
 0x7d2   : > { %10675 = vst.msk [vmem:[%s21142_s13 + $0x68] sm:$0xff] %vm503_vm1, %v10643_v59  ;;  %10676 = vst.msk [vmem:[%s21142_s13 + $0x70] sm:$0xff] %vm503_vm1, %v10644_v25  ;;  %v10659_v42 = vadd.f32 %v10627_v11, %v22456_v14  ;;  %v10660_v7 = vadd.f32 %v10628_v38, %v22457_v50  ;;  %v10661_v41 = vadd.f32 %v10629_v12, %v22458_v57 }
 0x7d3   : > { %10677 = vst.msk [vmem:[%s21142_s13 + $0x78] sm:$0xff] %vm503_vm1, %v10645_v48  ;;  %10678 = vst.msk [vmem:[%s21142_s13 + $0x80] sm:$0xff] %vm503_vm1, %v10646_v63 }
 0x7d4   : > { %10679 = vst.msk [vmem:[%s21142_s13 + $0x88] sm:$0xff] %vm503_vm1, %v10647_v62  ;;  %10680 = vst.msk [vmem:[%s21142_s13 + $0x90] sm:$0xff] %vm503_vm1, %v10648_v45 }
 0x7d5   : > { %10681 = vst.msk [vmem:[%s21142_s13 + $0x98] sm:$0xff] %vm503_vm1, %v10649_v58  ;;  %10682 = vst.msk [vmem:[%s21142_s13 + $0xa0] sm:$0xff] %vm503_vm1, %v10650_v28 }
 0x7d6   : > { %10683 = vst.msk [vmem:[%s21142_s13 + $0xa8] sm:$0xff] %vm503_vm1, %v10651_v51  ;;  %10684 = vst.msk [vmem:[%s21142_s13 + $0xb0] sm:$0xff] %vm503_vm1, %v10652_v2 }
 0x7d7   : > { %10685 = vst.msk [vmem:[%s21142_s13 + $0xb8] sm:$0xff] %vm503_vm1, %v10653_v5  ;;  %10686 = vst.msk [vmem:[%s21142_s13 + $0xc0] sm:$0xff] %vm503_vm1, %v10654_v24 }
 0x7d8   : > { %10687 = vst.msk [vmem:[%s21142_s13 + $0xc8] sm:$0xff] %vm503_vm1, %v10655_v10  ;;  %10688 = vst.msk [vmem:[%s21142_s13 + $0xd0] sm:$0xff] %vm503_vm1, %v10656_v31 }
 0x7d9   : > { %10689 = vst.msk [vmem:[%s21142_s13 + $0xd8] sm:$0xff] %vm503_vm1, %v10657_v18  ;;  %10690 = vst.msk [vmem:[%s21142_s13 + $0xe0] sm:$0xff] %vm503_vm1, %v10658_v53 }
 0x7da   : > { %10691 = vst.msk [vmem:[%s21142_s13 + $0xe8] sm:$0xff] %vm503_vm1, %v10659_v42  ;;  %10692 = vst.msk [vmem:[%s21142_s13 + $0xf0] sm:$0xff] %vm503_vm1, %v10660_v7 }
 0x7db   : > { %10693 = vst.msk [vmem:[%s21142_s13 + $0xf8] sm:$0xff] %vm503_vm1, %v10661_v41 }
 0x7dc   : > { %16609 = shalt.err (!%p16606_p3)
}
 0x7dd   : > { %s16610_s24 = scalar_lea.hbm %s21205_s19, 4096  ;;  %s16614_s13 = scalar_lea.hbm %s21288_s8, 8192 }
 0x7de   : > { %p16611_p4 = scmp.ne.s32.totalorder %s21205_s19, %s16610_s24  ;;  %p16615_p9 = scmp.lt.u32.totalorder %s21205_s19, %s21288_s8 }
 0x7df   : > { %p16616_p10 = scmp.lt.u32.totalorder %s16614_s13, %s16610_s24  ;;  %p16618_p12 = scmp.lt.u32.totalorder %s16610_s24, %s21205_s19 }
 0x7e0   : > { %p16612_p7 = pnand %p16611_p4, %p16750_p5 }
 0x7e1   : > { %p16617_p11 = por %p16616_p10, %p16615_p9 }
 0x7e2   : > { %p16613_p8 = pneg %p16612_p7 }
 0x7e3   : > { %p16619_p13 = por %p16618_p12, %p16617_p11 }
 0x7e5   : > { %p16620_p0 = pnand %p16619_p13, %p16613_p8 }
 0x7e7   : > { %16623 = shalt.err (!%p16620_p0)
}
 0x7e8   : > { %s16665_s18 = smov 128   ;;  %s16666_s21 = smov 8  }
 0x7e9   : > { %16473 = dma.vmem_to_hbm [thread:$0]  (%p16750_p5), %s21207_s26, 4096, %s21205_s19, %s21239_s25, %s16665_s18, %s16665_s18, %s16666_s21  }
 0x7ea PF: > { %p16479_p1 = scmp.ge.s32.totalorder %s16658_s30, 2  ;;  %s10723_s20 = sand.u32 1, %s16646_s27  }
 0x7eb   : > { %s10724_s22 = scalar_lea.sflag [#allocation4], %s10723_s20 }
 0x7ec   : > { %p16476_p2 = pnand %p16479_p1, %p16754_p6 }
 0x7ee   : > { %16641 = dma.done.wait (!%p16476_p2), %s10724_s22, 4096  }
 0x7ef   : > { %16643 = vsyncadd (!%p16476_p2), %s10724_s22, 4294963200  ;;  %p18_p3 = scmp.ge.s32.totalorder %s16737_s11, 4   ;;  %s22459_s27 = smov %s16650_s28 }
 0x7f0   : > { %s22460_s28 = smov %s16654_s29  ;;  %s22461_s29 = smov %s16748_s14 }
 0x7f1   : > { %s22462_s30 = smov %s16737_s11  ;;  %20 = sbr.rel (!%p18_p3) target bundleno = 3 (0x3), region = 120 }
 0x7f8   :  { %10729 = vsyncpa [#allocation4], 1 }
 0x7f9   :  { %10731 = vsyncpa [#allocation4 + $0x1], 1 }

</bundles_post_ra>
